<compile_context>
chip_gen: v6e
topology: v6e:2x2x1
jax: 0.10.0
libtpu: 0.0.40
codegen_flags: <defaults>
</compile_context>

<pallas_src>
import functools
import string

import jax
import jax.numpy as jnp
from jax.experimental import pallas as pl
from jax.experimental.pallas import tpu as pltpu

CHARS = string.ascii_lowercase + string.digits
NUM_CLASSES = len(CHARS) + 1  # 37
BN_EPS = 1e-5
LSTM_HIDDEN = 256


# ----------------------------------------------------------------------------
# Pallas kernels
# ----------------------------------------------------------------------------
def matmul_bias_kernel(x_ref, w_ref, b_ref, o_ref):
    """o = x @ w + b   (bf16 operands, f32 accumulation, lane-dense N)."""
    o_ref[...] = (
        jnp.dot(x_ref[...], w_ref[...], preferred_element_type=jnp.float32)
        + b_ref[...]
    ).astype(o_ref.dtype)


def conv3x3_pool_kernel(xa_ref, xb_ref, w_ref, shift_ref, o_ref, vrow_ref, *,
                        cin, width, pool_w):
    """3x3 conv (padding=1) + (bias/BN shift) + ReLU + (2, pool_w) max-pool.

    One grid step = one batch element x one *pooled* output row (= two conv
    rows).  xa_ref holds padded input rows [2r, 2r+2), xb_ref rows [2r+2, 2r+4).
    The 3x3 reduction is unrolled: 9 (W, Cin) @ (Cin, Cout) MXU matmuls per conv
    row (VPU broadcast-mults when Cin == 1).  BN scale is pre-folded into w.
    """
    W = width
    cout = o_ref.shape[-1]
    shift = shift_ref[...]                                    # (1, Cout) f32

    def tap(row, dj):                                         # local padded row
        ref = xa_ref if row < 2 else xb_ref
        return ref[0, row % 2, pl.ds(dj, W), :]               # (W, Cin)

    conv_rows = []
    for local_h in range(2):                                  # the two conv rows
        acc = jnp.zeros((W, cout), jnp.float32)
        for di in range(3):
            for dj in range(3):
                wk = w_ref[3 * di + dj]                       # (Cin, Cout)
                x_t = tap(local_h + di, dj)                   # (W, Cin)
                if cin == 1:                                  # VPU direct conv
                    acc = acc + x_t.astype(jnp.float32) * wk.astype(jnp.float32)
                else:                                         # MXU path
                    acc = acc + jnp.dot(x_t, wk,
                                        preferred_element_type=jnp.float32)
        conv_rows.append(jnp.maximum(acc + shift, 0.0))       # shift + ReLU
    v = jnp.maximum(conv_rows[0], conv_rows[1])               # vertical pool
    if pool_w == 2:                                           # horizontal pool
        vrow_ref[...] = v
        v = jnp.maximum(vrow_ref[pl.ds(0, W // 2, 2), :],
                        vrow_ref[pl.ds(1, W // 2, 2), :])
    o_ref[0, 0] = v.astype(o_ref.dtype)


def bilstm_kernel(gx_ref, whh_ref, o_ref, h_sc, c_sc, *, hidden):
    """One (direction, timestep) grid point of the bidirectional LSTM.

    gx_ref already holds x_t @ W_ih + b_ih + b_hh (hoisted projection); the
    recurrence only needs h_{t-1} @ W_hh.  (h, c) live in VMEM scratch and are
    re-initialised whenever the time grid index is 0 (i.e. per direction).
    """
    t = pl.program_id(1)

    @pl.when(t == 0)
    def _():
        h_sc[...] = jnp.zeros_like(h_sc)
        c_sc[...] = jnp.zeros_like(c_sc)

    gates = gx_ref[0, 0] + jnp.dot(h_sc[...].astype(jnp.bfloat16), whh_ref[0],
                                   preferred_element_type=jnp.float32)
    H = hidden
    i_g = jax.nn.sigmoid(gates[:, 0 * H:1 * H])
    f_g = jax.nn.sigmoid(gates[:, 1 * H:2 * H])
    g_g = jnp.tanh(gates[:, 2 * H:3 * H])
    o_g = jax.nn.sigmoid(gates[:, 3 * H:4 * H])
    c_new = f_g * c_sc[...] + i_g * g_g
    h_new = o_g * jnp.tanh(c_new)
    c_sc[...] = c_new
    h_sc[...] = h_new
    o_ref[0, 0] = h_new


# ----------------------------------------------------------------------------
# Wrappers around pallas_call
# ----------------------------------------------------------------------------
def matmul_bias(x, w, b):
    """(M, K) @ (K, N) + b -> f32 (M, N).  bf16 operands, M padded as needed."""
    M, K = x.shape
    N = w.shape[1]
    x = x.astype(jnp.bfloat16)
    w = w.astype(jnp.bfloat16)
    b = b.reshape(1, N).astype(jnp.float32)
    Mp = ((M + 7) // 8) * 8
    if Mp <= 512:
        tm = Mp
    else:
        Mp = ((M + 255) // 256) * 256
        tm = 256
    if Mp != M:
        x = jnp.pad(x, ((0, Mp - M), (0, 0)))
    out = pl.pallas_call(
        matmul_bias_kernel,
        out_shape=jax.ShapeDtypeStruct((Mp, N), jnp.float32),
        grid=(Mp // tm,),
        in_specs=[
            pl.BlockSpec((tm, K), lambda i: (i, 0)),
            pl.BlockSpec((K, N), lambda i: (0, 0)),
            pl.BlockSpec((1, N), lambda i: (0, 0)),
        ],
        out_specs=pl.BlockSpec((tm, N), lambda i: (i, 0)),
        compiler_params=pltpu.CompilerParams(dimension_semantics=("parallel",)),
    )(x, w, b)
    return out[:M] if Mp != M else out


def conv3x3_bn_relu_pool(x, w_oihw, scale, shift, pool_w):
    """x: (B, H, W, Cin) bf16 -> (B, H//2, W//pool_w, Cout) bf16 (fused pool)."""
    B, H, W, Cin = x.shape
    Cout = w_oihw.shape[0]
    assert H % 2 == 0 and (pool_w == 1 or W % 2 == 0)
    # (Cout, Cin, 3, 3) -> (9, Cin, Cout), BN/scale folded into the weights.
    wmat = (jnp.transpose(w_oihw, (2, 3, 1, 0)).reshape(9, Cin, Cout)
            * scale[None, None, :]).astype(jnp.bfloat16)
    shift2d = shift.reshape(1, Cout).astype(jnp.float32)
    xp = jnp.pad(x, ((0, 0), (1, 1), (1, 1), (0, 0)))
    Wp = W + 2
    Ho, Wo = H // 2, W // pool_w
    kernel = functools.partial(conv3x3_pool_kernel, cin=Cin, width=W,
                               pool_w=pool_w)
    return pl.pallas_call(
        kernel,
        out_shape=jax.ShapeDtypeStruct((B, Ho, Wo, Cout), jnp.bfloat16),
        grid=(B, Ho),
        in_specs=[
            pl.BlockSpec((1, 2, Wp, Cin), lambda b, r: (b, r, 0, 0)),      # rows 2r..2r+1
            pl.BlockSpec((1, 2, Wp, Cin), lambda b, r: (b, r + 1, 0, 0)),  # rows 2r+2..2r+3
            pl.BlockSpec((9, Cin, Cout), lambda b, r: (0, 0, 0)),
            pl.BlockSpec((1, Cout), lambda b, r: (0, 0)),
        ],
        out_specs=pl.BlockSpec((1, 1, Wo, Cout), lambda b, r: (b, r, 0, 0)),
        scratch_shapes=[pltpu.VMEM((W, Cout), jnp.float32)],
        compiler_params=pltpu.CompilerParams(
            dimension_semantics=("parallel", "parallel")),
    )(xp, xp, wmat, shift2d)


def bilstm(gates_x, whh_cat, hidden):
    """gates_x: (2, T, B, 4H) f32 (input proj + biases), whh_cat: (2, H, 4H) bf16."""
    ndir, T, B, G = gates_x.shape
    assert ndir == 2 and G == 4 * hidden

    def time_map(d, t):
        # d == 0: forward time t;  d == 1: reversed time T-1-t (no HBM reverse).
        return (d, t + d * (T - 1 - 2 * t), 0, 0)

    return pl.pallas_call(
        functools.partial(bilstm_kernel, hidden=hidden),
        out_shape=jax.ShapeDtypeStruct((2, T, B, hidden), jnp.float32),
        grid=(2, T),
        in_specs=[
            pl.BlockSpec((1, 1, B, 4 * hidden), time_map),
            pl.BlockSpec((1, hidden, 4 * hidden), lambda d, t: (d, 0, 0)),
        ],
        out_specs=pl.BlockSpec((1, 1, B, hidden), time_map),
        scratch_shapes=[pltpu.VMEM((B, hidden), jnp.float32),
                        pltpu.VMEM((B, hidden), jnp.float32)],
        compiler_params=pltpu.CompilerParams(
            dimension_semantics=("parallel", "arbitrary")),
    )(gates_x, whh_cat)


# ----------------------------------------------------------------------------
# Parameter init (deterministic, PyTorch-style uniform(-1/sqrt(fan_in), ...))
# ----------------------------------------------------------------------------
def _uniform(key, shape, fan_in):
    bound = 1.0 / (fan_in ** 0.5)
    return jax.random.uniform(key, shape, jnp.float32, -bound, bound)


def init_params(key):
    p = {}
    ks = iter(jax.random.split(key, 32))
    conv_dims = [(1, 64), (64, 128), (128, 256), (256, 256)]
    for idx, (cin, cout) in enumerate(conv_dims, start=1):
        fan_in = cin * 9
        p[f"conv{idx}_w"] = _uniform(next(ks), (cout, cin, 3, 3), fan_in)
        p[f"conv{idx}_b"] = _uniform(next(ks), (cout,), fan_in)
    for idx in (3, 4):  # BatchNorm2d(256) eval-mode defaults
        p[f"bn{idx}_gamma"] = jnp.ones((256,), jnp.float32)
        p[f"bn{idx}_beta"] = jnp.zeros((256,), jnp.float32)
        p[f"bn{idx}_mean"] = jnp.zeros((256,), jnp.float32)
        p[f"bn{idx}_var"] = jnp.ones((256,), jnp.float32)
    H, F = LSTM_HIDDEN, 512
    for d in ("fwd", "bwd"):
        p[f"lstm_{d}_wih"] = _uniform(next(ks), (4 * H, F), H)
        p[f"lstm_{d}_whh"] = _uniform(next(ks), (4 * H, H), H)
        p[f"lstm_{d}_bih"] = _uniform(next(ks), (4 * H,), H)
        p[f"lstm_{d}_bhh"] = _uniform(next(ks), (4 * H,), H)
    p["fc_w"] = _uniform(next(ks), (NUM_CLASSES, 512), 512)
    p["fc_b"] = _uniform(next(ks), (NUM_CLASSES,), 512)
    return p


# ----------------------------------------------------------------------------
# Forward pass (mirrors CRNN.forward, eval mode)
# ----------------------------------------------------------------------------
def crnn_forward(x_nchw, p):
    # NCHW (torch) -> NHWC (kernel layout), bf16 activations.
    x = jnp.transpose(x_nchw, (0, 2, 3, 1)).astype(jnp.bfloat16)

    # conv1/conv2: no BN -> scale=1, shift=bias.  conv3/conv4: BN folded.
    x = conv3x3_bn_relu_pool(x, p["conv1_w"], jnp.ones((64,), jnp.float32),
                             p["conv1_b"], pool_w=2)
    x = conv3x3_bn_relu_pool(x, p["conv2_w"], jnp.ones((128,), jnp.float32),
                             p["conv2_b"], pool_w=2)
    s3 = p["bn3_gamma"] / jnp.sqrt(p["bn3_var"] + BN_EPS)
    sh3 = (p["conv3_b"] - p["bn3_mean"]) * s3 + p["bn3_beta"]
    x = conv3x3_bn_relu_pool(x, p["conv3_w"], s3, sh3, pool_w=1)
    s4 = p["bn4_gamma"] / jnp.sqrt(p["bn4_var"] + BN_EPS)
    sh4 = (p["conv4_b"] - p["bn4_mean"]) * s4 + p["bn4_beta"]
    x = conv3x3_bn_relu_pool(x, p["conv4_w"], s4, sh4, pool_w=1)  # (B, h, w, c)

    B, h, w, c = x.shape
    # torch: (b,c,h,w) -> permute(0,3,1,2) -> (b,w,c,h) -> view(b,w,c*h)
    feat = jnp.transpose(x, (0, 2, 3, 1)).reshape(B, w, c * h)    # (B, T, 512)
    x_tbf = jnp.transpose(feat, (1, 0, 2))                        # (T, B, 512)
    T = w
    H = LSTM_HIDDEN

    # Hoisted LSTM input projection for BOTH directions in one lane-dense matmul.
    wih_cat = jnp.concatenate([p["lstm_fwd_wih"].T, p["lstm_bwd_wih"].T], axis=1)
    b_cat = jnp.concatenate([p["lstm_fwd_bih"] + p["lstm_fwd_bhh"],
                             p["lstm_bwd_bih"] + p["lstm_bwd_bhh"]])
    gx = matmul_bias(x_tbf.reshape(T * B, 512), wih_cat, b_cat)   # (T*B, 8H) f32
    gx = gx.reshape(T, B, 2, 4 * H).transpose(2, 0, 1, 3)         # (2, T, B, 4H)

    whh_cat = jnp.stack([p["lstm_fwd_whh"].T, p["lstm_bwd_whh"].T],
                        axis=0).astype(jnp.bfloat16)              # (2, H, 4H)
    h_out = bilstm(gx, whh_cat, H)                                # (2, T, B, H)
    h_cat = jnp.concatenate([h_out[0], h_out[1]], axis=-1)        # (T, B, 512)

    # Final Linear: pad N=37 -> 128 lanes, slice back afterwards.
    NC_PAD = 128
    w_fc = jnp.zeros((512, NC_PAD), jnp.float32).at[:, :NUM_CLASSES].set(p["fc_w"].T)
    b_fc = jnp.zeros((NC_PAD,), jnp.float32).at[:NUM_CLASSES].set(p["fc_b"])
    logits = matmul_bias(h_cat.reshape(T * B, 512), w_fc, b_fc)[:, :NUM_CLASSES]
    # torch returns x.permute(1, 0, 2): (W, B, NUM_CLASSES) — already (T, B, ·).
    return logits.reshape(T, B, NUM_CLASSES)


if __name__ == "__main__":
    key = jax.random.PRNGKey(0)
    k_in, k_par = jax.random.split(key)
    # Input height 32 so that c*h == 512 (LSTM input size); W=16 -> seq len 4.
    x = jax.random.normal(k_in, (2, 1, 32, 16), dtype=jnp.float32)  # NCHW
    params = init_params(k_par)

    fwd = jax.jit(crnn_forward)
    out = fwd(x, params)
    out = jax.block_until_ready(out)
    assert out.shape == (4, 2, NUM_CLASSES), out.shape
    assert bool(jnp.all(jnp.isfinite(out)))
    print("KERNEL_OK")
</pallas_src>

<mosaic_0001>
module attributes {stable_mosaic.version = 11 : i64} {
  func.func @conv3x3_pool_kernel(%arg0: i32, %arg1: i32, %arg2: memref<1x2x18x1xbf16, #tpu.memory_space<vmem>>, %arg3: memref<1x2x18x1xbf16, #tpu.memory_space<vmem>>, %arg4: memref<9x1x64xbf16, #tpu.memory_space<vmem>>, %arg5: memref<1x64xf32, #tpu.memory_space<vmem>>, %arg6: memref<1x1x8x64xbf16, #tpu.memory_space<vmem>>, %arg7: memref<16x64xf32, #tpu.memory_space<vmem>>) attributes {dimension_semantics = [#tpu.dimension_semantics<parallel>, #tpu.dimension_semantics<parallel>], iteration_bounds = array<i64: 2, 16>, scalar_prefetch = 0 : i64, scratch_operands = 1 : i64, tpu.core_type = #tpu.core_type<tc>, window_params = [{transform_indices = @transform_0, window_bounds = array<i64: 1, 2, 18, 1>}, {transform_indices = @transform_1, window_bounds = array<i64: 1, 2, 18, 1>}, {pipeline_mode = #tpu.pipeline_mode<synchronous>, transform_indices = @transform_2, window_bounds = array<i64: 9, 1, 64>}, {pipeline_mode = #tpu.pipeline_mode<synchronous>, transform_indices = @transform_3, window_bounds = array<i64: 1, 64>}, {transform_indices = @transform_4, window_bounds = array<i64: 1, 1, 8, 64>}]} {
    %c0 = arith.constant 0 : index
    %c0_0 = arith.constant 0 : index
    %0 = vector.load %arg5[%c0, %c0_0] : memref<1x64xf32, #tpu.memory_space<vmem>>, vector<1x64xf32>
    %cst = arith.constant 0.000000e+00 : f32
    %1 = vector.broadcast %cst : f32 to vector<16x64xf32>
    %c0_1 = arith.constant 0 : index
    %c0_2 = arith.constant 0 : index
    %c0_3 = arith.constant 0 : index
    %2 = vector.load %arg4[%c0_1, %c0_2, %c0_3] : memref<9x1x64xbf16, #tpu.memory_space<vmem>>, vector<1x1x64xbf16>
    %3 = vector.shape_cast %2 : vector<1x1x64xbf16> to vector<1x64xbf16>
    %c0_4 = arith.constant 0 : index
    %c0_5 = arith.constant 0 : index
    %c0_6 = arith.constant 0 : index
    %c0_7 = arith.constant 0 : index
    %4 = vector.load %arg2[%c0_4, %c0_5, %c0_6, %c0_7] : memref<1x2x18x1xbf16, #tpu.memory_space<vmem>>, vector<1x1x16x1xbf16>
    %5 = vector.shape_cast %4 : vector<1x1x16x1xbf16> to vector<16x1xbf16>
    %6 = arith.extf %5 : vector<16x1xbf16> to vector<16x1xf32>
    %7 = arith.extf %3 : vector<1x64xbf16> to vector<1x64xf32>
    %8 = vector.broadcast %6 : vector<16x1xf32> to vector<16x64xf32>
    %9 = vector.broadcast %7 : vector<1x64xf32> to vector<16x64xf32>
    %10 = arith.mulf %8, %9 : vector<16x64xf32>
    %11 = arith.addf %1, %10 : vector<16x64xf32>
    %c1 = arith.constant 1 : index
    %c0_8 = arith.constant 0 : index
    %c0_9 = arith.constant 0 : index
    %12 = vector.load %arg4[%c1, %c0_8, %c0_9] : memref<9x1x64xbf16, #tpu.memory_space<vmem>>, vector<1x1x64xbf16>
    %13 = vector.shape_cast %12 : vector<1x1x64xbf16> to vector<1x64xbf16>
    %c0_10 = arith.constant 0 : index
    %c0_11 = arith.constant 0 : index
    %c1_12 = arith.constant 1 : index
    %c0_13 = arith.constant 0 : index
    %14 = vector.load %arg2[%c0_10, %c0_11, %c1_12, %c0_13] : memref<1x2x18x1xbf16, #tpu.memory_space<vmem>>, vector<1x1x16x1xbf16>
    %15 = vector.shape_cast %14 : vector<1x1x16x1xbf16> to vector<16x1xbf16>
    %16 = arith.extf %15 : vector<16x1xbf16> to vector<16x1xf32>
    %17 = arith.extf %13 : vector<1x64xbf16> to vector<1x64xf32>
    %18 = vector.broadcast %16 : vector<16x1xf32> to vector<16x64xf32>
    %19 = vector.broadcast %17 : vector<1x64xf32> to vector<16x64xf32>
    %20 = arith.mulf %18, %19 : vector<16x64xf32>
    %21 = arith.addf %11, %20 : vector<16x64xf32>
    %c2 = arith.constant 2 : index
    %c0_14 = arith.constant 0 : index
    %c0_15 = arith.constant 0 : index
    %22 = vector.load %arg4[%c2, %c0_14, %c0_15] : memref<9x1x64xbf16, #tpu.memory_space<vmem>>, vector<1x1x64xbf16>
    %23 = vector.shape_cast %22 : vector<1x1x64xbf16> to vector<1x64xbf16>
    %c0_16 = arith.constant 0 : index
    %c0_17 = arith.constant 0 : index
    %c2_18 = arith.constant 2 : index
    %c0_19 = arith.constant 0 : index
    %24 = vector.load %arg2[%c0_16, %c0_17, %c2_18, %c0_19] : memref<1x2x18x1xbf16, #tpu.memory_space<vmem>>, vector<1x1x16x1xbf16>
    %25 = vector.shape_cast %24 : vector<1x1x16x1xbf16> to vector<16x1xbf16>
    %26 = arith.extf %25 : vector<16x1xbf16> to vector<16x1xf32>
    %27 = arith.extf %23 : vector<1x64xbf16> to vector<1x64xf32>
    %28 = vector.broadcast %26 : vector<16x1xf32> to vector<16x64xf32>
    %29 = vector.broadcast %27 : vector<1x64xf32> to vector<16x64xf32>
    %30 = arith.mulf %28, %29 : vector<16x64xf32>
    %31 = arith.addf %21, %30 : vector<16x64xf32>
    %c3 = arith.constant 3 : index
    %c0_20 = arith.constant 0 : index
    %c0_21 = arith.constant 0 : index
    %32 = vector.load %arg4[%c3, %c0_20, %c0_21] : memref<9x1x64xbf16, #tpu.memory_space<vmem>>, vector<1x1x64xbf16>
    %33 = vector.shape_cast %32 : vector<1x1x64xbf16> to vector<1x64xbf16>
    %c0_22 = arith.constant 0 : index
    %c1_23 = arith.constant 1 : index
    %c0_24 = arith.constant 0 : index
    %c0_25 = arith.constant 0 : index
    %34 = vector.load %arg2[%c0_22, %c1_23, %c0_24, %c0_25] : memref<1x2x18x1xbf16, #tpu.memory_space<vmem>>, vector<1x1x16x1xbf16>
    %35 = vector.shape_cast %34 : vector<1x1x16x1xbf16> to vector<16x1xbf16>
    %36 = arith.extf %35 : vector<16x1xbf16> to vector<16x1xf32>
    %37 = arith.extf %33 : vector<1x64xbf16> to vector<1x64xf32>
    %38 = vector.broadcast %36 : vector<16x1xf32> to vector<16x64xf32>
    %39 = vector.broadcast %37 : vector<1x64xf32> to vector<16x64xf32>
    %40 = arith.mulf %38, %39 : vector<16x64xf32>
    %41 = arith.addf %31, %40 : vector<16x64xf32>
    %c4 = arith.constant 4 : index
    %c0_26 = arith.constant 0 : index
    %c0_27 = arith.constant 0 : index
    %42 = vector.load %arg4[%c4, %c0_26, %c0_27] : memref<9x1x64xbf16, #tpu.memory_space<vmem>>, vector<1x1x64xbf16>
    %43 = vector.shape_cast %42 : vector<1x1x64xbf16> to vector<1x64xbf16>
    %c0_28 = arith.constant 0 : index
    %c1_29 = arith.constant 1 : index
    %c1_30 = arith.constant 1 : index
    %c0_31 = arith.constant 0 : index
    %44 = vector.load %arg2[%c0_28, %c1_29, %c1_30, %c0_31] : memref<1x2x18x1xbf16, #tpu.memory_space<vmem>>, vector<1x1x16x1xbf16>
    %45 = vector.shape_cast %44 : vector<1x1x16x1xbf16> to vector<16x1xbf16>
    %46 = arith.extf %45 : vector<16x1xbf16> to vector<16x1xf32>
    %47 = arith.extf %43 : vector<1x64xbf16> to vector<1x64xf32>
    %48 = vector.broadcast %46 : vector<16x1xf32> to vector<16x64xf32>
    %49 = vector.broadcast %47 : vector<1x64xf32> to vector<16x64xf32>
    %50 = arith.mulf %48, %49 : vector<16x64xf32>
    %51 = arith.addf %41, %50 : vector<16x64xf32>
    %c5 = arith.constant 5 : index
    %c0_32 = arith.constant 0 : index
    %c0_33 = arith.constant 0 : index
    %52 = vector.load %arg4[%c5, %c0_32, %c0_33] : memref<9x1x64xbf16, #tpu.memory_space<vmem>>, vector<1x1x64xbf16>
    %53 = vector.shape_cast %52 : vector<1x1x64xbf16> to vector<1x64xbf16>
    %c0_34 = arith.constant 0 : index
    %c1_35 = arith.constant 1 : index
    %c2_36 = arith.constant 2 : index
    %c0_37 = arith.constant 0 : index
    %54 = vector.load %arg2[%c0_34, %c1_35, %c2_36, %c0_37] : memref<1x2x18x1xbf16, #tpu.memory_space<vmem>>, vector<1x1x16x1xbf16>
    %55 = vector.shape_cast %54 : vector<1x1x16x1xbf16> to vector<16x1xbf16>
    %56 = arith.extf %55 : vector<16x1xbf16> to vector<16x1xf32>
    %57 = arith.extf %53 : vector<1x64xbf16> to vector<1x64xf32>
    %58 = vector.broadcast %56 : vector<16x1xf32> to vector<16x64xf32>
    %59 = vector.broadcast %57 : vector<1x64xf32> to vector<16x64xf32>
    %60 = arith.mulf %58, %59 : vector<16x64xf32>
    %61 = arith.addf %51, %60 : vector<16x64xf32>
    %c6 = arith.constant 6 : index
    %c0_38 = arith.constant 0 : index
    %c0_39 = arith.constant 0 : index
    %62 = vector.load %arg4[%c6, %c0_38, %c0_39] : memref<9x1x64xbf16, #tpu.memory_space<vmem>>, vector<1x1x64xbf16>
    %63 = vector.shape_cast %62 : vector<1x1x64xbf16> to vector<1x64xbf16>
    %c0_40 = arith.constant 0 : index
    %c0_41 = arith.constant 0 : index
    %c0_42 = arith.constant 0 : index
    %c0_43 = arith.constant 0 : index
    %64 = vector.load %arg3[%c0_40, %c0_41, %c0_42, %c0_43] : memref<1x2x18x1xbf16, #tpu.memory_space<vmem>>, vector<1x1x16x1xbf16>
    %65 = vector.shape_cast %64 : vector<1x1x16x1xbf16> to vector<16x1xbf16>
    %66 = arith.extf %65 : vector<16x1xbf16> to vector<16x1xf32>
    %67 = arith.extf %63 : vector<1x64xbf16> to vector<1x64xf32>
    %68 = vector.broadcast %66 : vector<16x1xf32> to vector<16x64xf32>
    %69 = vector.broadcast %67 : vector<1x64xf32> to vector<16x64xf32>
    %70 = arith.mulf %68, %69 : vector<16x64xf32>
    %71 = arith.addf %61, %70 : vector<16x64xf32>
    %c7 = arith.constant 7 : index
    %c0_44 = arith.constant 0 : index
    %c0_45 = arith.constant 0 : index
    %72 = vector.load %arg4[%c7, %c0_44, %c0_45] : memref<9x1x64xbf16, #tpu.memory_space<vmem>>, vector<1x1x64xbf16>
    %73 = vector.shape_cast %72 : vector<1x1x64xbf16> to vector<1x64xbf16>
    %c0_46 = arith.constant 0 : index
    %c0_47 = arith.constant 0 : index
    %c1_48 = arith.constant 1 : index
    %c0_49 = arith.constant 0 : index
    %74 = vector.load %arg3[%c0_46, %c0_47, %c1_48, %c0_49] : memref<1x2x18x1xbf16, #tpu.memory_space<vmem>>, vector<1x1x16x1xbf16>
    %75 = vector.shape_cast %74 : vector<1x1x16x1xbf16> to vector<16x1xbf16>
    %76 = arith.extf %75 : vector<16x1xbf16> to vector<16x1xf32>
    %77 = arith.extf %73 : vector<1x64xbf16> to vector<1x64xf32>
    %78 = vector.broadcast %76 : vector<16x1xf32> to vector<16x64xf32>
    %79 = vector.broadcast %77 : vector<1x64xf32> to vector<16x64xf32>
    %80 = arith.mulf %78, %79 : vector<16x64xf32>
    %81 = arith.addf %71, %80 : vector<16x64xf32>
    %c8 = arith.constant 8 : index
    %c0_50 = arith.constant 0 : index
    %c0_51 = arith.constant 0 : index
    %82 = vector.load %arg4[%c8, %c0_50, %c0_51] : memref<9x1x64xbf16, #tpu.memory_space<vmem>>, vector<1x1x64xbf16>
    %83 = vector.shape_cast %82 : vector<1x1x64xbf16> to vector<1x64xbf16>
    %c0_52 = arith.constant 0 : index
    %c0_53 = arith.constant 0 : index
    %c2_54 = arith.constant 2 : index
    %c0_55 = arith.constant 0 : index
    %84 = vector.load %arg3[%c0_52, %c0_53, %c2_54, %c0_55] : memref<1x2x18x1xbf16, #tpu.memory_space<vmem>>, vector<1x1x16x1xbf16>
    %85 = vector.shape_cast %84 : vector<1x1x16x1xbf16> to vector<16x1xbf16>
    %86 = arith.extf %85 : vector<16x1xbf16> to vector<16x1xf32>
    %87 = arith.extf %83 : vector<1x64xbf16> to vector<1x64xf32>
    %88 = vector.broadcast %86 : vector<16x1xf32> to vector<16x64xf32>
    %89 = vector.broadcast %87 : vector<1x64xf32> to vector<16x64xf32>
    %90 = arith.mulf %88, %89 : vector<16x64xf32>
    %91 = arith.addf %81, %90 : vector<16x64xf32>
    %92 = vector.broadcast %0 : vector<1x64xf32> to vector<16x64xf32>
    %93 = arith.addf %91, %92 : vector<16x64xf32>
    %cst_56 = arith.constant 0.000000e+00 : f32
    %94 = vector.broadcast %cst_56 : f32 to vector<16x64xf32>
    %95 = arith.maximumf %93, %94 : vector<16x64xf32>
    %cst_57 = arith.constant 0.000000e+00 : f32
    %96 = vector.broadcast %cst_57 : f32 to vector<16x64xf32>
    %c0_58 = arith.constant 0 : index
    %c0_59 = arith.constant 0 : index
    %c0_60 = arith.constant 0 : index
    %97 = vector.load %arg4[%c0_58, %c0_59, %c0_60] : memref<9x1x64xbf16, #tpu.memory_space<vmem>>, vector<1x1x64xbf16>
    %98 = vector.shape_cast %97 : vector<1x1x64xbf16> to vector<1x64xbf16>
    %c0_61 = arith.constant 0 : index
    %c1_62 = arith.constant 1 : index
    %c0_63 = arith.constant 0 : index
    %c0_64 = arith.constant 0 : index
    %99 = vector.load %arg2[%c0_61, %c1_62, %c0_63, %c0_64] : memref<1x2x18x1xbf16, #tpu.memory_space<vmem>>, vector<1x1x16x1xbf16>
    %100 = vector.shape_cast %99 : vector<1x1x16x1xbf16> to vector<16x1xbf16>
    %101 = arith.extf %100 : vector<16x1xbf16> to vector<16x1xf32>
    %102 = arith.extf %98 : vector<1x64xbf16> to vector<1x64xf32>
    %103 = vector.broadcast %101 : vector<16x1xf32> to vector<16x64xf32>
    %104 = vector.broadcast %102 : vector<1x64xf32> to vector<16x64xf32>
    %105 = arith.mulf %103, %104 : vector<16x64xf32>
    %106 = arith.addf %96, %105 : vector<16x64xf32>
    %c1_65 = arith.constant 1 : index
    %c0_66 = arith.constant 0 : index
    %c0_67 = arith.constant 0 : index
    %107 = vector.load %arg4[%c1_65, %c0_66, %c0_67] : memref<9x1x64xbf16, #tpu.memory_space<vmem>>, vector<1x1x64xbf16>
    %108 = vector.shape_cast %107 : vector<1x1x64xbf16> to vector<1x64xbf16>
    %c0_68 = arith.constant 0 : index
    %c1_69 = arith.constant 1 : index
    %c1_70 = arith.constant 1 : index
    %c0_71 = arith.constant 0 : index
    %109 = vector.load %arg2[%c0_68, %c1_69, %c1_70, %c0_71] : memref<1x2x18x1xbf16, #tpu.memory_space<vmem>>, vector<1x1x16x1xbf16>
    %110 = vector.shape_cast %109 : vector<1x1x16x1xbf16> to vector<16x1xbf16>
    %111 = arith.extf %110 : vector<16x1xbf16> to vector<16x1xf32>
    %112 = arith.extf %108 : vector<1x64xbf16> to vector<1x64xf32>
    %113 = vector.broadcast %111 : vector<16x1xf32> to vector<16x64xf32>
    %114 = vector.broadcast %112 : vector<1x64xf32> to vector<16x64xf32>
    %115 = arith.mulf %113, %114 : vector<16x64xf32>
    %116 = arith.addf %106, %115 : vector<16x64xf32>
    %c2_72 = arith.constant 2 : index
    %c0_73 = arith.constant 0 : index
    %c0_74 = arith.constant 0 : index
    %117 = vector.load %arg4[%c2_72, %c0_73, %c0_74] : memref<9x1x64xbf16, #tpu.memory_space<vmem>>, vector<1x1x64xbf16>
    %118 = vector.shape_cast %117 : vector<1x1x64xbf16> to vector<1x64xbf16>
    %c0_75 = arith.constant 0 : index
    %c1_76 = arith.constant 1 : index
    %c2_77 = arith.constant 2 : index
    %c0_78 = arith.constant 0 : index
    %119 = vector.load %arg2[%c0_75, %c1_76, %c2_77, %c0_78] : memref<1x2x18x1xbf16, #tpu.memory_space<vmem>>, vector<1x1x16x1xbf16>
    %120 = vector.shape_cast %119 : vector<1x1x16x1xbf16> to vector<16x1xbf16>
    %121 = arith.extf %120 : vector<16x1xbf16> to vector<16x1xf32>
    %122 = arith.extf %118 : vector<1x64xbf16> to vector<1x64xf32>
    %123 = vector.broadcast %121 : vector<16x1xf32> to vector<16x64xf32>
    %124 = vector.broadcast %122 : vector<1x64xf32> to vector<16x64xf32>
    %125 = arith.mulf %123, %124 : vector<16x64xf32>
    %126 = arith.addf %116, %125 : vector<16x64xf32>
    %c3_79 = arith.constant 3 : index
    %c0_80 = arith.constant 0 : index
    %c0_81 = arith.constant 0 : index
    %127 = vector.load %arg4[%c3_79, %c0_80, %c0_81] : memref<9x1x64xbf16, #tpu.memory_space<vmem>>, vector<1x1x64xbf16>
    %128 = vector.shape_cast %127 : vector<1x1x64xbf16> to vector<1x64xbf16>
    %c0_82 = arith.constant 0 : index
    %c0_83 = arith.constant 0 : index
    %c0_84 = arith.constant 0 : index
    %c0_85 = arith.constant 0 : index
    %129 = vector.load %arg3[%c0_82, %c0_83, %c0_84, %c0_85] : memref<1x2x18x1xbf16, #tpu.memory_space<vmem>>, vector<1x1x16x1xbf16>
    %130 = vector.shape_cast %129 : vector<1x1x16x1xbf16> to vector<16x1xbf16>
    %131 = arith.extf %130 : vector<16x1xbf16> to vector<16x1xf32>
    %132 = arith.extf %128 : vector<1x64xbf16> to vector<1x64xf32>
    %133 = vector.broadcast %131 : vector<16x1xf32> to vector<16x64xf32>
    %134 = vector.broadcast %132 : vector<1x64xf32> to vector<16x64xf32>
    %135 = arith.mulf %133, %134 : vector<16x64xf32>
    %136 = arith.addf %126, %135 : vector<16x64xf32>
    %c4_86 = arith.constant 4 : index
    %c0_87 = arith.constant 0 : index
    %c0_88 = arith.constant 0 : index
    %137 = vector.load %arg4[%c4_86, %c0_87, %c0_88] : memref<9x1x64xbf16, #tpu.memory_space<vmem>>, vector<1x1x64xbf16>
    %138 = vector.shape_cast %137 : vector<1x1x64xbf16> to vector<1x64xbf16>
    %c0_89 = arith.constant 0 : index
    %c0_90 = arith.constant 0 : index
    %c1_91 = arith.constant 1 : index
    %c0_92 = arith.constant 0 : index
    %139 = vector.load %arg3[%c0_89, %c0_90, %c1_91, %c0_92] : memref<1x2x18x1xbf16, #tpu.memory_space<vmem>>, vector<1x1x16x1xbf16>
    %140 = vector.shape_cast %139 : vector<1x1x16x1xbf16> to vector<16x1xbf16>
    %141 = arith.extf %140 : vector<16x1xbf16> to vector<16x1xf32>
    %142 = arith.extf %138 : vector<1x64xbf16> to vector<1x64xf32>
    %143 = vector.broadcast %141 : vector<16x1xf32> to vector<16x64xf32>
    %144 = vector.broadcast %142 : vector<1x64xf32> to vector<16x64xf32>
    %145 = arith.mulf %143, %144 : vector<16x64xf32>
    %146 = arith.addf %136, %145 : vector<16x64xf32>
    %c5_93 = arith.constant 5 : index
    %c0_94 = arith.constant 0 : index
    %c0_95 = arith.constant 0 : index
    %147 = vector.load %arg4[%c5_93, %c0_94, %c0_95] : memref<9x1x64xbf16, #tpu.memory_space<vmem>>, vector<1x1x64xbf16>
    %148 = vector.shape_cast %147 : vector<1x1x64xbf16> to vector<1x64xbf16>
    %c0_96 = arith.constant 0 : index
    %c0_97 = arith.constant 0 : index
    %c2_98 = arith.constant 2 : index
    %c0_99 = arith.constant 0 : index
    %149 = vector.load %arg3[%c0_96, %c0_97, %c2_98, %c0_99] : memref<1x2x18x1xbf16, #tpu.memory_space<vmem>>, vector<1x1x16x1xbf16>
    %150 = vector.shape_cast %149 : vector<1x1x16x1xbf16> to vector<16x1xbf16>
    %151 = arith.extf %150 : vector<16x1xbf16> to vector<16x1xf32>
    %152 = arith.extf %148 : vector<1x64xbf16> to vector<1x64xf32>
    %153 = vector.broadcast %151 : vector<16x1xf32> to vector<16x64xf32>
    %154 = vector.broadcast %152 : vector<1x64xf32> to vector<16x64xf32>
    %155 = arith.mulf %153, %154 : vector<16x64xf32>
    %156 = arith.addf %146, %155 : vector<16x64xf32>
    %c6_100 = arith.constant 6 : index
    %c0_101 = arith.constant 0 : index
    %c0_102 = arith.constant 0 : index
    %157 = vector.load %arg4[%c6_100, %c0_101, %c0_102] : memref<9x1x64xbf16, #tpu.memory_space<vmem>>, vector<1x1x64xbf16>
    %158 = vector.shape_cast %157 : vector<1x1x64xbf16> to vector<1x64xbf16>
    %c0_103 = arith.constant 0 : index
    %c1_104 = arith.constant 1 : index
    %c0_105 = arith.constant 0 : index
    %c0_106 = arith.constant 0 : index
    %159 = vector.load %arg3[%c0_103, %c1_104, %c0_105, %c0_106] : memref<1x2x18x1xbf16, #tpu.memory_space<vmem>>, vector<1x1x16x1xbf16>
    %160 = vector.shape_cast %159 : vector<1x1x16x1xbf16> to vector<16x1xbf16>
    %161 = arith.extf %160 : vector<16x1xbf16> to vector<16x1xf32>
    %162 = arith.extf %158 : vector<1x64xbf16> to vector<1x64xf32>
    %163 = vector.broadcast %161 : vector<16x1xf32> to vector<16x64xf32>
    %164 = vector.broadcast %162 : vector<1x64xf32> to vector<16x64xf32>
    %165 = arith.mulf %163, %164 : vector<16x64xf32>
    %166 = arith.addf %156, %165 : vector<16x64xf32>
    %c7_107 = arith.constant 7 : index
    %c0_108 = arith.constant 0 : index
    %c0_109 = arith.constant 0 : index
    %167 = vector.load %arg4[%c7_107, %c0_108, %c0_109] : memref<9x1x64xbf16, #tpu.memory_space<vmem>>, vector<1x1x64xbf16>
    %168 = vector.shape_cast %167 : vector<1x1x64xbf16> to vector<1x64xbf16>
    %c0_110 = arith.constant 0 : index
    %c1_111 = arith.constant 1 : index
    %c1_112 = arith.constant 1 : index
    %c0_113 = arith.constant 0 : index
    %169 = vector.load %arg3[%c0_110, %c1_111, %c1_112, %c0_113] : memref<1x2x18x1xbf16, #tpu.memory_space<vmem>>, vector<1x1x16x1xbf16>
    %170 = vector.shape_cast %169 : vector<1x1x16x1xbf16> to vector<16x1xbf16>
    %171 = arith.extf %170 : vector<16x1xbf16> to vector<16x1xf32>
    %172 = arith.extf %168 : vector<1x64xbf16> to vector<1x64xf32>
    %173 = vector.broadcast %171 : vector<16x1xf32> to vector<16x64xf32>
    %174 = vector.broadcast %172 : vector<1x64xf32> to vector<16x64xf32>
    %175 = arith.mulf %173, %174 : vector<16x64xf32>
    %176 = arith.addf %166, %175 : vector<16x64xf32>
    %c8_114 = arith.constant 8 : index
    %c0_115 = arith.constant 0 : index
    %c0_116 = arith.constant 0 : index
    %177 = vector.load %arg4[%c8_114, %c0_115, %c0_116] : memref<9x1x64xbf16, #tpu.memory_space<vmem>>, vector<1x1x64xbf16>
    %178 = vector.shape_cast %177 : vector<1x1x64xbf16> to vector<1x64xbf16>
    %c0_117 = arith.constant 0 : index
    %c1_118 = arith.constant 1 : index
    %c2_119 = arith.constant 2 : index
    %c0_120 = arith.constant 0 : index
    %179 = vector.load %arg3[%c0_117, %c1_118, %c2_119, %c0_120] : memref<1x2x18x1xbf16, #tpu.memory_space<vmem>>, vector<1x1x16x1xbf16>
    %180 = vector.shape_cast %179 : vector<1x1x16x1xbf16> to vector<16x1xbf16>
    %181 = arith.extf %180 : vector<16x1xbf16> to vector<16x1xf32>
    %182 = arith.extf %178 : vector<1x64xbf16> to vector<1x64xf32>
    %183 = vector.broadcast %181 : vector<16x1xf32> to vector<16x64xf32>
    %184 = vector.broadcast %182 : vector<1x64xf32> to vector<16x64xf32>
    %185 = arith.mulf %183, %184 : vector<16x64xf32>
    %186 = arith.addf %176, %185 : vector<16x64xf32>
    %187 = vector.broadcast %0 : vector<1x64xf32> to vector<16x64xf32>
    %188 = arith.addf %186, %187 : vector<16x64xf32>
    %cst_121 = arith.constant 0.000000e+00 : f32
    %189 = vector.broadcast %cst_121 : f32 to vector<16x64xf32>
    %190 = arith.maximumf %188, %189 : vector<16x64xf32>
    %191 = arith.maximumf %95, %190 : vector<16x64xf32>
    %c0_122 = arith.constant 0 : index
    %c0_123 = arith.constant 0 : index
    %192 = vector.load %arg7[%c0_122, %c0_123] : memref<16x64xf32, #tpu.memory_space<vmem>>, vector<16x64xf32>
    tpu.vector_store %arg7[%c0_122, %c0_123], %191 {strides = array<i32>} : memref<16x64xf32, #tpu.memory_space<vmem>>, vector<16x64xf32>,
    %c0_124 = arith.constant 0 : index
    %c0_125 = arith.constant 0 : index
    %193 = tpu.strided_load %arg7[%c0_124, %c0_125] {strides = array<i32: 2, 1>} : memref<16x64xf32, #tpu.memory_space<vmem>>, vector<8x64xf32>
    %c1_126 = arith.constant 1 : index
    %c0_127 = arith.constant 0 : index
    %194 = tpu.strided_load %arg7[%c1_126, %c0_127] {strides = array<i32: 2, 1>} : memref<16x64xf32, #tpu.memory_space<vmem>>, vector<8x64xf32>
    %195 = arith.maximumf %193, %194 : vector<8x64xf32>
    %196 = arith.truncf %195 : vector<8x64xf32> to vector<8x64xbf16>
    %c0_128 = arith.constant 0 : index
    %c0_129 = arith.constant 0 : index
    %c0_130 = arith.constant 0 : index
    %c0_131 = arith.constant 0 : index
    %197 = vector.load %arg6[%c0_128, %c0_129, %c0_130, %c0_131] : memref<1x1x8x64xbf16, #tpu.memory_space<vmem>>, vector<1x1x8x64xbf16>
    %198 = vector.shape_cast %197 : vector<1x1x8x64xbf16> to vector<8x64xbf16>
    %199 = vector.shape_cast %196 : vector<8x64xbf16> to vector<1x1x8x64xbf16>
    tpu.vector_store %arg6[%c0_128, %c0_129, %c0_130, %c0_131], %199 {strides = array<i32>} : memref<1x1x8x64xbf16, #tpu.memory_space<vmem>>, vector<1x1x8x64xbf16>,
    return
  }
  func.func @transform_0(%arg0: i32, %arg1: i32) -> (i32, i32, i32, i32) {
    %c0_i32 = arith.constant 0 : i32
    %c0_i32_0 = arith.constant 0 : i32
    %c0_i32_1 = arith.constant 0 : i32
    return %arg0, %arg1, %c0_i32, %c0_i32_0 : i32, i32, i32, i32
  }
  func.func @transform_1(%arg0: i32, %arg1: i32) -> (i32, i32, i32, i32) {
    %c1_i32 = arith.constant 1 : i32
    %0 = arith.addi %arg1, %c1_i32 : i32
    %c0_i32 = arith.constant 0 : i32
    %c0_i32_0 = arith.constant 0 : i32
    %c0_i32_1 = arith.constant 0 : i32
    return %arg0, %0, %c0_i32, %c0_i32_0 : i32, i32, i32, i32
  }
  func.func @transform_2(%arg0: i32, %arg1: i32) -> (i32, i32, i32) {
    %c0_i32 = arith.constant 0 : i32
    %c0_i32_0 = arith.constant 0 : i32
    %c0_i32_1 = arith.constant 0 : i32
    %c0_i32_2 = arith.constant 0 : i32
    return %c0_i32, %c0_i32_0, %c0_i32_1 : i32, i32, i32
  }
  func.func @transform_3(%arg0: i32, %arg1: i32) -> (i32, i32) {
    %c0_i32 = arith.constant 0 : i32
    %c0_i32_0 = arith.constant 0 : i32
    %c0_i32_1 = arith.constant 0 : i32
    return %c0_i32, %c0_i32_0 : i32, i32
  }
  func.func @transform_4(%arg0: i32, %arg1: i32) -> (i32, i32, i32, i32) {
    %c0_i32 = arith.constant 0 : i32
    %c0_i32_0 = arith.constant 0 : i32
    %c0_i32_1 = arith.constant 0 : i32
    return %arg0, %arg1, %c0_i32, %c0_i32_0 : i32, i32, i32, i32
  }
}

module attributes {stable_mosaic.version = 11 : i64} {
  func.func @conv3x3_pool_kernel(%arg0: i32, %arg1: i32, %arg2: memref<1x2x10x64xbf16, #tpu.memory_space<vmem>>, %arg3: memref<1x2x10x64xbf16, #tpu.memory_space<vmem>>, %arg4: memref<9x64x128xbf16, #tpu.memory_space<vmem>>, %arg5: memref<1x128xf32, #tpu.memory_space<vmem>>, %arg6: memref<1x1x4x128xbf16, #tpu.memory_space<vmem>>, %arg7: memref<8x128xf32, #tpu.memory_space<vmem>>) attributes {dimension_semantics = [#tpu.dimension_semantics<parallel>, #tpu.dimension_semantics<parallel>], iteration_bounds = array<i64: 2, 8>, scalar_prefetch = 0 : i64, scratch_operands = 1 : i64, tpu.core_type = #tpu.core_type<tc>, window_params = [{transform_indices = @transform_0, window_bounds = array<i64: 1, 2, 10, 64>}, {transform_indices = @transform_1, window_bounds = array<i64: 1, 2, 10, 64>}, {pipeline_mode = #tpu.pipeline_mode<synchronous>, transform_indices = @transform_2, window_bounds = array<i64: 9, 64, 128>}, {pipeline_mode = #tpu.pipeline_mode<synchronous>, transform_indices = @transform_3, window_bounds = array<i64: 1, 128>}, {transform_indices = @transform_4, window_bounds = array<i64: 1, 1, 4, 128>}]} {
    %c0 = arith.constant 0 : index
    %c0_0 = arith.constant 0 : index
    %0 = vector.load %arg5[%c0, %c0_0] : memref<1x128xf32, #tpu.memory_space<vmem>>, vector<1x128xf32>
    %cst = arith.constant 0.000000e+00 : f32
    %1 = vector.broadcast %cst : f32 to vector<8x128xf32>
    %c0_1 = arith.constant 0 : index
    %c0_2 = arith.constant 0 : index
    %c0_3 = arith.constant 0 : index
    %2 = vector.load %arg4[%c0_1, %c0_2, %c0_3] : memref<9x64x128xbf16, #tpu.memory_space<vmem>>, vector<1x64x128xbf16>
    %3 = vector.shape_cast %2 : vector<1x64x128xbf16> to vector<64x128xbf16>
    %c0_4 = arith.constant 0 : index
    %c0_5 = arith.constant 0 : index
    %c0_6 = arith.constant 0 : index
    %c0_7 = arith.constant 0 : index
    %4 = vector.load %arg2[%c0_4, %c0_5, %c0_6, %c0_7] : memref<1x2x10x64xbf16, #tpu.memory_space<vmem>>, vector<1x1x8x64xbf16>
    %5 = vector.shape_cast %4 : vector<1x1x8x64xbf16> to vector<8x64xbf16>
    %cst_8 = arith.constant dense<0.000000e+00> : vector<8x128xf32>
    %6 = tpu.matmul %5, %3, %cst_8 {dimension_numbers = #tpu.dot_dimension_numbers<[1], [0], [0], [1], [0, 0, 1, 1], [], []>} : vector<8x64xbf16>, vector<64x128xbf16>, vector<8x128xf32> -> vector<8x128xf32>
    %7 = arith.addf %1, %6 : vector<8x128xf32>
    %c1 = arith.constant 1 : index
    %c0_9 = arith.constant 0 : index
    %c0_10 = arith.constant 0 : index
    %8 = vector.load %arg4[%c1, %c0_9, %c0_10] : memref<9x64x128xbf16, #tpu.memory_space<vmem>>, vector<1x64x128xbf16>
    %9 = vector.shape_cast %8 : vector<1x64x128xbf16> to vector<64x128xbf16>
    %c0_11 = arith.constant 0 : index
    %c0_12 = arith.constant 0 : index
    %c1_13 = arith.constant 1 : index
    %c0_14 = arith.constant 0 : index
    %10 = vector.load %arg2[%c0_11, %c0_12, %c1_13, %c0_14] : memref<1x2x10x64xbf16, #tpu.memory_space<vmem>>, vector<1x1x8x64xbf16>
    %11 = vector.shape_cast %10 : vector<1x1x8x64xbf16> to vector<8x64xbf16>
    %cst_15 = arith.constant dense<0.000000e+00> : vector<8x128xf32>
    %12 = tpu.matmul %11, %9, %cst_15 {dimension_numbers = #tpu.dot_dimension_numbers<[1], [0], [0], [1], [0, 0, 1, 1], [], []>} : vector<8x64xbf16>, vector<64x128xbf16>, vector<8x128xf32> -> vector<8x128xf32>
    %13 = arith.addf %7, %12 : vector<8x128xf32>
    %c2 = arith.constant 2 : index
    %c0_16 = arith.constant 0 : index
    %c0_17 = arith.constant 0 : index
    %14 = vector.load %arg4[%c2, %c0_16, %c0_17] : memref<9x64x128xbf16, #tpu.memory_space<vmem>>, vector<1x64x128xbf16>
    %15 = vector.shape_cast %14 : vector<1x64x128xbf16> to vector<64x128xbf16>
    %c0_18 = arith.constant 0 : index
    %c0_19 = arith.constant 0 : index
    %c2_20 = arith.constant 2 : index
    %c0_21 = arith.constant 0 : index
    %16 = vector.load %arg2[%c0_18, %c0_19, %c2_20, %c0_21] : memref<1x2x10x64xbf16, #tpu.memory_space<vmem>>, vector<1x1x8x64xbf16>
    %17 = vector.shape_cast %16 : vector<1x1x8x64xbf16> to vector<8x64xbf16>
    %cst_22 = arith.constant dense<0.000000e+00> : vector<8x128xf32>
    %18 = tpu.matmul %17, %15, %cst_22 {dimension_numbers = #tpu.dot_dimension_numbers<[1], [0], [0], [1], [0, 0, 1, 1], [], []>} : vector<8x64xbf16>, vector<64x128xbf16>, vector<8x128xf32> -> vector<8x128xf32>
    %19 = arith.addf %13, %18 : vector<8x128xf32>
    %c3 = arith.constant 3 : index
    %c0_23 = arith.constant 0 : index
    %c0_24 = arith.constant 0 : index
    %20 = vector.load %arg4[%c3, %c0_23, %c0_24] : memref<9x64x128xbf16, #tpu.memory_space<vmem>>, vector<1x64x128xbf16>
    %21 = vector.shape_cast %20 : vector<1x64x128xbf16> to vector<64x128xbf16>
    %c0_25 = arith.constant 0 : index
    %c1_26 = arith.constant 1 : index
    %c0_27 = arith.constant 0 : index
    %c0_28 = arith.constant 0 : index
    %22 = vector.load %arg2[%c0_25, %c1_26, %c0_27, %c0_28] : memref<1x2x10x64xbf16, #tpu.memory_space<vmem>>, vector<1x1x8x64xbf16>
    %23 = vector.shape_cast %22 : vector<1x1x8x64xbf16> to vector<8x64xbf16>
    %cst_29 = arith.constant dense<0.000000e+00> : vector<8x128xf32>
    %24 = tpu.matmul %23, %21, %cst_29 {dimension_numbers = #tpu.dot_dimension_numbers<[1], [0], [0], [1], [0, 0, 1, 1], [], []>} : vector<8x64xbf16>, vector<64x128xbf16>, vector<8x128xf32> -> vector<8x128xf32>
    %25 = arith.addf %19, %24 : vector<8x128xf32>
    %c4 = arith.constant 4 : index
    %c0_30 = arith.constant 0 : index
    %c0_31 = arith.constant 0 : index
    %26 = vector.load %arg4[%c4, %c0_30, %c0_31] : memref<9x64x128xbf16, #tpu.memory_space<vmem>>, vector<1x64x128xbf16>
    %27 = vector.shape_cast %26 : vector<1x64x128xbf16> to vector<64x128xbf16>
    %c0_32 = arith.constant 0 : index
    %c1_33 = arith.constant 1 : index
    %c1_34 = arith.constant 1 : index
    %c0_35 = arith.constant 0 : index
    %28 = vector.load %arg2[%c0_32, %c1_33, %c1_34, %c0_35] : memref<1x2x10x64xbf16, #tpu.memory_space<vmem>>, vector<1x1x8x64xbf16>
    %29 = vector.shape_cast %28 : vector<1x1x8x64xbf16> to vector<8x64xbf16>
    %cst_36 = arith.constant dense<0.000000e+00> : vector<8x128xf32>
    %30 = tpu.matmul %29, %27, %cst_36 {dimension_numbers = #tpu.dot_dimension_numbers<[1], [0], [0], [1], [0, 0, 1, 1], [], []>} : vector<8x64xbf16>, vector<64x128xbf16>, vector<8x128xf32> -> vector<8x128xf32>
    %31 = arith.addf %25, %30 : vector<8x128xf32>
    %c5 = arith.constant 5 : index
    %c0_37 = arith.constant 0 : index
    %c0_38 = arith.constant 0 : index
    %32 = vector.load %arg4[%c5, %c0_37, %c0_38] : memref<9x64x128xbf16, #tpu.memory_space<vmem>>, vector<1x64x128xbf16>
    %33 = vector.shape_cast %32 : vector<1x64x128xbf16> to vector<64x128xbf16>
    %c0_39 = arith.constant 0 : index
    %c1_40 = arith.constant 1 : index
    %c2_41 = arith.constant 2 : index
    %c0_42 = arith.constant 0 : index
    %34 = vector.load %arg2[%c0_39, %c1_40, %c2_41, %c0_42] : memref<1x2x10x64xbf16, #tpu.memory_space<vmem>>, vector<1x1x8x64xbf16>
    %35 = vector.shape_cast %34 : vector<1x1x8x64xbf16> to vector<8x64xbf16>
    %cst_43 = arith.constant dense<0.000000e+00> : vector<8x128xf32>
    %36 = tpu.matmul %35, %33, %cst_43 {dimension_numbers = #tpu.dot_dimension_numbers<[1], [0], [0], [1], [0, 0, 1, 1], [], []>} : vector<8x64xbf16>, vector<64x128xbf16>, vector<8x128xf32> -> vector<8x128xf32>
    %37 = arith.addf %31, %36 : vector<8x128xf32>
    %c6 = arith.constant 6 : index
    %c0_44 = arith.constant 0 : index
    %c0_45 = arith.constant 0 : index
    %38 = vector.load %arg4[%c6, %c0_44, %c0_45] : memref<9x64x128xbf16, #tpu.memory_space<vmem>>, vector<1x64x128xbf16>
    %39 = vector.shape_cast %38 : vector<1x64x128xbf16> to vector<64x128xbf16>
    %c0_46 = arith.constant 0 : index
    %c0_47 = arith.constant 0 : index
    %c0_48 = arith.constant 0 : index
    %c0_49 = arith.constant 0 : index
    %40 = vector.load %arg3[%c0_46, %c0_47, %c0_48, %c0_49] : memref<1x2x10x64xbf16, #tpu.memory_space<vmem>>, vector<1x1x8x64xbf16>
    %41 = vector.shape_cast %40 : vector<1x1x8x64xbf16> to vector<8x64xbf16>
    %cst_50 = arith.constant dense<0.000000e+00> : vector<8x128xf32>
    %42 = tpu.matmul %41, %39, %cst_50 {dimension_numbers = #tpu.dot_dimension_numbers<[1], [0], [0], [1], [0, 0, 1, 1], [], []>} : vector<8x64xbf16>, vector<64x128xbf16>, vector<8x128xf32> -> vector<8x128xf32>
    %43 = arith.addf %37, %42 : vector<8x128xf32>
    %c7 = arith.constant 7 : index
    %c0_51 = arith.constant 0 : index
    %c0_52 = arith.constant 0 : index
    %44 = vector.load %arg4[%c7, %c0_51, %c0_52] : memref<9x64x128xbf16, #tpu.memory_space<vmem>>, vector<1x64x128xbf16>
    %45 = vector.shape_cast %44 : vector<1x64x128xbf16> to vector<64x128xbf16>
    %c0_53 = arith.constant 0 : index
    %c0_54 = arith.constant 0 : index
    %c1_55 = arith.constant 1 : index
    %c0_56 = arith.constant 0 : index
    %46 = vector.load %arg3[%c0_53, %c0_54, %c1_55, %c0_56] : memref<1x2x10x64xbf16, #tpu.memory_space<vmem>>, vector<1x1x8x64xbf16>
    %47 = vector.shape_cast %46 : vector<1x1x8x64xbf16> to vector<8x64xbf16>
    %cst_57 = arith.constant dense<0.000000e+00> : vector<8x128xf32>
    %48 = tpu.matmul %47, %45, %cst_57 {dimension_numbers = #tpu.dot_dimension_numbers<[1], [0], [0], [1], [0, 0, 1, 1], [], []>} : vector<8x64xbf16>, vector<64x128xbf16>, vector<8x128xf32> -> vector<8x128xf32>
    %49 = arith.addf %43, %48 : vector<8x128xf32>
    %c8 = arith.constant 8 : index
    %c0_58 = arith.constant 0 : index
    %c0_59 = arith.constant 0 : index
    %50 = vector.load %arg4[%c8, %c0_58, %c0_59] : memref<9x64x128xbf16, #tpu.memory_space<vmem>>, vector<1x64x128xbf16>
    %51 = vector.shape_cast %50 : vector<1x64x128xbf16> to vector<64x128xbf16>
    %c0_60 = arith.constant 0 : index
    %c0_61 = arith.constant 0 : index
    %c2_62 = arith.constant 2 : index
    %c0_63 = arith.constant 0 : index
    %52 = vector.load %arg3[%c0_60, %c0_61, %c2_62, %c0_63] : memref<1x2x10x64xbf16, #tpu.memory_space<vmem>>, vector<1x1x8x64xbf16>
    %53 = vector.shape_cast %52 : vector<1x1x8x64xbf16> to vector<8x64xbf16>
    %cst_64 = arith.constant dense<0.000000e+00> : vector<8x128xf32>
    %54 = tpu.matmul %53, %51, %cst_64 {dimension_numbers = #tpu.dot_dimension_numbers<[1], [0], [0], [1], [0, 0, 1, 1], [], []>} : vector<8x64xbf16>, vector<64x128xbf16>, vector<8x128xf32> -> vector<8x128xf32>
    %55 = arith.addf %49, %54 : vector<8x128xf32>
    %56 = vector.broadcast %0 : vector<1x128xf32> to vector<8x128xf32>
    %57 = arith.addf %55, %56 : vector<8x128xf32>
    %cst_65 = arith.constant 0.000000e+00 : f32
    %58 = vector.broadcast %cst_65 : f32 to vector<8x128xf32>
    %59 = arith.maximumf %57, %58 : vector<8x128xf32>
    %cst_66 = arith.constant 0.000000e+00 : f32
    %60 = vector.broadcast %cst_66 : f32 to vector<8x128xf32>
    %c0_67 = arith.constant 0 : index
    %c0_68 = arith.constant 0 : index
    %c0_69 = arith.constant 0 : index
    %61 = vector.load %arg4[%c0_67, %c0_68, %c0_69] : memref<9x64x128xbf16, #tpu.memory_space<vmem>>, vector<1x64x128xbf16>
    %62 = vector.shape_cast %61 : vector<1x64x128xbf16> to vector<64x128xbf16>
    %c0_70 = arith.constant 0 : index
    %c1_71 = arith.constant 1 : index
    %c0_72 = arith.constant 0 : index
    %c0_73 = arith.constant 0 : index
    %63 = vector.load %arg2[%c0_70, %c1_71, %c0_72, %c0_73] : memref<1x2x10x64xbf16, #tpu.memory_space<vmem>>, vector<1x1x8x64xbf16>
    %64 = vector.shape_cast %63 : vector<1x1x8x64xbf16> to vector<8x64xbf16>
    %cst_74 = arith.constant dense<0.000000e+00> : vector<8x128xf32>
    %65 = tpu.matmul %64, %62, %cst_74 {dimension_numbers = #tpu.dot_dimension_numbers<[1], [0], [0], [1], [0, 0, 1, 1], [], []>} : vector<8x64xbf16>, vector<64x128xbf16>, vector<8x128xf32> -> vector<8x128xf32>
    %66 = arith.addf %60, %65 : vector<8x128xf32>
    %c1_75 = arith.constant 1 : index
    %c0_76 = arith.constant 0 : index
    %c0_77 = arith.constant 0 : index
    %67 = vector.load %arg4[%c1_75, %c0_76, %c0_77] : memref<9x64x128xbf16, #tpu.memory_space<vmem>>, vector<1x64x128xbf16>
    %68 = vector.shape_cast %67 : vector<1x64x128xbf16> to vector<64x128xbf16>
    %c0_78 = arith.constant 0 : index
    %c1_79 = arith.constant 1 : index
    %c1_80 = arith.constant 1 : index
    %c0_81 = arith.constant 0 : index
    %69 = vector.load %arg2[%c0_78, %c1_79, %c1_80, %c0_81] : memref<1x2x10x64xbf16, #tpu.memory_space<vmem>>, vector<1x1x8x64xbf16>
    %70 = vector.shape_cast %69 : vector<1x1x8x64xbf16> to vector<8x64xbf16>
    %cst_82 = arith.constant dense<0.000000e+00> : vector<8x128xf32>
    %71 = tpu.matmul %70, %68, %cst_82 {dimension_numbers = #tpu.dot_dimension_numbers<[1], [0], [0], [1], [0, 0, 1, 1], [], []>} : vector<8x64xbf16>, vector<64x128xbf16>, vector<8x128xf32> -> vector<8x128xf32>
    %72 = arith.addf %66, %71 : vector<8x128xf32>
    %c2_83 = arith.constant 2 : index
    %c0_84 = arith.constant 0 : index
    %c0_85 = arith.constant 0 : index
    %73 = vector.load %arg4[%c2_83, %c0_84, %c0_85] : memref<9x64x128xbf16, #tpu.memory_space<vmem>>, vector<1x64x128xbf16>
    %74 = vector.shape_cast %73 : vector<1x64x128xbf16> to vector<64x128xbf16>
    %c0_86 = arith.constant 0 : index
    %c1_87 = arith.constant 1 : index
    %c2_88 = arith.constant 2 : index
    %c0_89 = arith.constant 0 : index
    %75 = vector.load %arg2[%c0_86, %c1_87, %c2_88, %c0_89] : memref<1x2x10x64xbf16, #tpu.memory_space<vmem>>, vector<1x1x8x64xbf16>
    %76 = vector.shape_cast %75 : vector<1x1x8x64xbf16> to vector<8x64xbf16>
    %cst_90 = arith.constant dense<0.000000e+00> : vector<8x128xf32>
    %77 = tpu.matmul %76, %74, %cst_90 {dimension_numbers = #tpu.dot_dimension_numbers<[1], [0], [0], [1], [0, 0, 1, 1], [], []>} : vector<8x64xbf16>, vector<64x128xbf16>, vector<8x128xf32> -> vector<8x128xf32>
    %78 = arith.addf %72, %77 : vector<8x128xf32>
    %c3_91 = arith.constant 3 : index
    %c0_92 = arith.constant 0 : index
    %c0_93 = arith.constant 0 : index
    %79 = vector.load %arg4[%c3_91, %c0_92, %c0_93] : memref<9x64x128xbf16, #tpu.memory_space<vmem>>, vector<1x64x128xbf16>
    %80 = vector.shape_cast %79 : vector<1x64x128xbf16> to vector<64x128xbf16>
    %c0_94 = arith.constant 0 : index
    %c0_95 = arith.constant 0 : index
    %c0_96 = arith.constant 0 : index
    %c0_97 = arith.constant 0 : index
    %81 = vector.load %arg3[%c0_94, %c0_95, %c0_96, %c0_97] : memref<1x2x10x64xbf16, #tpu.memory_space<vmem>>, vector<1x1x8x64xbf16>
    %82 = vector.shape_cast %81 : vector<1x1x8x64xbf16> to vector<8x64xbf16>
    %cst_98 = arith.constant dense<0.000000e+00> : vector<8x128xf32>
    %83 = tpu.matmul %82, %80, %cst_98 {dimension_numbers = #tpu.dot_dimension_numbers<[1], [0], [0], [1], [0, 0, 1, 1], [], []>} : vector<8x64xbf16>, vector<64x128xbf16>, vector<8x128xf32> -> vector<8x128xf32>
    %84 = arith.addf %78, %83 : vector<8x128xf32>
    %c4_99 = arith.constant 4 : index
    %c0_100 = arith.constant 0 : index
    %c0_101 = arith.constant 0 : index
    %85 = vector.load %arg4[%c4_99, %c0_100, %c0_101] : memref<9x64x128xbf16, #tpu.memory_space<vmem>>, vector<1x64x128xbf16>
    %86 = vector.shape_cast %85 : vector<1x64x128xbf16> to vector<64x128xbf16>
    %c0_102 = arith.constant 0 : index
    %c0_103 = arith.constant 0 : index
    %c1_104 = arith.constant 1 : index
    %c0_105 = arith.constant 0 : index
    %87 = vector.load %arg3[%c0_102, %c0_103, %c1_104, %c0_105] : memref<1x2x10x64xbf16, #tpu.memory_space<vmem>>, vector<1x1x8x64xbf16>
    %88 = vector.shape_cast %87 : vector<1x1x8x64xbf16> to vector<8x64xbf16>
    %cst_106 = arith.constant dense<0.000000e+00> : vector<8x128xf32>
    %89 = tpu.matmul %88, %86, %cst_106 {dimension_numbers = #tpu.dot_dimension_numbers<[1], [0], [0], [1], [0, 0, 1, 1], [], []>} : vector<8x64xbf16>, vector<64x128xbf16>, vector<8x128xf32> -> vector<8x128xf32>
    %90 = arith.addf %84, %89 : vector<8x128xf32>
    %c5_107 = arith.constant 5 : index
    %c0_108 = arith.constant 0 : index
    %c0_109 = arith.constant 0 : index
    %91 = vector.load %arg4[%c5_107, %c0_108, %c0_109] : memref<9x64x128xbf16, #tpu.memory_space<vmem>>, vector<1x64x128xbf16>
    %92 = vector.shape_cast %91 : vector<1x64x128xbf16> to vector<64x128xbf16>
    %c0_110 = arith.constant 0 : index
    %c0_111 = arith.constant 0 : index
    %c2_112 = arith.constant 2 : index
    %c0_113 = arith.constant 0 : index
    %93 = vector.load %arg3[%c0_110, %c0_111, %c2_112, %c0_113] : memref<1x2x10x64xbf16, #tpu.memory_space<vmem>>, vector<1x1x8x64xbf16>
    %94 = vector.shape_cast %93 : vector<1x1x8x64xbf16> to vector<8x64xbf16>
    %cst_114 = arith.constant dense<0.000000e+00> : vector<8x128xf32>
    %95 = tpu.matmul %94, %92, %cst_114 {dimension_numbers = #tpu.dot_dimension_numbers<[1], [0], [0], [1], [0, 0, 1, 1], [], []>} : vector<8x64xbf16>, vector<64x128xbf16>, vector<8x128xf32> -> vector<8x128xf32>
    %96 = arith.addf %90, %95 : vector<8x128xf32>
    %c6_115 = arith.constant 6 : index
    %c0_116 = arith.constant 0 : index
    %c0_117 = arith.constant 0 : index
    %97 = vector.load %arg4[%c6_115, %c0_116, %c0_117] : memref<9x64x128xbf16, #tpu.memory_space<vmem>>, vector<1x64x128xbf16>
    %98 = vector.shape_cast %97 : vector<1x64x128xbf16> to vector<64x128xbf16>
    %c0_118 = arith.constant 0 : index
    %c1_119 = arith.constant 1 : index
    %c0_120 = arith.constant 0 : index
    %c0_121 = arith.constant 0 : index
    %99 = vector.load %arg3[%c0_118, %c1_119, %c0_120, %c0_121] : memref<1x2x10x64xbf16, #tpu.memory_space<vmem>>, vector<1x1x8x64xbf16>
    %100 = vector.shape_cast %99 : vector<1x1x8x64xbf16> to vector<8x64xbf16>
    %cst_122 = arith.constant dense<0.000000e+00> : vector<8x128xf32>
    %101 = tpu.matmul %100, %98, %cst_122 {dimension_numbers = #tpu.dot_dimension_numbers<[1], [0], [0], [1], [0, 0, 1, 1], [], []>} : vector<8x64xbf16>, vector<64x128xbf16>, vector<8x128xf32> -> vector<8x128xf32>
    %102 = arith.addf %96, %101 : vector<8x128xf32>
    %c7_123 = arith.constant 7 : index
    %c0_124 = arith.constant 0 : index
    %c0_125 = arith.constant 0 : index
    %103 = vector.load %arg4[%c7_123, %c0_124, %c0_125] : memref<9x64x128xbf16, #tpu.memory_space<vmem>>, vector<1x64x128xbf16>
    %104 = vector.shape_cast %103 : vector<1x64x128xbf16> to vector<64x128xbf16>
    %c0_126 = arith.constant 0 : index
    %c1_127 = arith.constant 1 : index
    %c1_128 = arith.constant 1 : index
    %c0_129 = arith.constant 0 : index
    %105 = vector.load %arg3[%c0_126, %c1_127, %c1_128, %c0_129] : memref<1x2x10x64xbf16, #tpu.memory_space<vmem>>, vector<1x1x8x64xbf16>
    %106 = vector.shape_cast %105 : vector<1x1x8x64xbf16> to vector<8x64xbf16>
    %cst_130 = arith.constant dense<0.000000e+00> : vector<8x128xf32>
    %107 = tpu.matmul %106, %104, %cst_130 {dimension_numbers = #tpu.dot_dimension_numbers<[1], [0], [0], [1], [0, 0, 1, 1], [], []>} : vector<8x64xbf16>, vector<64x128xbf16>, vector<8x128xf32> -> vector<8x128xf32>
    %108 = arith.addf %102, %107 : vector<8x128xf32>
    %c8_131 = arith.constant 8 : index
    %c0_132 = arith.constant 0 : index
    %c0_133 = arith.constant 0 : index
    %109 = vector.load %arg4[%c8_131, %c0_132, %c0_133] : memref<9x64x128xbf16, #tpu.memory_space<vmem>>, vector<1x64x128xbf16>
    %110 = vector.shape_cast %109 : vector<1x64x128xbf16> to vector<64x128xbf16>
    %c0_134 = arith.constant 0 : index
    %c1_135 = arith.constant 1 : index
    %c2_136 = arith.constant 2 : index
    %c0_137 = arith.constant 0 : index
    %111 = vector.load %arg3[%c0_134, %c1_135, %c2_136, %c0_137] : memref<1x2x10x64xbf16, #tpu.memory_space<vmem>>, vector<1x1x8x64xbf16>
    %112 = vector.shape_cast %111 : vector<1x1x8x64xbf16> to vector<8x64xbf16>
    %cst_138 = arith.constant dense<0.000000e+00> : vector<8x128xf32>
    %113 = tpu.matmul %112, %110, %cst_138 {dimension_numbers = #tpu.dot_dimension_numbers<[1], [0], [0], [1], [0, 0, 1, 1], [], []>} : vector<8x64xbf16>, vector<64x128xbf16>, vector<8x128xf32> -> vector<8x128xf32>
    %114 = arith.addf %108, %113 : vector<8x128xf32>
    %115 = vector.broadcast %0 : vector<1x128xf32> to vector<8x128xf32>
    %116 = arith.addf %114, %115 : vector<8x128xf32>
    %cst_139 = arith.constant 0.000000e+00 : f32
    %117 = vector.broadcast %cst_139 : f32 to vector<8x128xf32>
    %118 = arith.maximumf %116, %117 : vector<8x128xf32>
    %119 = arith.maximumf %59, %118 : vector<8x128xf32>
    %c0_140 = arith.constant 0 : index
    %c0_141 = arith.constant 0 : index
    %120 = vector.load %arg7[%c0_140, %c0_141] : memref<8x128xf32, #tpu.memory_space<vmem>>, vector<8x128xf32>
    tpu.vector_store %arg7[%c0_140, %c0_141], %119 {strides = array<i32>} : memref<8x128xf32, #tpu.memory_space<vmem>>, vector<8x128xf32>,
    %c0_142 = arith.constant 0 : index
    %c0_143 = arith.constant 0 : index
    %121 = tpu.strided_load %arg7[%c0_142, %c0_143] {strides = array<i32: 2, 1>} : memref<8x128xf32, #tpu.memory_space<vmem>>, vector<4x128xf32>
    %c1_144 = arith.constant 1 : index
    %c0_145 = arith.constant 0 : index
    %122 = tpu.strided_load %arg7[%c1_144, %c0_145] {strides = array<i32: 2, 1>} : memref<8x128xf32, #tpu.memory_space<vmem>>, vector<4x128xf32>
    %123 = arith.maximumf %121, %122 : vector<4x128xf32>
    %124 = arith.truncf %123 : vector<4x128xf32> to vector<4x128xbf16>
    %c0_146 = arith.constant 0 : index
    %c0_147 = arith.constant 0 : index
    %c0_148 = arith.constant 0 : index
    %c0_149 = arith.constant 0 : index
    %125 = vector.load %arg6[%c0_146, %c0_147, %c0_148, %c0_149] : memref<1x1x4x128xbf16, #tpu.memory_space<vmem>>, vector<1x1x4x128xbf16>
    %126 = vector.shape_cast %125 : vector<1x1x4x128xbf16> to vector<4x128xbf16>
    %127 = vector.shape_cast %124 : vector<4x128xbf16> to vector<1x1x4x128xbf16>
    tpu.vector_store %arg6[%c0_146, %c0_147, %c0_148, %c0_149], %127 {strides = array<i32>} : memref<1x1x4x128xbf16, #tpu.memory_space<vmem>>, vector<1x1x4x128xbf16>,
    return
  }
  func.func @transform_0(%arg0: i32, %arg1: i32) -> (i32, i32, i32, i32) {
    %c0_i32 = arith.constant 0 : i32
    %c0_i32_0 = arith.constant 0 : i32
    %c0_i32_1 = arith.constant 0 : i32
    return %arg0, %arg1, %c0_i32, %c0_i32_0 : i32, i32, i32, i32
  }
  func.func @transform_1(%arg0: i32, %arg1: i32) -> (i32, i32, i32, i32) {
    %c1_i32 = arith.constant 1 : i32
    %0 = arith.addi %arg1, %c1_i32 : i32
    %c0_i32 = arith.constant 0 : i32
    %c0_i32_0 = arith.constant 0 : i32
    %c0_i32_1 = arith.constant 0 : i32
    return %arg0, %0, %c0_i32, %c0_i32_0 : i32, i32, i32, i32
  }
  func.func @transform_2(%arg0: i32, %arg1: i32) -> (i32, i32, i32) {
    %c0_i32 = arith.constant 0 : i32
    %c0_i32_0 = arith.constant 0 : i32
    %c0_i32_1 = arith.constant 0 : i32
    %c0_i32_2 = arith.constant 0 : i32
    return %c0_i32, %c0_i32_0, %c0_i32_1 : i32, i32, i32
  }
  func.func @transform_3(%arg0: i32, %arg1: i32) -> (i32, i32) {
    %c0_i32 = arith.constant 0 : i32
    %c0_i32_0 = arith.constant 0 : i32
    %c0_i32_1 = arith.constant 0 : i32
    return %c0_i32, %c0_i32_0 : i32, i32
  }
  func.func @transform_4(%arg0: i32, %arg1: i32) -> (i32, i32, i32, i32) {
    %c0_i32 = arith.constant 0 : i32
    %c0_i32_0 = arith.constant 0 : i32
    %c0_i32_1 = arith.constant 0 : i32
    return %arg0, %arg1, %c0_i32, %c0_i32_0 : i32, i32, i32, i32
  }
}

module attributes {stable_mosaic.version = 11 : i64} {
  func.func @conv3x3_pool_kernel(%arg0: i32, %arg1: i32, %arg2: memref<1x2x6x128xbf16, #tpu.memory_space<vmem>>, %arg3: memref<1x2x6x128xbf16, #tpu.memory_space<vmem>>, %arg4: memref<9x128x256xbf16, #tpu.memory_space<vmem>>, %arg5: memref<1x256xf32, #tpu.memory_space<vmem>>, %arg6: memref<1x1x4x256xbf16, #tpu.memory_space<vmem>>, %arg7: memref<4x256xf32, #tpu.memory_space<vmem>>) attributes {dimension_semantics = [#tpu.dimension_semantics<parallel>, #tpu.dimension_semantics<parallel>], iteration_bounds = array<i64: 2, 4>, scalar_prefetch = 0 : i64, scratch_operands = 1 : i64, tpu.core_type = #tpu.core_type<tc>, window_params = [{transform_indices = @transform_0, window_bounds = array<i64: 1, 2, 6, 128>}, {transform_indices = @transform_1, window_bounds = array<i64: 1, 2, 6, 128>}, {pipeline_mode = #tpu.pipeline_mode<synchronous>, transform_indices = @transform_2, window_bounds = array<i64: 9, 128, 256>}, {pipeline_mode = #tpu.pipeline_mode<synchronous>, transform_indices = @transform_3, window_bounds = array<i64: 1, 256>}, {transform_indices = @transform_4, window_bounds = array<i64: 1, 1, 4, 256>}]} {
    %c0 = arith.constant 0 : index
    %c0_0 = arith.constant 0 : index
    %0 = vector.load %arg5[%c0, %c0_0] : memref<1x256xf32, #tpu.memory_space<vmem>>, vector<1x256xf32>
    %cst = arith.constant 0.000000e+00 : f32
    %1 = vector.broadcast %cst : f32 to vector<4x256xf32>
    %c0_1 = arith.constant 0 : index
    %c0_2 = arith.constant 0 : index
    %c0_3 = arith.constant 0 : index
    %2 = vector.load %arg4[%c0_1, %c0_2, %c0_3] : memref<9x128x256xbf16, #tpu.memory_space<vmem>>, vector<1x128x256xbf16>
    %3 = vector.shape_cast %2 : vector<1x128x256xbf16> to vector<128x256xbf16>
    %c0_4 = arith.constant 0 : index
    %c0_5 = arith.constant 0 : index
    %c0_6 = arith.constant 0 : index
    %c0_7 = arith.constant 0 : index
    %4 = vector.load %arg2[%c0_4, %c0_5, %c0_6, %c0_7] : memref<1x2x6x128xbf16, #tpu.memory_space<vmem>>, vector<1x1x4x128xbf16>
    %5 = vector.shape_cast %4 : vector<1x1x4x128xbf16> to vector<4x128xbf16>
    %cst_8 = arith.constant dense<0.000000e+00> : vector<4x256xf32>
    %6 = tpu.matmul %5, %3, %cst_8 {dimension_numbers = #tpu.dot_dimension_numbers<[1], [0], [0], [1], [0, 0, 1, 1], [], []>} : vector<4x128xbf16>, vector<128x256xbf16>, vector<4x256xf32> -> vector<4x256xf32>
    %7 = arith.addf %1, %6 : vector<4x256xf32>
    %c1 = arith.constant 1 : index
    %c0_9 = arith.constant 0 : index
    %c0_10 = arith.constant 0 : index
    %8 = vector.load %arg4[%c1, %c0_9, %c0_10] : memref<9x128x256xbf16, #tpu.memory_space<vmem>>, vector<1x128x256xbf16>
    %9 = vector.shape_cast %8 : vector<1x128x256xbf16> to vector<128x256xbf16>
    %c0_11 = arith.constant 0 : index
    %c0_12 = arith.constant 0 : index
    %c1_13 = arith.constant 1 : index
    %c0_14 = arith.constant 0 : index
    %10 = vector.load %arg2[%c0_11, %c0_12, %c1_13, %c0_14] : memref<1x2x6x128xbf16, #tpu.memory_space<vmem>>, vector<1x1x4x128xbf16>
    %11 = vector.shape_cast %10 : vector<1x1x4x128xbf16> to vector<4x128xbf16>
    %cst_15 = arith.constant dense<0.000000e+00> : vector<4x256xf32>
    %12 = tpu.matmul %11, %9, %cst_15 {dimension_numbers = #tpu.dot_dimension_numbers<[1], [0], [0], [1], [0, 0, 1, 1], [], []>} : vector<4x128xbf16>, vector<128x256xbf16>, vector<4x256xf32> -> vector<4x256xf32>
    %13 = arith.addf %7, %12 : vector<4x256xf32>
    %c2 = arith.constant 2 : index
    %c0_16 = arith.constant 0 : index
    %c0_17 = arith.constant 0 : index
    %14 = vector.load %arg4[%c2, %c0_16, %c0_17] : memref<9x128x256xbf16, #tpu.memory_space<vmem>>, vector<1x128x256xbf16>
    %15 = vector.shape_cast %14 : vector<1x128x256xbf16> to vector<128x256xbf16>
    %c0_18 = arith.constant 0 : index
    %c0_19 = arith.constant 0 : index
    %c2_20 = arith.constant 2 : index
    %c0_21 = arith.constant 0 : index
    %16 = vector.load %arg2[%c0_18, %c0_19, %c2_20, %c0_21] : memref<1x2x6x128xbf16, #tpu.memory_space<vmem>>, vector<1x1x4x128xbf16>
    %17 = vector.shape_cast %16 : vector<1x1x4x128xbf16> to vector<4x128xbf16>
    %cst_22 = arith.constant dense<0.000000e+00> : vector<4x256xf32>
    %18 = tpu.matmul %17, %15, %cst_22 {dimension_numbers = #tpu.dot_dimension_numbers<[1], [0], [0], [1], [0, 0, 1, 1], [], []>} : vector<4x128xbf16>, vector<128x256xbf16>, vector<4x256xf32> -> vector<4x256xf32>
    %19 = arith.addf %13, %18 : vector<4x256xf32>
    %c3 = arith.constant 3 : index
    %c0_23 = arith.constant 0 : index
    %c0_24 = arith.constant 0 : index
    %20 = vector.load %arg4[%c3, %c0_23, %c0_24] : memref<9x128x256xbf16, #tpu.memory_space<vmem>>, vector<1x128x256xbf16>
    %21 = vector.shape_cast %20 : vector<1x128x256xbf16> to vector<128x256xbf16>
    %c0_25 = arith.constant 0 : index
    %c1_26 = arith.constant 1 : index
    %c0_27 = arith.constant 0 : index
    %c0_28 = arith.constant 0 : index
    %22 = vector.load %arg2[%c0_25, %c1_26, %c0_27, %c0_28] : memref<1x2x6x128xbf16, #tpu.memory_space<vmem>>, vector<1x1x4x128xbf16>
    %23 = vector.shape_cast %22 : vector<1x1x4x128xbf16> to vector<4x128xbf16>
    %cst_29 = arith.constant dense<0.000000e+00> : vector<4x256xf32>
    %24 = tpu.matmul %23, %21, %cst_29 {dimension_numbers = #tpu.dot_dimension_numbers<[1], [0], [0], [1], [0, 0, 1, 1], [], []>} : vector<4x128xbf16>, vector<128x256xbf16>, vector<4x256xf32> -> vector<4x256xf32>
    %25 = arith.addf %19, %24 : vector<4x256xf32>
    %c4 = arith.constant 4 : index
    %c0_30 = arith.constant 0 : index
    %c0_31 = arith.constant 0 : index
    %26 = vector.load %arg4[%c4, %c0_30, %c0_31] : memref<9x128x256xbf16, #tpu.memory_space<vmem>>, vector<1x128x256xbf16>
    %27 = vector.shape_cast %26 : vector<1x128x256xbf16> to vector<128x256xbf16>
    %c0_32 = arith.constant 0 : index
    %c1_33 = arith.constant 1 : index
    %c1_34 = arith.constant 1 : index
    %c0_35 = arith.constant 0 : index
    %28 = vector.load %arg2[%c0_32, %c1_33, %c1_34, %c0_35] : memref<1x2x6x128xbf16, #tpu.memory_space<vmem>>, vector<1x1x4x128xbf16>
    %29 = vector.shape_cast %28 : vector<1x1x4x128xbf16> to vector<4x128xbf16>
    %cst_36 = arith.constant dense<0.000000e+00> : vector<4x256xf32>
    %30 = tpu.matmul %29, %27, %cst_36 {dimension_numbers = #tpu.dot_dimension_numbers<[1], [0], [0], [1], [0, 0, 1, 1], [], []>} : vector<4x128xbf16>, vector<128x256xbf16>, vector<4x256xf32> -> vector<4x256xf32>
    %31 = arith.addf %25, %30 : vector<4x256xf32>
    %c5 = arith.constant 5 : index
    %c0_37 = arith.constant 0 : index
    %c0_38 = arith.constant 0 : index
    %32 = vector.load %arg4[%c5, %c0_37, %c0_38] : memref<9x128x256xbf16, #tpu.memory_space<vmem>>, vector<1x128x256xbf16>
    %33 = vector.shape_cast %32 : vector<1x128x256xbf16> to vector<128x256xbf16>
    %c0_39 = arith.constant 0 : index
    %c1_40 = arith.constant 1 : index
    %c2_41 = arith.constant 2 : index
    %c0_42 = arith.constant 0 : index
    %34 = vector.load %arg2[%c0_39, %c1_40, %c2_41, %c0_42] : memref<1x2x6x128xbf16, #tpu.memory_space<vmem>>, vector<1x1x4x128xbf16>
    %35 = vector.shape_cast %34 : vector<1x1x4x128xbf16> to vector<4x128xbf16>
    %cst_43 = arith.constant dense<0.000000e+00> : vector<4x256xf32>
    %36 = tpu.matmul %35, %33, %cst_43 {dimension_numbers = #tpu.dot_dimension_numbers<[1], [0], [0], [1], [0, 0, 1, 1], [], []>} : vector<4x128xbf16>, vector<128x256xbf16>, vector<4x256xf32> -> vector<4x256xf32>
    %37 = arith.addf %31, %36 : vector<4x256xf32>
    %c6 = arith.constant 6 : index
    %c0_44 = arith.constant 0 : index
    %c0_45 = arith.constant 0 : index
    %38 = vector.load %arg4[%c6, %c0_44, %c0_45] : memref<9x128x256xbf16, #tpu.memory_space<vmem>>, vector<1x128x256xbf16>
    %39 = vector.shape_cast %38 : vector<1x128x256xbf16> to vector<128x256xbf16>
    %c0_46 = arith.constant 0 : index
    %c0_47 = arith.constant 0 : index
    %c0_48 = arith.constant 0 : index
    %c0_49 = arith.constant 0 : index
    %40 = vector.load %arg3[%c0_46, %c0_47, %c0_48, %c0_49] : memref<1x2x6x128xbf16, #tpu.memory_space<vmem>>, vector<1x1x4x128xbf16>
    %41 = vector.shape_cast %40 : vector<1x1x4x128xbf16> to vector<4x128xbf16>
    %cst_50 = arith.constant dense<0.000000e+00> : vector<4x256xf32>
    %42 = tpu.matmul %41, %39, %cst_50 {dimension_numbers = #tpu.dot_dimension_numbers<[1], [0], [0], [1], [0, 0, 1, 1], [], []>} : vector<4x128xbf16>, vector<128x256xbf16>, vector<4x256xf32> -> vector<4x256xf32>
    %43 = arith.addf %37, %42 : vector<4x256xf32>
    %c7 = arith.constant 7 : index
    %c0_51 = arith.constant 0 : index
    %c0_52 = arith.constant 0 : index
    %44 = vector.load %arg4[%c7, %c0_51, %c0_52] : memref<9x128x256xbf16, #tpu.memory_space<vmem>>, vector<1x128x256xbf16>
    %45 = vector.shape_cast %44 : vector<1x128x256xbf16> to vector<128x256xbf16>
    %c0_53 = arith.constant 0 : index
    %c0_54 = arith.constant 0 : index
    %c1_55 = arith.constant 1 : index
    %c0_56 = arith.constant 0 : index
    %46 = vector.load %arg3[%c0_53, %c0_54, %c1_55, %c0_56] : memref<1x2x6x128xbf16, #tpu.memory_space<vmem>>, vector<1x1x4x128xbf16>
    %47 = vector.shape_cast %46 : vector<1x1x4x128xbf16> to vector<4x128xbf16>
    %cst_57 = arith.constant dense<0.000000e+00> : vector<4x256xf32>
    %48 = tpu.matmul %47, %45, %cst_57 {dimension_numbers = #tpu.dot_dimension_numbers<[1], [0], [0], [1], [0, 0, 1, 1], [], []>} : vector<4x128xbf16>, vector<128x256xbf16>, vector<4x256xf32> -> vector<4x256xf32>
    %49 = arith.addf %43, %48 : vector<4x256xf32>
    %c8 = arith.constant 8 : index
    %c0_58 = arith.constant 0 : index
    %c0_59 = arith.constant 0 : index
    %50 = vector.load %arg4[%c8, %c0_58, %c0_59] : memref<9x128x256xbf16, #tpu.memory_space<vmem>>, vector<1x128x256xbf16>
    %51 = vector.shape_cast %50 : vector<1x128x256xbf16> to vector<128x256xbf16>
    %c0_60 = arith.constant 0 : index
    %c0_61 = arith.constant 0 : index
    %c2_62 = arith.constant 2 : index
    %c0_63 = arith.constant 0 : index
    %52 = vector.load %arg3[%c0_60, %c0_61, %c2_62, %c0_63] : memref<1x2x6x128xbf16, #tpu.memory_space<vmem>>, vector<1x1x4x128xbf16>
    %53 = vector.shape_cast %52 : vector<1x1x4x128xbf16> to vector<4x128xbf16>
    %cst_64 = arith.constant dense<0.000000e+00> : vector<4x256xf32>
    %54 = tpu.matmul %53, %51, %cst_64 {dimension_numbers = #tpu.dot_dimension_numbers<[1], [0], [0], [1], [0, 0, 1, 1], [], []>} : vector<4x128xbf16>, vector<128x256xbf16>, vector<4x256xf32> -> vector<4x256xf32>
    %55 = arith.addf %49, %54 : vector<4x256xf32>
    %56 = vector.broadcast %0 : vector<1x256xf32> to vector<4x256xf32>
    %57 = arith.addf %55, %56 : vector<4x256xf32>
    %cst_65 = arith.constant 0.000000e+00 : f32
    %58 = vector.broadcast %cst_65 : f32 to vector<4x256xf32>
    %59 = arith.maximumf %57, %58 : vector<4x256xf32>
    %cst_66 = arith.constant 0.000000e+00 : f32
    %60 = vector.broadcast %cst_66 : f32 to vector<4x256xf32>
    %c0_67 = arith.constant 0 : index
    %c0_68 = arith.constant 0 : index
    %c0_69 = arith.constant 0 : index
    %61 = vector.load %arg4[%c0_67, %c0_68, %c0_69] : memref<9x128x256xbf16, #tpu.memory_space<vmem>>, vector<1x128x256xbf16>
    %62 = vector.shape_cast %61 : vector<1x128x256xbf16> to vector<128x256xbf16>
    %c0_70 = arith.constant 0 : index
    %c1_71 = arith.constant 1 : index
    %c0_72 = arith.constant 0 : index
    %c0_73 = arith.constant 0 : index
    %63 = vector.load %arg2[%c0_70, %c1_71, %c0_72, %c0_73] : memref<1x2x6x128xbf16, #tpu.memory_space<vmem>>, vector<1x1x4x128xbf16>
    %64 = vector.shape_cast %63 : vector<1x1x4x128xbf16> to vector<4x128xbf16>
    %cst_74 = arith.constant dense<0.000000e+00> : vector<4x256xf32>
    %65 = tpu.matmul %64, %62, %cst_74 {dimension_numbers = #tpu.dot_dimension_numbers<[1], [0], [0], [1], [0, 0, 1, 1], [], []>} : vector<4x128xbf16>, vector<128x256xbf16>, vector<4x256xf32> -> vector<4x256xf32>
    %66 = arith.addf %60, %65 : vector<4x256xf32>
    %c1_75 = arith.constant 1 : index
    %c0_76 = arith.constant 0 : index
    %c0_77 = arith.constant 0 : index
    %67 = vector.load %arg4[%c1_75, %c0_76, %c0_77] : memref<9x128x256xbf16, #tpu.memory_space<vmem>>, vector<1x128x256xbf16>
    %68 = vector.shape_cast %67 : vector<1x128x256xbf16> to vector<128x256xbf16>
    %c0_78 = arith.constant 0 : index
    %c1_79 = arith.constant 1 : index
    %c1_80 = arith.constant 1 : index
    %c0_81 = arith.constant 0 : index
    %69 = vector.load %arg2[%c0_78, %c1_79, %c1_80, %c0_81] : memref<1x2x6x128xbf16, #tpu.memory_space<vmem>>, vector<1x1x4x128xbf16>
    %70 = vector.shape_cast %69 : vector<1x1x4x128xbf16> to vector<4x128xbf16>
    %cst_82 = arith.constant dense<0.000000e+00> : vector<4x256xf32>
    %71 = tpu.matmul %70, %68, %cst_82 {dimension_numbers = #tpu.dot_dimension_numbers<[1], [0], [0], [1], [0, 0, 1, 1], [], []>} : vector<4x128xbf16>, vector<128x256xbf16>, vector<4x256xf32> -> vector<4x256xf32>
    %72 = arith.addf %66, %71 : vector<4x256xf32>
    %c2_83 = arith.constant 2 : index
    %c0_84 = arith.constant 0 : index
    %c0_85 = arith.constant 0 : index
    %73 = vector.load %arg4[%c2_83, %c0_84, %c0_85] : memref<9x128x256xbf16, #tpu.memory_space<vmem>>, vector<1x128x256xbf16>
    %74 = vector.shape_cast %73 : vector<1x128x256xbf16> to vector<128x256xbf16>
    %c0_86 = arith.constant 0 : index
    %c1_87 = arith.constant 1 : index
    %c2_88 = arith.constant 2 : index
    %c0_89 = arith.constant 0 : index
    %75 = vector.load %arg2[%c0_86, %c1_87, %c2_88, %c0_89] : memref<1x2x6x128xbf16, #tpu.memory_space<vmem>>, vector<1x1x4x128xbf16>
    %76 = vector.shape_cast %75 : vector<1x1x4x128xbf16> to vector<4x128xbf16>
    %cst_90 = arith.constant dense<0.000000e+00> : vector<4x256xf32>
    %77 = tpu.matmul %76, %74, %cst_90 {dimension_numbers = #tpu.dot_dimension_numbers<[1], [0], [0], [1], [0, 0, 1, 1], [], []>} : vector<4x128xbf16>, vector<128x256xbf16>, vector<4x256xf32> -> vector<4x256xf32>
    %78 = arith.addf %72, %77 : vector<4x256xf32>
    %c3_91 = arith.constant 3 : index
    %c0_92 = arith.constant 0 : index
    %c0_93 = arith.constant 0 : index
    %79 = vector.load %arg4[%c3_91, %c0_92, %c0_93] : memref<9x128x256xbf16, #tpu.memory_space<vmem>>, vector<1x128x256xbf16>
    %80 = vector.shape_cast %79 : vector<1x128x256xbf16> to vector<128x256xbf16>
    %c0_94 = arith.constant 0 : index
    %c0_95 = arith.constant 0 : index
    %c0_96 = arith.constant 0 : index
    %c0_97 = arith.constant 0 : index
    %81 = vector.load %arg3[%c0_94, %c0_95, %c0_96, %c0_97] : memref<1x2x6x128xbf16, #tpu.memory_space<vmem>>, vector<1x1x4x128xbf16>
    %82 = vector.shape_cast %81 : vector<1x1x4x128xbf16> to vector<4x128xbf16>
    %cst_98 = arith.constant dense<0.000000e+00> : vector<4x256xf32>
    %83 = tpu.matmul %82, %80, %cst_98 {dimension_numbers = #tpu.dot_dimension_numbers<[1], [0], [0], [1], [0, 0, 1, 1], [], []>} : vector<4x128xbf16>, vector<128x256xbf16>, vector<4x256xf32> -> vector<4x256xf32>
    %84 = arith.addf %78, %83 : vector<4x256xf32>
    %c4_99 = arith.constant 4 : index
    %c0_100 = arith.constant 0 : index
    %c0_101 = arith.constant 0 : index
    %85 = vector.load %arg4[%c4_99, %c0_100, %c0_101] : memref<9x128x256xbf16, #tpu.memory_space<vmem>>, vector<1x128x256xbf16>
    %86 = vector.shape_cast %85 : vector<1x128x256xbf16> to vector<128x256xbf16>
    %c0_102 = arith.constant 0 : index
    %c0_103 = arith.constant 0 : index
    %c1_104 = arith.constant 1 : index
    %c0_105 = arith.constant 0 : index
    %87 = vector.load %arg3[%c0_102, %c0_103, %c1_104, %c0_105] : memref<1x2x6x128xbf16, #tpu.memory_space<vmem>>, vector<1x1x4x128xbf16>
    %88 = vector.shape_cast %87 : vector<1x1x4x128xbf16> to vector<4x128xbf16>
    %cst_106 = arith.constant dense<0.000000e+00> : vector<4x256xf32>
    %89 = tpu.matmul %88, %86, %cst_106 {dimension_numbers = #tpu.dot_dimension_numbers<[1], [0], [0], [1], [0, 0, 1, 1], [], []>} : vector<4x128xbf16>, vector<128x256xbf16>, vector<4x256xf32> -> vector<4x256xf32>
    %90 = arith.addf %84, %89 : vector<4x256xf32>
    %c5_107 = arith.constant 5 : index
    %c0_108 = arith.constant 0 : index
    %c0_109 = arith.constant 0 : index
    %91 = vector.load %arg4[%c5_107, %c0_108, %c0_109] : memref<9x128x256xbf16, #tpu.memory_space<vmem>>, vector<1x128x256xbf16>
    %92 = vector.shape_cast %91 : vector<1x128x256xbf16> to vector<128x256xbf16>
    %c0_110 = arith.constant 0 : index
    %c0_111 = arith.constant 0 : index
    %c2_112 = arith.constant 2 : index
    %c0_113 = arith.constant 0 : index
    %93 = vector.load %arg3[%c0_110, %c0_111, %c2_112, %c0_113] : memref<1x2x6x128xbf16, #tpu.memory_space<vmem>>, vector<1x1x4x128xbf16>
    %94 = vector.shape_cast %93 : vector<1x1x4x128xbf16> to vector<4x128xbf16>
    %cst_114 = arith.constant dense<0.000000e+00> : vector<4x256xf32>
    %95 = tpu.matmul %94, %92, %cst_114 {dimension_numbers = #tpu.dot_dimension_numbers<[1], [0], [0], [1], [0, 0, 1, 1], [], []>} : vector<4x128xbf16>, vector<128x256xbf16>, vector<4x256xf32> -> vector<4x256xf32>
    %96 = arith.addf %90, %95 : vector<4x256xf32>
    %c6_115 = arith.constant 6 : index
    %c0_116 = arith.constant 0 : index
    %c0_117 = arith.constant 0 : index
    %97 = vector.load %arg4[%c6_115, %c0_116, %c0_117] : memref<9x128x256xbf16, #tpu.memory_space<vmem>>, vector<1x128x256xbf16>
    %98 = vector.shape_cast %97 : vector<1x128x256xbf16> to vector<128x256xbf16>
    %c0_118 = arith.constant 0 : index
    %c1_119 = arith.constant 1 : index
    %c0_120 = arith.constant 0 : index
    %c0_121 = arith.constant 0 : index
    %99 = vector.load %arg3[%c0_118, %c1_119, %c0_120, %c0_121] : memref<1x2x6x128xbf16, #tpu.memory_space<vmem>>, vector<1x1x4x128xbf16>
    %100 = vector.shape_cast %99 : vector<1x1x4x128xbf16> to vector<4x128xbf16>
    %cst_122 = arith.constant dense<0.000000e+00> : vector<4x256xf32>
    %101 = tpu.matmul %100, %98, %cst_122 {dimension_numbers = #tpu.dot_dimension_numbers<[1], [0], [0], [1], [0, 0, 1, 1], [], []>} : vector<4x128xbf16>, vector<128x256xbf16>, vector<4x256xf32> -> vector<4x256xf32>
    %102 = arith.addf %96, %101 : vector<4x256xf32>
    %c7_123 = arith.constant 7 : index
    %c0_124 = arith.constant 0 : index
    %c0_125 = arith.constant 0 : index
    %103 = vector.load %arg4[%c7_123, %c0_124, %c0_125] : memref<9x128x256xbf16, #tpu.memory_space<vmem>>, vector<1x128x256xbf16>
    %104 = vector.shape_cast %103 : vector<1x128x256xbf16> to vector<128x256xbf16>
    %c0_126 = arith.constant 0 : index
    %c1_127 = arith.constant 1 : index
    %c1_128 = arith.constant 1 : index
    %c0_129 = arith.constant 0 : index
    %105 = vector.load %arg3[%c0_126, %c1_127, %c1_128, %c0_129] : memref<1x2x6x128xbf16, #tpu.memory_space<vmem>>, vector<1x1x4x128xbf16>
    %106 = vector.shape_cast %105 : vector<1x1x4x128xbf16> to vector<4x128xbf16>
    %cst_130 = arith.constant dense<0.000000e+00> : vector<4x256xf32>
    %107 = tpu.matmul %106, %104, %cst_130 {dimension_numbers = #tpu.dot_dimension_numbers<[1], [0], [0], [1], [0, 0, 1, 1], [], []>} : vector<4x128xbf16>, vector<128x256xbf16>, vector<4x256xf32> -> vector<4x256xf32>
    %108 = arith.addf %102, %107 : vector<4x256xf32>
    %c8_131 = arith.constant 8 : index
    %c0_132 = arith.constant 0 : index
    %c0_133 = arith.constant 0 : index
    %109 = vector.load %arg4[%c8_131, %c0_132, %c0_133] : memref<9x128x256xbf16, #tpu.memory_space<vmem>>, vector<1x128x256xbf16>
    %110 = vector.shape_cast %109 : vector<1x128x256xbf16> to vector<128x256xbf16>
    %c0_134 = arith.constant 0 : index
    %c1_135 = arith.constant 1 : index
    %c2_136 = arith.constant 2 : index
    %c0_137 = arith.constant 0 : index
    %111 = vector.load %arg3[%c0_134, %c1_135, %c2_136, %c0_137] : memref<1x2x6x128xbf16, #tpu.memory_space<vmem>>, vector<1x1x4x128xbf16>
    %112 = vector.shape_cast %111 : vector<1x1x4x128xbf16> to vector<4x128xbf16>
    %cst_138 = arith.constant dense<0.000000e+00> : vector<4x256xf32>
    %113 = tpu.matmul %112, %110, %cst_138 {dimension_numbers = #tpu.dot_dimension_numbers<[1], [0], [0], [1], [0, 0, 1, 1], [], []>} : vector<4x128xbf16>, vector<128x256xbf16>, vector<4x256xf32> -> vector<4x256xf32>
    %114 = arith.addf %108, %113 : vector<4x256xf32>
    %115 = vector.broadcast %0 : vector<1x256xf32> to vector<4x256xf32>
    %116 = arith.addf %114, %115 : vector<4x256xf32>
    %cst_139 = arith.constant 0.000000e+00 : f32
    %117 = vector.broadcast %cst_139 : f32 to vector<4x256xf32>
    %118 = arith.maximumf %116, %117 : vector<4x256xf32>
    %119 = arith.maximumf %59, %118 : vector<4x256xf32>
    %120 = arith.truncf %119 : vector<4x256xf32> to vector<4x256xbf16>
    %c0_140 = arith.constant 0 : index
    %c0_141 = arith.constant 0 : index
    %c0_142 = arith.constant 0 : index
    %c0_143 = arith.constant 0 : index
    %121 = vector.load %arg6[%c0_140, %c0_141, %c0_142, %c0_143] : memref<1x1x4x256xbf16, #tpu.memory_space<vmem>>, vector<1x1x4x256xbf16>
    %122 = vector.shape_cast %121 : vector<1x1x4x256xbf16> to vector<4x256xbf16>
    %123 = vector.shape_cast %120 : vector<4x256xbf16> to vector<1x1x4x256xbf16>
    tpu.vector_store %arg6[%c0_140, %c0_141, %c0_142, %c0_143], %123 {strides = array<i32>} : memref<1x1x4x256xbf16, #tpu.memory_space<vmem>>, vector<1x1x4x256xbf16>,
    return
  }
  func.func @transform_0(%arg0: i32, %arg1: i32) -> (i32, i32, i32, i32) {
    %c0_i32 = arith.constant 0 : i32
    %c0_i32_0 = arith.constant 0 : i32
    %c0_i32_1 = arith.constant 0 : i32
    return %arg0, %arg1, %c0_i32, %c0_i32_0 : i32, i32, i32, i32
  }
  func.func @transform_1(%arg0: i32, %arg1: i32) -> (i32, i32, i32, i32) {
    %c1_i32 = arith.constant 1 : i32
    %0 = arith.addi %arg1, %c1_i32 : i32
    %c0_i32 = arith.constant 0 : i32
    %c0_i32_0 = arith.constant 0 : i32
    %c0_i32_1 = arith.constant 0 : i32
    return %arg0, %0, %c0_i32, %c0_i32_0 : i32, i32, i32, i32
  }
  func.func @transform_2(%arg0: i32, %arg1: i32) -> (i32, i32, i32) {
    %c0_i32 = arith.constant 0 : i32
    %c0_i32_0 = arith.constant 0 : i32
    %c0_i32_1 = arith.constant 0 : i32
    %c0_i32_2 = arith.constant 0 : i32
    return %c0_i32, %c0_i32_0, %c0_i32_1 : i32, i32, i32
  }
  func.func @transform_3(%arg0: i32, %arg1: i32) -> (i32, i32) {
    %c0_i32 = arith.constant 0 : i32
    %c0_i32_0 = arith.constant 0 : i32
    %c0_i32_1 = arith.constant 0 : i32
    return %c0_i32, %c0_i32_0 : i32, i32
  }
  func.func @transform_4(%arg0: i32, %arg1: i32) -> (i32, i32, i32, i32) {
    %c0_i32 = arith.constant 0 : i32
    %c0_i32_0 = arith.constant 0 : i32
    %c0_i32_1 = arith.constant 0 : i32
    return %arg0, %arg1, %c0_i32, %c0_i32_0 : i32, i32, i32, i32
  }
}

module attributes {stable_mosaic.version = 11 : i64} {
  func.func @conv3x3_pool_kernel(%arg0: i32, %arg1: i32, %arg2: memref<1x2x6x256xbf16, #tpu.memory_space<vmem>>, %arg3: memref<1x2x6x256xbf16, #tpu.memory_space<vmem>>, %arg4: memref<9x256x256xbf16, #tpu.memory_space<vmem>>, %arg5: memref<1x256xf32, #tpu.memory_space<vmem>>, %arg6: memref<1x1x4x256xbf16, #tpu.memory_space<vmem>>, %arg7: memref<4x256xf32, #tpu.memory_space<vmem>>) attributes {dimension_semantics = [#tpu.dimension_semantics<parallel>, #tpu.dimension_semantics<parallel>], iteration_bounds = array<i64: 2, 2>, scalar_prefetch = 0 : i64, scratch_operands = 1 : i64, tpu.core_type = #tpu.core_type<tc>, window_params = [{transform_indices = @transform_0, window_bounds = array<i64: 1, 2, 6, 256>}, {transform_indices = @transform_1, window_bounds = array<i64: 1, 2, 6, 256>}, {pipeline_mode = #tpu.pipeline_mode<synchronous>, transform_indices = @transform_2, window_bounds = array<i64: 9, 256, 256>}, {pipeline_mode = #tpu.pipeline_mode<synchronous>, transform_indices = @transform_3, window_bounds = array<i64: 1, 256>}, {transform_indices = @transform_4, window_bounds = array<i64: 1, 1, 4, 256>}]} {
    %c0 = arith.constant 0 : index
    %c0_0 = arith.constant 0 : index
    %0 = vector.load %arg5[%c0, %c0_0] : memref<1x256xf32, #tpu.memory_space<vmem>>, vector<1x256xf32>
    %cst = arith.constant 0.000000e+00 : f32
    %1 = vector.broadcast %cst : f32 to vector<4x256xf32>
    %c0_1 = arith.constant 0 : index
    %c0_2 = arith.constant 0 : index
    %c0_3 = arith.constant 0 : index
    %2 = vector.load %arg4[%c0_1, %c0_2, %c0_3] : memref<9x256x256xbf16, #tpu.memory_space<vmem>>, vector<1x256x256xbf16>
    %3 = vector.shape_cast %2 : vector<1x256x256xbf16> to vector<256x256xbf16>
    %c0_4 = arith.constant 0 : index
    %c0_5 = arith.constant 0 : index
    %c0_6 = arith.constant 0 : index
    %c0_7 = arith.constant 0 : index
    %4 = vector.load %arg2[%c0_4, %c0_5, %c0_6, %c0_7] : memref<1x2x6x256xbf16, #tpu.memory_space<vmem>>, vector<1x1x4x256xbf16>
    %5 = vector.shape_cast %4 : vector<1x1x4x256xbf16> to vector<4x256xbf16>
    %cst_8 = arith.constant dense<0.000000e+00> : vector<4x256xf32>
    %6 = tpu.matmul %5, %3, %cst_8 {dimension_numbers = #tpu.dot_dimension_numbers<[1], [0], [0], [1], [0, 0, 1, 1], [], []>} : vector<4x256xbf16>, vector<256x256xbf16>, vector<4x256xf32> -> vector<4x256xf32>
    %7 = arith.addf %1, %6 : vector<4x256xf32>
    %c1 = arith.constant 1 : index
    %c0_9 = arith.constant 0 : index
    %c0_10 = arith.constant 0 : index
    %8 = vector.load %arg4[%c1, %c0_9, %c0_10] : memref<9x256x256xbf16, #tpu.memory_space<vmem>>, vector<1x256x256xbf16>
    %9 = vector.shape_cast %8 : vector<1x256x256xbf16> to vector<256x256xbf16>
    %c0_11 = arith.constant 0 : index
    %c0_12 = arith.constant 0 : index
    %c1_13 = arith.constant 1 : index
    %c0_14 = arith.constant 0 : index
    %10 = vector.load %arg2[%c0_11, %c0_12, %c1_13, %c0_14] : memref<1x2x6x256xbf16, #tpu.memory_space<vmem>>, vector<1x1x4x256xbf16>
    %11 = vector.shape_cast %10 : vector<1x1x4x256xbf16> to vector<4x256xbf16>
    %cst_15 = arith.constant dense<0.000000e+00> : vector<4x256xf32>
    %12 = tpu.matmul %11, %9, %cst_15 {dimension_numbers = #tpu.dot_dimension_numbers<[1], [0], [0], [1], [0, 0, 1, 1], [], []>} : vector<4x256xbf16>, vector<256x256xbf16>, vector<4x256xf32> -> vector<4x256xf32>
    %13 = arith.addf %7, %12 : vector<4x256xf32>
    %c2 = arith.constant 2 : index
    %c0_16 = arith.constant 0 : index
    %c0_17 = arith.constant 0 : index
    %14 = vector.load %arg4[%c2, %c0_16, %c0_17] : memref<9x256x256xbf16, #tpu.memory_space<vmem>>, vector<1x256x256xbf16>
    %15 = vector.shape_cast %14 : vector<1x256x256xbf16> to vector<256x256xbf16>
    %c0_18 = arith.constant 0 : index
    %c0_19 = arith.constant 0 : index
    %c2_20 = arith.constant 2 : index
    %c0_21 = arith.constant 0 : index
    %16 = vector.load %arg2[%c0_18, %c0_19, %c2_20, %c0_21] : memref<1x2x6x256xbf16, #tpu.memory_space<vmem>>, vector<1x1x4x256xbf16>
    %17 = vector.shape_cast %16 : vector<1x1x4x256xbf16> to vector<4x256xbf16>
    %cst_22 = arith.constant dense<0.000000e+00> : vector<4x256xf32>
    %18 = tpu.matmul %17, %15, %cst_22 {dimension_numbers = #tpu.dot_dimension_numbers<[1], [0], [0], [1], [0, 0, 1, 1], [], []>} : vector<4x256xbf16>, vector<256x256xbf16>, vector<4x256xf32> -> vector<4x256xf32>
    %19 = arith.addf %13, %18 : vector<4x256xf32>
    %c3 = arith.constant 3 : index
    %c0_23 = arith.constant 0 : index
    %c0_24 = arith.constant 0 : index
    %20 = vector.load %arg4[%c3, %c0_23, %c0_24] : memref<9x256x256xbf16, #tpu.memory_space<vmem>>, vector<1x256x256xbf16>
    %21 = vector.shape_cast %20 : vector<1x256x256xbf16> to vector<256x256xbf16>
    %c0_25 = arith.constant 0 : index
    %c1_26 = arith.constant 1 : index
    %c0_27 = arith.constant 0 : index
    %c0_28 = arith.constant 0 : index
    %22 = vector.load %arg2[%c0_25, %c1_26, %c0_27, %c0_28] : memref<1x2x6x256xbf16, #tpu.memory_space<vmem>>, vector<1x1x4x256xbf16>
    %23 = vector.shape_cast %22 : vector<1x1x4x256xbf16> to vector<4x256xbf16>
    %cst_29 = arith.constant dense<0.000000e+00> : vector<4x256xf32>
    %24 = tpu.matmul %23, %21, %cst_29 {dimension_numbers = #tpu.dot_dimension_numbers<[1], [0], [0], [1], [0, 0, 1, 1], [], []>} : vector<4x256xbf16>, vector<256x256xbf16>, vector<4x256xf32> -> vector<4x256xf32>
    %25 = arith.addf %19, %24 : vector<4x256xf32>
    %c4 = arith.constant 4 : index
    %c0_30 = arith.constant 0 : index
    %c0_31 = arith.constant 0 : index
    %26 = vector.load %arg4[%c4, %c0_30, %c0_31] : memref<9x256x256xbf16, #tpu.memory_space<vmem>>, vector<1x256x256xbf16>
    %27 = vector.shape_cast %26 : vector<1x256x256xbf16> to vector<256x256xbf16>
    %c0_32 = arith.constant 0 : index
    %c1_33 = arith.constant 1 : index
    %c1_34 = arith.constant 1 : index
    %c0_35 = arith.constant 0 : index
    %28 = vector.load %arg2[%c0_32, %c1_33, %c1_34, %c0_35] : memref<1x2x6x256xbf16, #tpu.memory_space<vmem>>, vector<1x1x4x256xbf16>
    %29 = vector.shape_cast %28 : vector<1x1x4x256xbf16> to vector<4x256xbf16>
    %cst_36 = arith.constant dense<0.000000e+00> : vector<4x256xf32>
    %30 = tpu.matmul %29, %27, %cst_36 {dimension_numbers = #tpu.dot_dimension_numbers<[1], [0], [0], [1], [0, 0, 1, 1], [], []>} : vector<4x256xbf16>, vector<256x256xbf16>, vector<4x256xf32> -> vector<4x256xf32>
    %31 = arith.addf %25, %30 : vector<4x256xf32>
    %c5 = arith.constant 5 : index
    %c0_37 = arith.constant 0 : index
    %c0_38 = arith.constant 0 : index
    %32 = vector.load %arg4[%c5, %c0_37, %c0_38] : memref<9x256x256xbf16, #tpu.memory_space<vmem>>, vector<1x256x256xbf16>
    %33 = vector.shape_cast %32 : vector<1x256x256xbf16> to vector<256x256xbf16>
    %c0_39 = arith.constant 0 : index
    %c1_40 = arith.constant 1 : index
    %c2_41 = arith.constant 2 : index
    %c0_42 = arith.constant 0 : index
    %34 = vector.load %arg2[%c0_39, %c1_40, %c2_41, %c0_42] : memref<1x2x6x256xbf16, #tpu.memory_space<vmem>>, vector<1x1x4x256xbf16>
    %35 = vector.shape_cast %34 : vector<1x1x4x256xbf16> to vector<4x256xbf16>
    %cst_43 = arith.constant dense<0.000000e+00> : vector<4x256xf32>
    %36 = tpu.matmul %35, %33, %cst_43 {dimension_numbers = #tpu.dot_dimension_numbers<[1], [0], [0], [1], [0, 0, 1, 1], [], []>} : vector<4x256xbf16>, vector<256x256xbf16>, vector<4x256xf32> -> vector<4x256xf32>
    %37 = arith.addf %31, %36 : vector<4x256xf32>
    %c6 = arith.constant 6 : index
    %c0_44 = arith.constant 0 : index
    %c0_45 = arith.constant 0 : index
    %38 = vector.load %arg4[%c6, %c0_44, %c0_45] : memref<9x256x256xbf16, #tpu.memory_space<vmem>>, vector<1x256x256xbf16>
    %39 = vector.shape_cast %38 : vector<1x256x256xbf16> to vector<256x256xbf16>
    %c0_46 = arith.constant 0 : index
    %c0_47 = arith.constant 0 : index
    %c0_48 = arith.constant 0 : index
    %c0_49 = arith.constant 0 : index
    %40 = vector.load %arg3[%c0_46, %c0_47, %c0_48, %c0_49] : memref<1x2x6x256xbf16, #tpu.memory_space<vmem>>, vector<1x1x4x256xbf16>
    %41 = vector.shape_cast %40 : vector<1x1x4x256xbf16> to vector<4x256xbf16>
    %cst_50 = arith.constant dense<0.000000e+00> : vector<4x256xf32>
    %42 = tpu.matmul %41, %39, %cst_50 {dimension_numbers = #tpu.dot_dimension_numbers<[1], [0], [0], [1], [0, 0, 1, 1], [], []>} : vector<4x256xbf16>, vector<256x256xbf16>, vector<4x256xf32> -> vector<4x256xf32>
    %43 = arith.addf %37, %42 : vector<4x256xf32>
    %c7 = arith.constant 7 : index
    %c0_51 = arith.constant 0 : index
    %c0_52 = arith.constant 0 : index
    %44 = vector.load %arg4[%c7, %c0_51, %c0_52] : memref<9x256x256xbf16, #tpu.memory_space<vmem>>, vector<1x256x256xbf16>
    %45 = vector.shape_cast %44 : vector<1x256x256xbf16> to vector<256x256xbf16>
    %c0_53 = arith.constant 0 : index
    %c0_54 = arith.constant 0 : index
    %c1_55 = arith.constant 1 : index
    %c0_56 = arith.constant 0 : index
    %46 = vector.load %arg3[%c0_53, %c0_54, %c1_55, %c0_56] : memref<1x2x6x256xbf16, #tpu.memory_space<vmem>>, vector<1x1x4x256xbf16>
    %47 = vector.shape_cast %46 : vector<1x1x4x256xbf16> to vector<4x256xbf16>
    %cst_57 = arith.constant dense<0.000000e+00> : vector<4x256xf32>
    %48 = tpu.matmul %47, %45, %cst_57 {dimension_numbers = #tpu.dot_dimension_numbers<[1], [0], [0], [1], [0, 0, 1, 1], [], []>} : vector<4x256xbf16>, vector<256x256xbf16>, vector<4x256xf32> -> vector<4x256xf32>
    %49 = arith.addf %43, %48 : vector<4x256xf32>
    %c8 = arith.constant 8 : index
    %c0_58 = arith.constant 0 : index
    %c0_59 = arith.constant 0 : index
    %50 = vector.load %arg4[%c8, %c0_58, %c0_59] : memref<9x256x256xbf16, #tpu.memory_space<vmem>>, vector<1x256x256xbf16>
    %51 = vector.shape_cast %50 : vector<1x256x256xbf16> to vector<256x256xbf16>
    %c0_60 = arith.constant 0 : index
    %c0_61 = arith.constant 0 : index
    %c2_62 = arith.constant 2 : index
    %c0_63 = arith.constant 0 : index
    %52 = vector.load %arg3[%c0_60, %c0_61, %c2_62, %c0_63] : memref<1x2x6x256xbf16, #tpu.memory_space<vmem>>, vector<1x1x4x256xbf16>
    %53 = vector.shape_cast %52 : vector<1x1x4x256xbf16> to vector<4x256xbf16>
    %cst_64 = arith.constant dense<0.000000e+00> : vector<4x256xf32>
    %54 = tpu.matmul %53, %51, %cst_64 {dimension_numbers = #tpu.dot_dimension_numbers<[1], [0], [0], [1], [0, 0, 1, 1], [], []>} : vector<4x256xbf16>, vector<256x256xbf16>, vector<4x256xf32> -> vector<4x256xf32>
    %55 = arith.addf %49, %54 : vector<4x256xf32>
    %56 = vector.broadcast %0 : vector<1x256xf32> to vector<4x256xf32>
    %57 = arith.addf %55, %56 : vector<4x256xf32>
    %cst_65 = arith.constant 0.000000e+00 : f32
    %58 = vector.broadcast %cst_65 : f32 to vector<4x256xf32>
    %59 = arith.maximumf %57, %58 : vector<4x256xf32>
    %cst_66 = arith.constant 0.000000e+00 : f32
    %60 = vector.broadcast %cst_66 : f32 to vector<4x256xf32>
    %c0_67 = arith.constant 0 : index
    %c0_68 = arith.constant 0 : index
    %c0_69 = arith.constant 0 : index
    %61 = vector.load %arg4[%c0_67, %c0_68, %c0_69] : memref<9x256x256xbf16, #tpu.memory_space<vmem>>, vector<1x256x256xbf16>
    %62 = vector.shape_cast %61 : vector<1x256x256xbf16> to vector<256x256xbf16>
    %c0_70 = arith.constant 0 : index
    %c1_71 = arith.constant 1 : index
    %c0_72 = arith.constant 0 : index
    %c0_73 = arith.constant 0 : index
    %63 = vector.load %arg2[%c0_70, %c1_71, %c0_72, %c0_73] : memref<1x2x6x256xbf16, #tpu.memory_space<vmem>>, vector<1x1x4x256xbf16>
    %64 = vector.shape_cast %63 : vector<1x1x4x256xbf16> to vector<4x256xbf16>
    %cst_74 = arith.constant dense<0.000000e+00> : vector<4x256xf32>
    %65 = tpu.matmul %64, %62, %cst_74 {dimension_numbers = #tpu.dot_dimension_numbers<[1], [0], [0], [1], [0, 0, 1, 1], [], []>} : vector<4x256xbf16>, vector<256x256xbf16>, vector<4x256xf32> -> vector<4x256xf32>
    %66 = arith.addf %60, %65 : vector<4x256xf32>
    %c1_75 = arith.constant 1 : index
    %c0_76 = arith.constant 0 : index
    %c0_77 = arith.constant 0 : index
    %67 = vector.load %arg4[%c1_75, %c0_76, %c0_77] : memref<9x256x256xbf16, #tpu.memory_space<vmem>>, vector<1x256x256xbf16>
    %68 = vector.shape_cast %67 : vector<1x256x256xbf16> to vector<256x256xbf16>
    %c0_78 = arith.constant 0 : index
    %c1_79 = arith.constant 1 : index
    %c1_80 = arith.constant 1 : index
    %c0_81 = arith.constant 0 : index
    %69 = vector.load %arg2[%c0_78, %c1_79, %c1_80, %c0_81] : memref<1x2x6x256xbf16, #tpu.memory_space<vmem>>, vector<1x1x4x256xbf16>
    %70 = vector.shape_cast %69 : vector<1x1x4x256xbf16> to vector<4x256xbf16>
    %cst_82 = arith.constant dense<0.000000e+00> : vector<4x256xf32>
    %71 = tpu.matmul %70, %68, %cst_82 {dimension_numbers = #tpu.dot_dimension_numbers<[1], [0], [0], [1], [0, 0, 1, 1], [], []>} : vector<4x256xbf16>, vector<256x256xbf16>, vector<4x256xf32> -> vector<4x256xf32>
    %72 = arith.addf %66, %71 : vector<4x256xf32>
    %c2_83 = arith.constant 2 : index
    %c0_84 = arith.constant 0 : index
    %c0_85 = arith.constant 0 : index
    %73 = vector.load %arg4[%c2_83, %c0_84, %c0_85] : memref<9x256x256xbf16, #tpu.memory_space<vmem>>, vector<1x256x256xbf16>
    %74 = vector.shape_cast %73 : vector<1x256x256xbf16> to vector<256x256xbf16>
    %c0_86 = arith.constant 0 : index
    %c1_87 = arith.constant 1 : index
    %c2_88 = arith.constant 2 : index
    %c0_89 = arith.constant 0 : index
    %75 = vector.load %arg2[%c0_86, %c1_87, %c2_88, %c0_89] : memref<1x2x6x256xbf16, #tpu.memory_space<vmem>>, vector<1x1x4x256xbf16>
    %76 = vector.shape_cast %75 : vector<1x1x4x256xbf16> to vector<4x256xbf16>
    %cst_90 = arith.constant dense<0.000000e+00> : vector<4x256xf32>
    %77 = tpu.matmul %76, %74, %cst_90 {dimension_numbers = #tpu.dot_dimension_numbers<[1], [0], [0], [1], [0, 0, 1, 1], [], []>} : vector<4x256xbf16>, vector<256x256xbf16>, vector<4x256xf32> -> vector<4x256xf32>
    %78 = arith.addf %72, %77 : vector<4x256xf32>
    %c3_91 = arith.constant 3 : index
    %c0_92 = arith.constant 0 : index
    %c0_93 = arith.constant 0 : index
    %79 = vector.load %arg4[%c3_91, %c0_92, %c0_93] : memref<9x256x256xbf16, #tpu.memory_space<vmem>>, vector<1x256x256xbf16>
    %80 = vector.shape_cast %79 : vector<1x256x256xbf16> to vector<256x256xbf16>
    %c0_94 = arith.constant 0 : index
    %c0_95 = arith.constant 0 : index
    %c0_96 = arith.constant 0 : index
    %c0_97 = arith.constant 0 : index
    %81 = vector.load %arg3[%c0_94, %c0_95, %c0_96, %c0_97] : memref<1x2x6x256xbf16, #tpu.memory_space<vmem>>, vector<1x1x4x256xbf16>
    %82 = vector.shape_cast %81 : vector<1x1x4x256xbf16> to vector<4x256xbf16>
    %cst_98 = arith.constant dense<0.000000e+00> : vector<4x256xf32>
    %83 = tpu.matmul %82, %80, %cst_98 {dimension_numbers = #tpu.dot_dimension_numbers<[1], [0], [0], [1], [0, 0, 1, 1], [], []>} : vector<4x256xbf16>, vector<256x256xbf16>, vector<4x256xf32> -> vector<4x256xf32>
    %84 = arith.addf %78, %83 : vector<4x256xf32>
    %c4_99 = arith.constant 4 : index
    %c0_100 = arith.constant 0 : index
    %c0_101 = arith.constant 0 : index
    %85 = vector.load %arg4[%c4_99, %c0_100, %c0_101] : memref<9x256x256xbf16, #tpu.memory_space<vmem>>, vector<1x256x256xbf16>
    %86 = vector.shape_cast %85 : vector<1x256x256xbf16> to vector<256x256xbf16>
    %c0_102 = arith.constant 0 : index
    %c0_103 = arith.constant 0 : index
    %c1_104 = arith.constant 1 : index
    %c0_105 = arith.constant 0 : index
    %87 = vector.load %arg3[%c0_102, %c0_103, %c1_104, %c0_105] : memref<1x2x6x256xbf16, #tpu.memory_space<vmem>>, vector<1x1x4x256xbf16>
    %88 = vector.shape_cast %87 : vector<1x1x4x256xbf16> to vector<4x256xbf16>
    %cst_106 = arith.constant dense<0.000000e+00> : vector<4x256xf32>
    %89 = tpu.matmul %88, %86, %cst_106 {dimension_numbers = #tpu.dot_dimension_numbers<[1], [0], [0], [1], [0, 0, 1, 1], [], []>} : vector<4x256xbf16>, vector<256x256xbf16>, vector<4x256xf32> -> vector<4x256xf32>
    %90 = arith.addf %84, %89 : vector<4x256xf32>
    %c5_107 = arith.constant 5 : index
    %c0_108 = arith.constant 0 : index
    %c0_109 = arith.constant 0 : index
    %91 = vector.load %arg4[%c5_107, %c0_108, %c0_109] : memref<9x256x256xbf16, #tpu.memory_space<vmem>>, vector<1x256x256xbf16>
    %92 = vector.shape_cast %91 : vector<1x256x256xbf16> to vector<256x256xbf16>
    %c0_110 = arith.constant 0 : index
    %c0_111 = arith.constant 0 : index
    %c2_112 = arith.constant 2 : index
    %c0_113 = arith.constant 0 : index
    %93 = vector.load %arg3[%c0_110, %c0_111, %c2_112, %c0_113] : memref<1x2x6x256xbf16, #tpu.memory_space<vmem>>, vector<1x1x4x256xbf16>
    %94 = vector.shape_cast %93 : vector<1x1x4x256xbf16> to vector<4x256xbf16>
    %cst_114 = arith.constant dense<0.000000e+00> : vector<4x256xf32>
    %95 = tpu.matmul %94, %92, %cst_114 {dimension_numbers = #tpu.dot_dimension_numbers<[1], [0], [0], [1], [0, 0, 1, 1], [], []>} : vector<4x256xbf16>, vector<256x256xbf16>, vector<4x256xf32> -> vector<4x256xf32>
    %96 = arith.addf %90, %95 : vector<4x256xf32>
    %c6_115 = arith.constant 6 : index
    %c0_116 = arith.constant 0 : index
    %c0_117 = arith.constant 0 : index
    %97 = vector.load %arg4[%c6_115, %c0_116, %c0_117] : memref<9x256x256xbf16, #tpu.memory_space<vmem>>, vector<1x256x256xbf16>
    %98 = vector.shape_cast %97 : vector<1x256x256xbf16> to vector<256x256xbf16>
    %c0_118 = arith.constant 0 : index
    %c1_119 = arith.constant 1 : index
    %c0_120 = arith.constant 0 : index
    %c0_121 = arith.constant 0 : index
    %99 = vector.load %arg3[%c0_118, %c1_119, %c0_120, %c0_121] : memref<1x2x6x256xbf16, #tpu.memory_space<vmem>>, vector<1x1x4x256xbf16>
    %100 = vector.shape_cast %99 : vector<1x1x4x256xbf16> to vector<4x256xbf16>
    %cst_122 = arith.constant dense<0.000000e+00> : vector<4x256xf32>
    %101 = tpu.matmul %100, %98, %cst_122 {dimension_numbers = #tpu.dot_dimension_numbers<[1], [0], [0], [1], [0, 0, 1, 1], [], []>} : vector<4x256xbf16>, vector<256x256xbf16>, vector<4x256xf32> -> vector<4x256xf32>
    %102 = arith.addf %96, %101 : vector<4x256xf32>
    %c7_123 = arith.constant 7 : index
    %c0_124 = arith.constant 0 : index
    %c0_125 = arith.constant 0 : index
    %103 = vector.load %arg4[%c7_123, %c0_124, %c0_125] : memref<9x256x256xbf16, #tpu.memory_space<vmem>>, vector<1x256x256xbf16>
    %104 = vector.shape_cast %103 : vector<1x256x256xbf16> to vector<256x256xbf16>
    %c0_126 = arith.constant 0 : index
    %c1_127 = arith.constant 1 : index
    %c1_128 = arith.constant 1 : index
    %c0_129 = arith.constant 0 : index
    %105 = vector.load %arg3[%c0_126, %c1_127, %c1_128, %c0_129] : memref<1x2x6x256xbf16, #tpu.memory_space<vmem>>, vector<1x1x4x256xbf16>
    %106 = vector.shape_cast %105 : vector<1x1x4x256xbf16> to vector<4x256xbf16>
    %cst_130 = arith.constant dense<0.000000e+00> : vector<4x256xf32>
    %107 = tpu.matmul %106, %104, %cst_130 {dimension_numbers = #tpu.dot_dimension_numbers<[1], [0], [0], [1], [0, 0, 1, 1], [], []>} : vector<4x256xbf16>, vector<256x256xbf16>, vector<4x256xf32> -> vector<4x256xf32>
    %108 = arith.addf %102, %107 : vector<4x256xf32>
    %c8_131 = arith.constant 8 : index
    %c0_132 = arith.constant 0 : index
    %c0_133 = arith.constant 0 : index
    %109 = vector.load %arg4[%c8_131, %c0_132, %c0_133] : memref<9x256x256xbf16, #tpu.memory_space<vmem>>, vector<1x256x256xbf16>
    %110 = vector.shape_cast %109 : vector<1x256x256xbf16> to vector<256x256xbf16>
    %c0_134 = arith.constant 0 : index
    %c1_135 = arith.constant 1 : index
    %c2_136 = arith.constant 2 : index
    %c0_137 = arith.constant 0 : index
    %111 = vector.load %arg3[%c0_134, %c1_135, %c2_136, %c0_137] : memref<1x2x6x256xbf16, #tpu.memory_space<vmem>>, vector<1x1x4x256xbf16>
    %112 = vector.shape_cast %111 : vector<1x1x4x256xbf16> to vector<4x256xbf16>
    %cst_138 = arith.constant dense<0.000000e+00> : vector<4x256xf32>
    %113 = tpu.matmul %112, %110, %cst_138 {dimension_numbers = #tpu.dot_dimension_numbers<[1], [0], [0], [1], [0, 0, 1, 1], [], []>} : vector<4x256xbf16>, vector<256x256xbf16>, vector<4x256xf32> -> vector<4x256xf32>
    %114 = arith.addf %108, %113 : vector<4x256xf32>
    %115 = vector.broadcast %0 : vector<1x256xf32> to vector<4x256xf32>
    %116 = arith.addf %114, %115 : vector<4x256xf32>
    %cst_139 = arith.constant 0.000000e+00 : f32
    %117 = vector.broadcast %cst_139 : f32 to vector<4x256xf32>
    %118 = arith.maximumf %116, %117 : vector<4x256xf32>
    %119 = arith.maximumf %59, %118 : vector<4x256xf32>
    %120 = arith.truncf %119 : vector<4x256xf32> to vector<4x256xbf16>
    %c0_140 = arith.constant 0 : index
    %c0_141 = arith.constant 0 : index
    %c0_142 = arith.constant 0 : index
    %c0_143 = arith.constant 0 : index
    %121 = vector.load %arg6[%c0_140, %c0_141, %c0_142, %c0_143] : memref<1x1x4x256xbf16, #tpu.memory_space<vmem>>, vector<1x1x4x256xbf16>
    %122 = vector.shape_cast %121 : vector<1x1x4x256xbf16> to vector<4x256xbf16>
    %123 = vector.shape_cast %120 : vector<4x256xbf16> to vector<1x1x4x256xbf16>
    tpu.vector_store %arg6[%c0_140, %c0_141, %c0_142, %c0_143], %123 {strides = array<i32>} : memref<1x1x4x256xbf16, #tpu.memory_space<vmem>>, vector<1x1x4x256xbf16>,
    return
  }
  func.func @transform_0(%arg0: i32, %arg1: i32) -> (i32, i32, i32, i32) {
    %c0_i32 = arith.constant 0 : i32
    %c0_i32_0 = arith.constant 0 : i32
    %c0_i32_1 = arith.constant 0 : i32
    return %arg0, %arg1, %c0_i32, %c0_i32_0 : i32, i32, i32, i32
  }
  func.func @transform_1(%arg0: i32, %arg1: i32) -> (i32, i32, i32, i32) {
    %c1_i32 = arith.constant 1 : i32
    %0 = arith.addi %arg1, %c1_i32 : i32
    %c0_i32 = arith.constant 0 : i32
    %c0_i32_0 = arith.constant 0 : i32
    %c0_i32_1 = arith.constant 0 : i32
    return %arg0, %0, %c0_i32, %c0_i32_0 : i32, i32, i32, i32
  }
  func.func @transform_2(%arg0: i32, %arg1: i32) -> (i32, i32, i32) {
    %c0_i32 = arith.constant 0 : i32
    %c0_i32_0 = arith.constant 0 : i32
    %c0_i32_1 = arith.constant 0 : i32
    %c0_i32_2 = arith.constant 0 : i32
    return %c0_i32, %c0_i32_0, %c0_i32_1 : i32, i32, i32
  }
  func.func @transform_3(%arg0: i32, %arg1: i32) -> (i32, i32) {
    %c0_i32 = arith.constant 0 : i32
    %c0_i32_0 = arith.constant 0 : i32
    %c0_i32_1 = arith.constant 0 : i32
    return %c0_i32, %c0_i32_0 : i32, i32
  }
  func.func @transform_4(%arg0: i32, %arg1: i32) -> (i32, i32, i32, i32) {
    %c0_i32 = arith.constant 0 : i32
    %c0_i32_0 = arith.constant 0 : i32
    %c0_i32_1 = arith.constant 0 : i32
    return %arg0, %arg1, %c0_i32, %c0_i32_0 : i32, i32, i32, i32
  }
}

module attributes {stable_mosaic.version = 11 : i64} {
  func.func @matmul_bias_kernel(%arg0: i32, %arg1: memref<8x512xbf16, #tpu.memory_space<vmem>>, %arg2: memref<512x2048xbf16, #tpu.memory_space<vmem>>, %arg3: memref<1x2048xf32, #tpu.memory_space<vmem>>, %arg4: memref<8x2048xf32, #tpu.memory_space<vmem>>) attributes {dimension_semantics = [#tpu.dimension_semantics<parallel>], iteration_bounds = array<i64: 1>, scalar_prefetch = 0 : i64, scratch_operands = 0 : i64, tpu.core_type = #tpu.core_type<tc>, window_params = [{transform_indices = @transform_0, window_bounds = array<i64: 8, 512>}, {pipeline_mode = #tpu.pipeline_mode<synchronous>, transform_indices = @transform_1, window_bounds = array<i64: 512, 2048>}, {pipeline_mode = #tpu.pipeline_mode<synchronous>, transform_indices = @transform_2, window_bounds = array<i64: 1, 2048>}, {transform_indices = @transform_3, window_bounds = array<i64: 8, 2048>}]} {
    %c0 = arith.constant 0 : index
    %c0_0 = arith.constant 0 : index
    %0 = vector.load %arg1[%c0, %c0_0] : memref<8x512xbf16, #tpu.memory_space<vmem>>, vector<8x512xbf16>
    %c0_1 = arith.constant 0 : index
    %c0_2 = arith.constant 0 : index
    %1 = vector.load %arg2[%c0_1, %c0_2] : memref<512x2048xbf16, #tpu.memory_space<vmem>>, vector<512x2048xbf16>
    %cst = arith.constant dense<0.000000e+00> : vector<8x2048xf32>
    %2 = tpu.matmul %0, %1, %cst {dimension_numbers = #tpu.dot_dimension_numbers<[1], [0], [0], [1], [0, 0, 1, 1], [], []>} : vector<8x512xbf16>, vector<512x2048xbf16>, vector<8x2048xf32> -> vector<8x2048xf32>
    %c0_3 = arith.constant 0 : index
    %c0_4 = arith.constant 0 : index
    %3 = vector.load %arg3[%c0_3, %c0_4] : memref<1x2048xf32, #tpu.memory_space<vmem>>, vector<1x2048xf32>
    %4 = vector.broadcast %3 : vector<1x2048xf32> to vector<8x2048xf32>
    %5 = arith.addf %2, %4 : vector<8x2048xf32>
    %c0_5 = arith.constant 0 : index
    %c0_6 = arith.constant 0 : index
    %6 = vector.load %arg4[%c0_5, %c0_6] : memref<8x2048xf32, #tpu.memory_space<vmem>>, vector<8x2048xf32>
    tpu.vector_store %arg4[%c0_5, %c0_6], %5 {strides = array<i32>} : memref<8x2048xf32, #tpu.memory_space<vmem>>, vector<8x2048xf32>,
    return
  }
  func.func @transform_0(%arg0: i32) -> (i32, i32) {
    %c0_i32 = arith.constant 0 : i32
    %c0_i32_0 = arith.constant 0 : i32
    return %arg0, %c0_i32 : i32, i32
  }
  func.func @transform_1(%arg0: i32) -> (i32, i32) {
    %c0_i32 = arith.constant 0 : i32
    %c0_i32_0 = arith.constant 0 : i32
    %c0_i32_1 = arith.constant 0 : i32
    return %c0_i32, %c0_i32_0 : i32, i32
  }
  func.func @transform_2(%arg0: i32) -> (i32, i32) {
    %c0_i32 = arith.constant 0 : i32
    %c0_i32_0 = arith.constant 0 : i32
    %c0_i32_1 = arith.constant 0 : i32
    return %c0_i32, %c0_i32_0 : i32, i32
  }
  func.func @transform_3(%arg0: i32) -> (i32, i32) {
    %c0_i32 = arith.constant 0 : i32
    %c0_i32_0 = arith.constant 0 : i32
    return %arg0, %c0_i32 : i32, i32
  }
}

module attributes {stable_mosaic.version = 11 : i64} {
  func.func @bilstm_kernel(%arg0: i32, %arg1: i32, %arg2: memref<1x1x2x1024xf32, #tpu.memory_space<vmem>>, %arg3: memref<1x256x1024xbf16, #tpu.memory_space<vmem>>, %arg4: memref<1x1x2x256xf32, #tpu.memory_space<vmem>>, %arg5: memref<2x256xf32, #tpu.memory_space<vmem>>, %arg6: memref<2x256xf32, #tpu.memory_space<vmem>>) attributes {dimension_semantics = [#tpu.dimension_semantics<parallel>, #tpu.dimension_semantics<arbitrary>], iteration_bounds = array<i64: 2, 4>, scalar_prefetch = 0 : i64, scratch_operands = 2 : i64, tpu.core_type = #tpu.core_type<tc>, window_params = [{transform_indices = @transform_0, window_bounds = array<i64: 1, 1, 2, 1024>}, {transform_indices = @transform_1, window_bounds = array<i64: 1, 256, 1024>}, {transform_indices = @transform_2, window_bounds = array<i64: 1, 1, 2, 256>}]} {
    %c0_i32 = arith.constant 0 : i32
    %0 = arith.cmpi eq, %arg1, %c0_i32 : i32
    %1 = arith.extui %0 : i1 to i32
    %c0_i32_0 = arith.constant 0 : i32
    %2 = arith.cmpi ne, %1, %c0_i32_0 : i32
    scf.if %2 {
      %cst_22 = arith.constant 0.000000e+00 : f32
      %42 = vector.broadcast %cst_22 : f32 to vector<2x256xf32>
      %c0_23 = arith.constant 0 : index
      %c0_24 = arith.constant 0 : index
      %43 = vector.load %arg5[%c0_23, %c0_24] : memref<2x256xf32, #tpu.memory_space<vmem>>, vector<2x256xf32>
      tpu.vector_store %arg5[%c0_23, %c0_24], %42 {strides = array<i32>} : memref<2x256xf32, #tpu.memory_space<vmem>>, vector<2x256xf32>,
      %cst_25 = arith.constant 0.000000e+00 : f32
      %44 = vector.broadcast %cst_25 : f32 to vector<2x256xf32>
      %c0_26 = arith.constant 0 : index
      %c0_27 = arith.constant 0 : index
      %45 = vector.load %arg6[%c0_26, %c0_27] : memref<2x256xf32, #tpu.memory_space<vmem>>, vector<2x256xf32>
      tpu.vector_store %arg6[%c0_26, %c0_27], %44 {strides = array<i32>} : memref<2x256xf32, #tpu.memory_space<vmem>>, vector<2x256xf32>,
    } else {
    }
    %c0 = arith.constant 0 : index
    %c0_1 = arith.constant 0 : index
    %c0_2 = arith.constant 0 : index
    %c0_3 = arith.constant 0 : index
    %3 = vector.load %arg2[%c0, %c0_1, %c0_2, %c0_3] : memref<1x1x2x1024xf32, #tpu.memory_space<vmem>>, vector<1x1x2x1024xf32>
    %4 = vector.shape_cast %3 : vector<1x1x2x1024xf32> to vector<2x1024xf32>
    %c0_4 = arith.constant 0 : index
    %c0_5 = arith.constant 0 : index
    %5 = vector.load %arg5[%c0_4, %c0_5] : memref<2x256xf32, #tpu.memory_space<vmem>>, vector<2x256xf32>
    %6 = arith.truncf %5 : vector<2x256xf32> to vector<2x256xbf16>
    %c0_6 = arith.constant 0 : index
    %c0_7 = arith.constant 0 : index
    %c0_8 = arith.constant 0 : index
    %7 = vector.load %arg3[%c0_6, %c0_7, %c0_8] : memref<1x256x1024xbf16, #tpu.memory_space<vmem>>, vector<1x256x1024xbf16>
    %8 = vector.shape_cast %7 : vector<1x256x1024xbf16> to vector<256x1024xbf16>
    %cst = arith.constant dense<0.000000e+00> : vector<2x1024xf32>
    %9 = tpu.matmul %6, %8, %cst {dimension_numbers = #tpu.dot_dimension_numbers<[1], [0], [0], [1], [0, 0, 1, 1], [], []>} : vector<2x256xbf16>, vector<256x1024xbf16>, vector<2x1024xf32> -> vector<2x1024xf32>
    %10 = arith.addf %4, %9 : vector<2x1024xf32>
    %11 = vector.extract_strided_slice %10 {offsets = [0, 0], sizes = [2, 256], strides = [1, 1]} : vector<2x1024xf32> to vector<2x256xf32>
    %12 = arith.negf %11 : vector<2x256xf32>
    %13 = math.exp %12 : vector<2x256xf32>
    %cst_9 = arith.constant 1.000000e+00 : f32
    %14 = vector.broadcast %cst_9 : f32 to vector<2x256xf32>
    %15 = arith.addf %14, %13 : vector<2x256xf32>
    %16 = arith.divf %14, %15 : vector<2x256xf32>
    %17 = vector.extract_strided_slice %10 {offsets = [0, 256], sizes = [2, 256], strides = [1, 1]} : vector<2x1024xf32> to vector<2x256xf32>
    %18 = arith.negf %17 : vector<2x256xf32>
    %19 = math.exp %18 : vector<2x256xf32>
    %cst_10 = arith.constant 1.000000e+00 : f32
    %20 = vector.broadcast %cst_10 : f32 to vector<2x256xf32>
    %21 = arith.addf %20, %19 : vector<2x256xf32>
    %22 = arith.divf %20, %21 : vector<2x256xf32>
    %23 = vector.extract_strided_slice %10 {offsets = [0, 512], sizes = [2, 256], strides = [1, 1]} : vector<2x1024xf32> to vector<2x256xf32>
    %24 = math.tanh %23 : vector<2x256xf32>
    %25 = vector.extract_strided_slice %10 {offsets = [0, 768], sizes = [2, 256], strides = [1, 1]} : vector<2x1024xf32> to vector<2x256xf32>
    %26 = arith.negf %25 : vector<2x256xf32>
    %27 = math.exp %26 : vector<2x256xf32>
    %cst_11 = arith.constant 1.000000e+00 : f32
    %28 = vector.broadcast %cst_11 : f32 to vector<2x256xf32>
    %29 = arith.addf %28, %27 : vector<2x256xf32>
    %30 = arith.divf %28, %29 : vector<2x256xf32>
    %c0_12 = arith.constant 0 : index
    %c0_13 = arith.constant 0 : index
    %31 = vector.load %arg6[%c0_12, %c0_13] : memref<2x256xf32, #tpu.memory_space<vmem>>, vector<2x256xf32>
    %32 = arith.mulf %22, %31 : vector<2x256xf32>
    %33 = arith.mulf %16, %24 : vector<2x256xf32>
    %34 = arith.addf %32, %33 : vector<2x256xf32>
    %35 = math.tanh %34 : vector<2x256xf32>
    %36 = arith.mulf %30, %35 : vector<2x256xf32>
    %c0_14 = arith.constant 0 : index
    %c0_15 = arith.constant 0 : index
    %37 = vector.load %arg6[%c0_14, %c0_15] : memref<2x256xf32, #tpu.memory_space<vmem>>, vector<2x256xf32>
    tpu.vector_store %arg6[%c0_14, %c0_15], %34 {strides = array<i32>} : memref<2x256xf32, #tpu.memory_space<vmem>>, vector<2x256xf32>,
    %c0_16 = arith.constant 0 : index
    %c0_17 = arith.constant 0 : index
    %38 = vector.load %arg5[%c0_16, %c0_17] : memref<2x256xf32, #tpu.memory_space<vmem>>, vector<2x256xf32>
    tpu.vector_store %arg5[%c0_16, %c0_17], %36 {strides = array<i32>} : memref<2x256xf32, #tpu.memory_space<vmem>>, vector<2x256xf32>,
    %c0_18 = arith.constant 0 : index
    %c0_19 = arith.constant 0 : index
    %c0_20 = arith.constant 0 : index
    %c0_21 = arith.constant 0 : index
    %39 = vector.load %arg4[%c0_18, %c0_19, %c0_20, %c0_21] : memref<1x1x2x256xf32, #tpu.memory_space<vmem>>, vector<1x1x2x256xf32>
    %40 = vector.shape_cast %39 : vector<1x1x2x256xf32> to vector<2x256xf32>
    %41 = vector.shape_cast %36 : vector<2x256xf32> to vector<1x1x2x256xf32>
    tpu.vector_store %arg4[%c0_18, %c0_19, %c0_20, %c0_21], %41 {strides = array<i32>} : memref<1x1x2x256xf32, #tpu.memory_space<vmem>>, vector<1x1x2x256xf32>,
    return
  }
  func.func @transform_0(%arg0: i32, %arg1: i32) -> (i32, i32, i32, i32) {
    %c2_i32 = arith.constant 2 : i32
    %0 = arith.muli %c2_i32, %arg1 : i32
    %c3_i32 = arith.constant 3 : i32
    %1 = arith.subi %c3_i32, %0 : i32
    %2 = arith.muli %arg0, %1 : i32
    %3 = arith.addi %arg1, %2 : i32
    %c0_i32 = arith.constant 0 : i32
    %c0_i32_0 = arith.constant 0 : i32
    %c0_i32_1 = arith.constant 0 : i32
    return %arg0, %3, %c0_i32, %c0_i32_0 : i32, i32, i32, i32
  }
  func.func @transform_1(%arg0: i32, %arg1: i32) -> (i32, i32, i32) {
    %c0_i32 = arith.constant 0 : i32
    %c0_i32_0 = arith.constant 0 : i32
    %c0_i32_1 = arith.constant 0 : i32
    return %arg0, %c0_i32, %c0_i32_0 : i32, i32, i32
  }
  func.func @transform_2(%arg0: i32, %arg1: i32) -> (i32, i32, i32, i32) {
    %c2_i32 = arith.constant 2 : i32
    %0 = arith.muli %c2_i32, %arg1 : i32
    %c3_i32 = arith.constant 3 : i32
    %1 = arith.subi %c3_i32, %0 : i32
    %2 = arith.muli %arg0, %1 : i32
    %3 = arith.addi %arg1, %2 : i32
    %c0_i32 = arith.constant 0 : i32
    %c0_i32_0 = arith.constant 0 : i32
    %c0_i32_1 = arith.constant 0 : i32
    return %arg0, %3, %c0_i32, %c0_i32_0 : i32, i32, i32, i32
  }
}

module attributes {stable_mosaic.version = 11 : i64} {
  func.func @matmul_bias_kernel(%arg0: i32, %arg1: memref<8x512xbf16, #tpu.memory_space<vmem>>, %arg2: memref<512x128xbf16, #tpu.memory_space<vmem>>, %arg3: memref<1x128xf32, #tpu.memory_space<vmem>>, %arg4: memref<8x128xf32, #tpu.memory_space<vmem>>) attributes {dimension_semantics = [#tpu.dimension_semantics<parallel>], iteration_bounds = array<i64: 1>, scalar_prefetch = 0 : i64, scratch_operands = 0 : i64, tpu.core_type = #tpu.core_type<tc>, window_params = [{transform_indices = @transform_0, window_bounds = array<i64: 8, 512>}, {pipeline_mode = #tpu.pipeline_mode<synchronous>, transform_indices = @transform_1, window_bounds = array<i64: 512, 128>}, {pipeline_mode = #tpu.pipeline_mode<synchronous>, transform_indices = @transform_2, window_bounds = array<i64: 1, 128>}, {transform_indices = @transform_3, window_bounds = array<i64: 8, 128>}]} {
    %c0 = arith.constant 0 : index
    %c0_0 = arith.constant 0 : index
    %0 = vector.load %arg1[%c0, %c0_0] : memref<8x512xbf16, #tpu.memory_space<vmem>>, vector<8x512xbf16>
    %c0_1 = arith.constant 0 : index
    %c0_2 = arith.constant 0 : index
    %1 = vector.load %arg2[%c0_1, %c0_2] : memref<512x128xbf16, #tpu.memory_space<vmem>>, vector<512x128xbf16>
    %cst = arith.constant dense<0.000000e+00> : vector<8x128xf32>
    %2 = tpu.matmul %0, %1, %cst {dimension_numbers = #tpu.dot_dimension_numbers<[1], [0], [0], [1], [0, 0, 1, 1], [], []>} : vector<8x512xbf16>, vector<512x128xbf16>, vector<8x128xf32> -> vector<8x128xf32>
    %c0_3 = arith.constant 0 : index
    %c0_4 = arith.constant 0 : index
    %3 = vector.load %arg3[%c0_3, %c0_4] : memref<1x128xf32, #tpu.memory_space<vmem>>, vector<1x128xf32>
    %4 = vector.broadcast %3 : vector<1x128xf32> to vector<8x128xf32>
    %5 = arith.addf %2, %4 : vector<8x128xf32>
    %c0_5 = arith.constant 0 : index
    %c0_6 = arith.constant 0 : index
    %6 = vector.load %arg4[%c0_5, %c0_6] : memref<8x128xf32, #tpu.memory_space<vmem>>, vector<8x128xf32>
    tpu.vector_store %arg4[%c0_5, %c0_6], %5 {strides = array<i32>} : memref<8x128xf32, #tpu.memory_space<vmem>>, vector<8x128xf32>,
    return
  }
  func.func @transform_0(%arg0: i32) -> (i32, i32) {
    %c0_i32 = arith.constant 0 : i32
    %c0_i32_0 = arith.constant 0 : i32
    return %arg0, %c0_i32 : i32, i32
  }
  func.func @transform_1(%arg0: i32) -> (i32, i32) {
    %c0_i32 = arith.constant 0 : i32
    %c0_i32_0 = arith.constant 0 : i32
    %c0_i32_1 = arith.constant 0 : i32
    return %c0_i32, %c0_i32_0 : i32, i32
  }
  func.func @transform_2(%arg0: i32) -> (i32, i32) {
    %c0_i32 = arith.constant 0 : i32
    %c0_i32_0 = arith.constant 0 : i32
    %c0_i32_1 = arith.constant 0 : i32
    return %c0_i32, %c0_i32_0 : i32, i32
  }
  func.func @transform_3(%arg0: i32) -> (i32, i32) {
    %c0_i32 = arith.constant 0 : i32
    %c0_i32_0 = arith.constant 0 : i32
    return %arg0, %c0_i32 : i32, i32
  }
}

</mosaic_0001>

<bundles_post_ra>
// kernel: crnn_forward.7
= control target key start
LH: loop header
LB: loop body
LE: loop exit
PB: predicated region body
PF: predicated region fallthrough
CT: control target
= control target key end

     0   :  { %s1082_s15 = smov 0   ;;  %s1084_s16 = smov 0   ;;  %s1321_s0 = inlined_call_operand.vmem [shape: bf16[2,34,18,1], index: 0, kind: input, shape index: {}, may-alias: {0,1}]   ;;  %s1322_s1 = inlined_call_operand.vmem [shape: bf16[2,34,18,1], index: 1, kind: input, shape index: {}, may-alias: {0,1}]   ;;  %s1323_s2 = inlined_call_operand.vmem [shape: bf16[9,1,64], index: 2, kind: input, shape index: {}]   ;;  %s1324_s3 = inlined_call_operand.vmem [shape: f32[1,64], index: 3, kind: input, shape index: {}]   ;;  %s1325_s4 = inlined_call_operand.vmem [shape: bf16[2,16,8,64], index: 4, kind: output, shape index: {}]  }
   0x1   :  { %s1086_s17 = smov 0   ;;  %s1088_s18 = smov 0  }
   0x2   :  { %s1090_s19 = smov 0  }
   0x3 LB: > { %s23_s20 = sadd.s32 1, %s1046_s17  ;;  %s26_s21 = sadd.s32 1, %s1050_s18  ;;  %s1054_s19 = sphi %s1090_s19, %s14_s19   ;;  %s1050_s18 = sphi %s1088_s18, %s1330_s18   ;;  %s1046_s17 = sphi %s1086_s17, %s1329_s17   ;;  %s1042_s16 = sphi %s1084_s16, %s1328_s16   ;;  %s1038_s15 = sphi %s1082_s15, %s1327_s15  }
   0x4   : > { %p24_p0 = scmp.ge.s32.totalorder %s23_s20, 16  ;;  %p862_p1 = scmp.ge.s32.totalorder %s1054_s19, 1 }
   0x5   : > { %p206_p2 = scmp.lt.s32.totalorder %s1054_s19, 33 }
   0x6   : > { %s1332_s20 = smov (%p24_p0, %s23_s20), 0  ;;  %s1334_s21 = smov (!%p24_p0, %s26_s21), %s1050_s18 }
   0x7   : > { %p207_p3 = pnand %p862_p1, %p206_p2  ;;  %p28_p4 = scmp.ge.s32.totalorder %s1334_s21, 2 }
   0x8   : > { %s1115_s22 = sshll.u32 (!%p207_p3), %s1038_s15, 1  ;;  %p252_p5 = scmp.lt.s32.totalorder (!%p207_p3), %s1042_s16, 1 }
   0x9   : > { %s1336_s21 = smov (%p28_p4, %s1334_s21), 0  ;;  %210 = sbr.rel (%p207_p3) target bundleno = 215 (0xd7), region = 36 }
   0xa   : > { %p254_p6 = scmp.lt.s32.totalorder (!%p207_p3), %s1115_s22, 33  ;;  %s893_s26 = sadd.s32 (!%p207_p3), 2, %s1115_s22 }
   0xb   : > { %p1125_p7 = scmp.lt.s32.totalorder (!%p207_p3), %s893_s26, 33  ;;  %p277_p8 = scmp.lt.s32.totalorder (!%p207_p3), %s1038_s15, 15 }
   0xe   : > { %v1056_v0 = vmov 0   ;;  %s1338_s16 = smov (!%p252_p5, %s1042_s16), 1  ;;  %s1340_s26 = smov (!%p1125_p7, %s893_s26), 33  ;;  %v300_v46 = vlaneseq  ;;  %v874_v48 = vld [vmem:[%s1323_s2 + $0x4] sm:$0x1]  ;;  %vm342_vm0 = vcmask 1046528  }
   0xf   : > { %965 = vset.pattern.permute.xlu1 %v1056_v0  ;;  %954 = vset.pattern.permute.xlu0 %v1056_v0  ;;  %s255_s23 = scalar_select %p254_p6, %s1115_s22, 33  ;;  %v878_v49 = vld [vmem:[%s1323_s2 + $0x5] sm:$0x1]  ;;  %v869_v50 = vld [vmem:[%s1323_s2 + $0x1] sm:$0x1]  ;;  %v416_v51 = vunpack.c.l.bf16 %v874_v48  ;;  %vm372_vm1 = vcmask 1045504  }
  0x10   : > { %s911_s24 = smul.u32 102, %s1338_s16  ;;  %v301_v47 = vshrl.u32 %v300_v46, 7  ;;  %v455_v52 = vunpack.c.l.bf16 %v878_v49  ;;  %v870_v54 = vld [vmem:[%s1323_s2 + $0x2] sm:$0x1]  ;;  %v284_v55 = vld [vmem:[%s1323_s2] sm:$0x1]  ;;  %v316_v58 = vunpack.c.l.bf16 %v869_v50 }
  0x11   : > { %s910_s25 = smul.u32 3, %s255_s23  ;;  %v871_v56 = vld [vmem:[%s1323_s2 + $0x3] sm:$0x1]  ;;  %v880_v57 = vld [vmem:[%s1323_s2 + $0x6] sm:$0x1]  ;;  %v356_v60 = vunpack.c.l.bf16 %v870_v54  ;;  %vm738_vm2 = vcmask 523264  }
  0x12   : > { %s912_s7 = smul.u32 3, %s1340_s26  ;;  %v302_v53 = vsub.s32 0, %v301_v47  ;;  %v881_v59 = vld [vmem:[%s1323_s2 + $0x7] sm:$0x1]  ;;  %v882_v63 = vld [vmem:[%s1323_s2 + $0x8] sm:$0x1] }
  0x13   : > { %s258_s27 = sadd.s32 %s911_s24, %s910_s25  ;;  %s1342_s15 = smov (!%p277_p8, %s1038_s15), 15  ;;  %vm746_vm3 = vcmask 519168  }
  0x14   : > { %s864_s28 = sshll.u32 %s258_s27, 2  ;;  %s270_s8 = sadd.s32 %s912_s7, %s911_s24  ;;  %v1163_v61 = vrot.slane %v416_v51, %v302_v53  ;;  %v1165_v62 = vrot.slane %v455_v52, %v302_v53 }
  0x15   : > { %s260_s6 = scalar_lea.vmem %s1321_s0, %s864_s28  ;;  %s866_s9 = sshll.u32 %s270_s8, 2 }
  0x16   : > { %v876_v1 = vld [vmem:[%s260_s6 + $0xc] sm:$0xff]   ;;  %v877_v2 = vld [vmem:[%s260_s6 + $0x14] sm:$0x1]  ;;  %v899_v3 = vld [vmem:[%s260_s6] sm:$0xff]   ;;  %s272_s12 = scalar_lea.vmem %s1322_s1, %s866_s9  ;;  %s867_s14 = sshll.u32 %s1338_s16, 4 }
  0x17   : > { %v414_v4 = vunpack.c.h.bf16 %v876_v1  ;;  %v415_v5 = vunpack.c.l.bf16 %v877_v2  ;;  %v900_v6 = vunpack.c.l.bf16 %v899_v3  ;;  %v901_v7 = vunpack.c.h.bf16 %v899_v3  ;;  %v354_v8 = vld [vmem:[%s260_s6] sm:$0xe]  ;;  %v879_v9 = vld [vmem:[%s260_s6 + $0xc] sm:$0xe]  ;;  %v312_v10 = vld [vmem:[%s260_s6 + $0x8] sm:$0x1]  ;;  %s280_s22 = sadd.s32 %s867_s14, %s1342_s15 }
  0x18   : > { %v355_v11 = vunpack.c.l.bf16 %v354_v8  ;;  %v454_v12 = vunpack.c.l.bf16 %v879_v9  ;;  %v315_v13 = vunpack.c.l.bf16 %v312_v10  ;;  %v413_v14 = vunpack.c.l.bf16 %v876_v1  ;;  %v872_v15 = vld [vmem:[%s260_s6 + $0xc] sm:$0xff]   ;;  %v903_v23 = vld [vmem:[%s272_s12] sm:$0xff]   ;;  %v509_v24 = vld [vmem:[%s272_s12 + $0x8] sm:$0x1]  ;;  %s868_s23 = sshll.u32 %s280_s22, 2 }
  0x19   : > { %v966_v16 = vpack.i.bf16 %v415_v5, %v414_v4  ;;  %v955_v17 = vpack.i.bf16 %v901_v7, %v900_v6  ;;  %v387_v20 = vunpack.c.l.bf16 %v872_v15  ;;  %v388_v21 = vunpack.c.h.bf16 %v872_v15  ;;  %v886_v25 = vld [vmem:[%s272_s12 + $0xc] sm:$0xff]   ;;  %v550_v29 = vld [vmem:[%s272_s12] sm:$0xe]  ;;  %v888_v37 = vld [vmem:[%s272_s12 + $0x14] sm:$0x1]  ;;  %s282_s26 = scalar_lea.vmem %s1325_s4, %s868_s23 }
  0x1a   : > { %v971_v18 = vpack.i.bf16 %v454_v12, %v355_v11  ;;  %v960_v19 = vpack.i.bf16 %v413_v14, %v315_v13  ;;  %v904_v26 = vunpack.c.l.bf16 %v903_v23  ;;  %v512_v27 = vunpack.c.l.bf16 %v509_v24  ;;  %v885_v35 = vld [vmem:[%s272_s12 + $0xc] sm:$0xff]  }
  0x1b   : > { %967 = vperm.xlu1 %965, %v966_v16   ;;  %956 = vperm.xlu0 %954, %v955_v17   ;;  %v981_v22 = vpack.i.bf16 %v388_v21, %v387_v20  ;;  %v909_v28 = vunpack.c.h.bf16 %v903_v23  ;;  %v677_v30 = vunpack.c.l.bf16 %v886_v25  ;;  %v678_v33 = vunpack.c.h.bf16 %v886_v25  ;;  %v889_v36 = vld [vmem:[%s272_s12 + $0xc] sm:$0xe] }
  0x1c   : > { %v991_v31 = vpack.i.bf16 %v904_v26, %v512_v27  ;;  %v551_v34 = vunpack.c.l.bf16 %v550_v29  ;;  %v659_v38 = vunpack.c.h.bf16 %v885_v35  ;;  %v711_v39 = vunpack.c.l.bf16 %v889_v36 }
  0x1d   : > { %v986_v32 = vpack.i.bf16 %v909_v28, %v904_v26  ;;  %v1001_v40 = vpack.i.bf16 %v678_v33, %v677_v30  ;;  %v658_v42 = vunpack.c.l.bf16 %v885_v35  ;;  %v679_v43 = vunpack.c.l.bf16 %v888_v37 }
  0x1e   : > { %v996_v41 = vpack.i.bf16 %v551_v34, %v909_v28  ;;  %v1011_v44 = vpack.i.bf16 %v711_v39, %v659_v38  ;;  %v289_v2 = vunpack.c.l.bf16 %v284_v55  ;;  %v389_v3 = vunpack.c.l.bf16 %v871_v56 }
  0x1f   : > { %972 = vperm.xlu1 %965, %v971_v18   ;;  %961 = vperm.xlu0 %954, %v960_v19   ;;  %v1006_v45 = vpack.i.bf16 %v658_v42, %v679_v43  ;;  %v486_v4 = vunpack.c.l.bf16 %v880_v57  ;;  %v513_v7 = vunpack.c.l.bf16 %v881_v59  ;;  %v335_v8 = vrot.slane %v316_v58, %v302_v53 }
  0x20   : > { %v552_v9 = vunpack.c.l.bf16 %v882_v63  ;;  %v365_v10 = vrot.slane %v356_v60, %v302_v53  ;;  %v1176_v15 = vrot.slane %v289_v2, %v302_v53  ;;  %v1178_v16 = vrot.slane %v389_v3, %v302_v53 }
  0x22   : > { %v1192_v26 = vrot.slane %v552_v9, %v302_v53 }
  0x23   : > { %982 = vperm.xlu1 %965, %v981_v22   ;;  %977 = vperm.xlu0 %954, %v955_v17   ;;  %v1180_v17 = vrot.slane %v486_v4, %v302_v53  ;;  %v1184_v22 = vrot.slane %v513_v7, %v302_v53 }
  0x27   : > { %992 = vperm.xlu1 %965, %v991_v31   ;;  %987 = vperm.xlu0 %954, %v986_v32  }
  0x2b   : > { %1002 = vperm.xlu1 %965, %v1001_v40   ;;  %997 = vperm.xlu0 %954, %v996_v41  }
  0x2f   : > { %1012 = vperm.xlu1 %965, %v1011_v44   ;;  %1007 = vperm.xlu0 %954, %v1006_v45  }
  0x96   : > { %v968_v0 = vpop.permute.xlu1 %967  ;;  %v957_v1 = vpop.permute.xlu0 %956 }
  0x97   : > { %v970_v5 = vunpack.i.h.bf16 %v968_v0  ;;  %v969_v6 = vunpack.i.l.bf16 %v968_v0  ;;  %v959_v20 = vunpack.i.h.bf16 %v957_v1  ;;  %v958_v25 = vunpack.i.l.bf16 %v957_v1 }
  0x99   : > { %v1171_v11 = vmul.f32 %v970_v5, %v1163_v61  ;;  %v1174_v12 = vmul.f32 %v970_v5, %v1165_v62  ;;  %v593_v13 = vmul.f32 %v970_v5, %v335_v8  ;;  %v1182_v18 = vmul.f32 %v970_v5, %v365_v10 }
  0x9a   : > { %v973_v14 = vpop.permute.xlu1 %972  ;;  %v592_v19 = vmul.f32 %v969_v6, %v335_v8  ;;  %v962_v21 = vpop.permute.xlu0 %961  ;;  %v1187_v23 = vmul.f32 %v969_v6, %v1163_v61  ;;  %v1190_v24 = vmul.f32 %v969_v6, %v1165_v62  ;;  %v1196_v29 = vmul.f32 %v969_v6, %v365_v10 }
  0x9b   : > { %v445_v27 = vrot.slane %v1171_v11, 1  ;;  %v474_v28 = vrot.slane %v1174_v12, 2  ;;  %v975_v30 = vunpack.i.h.bf16 %v973_v14  ;;  %v600_v31 = vrot.slane %v593_v13, 1 }
  0x9c   : > { %v974_v32 = vunpack.i.l.bf16 %v973_v14  ;;  %v964_v33 = vunpack.i.h.bf16 %v962_v21  ;;  %v963_v34 = vunpack.i.l.bf16 %v962_v21  ;;  %v615_v36 = vrot.slane %v1182_v18, 2 }
  0x9d   : > { %v598_v37 = vrot.slane %v592_v19, 1  ;;  %v337_v38 = vmul.f32 %v959_v20, %v335_v8  ;;  %v367_v39 = vmul.f32 %v959_v20, %v365_v10  ;;  %v336_v40 = vmul.f32 %v958_v25, %v335_v8 }
  0x9e   : > { %v983_v35 = vpop.permute.xlu1 %982  ;;  %v465_v41 = vmul.f32 %v975_v30, %v1165_v62  ;;  %v436_v42 = vmul.f32 %v964_v33, %v1163_v61  ;;  %v591_v43 = vmul.f32 %v964_v33, %v335_v8  ;;  %v606_v44 = vmul.f32 %v975_v30, %v365_v10  ;;  %v978_v48 = vpop.permute.xlu0 %977 }
  0x9f   : > { %v366_v45 = vmul.f32 %v974_v32, %v365_v10  ;;  %v338_v46 = vmul.f32 %v963_v34, %v335_v8  ;;  %v985_v47 = vunpack.i.h.bf16 %v983_v35  ;;  %v443_v49 = vrot.slane %v1187_v23, 1 }
  0xa0   : > { %v472_v50 = vrot.slane %v1190_v24, 2  ;;  %v613_v51 = vrot.slane %v1196_v29, 2  ;;  %v597_v52 = vrot.slane %v591_v43, 1  ;;  %v344_v53 = vrot.slane %v337_v38, 1 }
  0xa1   : > { %v346_v54 = vrot.slane %v338_v46, 1  ;;  %v368_v55 = vmul.f32 %v963_v34, %v365_v10  ;;  %v601_v56 = vsel %vm342_vm0, %v598_v37, %v600_v31  ;;  %v374_v57 = vrot.slane %v367_v39, 2 }
  0xa2   : > { %v343_v58 = vrot.slane %v336_v40, 1  ;;  %v442_v59 = vrot.slane %v436_v42, 1  ;;  %v984_v60 = vunpack.i.l.bf16 %v983_v35  ;;  %v993_v63 = vpop.permute.xlu1 %992  ;;  %v471_v0 = vrot.slane %v465_v41, 2  ;;  %v988_v14 = vpop.permute.xlu0 %987 }
  0xa3   : > { %v612_v1 = vrot.slane %v606_v44, 2  ;;  %v373_v2 = vrot.slane %v366_v45, 2  ;;  %v588_v3 = vmul.f32 %v985_v47, %v1176_v15  ;;  %v599_v5 = vsel %vm342_vm0, %v597_v52, %v598_v37 }
  0xa4   : > { %v587_v4 = vmul.f32 %v984_v60, %v1176_v15  ;;  %v980_v6 = vunpack.i.h.bf16 %v978_v48  ;;  %v979_v7 = vunpack.i.l.bf16 %v978_v48  ;;  %v376_v8 = vrot.slane %v368_v55, 2 }
  0xa5   : > { %v405_v9 = vmul.f32 %v985_v47, %v1178_v16  ;;  %v347_v10 = vsel %vm342_vm0, %v344_v53, %v346_v54  ;;  %v994_v13 = vunpack.i.l.bf16 %v993_v63  ;;  %v444_v19 = vsel %vm342_vm0, %v442_v59, %v443_v49 }
  0xa6   : > { %v305_v20 = vmul.f32 %v980_v6, %v1176_v15  ;;  %v304_v21 = vmul.f32 %v979_v7, %v1176_v15  ;;  %v995_v25 = vunpack.i.h.bf16 %v993_v63  ;;  %v1215_v30 = vadd.f32 %v601_v56, %v588_v3  ;;  %v1003_v46 = vpop.permute.xlu1 %1002 }
  0xa7   : > { %v604_v31 = vadd.f32 %v599_v5, %v587_v4  ;;  %v345_v32 = vsel %vm342_vm0, %v343_v58, %v344_v53  ;;  %v1219_v33 = vmul.f32 %v994_v13, %v1184_v22  ;;  %v375_v34 = vsel %vm372_vm1, %v373_v2, %v374_v57 }
  0xa8   : > { %v351_v35 = vadd.f32 %v347_v10, %v305_v20  ;;  %v350_v37 = vadd.f32 %v345_v32, %v304_v21  ;;  %v990_v38 = vunpack.i.h.bf16 %v988_v14  ;;  %v404_v39 = vmul.f32 %v984_v60, %v1178_v16 }
  0xa9   : > { %v377_v40 = vsel %vm372_vm1, %v374_v57, %v376_v8  ;;  %v473_v15 = vsel %vm372_vm1, %v471_v0, %v472_v50  ;;  %v614_v41 = vsel %vm372_vm1, %v612_v1, %v613_v51  ;;  %v501_v43 = vmul.f32 %v995_v25, %v1180_v17  ;;  %v998_v8 = vpop.permute.xlu0 %997 }
  0xaa   : > { %v380_v42 = vadd.f32 %v375_v34, %v350_v37  ;;  %v621_v44 = vmul.f32 %v995_v25, %v1178_v16  ;;  %v1233_v45 = vmul.f32 %v994_v13, %v1192_v26  ;;  %v381_v47 = vadd.f32 %v377_v40, %v351_v35 }
  0xab   : > { %v542_v48 = vrot.slane %v1219_v33, 1  ;;  %v619_v52 = vadd.f32 %v614_v41, %v604_v31  ;;  %v627_v53 = vmul.f32 %v994_v13, %v1163_v61  ;;  %v1238_v55 = vmul.f32 %v994_v13, %v1165_v62 }
  0xac   : > { %v406_v54 = vadd.f32 %v404_v39, %v380_v42  ;;  %v534_v56 = vmul.f32 %v990_v38, %v1184_v22  ;;  %v989_v57 = vunpack.i.l.bf16 %v988_v14  ;;  %v1242_v58 = vmul.f32 %v990_v38, %v1192_v26 }
  0xad   : > { %v626_v59 = vmul.f32 %v990_v38, %v1163_v61  ;;  %v641_v60 = vmul.f32 %v990_v38, %v1165_v62  ;;  %v1005_v63 = vunpack.i.h.bf16 %v1003_v46  ;;  %v1004_v3 = vunpack.i.l.bf16 %v1003_v46 }
  0xae   : > { %v449_v0 = vadd.f32 %v444_v19, %v406_v54  ;;  %v533_v1 = vmul.f32 %v989_v57, %v1184_v22  ;;  %v625_v2 = vmul.f32 %v989_v57, %v1163_v61  ;;  %v407_v4 = vadd.f32 %v405_v9, %v381_v47  ;;  %v1013_v9 = vpop.permute.xlu1 %1012 }
  0xaf   : > { %v571_v5 = vrot.slane %v1233_v45, 2  ;;  %v623_v6 = vadd.f32 %v621_v44, %v619_v52  ;;  %v634_v7 = vrot.slane %v627_v53, 1  ;;  %v649_v13 = vrot.slane %v1238_v55, 2 }
  0xb0   : > { %v478_v10 = vadd.f32 %v473_v15, %v449_v0  ;;  %v540_v14 = vrot.slane %v534_v56, 1  ;;  %v1251_v20 = vmul.f32 %v1005_v63, %v1184_v22  ;;  %v569_v19 = vrot.slane %v1242_v58, 2 }
  0xb1   : > { %v632_v21 = vrot.slane %v626_v59, 1  ;;  %v647_v25 = vrot.slane %v641_v60, 2  ;;  %v1255_v61 = vmul.f32 %v1005_v63, %v1192_v26  ;;  %v539_v31 = vrot.slane %v533_v1, 1 }
  0xb2   : > { %v631_v32 = vrot.slane %v625_v2, 1  ;;  %v695_v33 = vmul.f32 %v1004_v3, %v1184_v22  ;;  %v446_v34 = vsel %vm342_vm0, %v443_v49, %v445_v27  ;;  %v475_v35 = vsel %vm372_vm1, %v472_v50, %v474_v28  ;;  %v1008_v49 = vpop.permute.xlu0 %1007 }
  0xb3   : > { %v1000_v37 = vunpack.i.h.bf16 %v998_v8  ;;  %v999_v38 = vunpack.i.l.bf16 %v998_v8  ;;  %v450_v39 = vadd.f32 %v446_v34, %v407_v4  ;;  %v503_v40 = vadd.f32 %v501_v43, %v478_v10 }
  0xb4   : > { %v702_v15 = vrot.slane %v1251_v20, 1  ;;  %v616_v11 = vsel %vm372_vm1, %v613_v51, %v615_v36  ;;  %v1015_v23 = vunpack.i.h.bf16 %v1013_v9  ;;  %v541_v50 = vsel %vm342_vm0, %v539_v31, %v540_v14 }
  0xb5   : > { %v562_v27 = vmul.f32 %v1000_v37, %v1192_v26  ;;  %v640_v12 = vmul.f32 %v1000_v37, %v1165_v62  ;;  %v479_v24 = vadd.f32 %v475_v35, %v450_v39  ;;  %v502_v28 = vmul.f32 %v999_v38, %v1180_v17 }
  0xb6   : > { %v701_v41 = vrot.slane %v695_v33, 1  ;;  %v620_v42 = vadd.f32 %v616_v11, %v1215_v30  ;;  %v622_v18 = vmul.f32 %v999_v38, %v1178_v16  ;;  %v633_v29 = vsel %vm342_vm0, %v631_v32, %v632_v21 }
  0xb7   : > { %v646_v43 = vrot.slane %v640_v12, 2  ;;  %v504_v36 = vadd.f32 %v502_v28, %v479_v24  ;;  %v543_v51 = vsel %vm342_vm0, %v540_v14, %v542_v48  ;;  %v546_v44 = vadd.f32 %v541_v50, %v503_v40 }
  0xb8   : > { %v624_v45 = vadd.f32 %v622_v18, %v620_v42  ;;  %v1014_v62 = vunpack.i.l.bf16 %v1013_v9  ;;  %v1010_v46 = vunpack.i.h.bf16 %v1008_v49  ;;  %v568_v47 = vrot.slane %v562_v27, 2 }
  0xb9   : > { %v635_v52 = vsel %vm342_vm0, %v632_v21, %v634_v7  ;;  %v717_v53 = vmul.f32 %v1015_v23, %v1192_v26  ;;  %v1009_v54 = vunpack.i.l.bf16 %v1008_v49  ;;  %v547_v55 = vadd.f32 %v543_v51, %v504_v36 }
  0xba   : > { %v639_v30 = vadd.f32 %v635_v52, %v624_v45  ;;  %v670_v16 = vmul.f32 %v1010_v46, %v1180_v17  ;;  %v638_v56 = vadd.f32 %v633_v29, %v623_v6  ;;  %v650_v57 = vsel %vm372_vm1, %v647_v25, %v649_v13 }
  0xbb   : > { %v648_v58 = vsel %vm372_vm1, %v646_v43, %v647_v25  ;;  %v697_v48 = vmul.f32 %v1009_v54, %v1184_v22  ;;  %v719_v59 = vmul.f32 %v1009_v54, %v1192_v26  ;;  %v572_v60 = vsel %vm372_vm1, %v569_v19, %v571_v5  ;;  %v883_v26 = vld [vmem:[%s1324_s3] ss:$0 sm:$0xff] }
  0xbc   : > { %v654_v63 = vadd.f32 %v650_v57, %v639_v30  ;;  %v671_v0 = vmul.f32 %v1014_v62, %v1180_v17  ;;  %v653_v1 = vadd.f32 %v648_v58, %v638_v56  ;;  %v570_v2 = vsel %vm372_vm1, %v568_v47, %v569_v19 }
  0xbd   : > { %v723_v3 = vrot.slane %v717_v53, 2  ;;  %v704_v4 = vrot.slane %v697_v48, 1  ;;  %v726_v7 = vrot.slane %v719_v59, 2  ;;  %v575_v6 = vadd.f32 %v570_v2, %v546_v44 }
  0xbe   : > { %v576_v8 = vadd.f32 %v572_v60, %v547_v55  ;;  %v673_v10 = vadd.f32 %v671_v0, %v654_v63  ;;  %v672_v13 = vadd.f32 %v670_v16, %v653_v1  ;;  %v724_v22 = vrot.slane %v1255_v61, 2 }
  0xbf   : > { %v703_v5 = vsel %vm342_vm0, %v701_v41, %v702_v15  ;;  %v705_v17 = vsel %vm342_vm0, %v702_v15, %v704_v4  ;;  %v583_v25 = vadd.f32 %v883_v26, %v575_v6 }
  0xc0   : > { %v708_v14 = vadd.f32 %v703_v5, %v672_v13  ;;  %v709_v20 = vadd.f32 %v705_v17, %v673_v10  ;;  %v725_v19 = vsel %vm372_vm1, %v723_v3, %v724_v22  ;;  %v727_v21 = vsel %vm372_vm1, %v724_v22, %v726_v7 }
  0xc1   : > { %v584_v9 = vadd.f32 %v883_v26, %v576_v8  ;;  %v585_v34 = vmax.f32 %v583_v25, 0.0 }
  0xc2   : > { %v730_v31 = vadd.f32 %v725_v19, %v708_v14  ;;  %v731_v61 = vadd.f32 %v727_v21, %v709_v20 }
  0xc3   : > { %v586_v35 = vmax.f32 %v584_v9, 0.0 }
  0xc4   : > { %v732_v32 = vadd.f32 %v883_v26, %v730_v31  ;;  %v733_v33 = vadd.f32 %v883_v26, %v731_v61 }
  0xc6   : > { %v734_v37 = vmax.f32 %v732_v32, 0.0  ;;  %v735_v38 = vmax.f32 %v733_v33, 0.0 }
  0xc8   : > { %v736_v39 = vmax.f32 %v585_v34, %v734_v37  ;;  %v737_v40 = vmax.f32 %v586_v35, %v735_v38 }
  0xca   : > { %739 = vst.msk [vmem:[#allocation2] sm:$0xff] %vm738_vm2, %v736_v39  ;;  %740 = vst.msk [vmem:[#allocation2 + $0x8] sm:$0xff] %vm738_vm2, %v737_v40 }
  0xd1   : > { %v741_v15 = vld [vmem:[#allocation2] ss:$2 sm:$0xff]  ;;  %v743_v11 = vld [vmem:[#allocation2 + $0x1] ss:$2 sm:$0xff] }
  0xd2   : > { %v744_v23 = vmax.f32 %v741_v15, %v743_v11 }
  0xd4   : > { %v745_v27 = vpack.c.bf16 %v744_v23, %v744_v23 }
  0xd6   : > { %747 = vst.msk [vmem:[%s282_s26] sm:$0xf] %vm746_vm3, %v745_v27 }
  0xd7 PF: > { %s14_s19 = sadd.s32 1, %s1054_s19   ;;  %s1327_s15 = smov %s1046_s17 }
  0xd8   : > { %p11_p9 = scmp.ge.s32.totalorder %s14_s19, 34   ;;  %s1328_s16 = smov %s1050_s18 }
  0xd9   : > { %s1329_s17 = smov %s1332_s20  ;;  %s1330_s18 = smov %s1336_s21 }
  0xda   :  { %13 = sbr.rel (!%p11_p9) target bundleno = 3 (0x3), region = 80 }

// kernel: crnn_forward.8
= control target key start
LH: loop header
LB: loop body
LE: loop exit
PB: predicated region body
PF: predicated region fallthrough
CT: control target
= control target key end

     0   :  { %s2173_s15 = smov 0   ;;  %s2175_s16 = smov 0   ;;  %s2669_s0 = inlined_call_operand.vmem [shape: bf16[2,18,10,64], index: 0, kind: input, shape index: {}, may-alias: {0,1}]   ;;  %s2670_s1 = inlined_call_operand.vmem [shape: bf16[2,18,10,64], index: 1, kind: input, shape index: {}, may-alias: {0,1}]   ;;  %s2671_s2 = inlined_call_operand.vmem [shape: bf16[9,64,128], index: 2, kind: input, shape index: {}]   ;;  %s2672_s3 = inlined_call_operand.vmem [shape: f32[1,128], index: 3, kind: input, shape index: {}]   ;;  %s2673_s4 = inlined_call_operand.vmem [shape: bf16[2,8,4,128], index: 4, kind: output, shape index: {}]  }
   0x1   :  { %s2177_s17 = smov 0   ;;  %s2179_s18 = smov 0  }
   0x2   :  { %s2181_s19 = smov 0  }
   0x3 LB: > { %s23_s20 = sadd.s32 1, %s2136_s17  ;;  %s26_s21 = sadd.s32 1, %s2140_s18  ;;  %s2144_s19 = sphi %s2181_s19, %s14_s19   ;;  %s2140_s18 = sphi %s2179_s18, %s2677_s18   ;;  %s2136_s17 = sphi %s2177_s17, %s2676_s17   ;;  %s2132_s16 = sphi %s2175_s16, %s2675_s16   ;;  %s2128_s15 = sphi %s2173_s15, %s2674_s15  }
   0x4   : > { %p24_p0 = scmp.ge.s32.totalorder %s23_s20, 8  ;;  %p1565_p1 = scmp.ge.s32.totalorder %s2144_s19, 1 }
   0x5   : > { %p206_p2 = scmp.lt.s32.totalorder %s2144_s19, 17 }
   0x6   : > { %s2679_s20 = smov (%p24_p0, %s23_s20), 0  ;;  %s2681_s21 = smov (!%p24_p0, %s26_s21), %s2140_s18 }
   0x7   : > { %p207_p3 = pnand %p1565_p1, %p206_p2  ;;  %p28_p4 = scmp.ge.s32.totalorder %s2681_s21, 2 }
   0x8   : > { %s2228_s28 = sshll.u32 (!%p207_p3), %s2128_s15, 1  ;;  %p252_p5 = scmp.lt.s32.totalorder (!%p207_p3), %s2132_s16, 1 }
   0x9   : > { %s2683_s21 = smov (%p28_p4, %s2681_s21), 0  ;;  %210 = sbr.rel (%p207_p3) target bundleno = 375 (0x177), region = 36 }
   0xa   : > { %p254_p6 = scmp.lt.s32.totalorder (!%p207_p3), %s2228_s28, 17  ;;  %p277_p8 = scmp.lt.s32.totalorder (!%p207_p3), %s2128_s15, 7 }
   0xe   : > { %v2210_v0 = vld [vmem:[%s2671_s2 + $0x38] sm:$0xff]   ;;  %v2146_v1 = vmov 0.0   ;;  %v2223_v3 = vld [vmem:[%s2671_s2 + $0x30] sm:$0xff]   ;;  %vm2147_vm0 = vmmov 0   ;;  %s2685_s16 = smov (!%p252_p5, %s2132_s16), 1  ;;  %v2249_v5 = vld [vmem:[%s2671_s2 + $0x28] sm:$0xff]  }
   0xf   : > { %1803 = vmatprep.subr.bf16.mxu0 %v2146_v1  ;;  %1815 = vmatprep.subr.bf16.mxu1 %v2146_v1  ;;  %v2217_v2 = vld [vmem:[%s2671_s2 + $0x18] sm:$0xff]   ;;  %v2235_v4 = vld [vmem:[%s2671_s2 + $0x10] sm:$0xff]   ;;  %s255_s7 = scalar_select %p254_p6, %s2228_s28, 17  ;;  %v2257_v6 = vld [vmem:[%s2671_s2 + $0x8] sm:$0xff]   ;;  %vm340_vm1 = vcmask 523264  }
  0x10   : > { %1804 = vmatpush3.bf16.msra.mxu0 %v2210_v0  ;;  %1811 = vmatprep.mubr.msk.bf16.mxu0 %vm2147_vm0, %v2146_v1  ;;  %s2019_s10 = smul.u32 36, %s2685_s16  ;;  %v2264_v7 = vld [vmem:[%s2671_s2 + $0x20] sm:$0xff]   ;;  %v2290_v14 = vld [vmem:[%s2671_s2 + $0x78] sm:$0xff]   ;;  %v2303_v18 = vld [vmem:[%s2671_s2 + $0x70] sm:$0xff]   ;;  %s2689_s15 = smov (!%p277_p8, %s2128_s15), 7 }
  0x11   : > { %1816 = vmatpush3.bf16.msra.mxu1 %v2217_v2  ;;  %1805 = vmatprep.subr.bf16.mxu0 %v2146_v1  ;;  %s1567_s11 = sshll.u32 %s255_s7, 1  ;;  %v2272_v8 = vld [vmem:[%s2671_s2] sm:$0xff]   ;;  %v2297_v16 = vld [vmem:[%s2671_s2 + $0x58] sm:$0xff]   ;;  %v2313_v19 = vld [vmem:[%s2671_s2 + $0x50] sm:$0xff]  }
  0x12   : > { %1817 = vmatprep.subr.bf16.mxu1 %v2146_v1  ;;  %1823 = vmatprep.mubr.msk.bf16.mxu1 %vm2147_vm0, %v2146_v1  ;;  %s258_s14 = sadd.s32 %s2019_s10, %s1567_s11  ;;  %v2322_v20 = vld [vmem:[%s2671_s2 + $0x68] sm:$0xff]   ;;  %v2338_v23 = vld [vmem:[%s2671_s2 + $0x60] sm:$0xff]   ;;  %v2355_v27 = vld [vmem:[%s2671_s2 + $0xb8] sm:$0xff]  }
  0x13   : > { %s1568_s24 = sshll.u32 %s258_s14, 2  ;;  %s1712_s14 = sadd.s32 2, %s2228_s28  ;;  %v2331_v22 = vld [vmem:[%s2671_s2 + $0x48] sm:$0xff]   ;;  %v2344_v25 = vld [vmem:[%s2671_s2 + $0x40] sm:$0xff]   ;;  %v2361_v29 = vld [vmem:[%s2671_s2 + $0x98] sm:$0xff]  }
  0x14   : > { %1806 = vmatpush3.bf16.msra.mxu0 %v2223_v3  ;;  %s2279_s27 = scalar_lea.vmem %s2669_s0, %s1568_s24  ;;  %p266_p7 = scmp.lt.s32.totalorder %s1712_s14, 17  ;;  %v2373_v32 = vld [vmem:[%s2671_s2 + $0xb0] sm:$0xff]   ;;  %v2394_v35 = vld [vmem:[%s2671_s2 + $0xa8] sm:$0xff]   ;;  %v2409_v40 = vld [vmem:[%s2671_s2 + $0xa0] sm:$0xff]  }
  0x15   : > { %1818 = vmatpush3.bf16.msra.mxu1 %v2235_v4  ;;  %1807 = vmatprep.subr.bf16.mxu0 %v2146_v1  ;;  %v293_v9 = vld [vmem:[%s2279_s27] sm:$0xf]  ;;  %v303_v10 = vld [vmem:[%s2279_s27 + $0x4] sm:$0x1]  ;;  %v2347_v26 = vld [vmem:[%s2279_s27 + $0x8] sm:$0xf] }
  0x16   : > { %1819 = vmatprep.subr.bf16.mxu1 %v2146_v1  ;;  %v1582_v11 = vcombine.low %v293_v9, %v303_v10  ;;  %v460_v21 = vld [vmem:[%s2279_s27] sm:$0xe]  ;;  %s2687_s14 = smov (!%p266_p7, %s1712_s14), 17  ;;  %v1629_v30 = vld [vmem:[%s2279_s27 + $0x8] sm:$0xf]  ;;  %v2383_v34 = vld [vmem:[%s2671_s2 + $0x90] sm:$0xff]  }
  0x17   : > { %v1601_v24 = vcombine.low %v460_v21, %v303_v10  ;;  %v1630_v31 = vld [vmem:[%s2279_s27 + $0xc] sm:$0x1]  ;;  %s1570_s9 = sshll.u32 %s2687_s14, 1  ;;  %v1645_v36 = vld [vmem:[%s2279_s27 + $0x8] sm:$0xe]  ;;  %v2421_v43 = vld [vmem:[%s2671_s2 + $0x80] sm:$0xff]  }
  0x18   : > { %1808 = vmatpush3.bf16.msra.mxu0 %v2249_v5  ;;  %v310_v12 = vshrl.u32 %v1582_v11, 16  ;;  %v312_v13 = vshll.u32 %v1582_v11, 16  ;;  %v1631_v33 = vcombine.low %v1629_v30, %v1630_v31  ;;  %s270_s13 = sadd.s32 %s2019_s10, %s1570_s9  ;;  %v2402_v38 = vld [vmem:[%s2671_s2 + $0x88] sm:$0xff]   ;;  %v1646_v39 = vcombine.low %v1645_v36, %v1630_v31  ;;  %v2430_v45 = vld [vmem:[%s2671_s2 + $0xf8] sm:$0xff]   ;;  %v2448_v51 = vld [vmem:[%s2671_s2 + $0xf0] sm:$0xff]   ;;  %s1572_s14 = sshll.u32 %s2685_s16, 3 }
  0x19   : > { %1820 = vmatpush3.bf16.msra.mxu1 %v2257_v6  ;;  %1809 = vmatprep.subr.bf16.mxu0 %v2146_v1  ;;  %v464_v28 = vrot.slane %v1601_v24, 1  ;;  %s1571_s23 = sshll.u32 %s270_s13, 2  ;;  %v2441_v49 = vld [vmem:[%s2671_s2 + $0xd8] sm:$0xff]   ;;  %v2458_v52 = vld [vmem:[%s2671_s2 + $0xd0] sm:$0xff]   ;;  %v2467_v54 = vld [vmem:[%s2671_s2 + $0xe8] sm:$0xff]   ;;  %s280_s22 = sadd.s32 %s1572_s14, %s2689_s15 }
  0x1a   : > { %1821 = vmatprep.subr.bf16.mxu1 %v2146_v1  ;;  %v314_v15 = vrot.slane %v312_v13, 1  ;;  %v631_v37 = vshll.u32 %v1631_v33, 16  ;;  %s2415_s29 = scalar_lea.vmem %s2670_s1, %s1571_s23  ;;  %v629_v41 = vshrl.u32 %v1631_v33, 16  ;;  %v2423_v44 = vrot.slane %v1646_v39, 1  ;;  %v2474_v55 = vld [vmem:[%s2671_s2 + $0xc8] sm:$0xff]   ;;  %v2481_v58 = vld [vmem:[%s2671_s2 + $0xe0] sm:$0xff]  }
  0x1b   : > { %v872_v46 = vld [vmem:[%s2415_s29] sm:$0xf]  ;;  %v873_v47 = vld [vmem:[%s2415_s29 + $0x4] sm:$0x1]  ;;  %v2504_v62 = vld [vmem:[%s2671_s2 + $0x118] sm:$0xff]   ;;  %s1573_s23 = sshll.u32 %s280_s22, 1 }
  0x1c   : > { %1810 = vmatpush3.bf16.msra.mxu0 %v2264_v7  ;;  %v315_v17 = vor.u32 %v314_v15, %v310_v12  ;;  %v633_v42 = vrot.slane %v631_v37, 1  ;;  %v1673_v50 = vcombine.low %v872_v46, %v873_v47  ;;  %v2488_v59 = vld [vmem:[%s2671_s2 + $0xc0] sm:$0xff]   ;;  %v2517_v63 = vld [vmem:[%s2671_s2 + $0x110] sm:$0xff]   ;;  %s282_s10 = scalar_lea.vmem %s2673_s4, %s1573_s23 }
  0x1d   : > { %1822 = vmatpush3.bf16.msra.mxu1 %v2272_v8  ;;  %1827 = vmatprep.subr.bf16.mxu0 %v2146_v1  ;;  %v2497_v61 = vld [vmem:[%s2415_s29] sm:$0xf] }
  0x1e   : > { %1839 = vmatprep.subr.bf16.mxu1 %v2146_v1  ;;  %v634_v48 = vor.u32 %v633_v42, %v629_v41  ;;  %v882_v53 = vshll.u32 %v1673_v50, 16  ;;  %v880_v56 = vshrl.u32 %v1673_v50, 16 }
  0x1f   : > { %1812 = vmatmul.mubr.msk.bf16.vlgmr.msra.gmra.mxu0 %vm340_vm1, %v315_v17 }
  0x20   : > { %1824 = vmatmul.mubr.msk.bf16.vlgmr.msra.gmra.mxu1 %vm340_vm1, %v293_v9  ;;  %1828 = vmatpush3.bf16.msra.mxu0 %v2297_v16  ;;  %v884_v57 = vrot.slane %v882_v53, 1  ;;  %v963_v9 = vld [vmem:[%s2415_s29] sm:$0xe] }
  0x21   : > { %1840 = vmatpush3.bf16.msra.mxu1 %v2290_v14  ;;  %1847 = vmatprep.mubr.msk.bf16.mxu1 %vm2147_vm0, %v2146_v1  ;;  %v1687_v10 = vcombine.low %v963_v9, %v873_v47 }
  0x22   : > { %1841 = vmatprep.subr.bf16.mxu1 %v2146_v1  ;;  %1835 = vmatprep.mubr.msk.bf16.mxu0 %vm2147_vm0, %v2146_v1  ;;  %v2490_v60 = vor.u32 %v884_v57, %v880_v56 }
  0x23   : > { %1829 = vmatprep.subr.bf16.mxu0 %v2146_v1  ;;  %v2543_v11 = vrot.slane %v1687_v10, 1 }
  0x24   : > { %1830 = vmatpush3.bf16.msra.mxu0 %v2313_v19 }
  0x25   : > { %1842 = vmatpush3.bf16.msra.mxu1 %v2303_v18  ;;  %1831 = vmatprep.subr.bf16.mxu0 %v2146_v1 }
  0x26   : > { %1843 = vmatprep.subr.bf16.mxu1 %v2146_v1 }
  0x28   : > { %1832 = vmatpush3.bf16.msra.mxu0 %v2331_v22 }
  0x29   : > { %1844 = vmatpush3.bf16.msra.mxu1 %v2322_v20  ;;  %1833 = vmatprep.subr.bf16.mxu0 %v2146_v1 }
  0x2a   : > { %1845 = vmatprep.subr.bf16.mxu1 %v2146_v1 }
  0x2c   : > { %1834 = vmatpush3.bf16.msra.mxu0 %v2344_v25 }
  0x2d   : > { %1846 = vmatpush3.bf16.msra.mxu1 %v2338_v23  ;;  %1851 = vmatprep.subr.bf16.mxu0 %v2146_v1 }
  0x2e   : > { %1863 = vmatprep.subr.bf16.mxu1 %v2146_v1 }
  0x2f   : > { %1836 = vmatmul.mubr.msk.bf16.vlgmr.msra.gmra.mxu0 %vm340_vm1, %v464_v28 }
  0x30   : > { %1848 = vmatmul.mubr.msk.bf16.vlgmr.msra.gmra.mxu1 %vm340_vm1, %v2347_v26  ;;  %1852 = vmatpush3.bf16.msra.mxu0 %v2361_v29 }
  0x31   : > { %1864 = vmatpush3.bf16.msra.mxu1 %v2355_v27  ;;  %1871 = vmatprep.mubr.msk.bf16.mxu1 %vm2147_vm0, %v2146_v1 }
  0x32   : > { %1865 = vmatprep.subr.bf16.mxu1 %v2146_v1  ;;  %1859 = vmatprep.mubr.msk.bf16.mxu0 %vm2147_vm0, %v2146_v1 }
  0x33   : > { %1853 = vmatprep.subr.bf16.mxu0 %v2146_v1 }
  0x34   : > { %1854 = vmatpush3.bf16.msra.mxu0 %v2383_v34 }
  0x35   : > { %1866 = vmatpush3.bf16.msra.mxu1 %v2373_v32  ;;  %1855 = vmatprep.subr.bf16.mxu0 %v2146_v1 }
  0x36   : > { %1867 = vmatprep.subr.bf16.mxu1 %v2146_v1 }
  0x38   : > { %1856 = vmatpush3.bf16.msra.mxu0 %v2402_v38 }
  0x39   : > { %1868 = vmatpush3.bf16.msra.mxu1 %v2394_v35  ;;  %1857 = vmatprep.subr.bf16.mxu0 %v2146_v1 }
  0x3a   : > { %1869 = vmatprep.subr.bf16.mxu1 %v2146_v1 }
  0x3c   : > { %1858 = vmatpush3.bf16.msra.mxu0 %v2421_v43 }
  0x3d   : > { %1870 = vmatpush3.bf16.msra.mxu1 %v2409_v40  ;;  %1875 = vmatprep.subr.bf16.mxu0 %v2146_v1 }
  0x3e   : > { %1887 = vmatprep.subr.bf16.mxu1 %v2146_v1 }
  0x3f   : > { %1860 = vmatmul.mubr.msk.bf16.vlgmr.msra.gmra.mxu0 %vm340_vm1, %v634_v48 }
  0x40   : > { %1872 = vmatmul.mubr.msk.bf16.vlgmr.msra.gmra.mxu1 %vm340_vm1, %v2423_v44  ;;  %1876 = vmatpush3.bf16.msra.mxu0 %v2441_v49 }
  0x41   : > { %1888 = vmatpush3.bf16.msra.mxu1 %v2430_v45  ;;  %1895 = vmatprep.mubr.msk.bf16.mxu1 %vm2147_vm0, %v2146_v1 }
  0x42   : > { %1889 = vmatprep.subr.bf16.mxu1 %v2146_v1  ;;  %1883 = vmatprep.mubr.msk.bf16.mxu0 %vm2147_vm0, %v2146_v1 }
  0x43   : > { %1877 = vmatprep.subr.bf16.mxu0 %v2146_v1 }
  0x44   : > { %1878 = vmatpush3.bf16.msra.mxu0 %v2458_v52 }
  0x45   : > { %1890 = vmatpush3.bf16.msra.mxu1 %v2448_v51  ;;  %1879 = vmatprep.subr.bf16.mxu0 %v2146_v1 }
  0x46   : > { %1891 = vmatprep.subr.bf16.mxu1 %v2146_v1 }
  0x48   : > { %1880 = vmatpush3.bf16.msra.mxu0 %v2474_v55 }
  0x49   : > { %1892 = vmatpush3.bf16.msra.mxu1 %v2467_v54  ;;  %1881 = vmatprep.subr.bf16.mxu0 %v2146_v1 }
  0x4a   : > { %1893 = vmatprep.subr.bf16.mxu1 %v2146_v1 }
  0x4c   : > { %1882 = vmatpush3.bf16.msra.mxu0 %v2488_v59 }
  0x4d   : > { %1894 = vmatpush3.bf16.msra.mxu1 %v2481_v58  ;;  %1899 = vmatprep.subr.bf16.mxu0 %v2146_v1 }
  0x4e   : > { %1911 = vmatprep.subr.bf16.mxu1 %v2146_v1 }
  0x4f   : > { %1884 = vmatmul.mubr.msk.bf16.vlgmr.msra.gmra.mxu0 %vm340_vm1, %v2497_v61 }
  0x50   : > { %1896 = vmatmul.mubr.msk.bf16.vlgmr.msra.gmra.mxu1 %vm340_vm1, %v2490_v60  ;;  %1900 = vmatpush3.bf16.msra.mxu0 %v2504_v62 }
  0x51   : > { %1912 = vmatpush3.bf16.msra.mxu1 %v2210_v0  ;;  %1919 = vmatprep.mubr.msk.bf16.mxu1 %vm2147_vm0, %v2146_v1  ;;  %v2528_v0 = vld [vmem:[%s2671_s2 + $0x108] sm:$0xff]  }
  0x52   : > { %1913 = vmatprep.subr.bf16.mxu1 %v2146_v1  ;;  %1907 = vmatprep.mubr.msk.bf16.mxu0 %vm2147_vm0, %v2146_v1 }
  0x53   : > { %1901 = vmatprep.subr.bf16.mxu0 %v2146_v1 }
  0x54   : > { %1902 = vmatpush3.bf16.msra.mxu0 %v2517_v63 }
  0x55   : > { %1914 = vmatpush3.bf16.msra.mxu1 %v2223_v3  ;;  %1903 = vmatprep.subr.bf16.mxu0 %v2146_v1  ;;  %v2538_v3 = vld [vmem:[%s2671_s2 + $0x100] sm:$0xff]  }
  0x56   : > { %1915 = vmatprep.subr.bf16.mxu1 %v2146_v1 }
  0x58   : > { %1904 = vmatpush3.bf16.msra.mxu0 %v2528_v0 }
  0x59   : > { %1916 = vmatpush3.bf16.msra.mxu1 %v2249_v5  ;;  %1905 = vmatprep.subr.bf16.mxu0 %v2146_v1  ;;  %v1703_v5 = vld [vmem:[%s2415_s29 + $0xc] sm:$0x1] }
  0x5a   : > { %1917 = vmatprep.subr.bf16.mxu1 %v2146_v1 }
  0x5c   : > { %1906 = vmatpush3.bf16.msra.mxu0 %v2538_v3 }
  0x5d   : > { %1918 = vmatpush3.bf16.msra.mxu1 %v2264_v7  ;;  %1923 = vmatprep.subr.bf16.mxu0 %v2146_v1  ;;  %v1706_v7 = vld [vmem:[%s2415_s29 + $0x8] sm:$0xe] }
  0x5e   : > { %1935 = vmatprep.subr.bf16.mxu1 %v2146_v1  ;;  %v1707_v12 = vcombine.low %v1706_v7, %v1703_v5 }
  0x5f   : > { %1908 = vmatmul.mubr.msk.bf16.vlgmr.msra.gmra.mxu0 %vm340_vm1, %v2543_v11 }
  0x60   : > { %1920 = vmatmul.mubr.msk.bf16.vlgmr.msra.gmra.mxu1 %vm340_vm1, %v634_v48  ;;  %1924 = vmatpush3.bf16.msra.mxu0 %v2217_v2  ;;  %v1700_v2 = vld [vmem:[%s2415_s29 + $0x8] sm:$0xf]  ;;  %v1396_v15 = vrot.slane %v1707_v12, 1 }
  0x61   : > { %1936 = vmatpush3.bf16.msra.mxu1 %v2297_v16  ;;  %1943 = vmatprep.mubr.msk.bf16.mxu1 %vm2147_vm0, %v2146_v1 }
  0x62   : > { %1937 = vmatprep.subr.bf16.mxu1 %v2146_v1  ;;  %1931 = vmatprep.mubr.msk.bf16.mxu0 %vm2147_vm0, %v2146_v1 }
  0x63   : > { %1925 = vmatprep.subr.bf16.mxu0 %v2146_v1 }
  0x64   : > { %1926 = vmatpush3.bf16.msra.mxu0 %v2235_v4  ;;  %v1702_v4 = vld [vmem:[%s2415_s29 + $0x8] sm:$0xf] }
  0x65   : > { %1938 = vmatpush3.bf16.msra.mxu1 %v2313_v19  ;;  %1927 = vmatprep.subr.bf16.mxu0 %v2146_v1 }
  0x66   : > { %1939 = vmatprep.subr.bf16.mxu1 %v2146_v1 }
  0x68   : > { %1928 = vmatpush3.bf16.msra.mxu0 %v2257_v6  ;;  %v1704_v6 = vcombine.low %v1702_v4, %v1703_v5 }
  0x69   : > { %1940 = vmatpush3.bf16.msra.mxu1 %v2331_v22  ;;  %1929 = vmatprep.subr.bf16.mxu0 %v2146_v1 }
  0x6a   : > { %1941 = vmatprep.subr.bf16.mxu1 %v2146_v1  ;;  %v1342_v13 = vshrl.u32 %v1704_v6, 16 }
  0x6c   : > { %1930 = vmatpush3.bf16.msra.mxu0 %v2272_v8  ;;  %v1344_v8 = vshll.u32 %v1704_v6, 16 }
  0x6d   : > { %1942 = vmatpush3.bf16.msra.mxu1 %v2344_v25  ;;  %1947 = vmatprep.subr.bf16.mxu0 %v2146_v1 }
  0x6e   : > { %1959 = vmatprep.subr.bf16.mxu1 %v2146_v1 }
  0x6f   : > { %1932 = vmatmul.mubr.msk.bf16.vlgmr.msra.gmra.mxu0 %vm340_vm1, %v2347_v26 }
  0x70   : > { %1944 = vmatmul.mubr.msk.bf16.vlgmr.msra.gmra.mxu1 %vm340_vm1, %v2423_v44  ;;  %1948 = vmatpush3.bf16.msra.mxu0 %v2290_v14  ;;  %v1346_v14 = vrot.slane %v1344_v8, 1 }
  0x71   : > { %1960 = vmatpush3.bf16.msra.mxu1 %v2361_v29  ;;  %1967 = vmatprep.mubr.msk.bf16.mxu1 %vm2147_vm0, %v2146_v1 }
  0x72   : > { %1961 = vmatprep.subr.bf16.mxu1 %v2146_v1  ;;  %1955 = vmatprep.mubr.msk.bf16.mxu0 %vm2147_vm0, %v2146_v1  ;;  %v1347_v16 = vor.u32 %v1346_v14, %v1342_v13 }
  0x73   : > { %1949 = vmatprep.subr.bf16.mxu0 %v2146_v1 }
  0x74   : > { %1950 = vmatpush3.bf16.msra.mxu0 %v2303_v18 }
  0x75   : > { %1962 = vmatpush3.bf16.msra.mxu1 %v2383_v34  ;;  %1951 = vmatprep.subr.bf16.mxu0 %v2146_v1 }
  0x76   : > { %1963 = vmatprep.subr.bf16.mxu1 %v2146_v1 }
  0x78   : > { %1952 = vmatpush3.bf16.msra.mxu0 %v2322_v20 }
  0x79   : > { %1964 = vmatpush3.bf16.msra.mxu1 %v2402_v38  ;;  %1953 = vmatprep.subr.bf16.mxu0 %v2146_v1 }
  0x7a   : > { %1965 = vmatprep.subr.bf16.mxu1 %v2146_v1 }
  0x7c   : > { %1954 = vmatpush3.bf16.msra.mxu0 %v2338_v23 }
  0x7d   : > { %1966 = vmatpush3.bf16.msra.mxu1 %v2421_v43  ;;  %1971 = vmatprep.subr.bf16.mxu0 %v2146_v1 }
  0x7e   : > { %1983 = vmatprep.subr.bf16.mxu1 %v2146_v1 }
  0x7f   : > { %1956 = vmatmul.mubr.msk.bf16.vlgmr.msra.gmra.mxu0 %vm340_vm1, %v2497_v61 }
  0x80   : > { %1968 = vmatmul.mubr.msk.bf16.vlgmr.msra.gmra.mxu1 %vm340_vm1, %v2490_v60  ;;  %1972 = vmatpush3.bf16.msra.mxu0 %v2355_v27 }
  0x81   : > { %1984 = vmatpush3.bf16.msra.mxu1 %v2441_v49  ;;  %1991 = vmatprep.mubr.msk.bf16.mxu1 %vm2147_vm0, %v2146_v1 }
  0x82   : > { %1985 = vmatprep.subr.bf16.mxu1 %v2146_v1  ;;  %1979 = vmatprep.mubr.msk.bf16.mxu0 %vm2147_vm0, %v2146_v1 }
  0x83   : > { %1973 = vmatprep.subr.bf16.mxu0 %v2146_v1 }
  0x84   : > { %1974 = vmatpush3.bf16.msra.mxu0 %v2373_v32 }
  0x85   : > { %1986 = vmatpush3.bf16.msra.mxu1 %v2458_v52  ;;  %1975 = vmatprep.subr.bf16.mxu0 %v2146_v1 }
  0x86   : > { %1987 = vmatprep.subr.bf16.mxu1 %v2146_v1 }
  0x88   : > { %1976 = vmatpush3.bf16.msra.mxu0 %v2394_v35 }
  0x89   : > { %1988 = vmatpush3.bf16.msra.mxu1 %v2474_v55  ;;  %1977 = vmatprep.subr.bf16.mxu0 %v2146_v1 }
  0x8a   : > { %1989 = vmatprep.subr.bf16.mxu1 %v2146_v1 }
  0x8c   : > { %1978 = vmatpush3.bf16.msra.mxu0 %v2409_v40 }
  0x8d   : > { %1990 = vmatpush3.bf16.msra.mxu1 %v2488_v59  ;;  %1995 = vmatprep.subr.bf16.mxu0 %v2146_v1 }
  0x8e   : > { %2007 = vmatprep.subr.bf16.mxu1 %v2146_v1 }
  0x8f   : > { %1980 = vmatmul.mubr.msk.bf16.vlgmr.msra.gmra.mxu0 %vm340_vm1, %v2543_v11 }
  0x90   : > { %1992 = vmatmul.mubr.msk.bf16.vlgmr.msra.gmra.mxu1 %vm340_vm1, %v1700_v2  ;;  %1996 = vmatpush3.bf16.msra.mxu0 %v2430_v45 }
  0x91   : > { %2008 = vmatpush3.bf16.msra.mxu1 %v2504_v62  ;;  %2015 = vmatprep.mubr.msk.bf16.mxu1 %vm2147_vm0, %v2146_v1 }
  0x92   : > { %2009 = vmatprep.subr.bf16.mxu1 %v2146_v1  ;;  %2003 = vmatprep.mubr.msk.bf16.mxu0 %vm2147_vm0, %v2146_v1 }
  0x93   : > { %1997 = vmatprep.subr.bf16.mxu0 %v2146_v1 }
  0x94   : > { %1998 = vmatpush3.bf16.msra.mxu0 %v2448_v51 }
  0x95   : > { %2010 = vmatpush3.bf16.msra.mxu1 %v2517_v63  ;;  %1999 = vmatprep.subr.bf16.mxu0 %v2146_v1 }
  0x96   : > { %2011 = vmatprep.subr.bf16.mxu1 %v2146_v1 }
  0x98   : > { %2000 = vmatpush3.bf16.msra.mxu0 %v2467_v54 }
  0x99   : > { %2012 = vmatpush3.bf16.msra.mxu1 %v2528_v0  ;;  %2001 = vmatprep.subr.bf16.mxu0 %v2146_v1 }
  0x9a   : > { %2013 = vmatprep.subr.bf16.mxu1 %v2146_v1 }
  0x9c   : > { %2002 = vmatpush3.bf16.msra.mxu0 %v2481_v58 }
  0x9d   : > { %2014 = vmatpush3.bf16.msra.mxu1 %v2538_v3 }
  0x9f   : > { %2004 = vmatmul.mubr.msk.bf16.vlgmr.msra.gmra.mxu0 %vm340_vm1, %v1347_v16 }
  0xa0   : > { %2016 = vmatmul.mubr.msk.bf16.vlgmr.msra.gmra.mxu1 %vm340_vm1, %v1396_v15 }
  0xdf   : > { %v378_v19 = vpop.f32.mrf.mxu0 }
  0xe0   : > { %v445_v17 = vpop.f32.mrf.mxu1 }
  0xe1   : > { %v446_v20 = vadd.f32 %v445_v17, %v378_v19  ;;  %v1813_v22 = vpop.f32.mrf.mxu0 }
  0xe2   : > { %v1825_v18 = vpop.f32.mrf.mxu1 }
  0xe3   : > { %v381_v24 = vpop.f32.mrf.mxu0 }
  0xe4   : > { %v448_v21 = vpop.f32.mrf.mxu1 }
  0xe5   : > { %v1814_v25 = vpop.f32.mrf.mxu0 }
  0xe6   : > { %v1826_v23 = vpop.f32.mrf.mxu1 }
  0xef   : > { %v526_v27 = vpop.f32.mrf.mxu0 }
  0xf0   : > { %v605_v26 = vpop.f32.mrf.mxu1  ;;  %v532_v28 = vadd.f32 %v526_v27, %v446_v20 }
  0xf1   : > { %v1837_v30 = vpop.f32.mrf.mxu0 }
  0xf2   : > { %v1849_v1 = vpop.f32.mrf.mxu1  ;;  %v611_v31 = vadd.f32 %v605_v26, %v532_v28 }
  0xf3   : > { %v529_v33 = vpop.f32.mrf.mxu0 }
  0xf4   : > { %v608_v29 = vpop.f32.mrf.mxu1 }
  0xf5   : > { %v1838_v34 = vpop.f32.mrf.mxu0 }
  0xf6   : > { %v1850_v32 = vpop.f32.mrf.mxu1 }
  0xf7   : > { %v1693_v32 = vld [vmem:[%s2672_s3] ss:$0 sm:$0xff] }
  0xff   : > { %v696_v37 = vpop.f32.mrf.mxu0 }
 0x100   : > { %v778_v35 = vpop.f32.mrf.mxu1  ;;  %v702_v38 = vadd.f32 %v696_v37, %v611_v31 }
 0x101   : > { %v1861_v40 = vpop.f32.mrf.mxu0 }
 0x102   : > { %v1873_v36 = vpop.f32.mrf.mxu1  ;;  %v784_v41 = vadd.f32 %v778_v35, %v702_v38 }
 0x103   : > { %v699_v43 = vpop.f32.mrf.mxu0 }
 0x104   : > { %v781_v39 = vpop.f32.mrf.mxu1 }
 0x105   : > { %v1862_v44 = vpop.f32.mrf.mxu0 }
 0x106   : > { %v1874_v42 = vpop.f32.mrf.mxu1 }
 0x10f   : > { %v856_v47 = vpop.f32.mrf.mxu0 }
 0x110   : > { %v947_v45 = vpop.f32.mrf.mxu1  ;;  %v862_v48 = vadd.f32 %v856_v47, %v784_v41 }
 0x111   : > { %v1885_v50 = vpop.f32.mrf.mxu0 }
 0x112   : > { %v1897_v46 = vpop.f32.mrf.mxu1  ;;  %v953_v51 = vadd.f32 %v947_v45, %v862_v48 }
 0x113   : > { %v859_v53 = vpop.f32.mrf.mxu0 }
 0x114   : > { %v950_v49 = vpop.f32.mrf.mxu1 }
 0x115   : > { %v1886_v54 = vpop.f32.mrf.mxu0 }
 0x116   : > { %v1898_v52 = vpop.f32.mrf.mxu1 }
 0x11f   : > { %v1029_v57 = vpop.f32.mrf.mxu0 }
 0x120   : > { %v1078_v55 = vpop.f32.mrf.mxu1  ;;  %v1035_v58 = vadd.f32 %v1029_v57, %v953_v51 }
 0x121   : > { %v1909_v60 = vpop.f32.mrf.mxu0 }
 0x122   : > { %v1921_v56 = vpop.f32.mrf.mxu1  ;;  %v1042_v37 = vadd.f32 %v1693_v32, %v1035_v58 }
 0x123   : > { %v1032_v62 = vpop.f32.mrf.mxu0 }
 0x124   : > { %v1081_v59 = vpop.f32.mrf.mxu1  ;;  %v1043_v43 = vmax.f32 %v1042_v37, 0.0 }
 0x125   : > { %v1910_v63 = vpop.f32.mrf.mxu0 }
 0x126   : > { %v1922_v61 = vpop.f32.mrf.mxu1 }
 0x12f   : > { %v1118_v10 = vpop.f32.mrf.mxu0 }
 0x130   : > { %v1158_v0 = vpop.f32.mrf.mxu1  ;;  %v1119_v18 = vadd.f32 %v1118_v10, %v1078_v55 }
 0x131   : > { %v1933_v11 = vpop.f32.mrf.mxu0 }
 0x132   : > { %v1945_v9 = vpop.f32.mrf.mxu1  ;;  %v1164_v23 = vadd.f32 %v1158_v0, %v1119_v18 }
 0x133   : > { %v1121_v4 = vpop.f32.mrf.mxu0 }
 0x134   : > { %v1161_v3 = vpop.f32.mrf.mxu1 }
 0x135   : > { %v1934_v5 = vpop.f32.mrf.mxu0 }
 0x136   : > { %v1946_v2 = vpop.f32.mrf.mxu1 }
 0x13f   : > { %v1199_v8 = vpop.f32.mrf.mxu0 }
 0x140   : > { %v1240_v6 = vpop.f32.mrf.mxu1  ;;  %v1205_v26 = vadd.f32 %v1199_v8, %v1164_v23 }
 0x141   : > { %v1957_v13 = vpop.f32.mrf.mxu0 }
 0x142   : > { %v1969_v7 = vpop.f32.mrf.mxu1  ;;  %v1246_v27 = vadd.f32 %v1240_v6, %v1205_v26 }
 0x143   : > { %v1202_v15 = vpop.f32.mrf.mxu0 }
 0x144   : > { %v1243_v12 = vpop.f32.mrf.mxu1 }
 0x145   : > { %v1958_v16 = vpop.f32.mrf.mxu0 }
 0x146   : > { %v1970_v14 = vpop.f32.mrf.mxu1 }
 0x14f   : > { %v1281_v20 = vpop.f32.mrf.mxu0 }
 0x150   : > { %v1327_v17 = vpop.f32.mrf.mxu1  ;;  %v1287_v28 = vadd.f32 %v1281_v20, %v1246_v27 }
 0x151   : > { %v1981_v22 = vpop.f32.mrf.mxu0 }
 0x152   : > { %v1993_v19 = vpop.f32.mrf.mxu1  ;;  %v1333_v30 = vadd.f32 %v1327_v17, %v1287_v28 }
 0x153   : > { %v1284_v25 = vpop.f32.mrf.mxu0 }
 0x154   : > { %v1330_v21 = vpop.f32.mrf.mxu1 }
 0x155   : > { %v1982_v1 = vpop.f32.mrf.mxu0 }
 0x156   : > { %v1994_v24 = vpop.f32.mrf.mxu1 }
 0x15f   : > { %v1385_v33 = vpop.f32.mrf.mxu0 }
 0x160   : > { %v1434_v29 = vpop.f32.mrf.mxu1  ;;  %v1391_v34 = vadd.f32 %v1385_v33, %v1333_v30 }
 0x161   : > { %v2005_v36 = vpop.f32.mrf.mxu0 }
 0x162   : > { %v2017_v31 = vpop.f32.mrf.mxu1  ;;  %v1440_v38 = vadd.f32 %v1434_v29, %v1391_v34 }
 0x163   : > { %v1388_v40 = vpop.f32.mrf.mxu0 }
 0x164   : > { %v1437_v35 = vpop.f32.mrf.mxu1  ;;  %v1441_v41 = vadd.f32 %v1693_v32, %v1440_v38 }
 0x165   : > { %v2006_v42 = vpop.f32.mrf.mxu0 }
 0x166   : > { %v2018_v39 = vpop.f32.mrf.mxu1  ;;  %v1442_v44 = vmax.f32 %v1441_v41, 0.0 }
 0x168   : > { %v1443_v45 = vmax.f32 %v1043_v43, %v1442_v44 }
 0x16a   : > { %1444 = vst [vmem:[#allocation2] sm:$0xff] %v1443_v45 }
 0x171   : > { %v1445_v46 = vld [vmem:[#allocation2] ss:$2 sm:$0xf]  ;;  %v1447_v47 = vld [vmem:[#allocation2 + $0x1] ss:$2 sm:$0xf] }
 0x172   : > { %v1448_v48 = vmax.f32 %v1445_v46, %v1447_v47 }
 0x174   : > { %v1449_v49 = vpack.c.bf16 %v1448_v48, %v1448_v48 }
 0x176   : > { %1450 = vst [vmem:[%s282_s10] sm:$0x3] %v1449_v49 }
 0x177 PF: > { %s14_s19 = sadd.s32 1, %s2144_s19   ;;  %s2674_s15 = smov %s2136_s17 }
 0x178   : > { %p11_p9 = scmp.ge.s32.totalorder %s14_s19, 18   ;;  %s2675_s16 = smov %s2140_s18 }
 0x179   : > { %s2676_s17 = smov %s2679_s20  ;;  %s2677_s18 = smov %s2683_s21 }
 0x17a   :  { %13 = sbr.rel (!%p11_p9) target bundleno = 3 (0x3), region = 80 }

// kernel: crnn_forward.9
= control target key start
LH: loop header
LB: loop body
LE: loop exit
PB: predicated region body
PF: predicated region fallthrough
CT: control target
= control target key end

     0   :  { %s2778_s15 = smov 0   ;;  %s2780_s16 = smov 0   ;;  %s3930_s0 = inlined_call_operand.vmem [shape: bf16[2,10,6,128], index: 0, kind: input, shape index: {}, may-alias: {0,1}]   ;;  %s3931_s1 = inlined_call_operand.vmem [shape: bf16[2,10,6,128], index: 1, kind: input, shape index: {}, may-alias: {0,1}]   ;;  %s3932_s2 = inlined_call_operand.vmem [shape: bf16[9,128,256], index: 2, kind: input, shape index: {}]   ;;  %s3933_s3 = inlined_call_operand.vmem [shape: f32[1,256], index: 3, kind: input, shape index: {}]   ;;  %s3934_s4 = inlined_call_operand.vmem [shape: bf16[2,4,4,256], index: 4, kind: output, shape index: {}]  }
   0x1   :  { %s2782_s17 = smov 0   ;;  %s2784_s18 = smov 0  }
   0x2   :  { %s2786_s19 = smov 0  }
   0x3 LB: > { %s23_s20 = sadd.s32 1, %s2742_s17  ;;  %s26_s21 = sadd.s32 1, %s2746_s18  ;;  %s2750_s19 = sphi %s2786_s19, %s14_s19   ;;  %s2746_s18 = sphi %s2784_s18, %s4168_s18   ;;  %s2742_s17 = sphi %s2782_s17, %s4167_s17   ;;  %s2738_s16 = sphi %s2780_s16, %s4166_s16   ;;  %s2734_s15 = sphi %s2778_s15, %s4165_s15  }
   0x4   : > { %p24_p0 = scmp.ge.s32.totalorder %s23_s20, 4  ;;  %p2146_p1 = scmp.ge.s32.totalorder %s2750_s19, 1 }
   0x5   : > { %p204_p2 = scmp.lt.s32.totalorder %s2750_s19, 9 }
   0x6   : > { %s4170_s20 = smov (%p24_p0, %s23_s20), 0  ;;  %s4172_s21 = smov (!%p24_p0, %s26_s21), %s2746_s18 }
   0x7   : > { %p205_p3 = pnand %p2146_p1, %p204_p2  ;;  %p28_p4 = scmp.ge.s32.totalorder %s4172_s21, 2 }
   0x9   : > { %s4174_s21 = smov (%p28_p4, %s4172_s21), 0  ;;  %208 = sbr.rel (%p205_p3) target bundleno = 512 (0x200), region = 36 }
   0xe   : > { %v2815_v0 = vld [vmem:[%s3932_s2 + $0xf4] ss:$8 sps:$4 sm:$0xff]   ;;  %v3935_v2 = vmov 0   ;;  %s2825_s26 = sshll.u32 %s2734_s15, 1  ;;  %p249_p5 = scmp.lt.s32.totalorder %s2738_s16, 1 }
   0xf   : > { %v2820_v1 = vld [vmem:[%s3932_s2 + $0x74] ss:$8 sps:$4 sm:$0xff]   ;;  %439 = vmatprep.mubr.bf16.mxu0 %v3935_v2  ;;  %560 = vmatprep.mubr.bf16.mxu1 %v3935_v2  ;;  %v2832_v3 = vld [vmem:[%s3932_s2 + $0xf0] ss:$8 sps:$4 sm:$0xff]   ;;  %v2843_v5 = vld [vmem:[%s3932_s2 + $0xe4] ss:$8 sps:$4 sm:$0xff]  }
  0x10   : > { %407 = vmatprep.subr.bf16.mxu0 %v2815_v0  ;;  %v2837_v4 = vld [vmem:[%s3932_s2 + $0x70] ss:$8 sps:$4 sm:$0xff]   ;;  %528 = vmatprep.subr.bf16.mxu1 %v2820_v1  ;;  %s2445_s7 = sadd.s32 2, %s2825_s26  ;;  %v2851_v6 = vld [vmem:[%s3932_s2 + $0x64] ss:$8 sps:$4 sm:$0xff]   ;;  %p251_p6 = scmp.lt.s32.totalorder %s2825_s26, 9 }
  0x11   : > { %408 = vmatpush1.bf16.msra.mxu0 %v2832_v3  ;;  %529 = vmatpush1.bf16.msra.mxu1 %v2837_v4  ;;  %v2856_v7 = vld [vmem:[%s3932_s2 + $0xe0] ss:$8 sps:$4 sm:$0xff]   ;;  %s4176_s16 = smov (!%p249_p5, %s2738_s16), 1  ;;  %v2874_v9 = vld [vmem:[%s3932_s2 + $0xd4] ss:$8 sps:$4 sm:$0xff]   ;;  %p262_p7 = scmp.lt.s32.totalorder %s2445_s7, 9 }
  0x12   : > { %409 = vmatprep.subr.bf16.mxu0 %v2843_v5  ;;  %v2863_v8 = vld [vmem:[%s3932_s2 + $0x60] ss:$8 sps:$4 sm:$0xff]   ;;  %530 = vmatprep.subr.bf16.mxu1 %v2851_v6  ;;  %v2879_v10 = vld [vmem:[%s3932_s2 + $0x54] ss:$8 sps:$4 sm:$0xff]   ;;  %v2884_v11 = vld [vmem:[%s3932_s2 + $0xd0] ss:$8 sps:$4 sm:$0xff]  }
  0x13   : > { %v2889_v12 = vld [vmem:[%s3932_s2 + $0x50] ss:$8 sps:$4 sm:$0xff]   ;;  %v2896_v13 = vld [vmem:[%s3932_s2 + $0xc4] ss:$8 sps:$4 sm:$0xff]   ;;  %s4178_s26 = smov (!%p251_p6, %s2825_s26), 9  ;;  %s2446_s9 = smul.u32 10, %s4176_s16 }
  0x14   : > { %v2904_v14 = vld [vmem:[%s3932_s2 + $0x44] ss:$8 sps:$4 sm:$0xff]   ;;  %s4180_s7 = smov (!%p262_p7, %s2445_s7), 9  ;;  %v2910_v15 = vld [vmem:[%s3932_s2 + $0xc0] ss:$8 sps:$4 sm:$0xff]   ;;  %p272_p8 = scmp.lt.s32.totalorder %s2734_s15, 3 }
  0x15   : > { %410 = vmatpush1.bf16.msra.mxu0 %v2856_v7  ;;  %531 = vmatpush1.bf16.msra.mxu1 %v2863_v8  ;;  %v2917_v16 = vld [vmem:[%s3932_s2 + $0x40] ss:$8 sps:$4 sm:$0xff]   ;;  %v2922_v17 = vld [vmem:[%s3932_s2 + $0xb4] ss:$8 sps:$4 sm:$0xff]   ;;  %s2924_s23 = sadd.s32 %s2446_s9, %s4180_s7  ;;  %s254_s27 = sadd.s32 %s2446_s9, %s4178_s26  ;;  %v2936_v19 = vld [vmem:[%s3932_s2 + $0xb0] ss:$8 sps:$4 sm:$0xff]  }
  0x16   : > { %411 = vmatprep.subr.bf16.mxu0 %v2874_v9  ;;  %532 = vmatprep.subr.bf16.mxu1 %v2879_v10  ;;  %v2931_v18 = vld [vmem:[%s3932_s2 + $0x34] ss:$8 sps:$4 sm:$0xff]   ;;  %v2941_v20 = vld [vmem:[%s3932_s2 + $0x30] ss:$8 sps:$4 sm:$0xff]   ;;  %v2948_v21 = vld [vmem:[%s3932_s2 + $0xa4] ss:$8 sps:$4 sm:$0xff]  }
  0x17   : > { %s2148_s26 = sshll.u32 %s254_s27, 2  ;;  %v2955_v22 = vld [vmem:[%s3932_s2 + $0x24] ss:$8 sps:$4 sm:$0xff]   ;;  %v2967_v23 = vld [vmem:[%s3932_s2 + $0xa0] ss:$8 sps:$4 sm:$0xff]   ;;  %s2150_s13 = sshll.u32 %s2924_s23, 2 }
  0x18   : > { %s2960_s12 = scalar_lea.vmem %s3930_s0, %s2148_s26  ;;  %v2972_v24 = vld [vmem:[%s3932_s2 + $0x20] ss:$8 sps:$4 sm:$0xff]   ;;  %v2979_v25 = vld [vmem:[%s3932_s2 + $0x94] ss:$8 sps:$4 sm:$0xff]   ;;  %v2990_v28 = vld [vmem:[%s3932_s2 + $0x90] ss:$8 sps:$4 sm:$0xff]   ;;  %s3403_s30 = scalar_lea.vmem %s3931_s1, %s2150_s13 }
  0x19   : > { %412 = vmatpush1.bf16.msra.mxu0 %v2884_v11  ;;  %533 = vmatpush1.bf16.msra.mxu1 %v2889_v12  ;;  %v2984_v26 = vld [vmem:[%s3932_s2 + $0x14] ss:$8 sps:$4 sm:$0xff]   ;;  %v2536_v27 = vld [vmem:[%s2960_s12] ss:$0 sps:$4 sm:$0x77]   ;;  %s4182_s15 = smov (!%p272_p8, %s2734_s15), 3 }
  0x1a   : > { %413 = vmatprep.subr.bf16.mxu0 %v2896_v13  ;;  %534 = vmatprep.subr.bf16.mxu1 %v2904_v14  ;;  %v2997_v29 = vld [vmem:[%s3932_s2 + $0x10] ss:$8 sps:$4 sm:$0xff]   ;;  %v322_v30 = vshll.u32 %v2536_v27, 16  ;;  %v3004_v31 = vld [vmem:[%s3932_s2 + $0x84] ss:$8 sps:$4 sm:$0xff]   ;;  %v320_v34 = vshrl.u32 %v2536_v27, 16 }
  0x1b   : > { %v3009_v32 = vld [vmem:[%s3932_s2 + $0x4] ss:$8 sps:$4 sm:$0xff]   ;;  %v3014_v33 = vld [vmem:[%s3932_s2 + $0x80] ss:$8 sps:$4 sm:$0xff]   ;;  %v3026_v37 = vld [vmem:[%s3932_s2 + $0x174] ss:$8 sps:$4 sm:$0xff]  }
  0x1c   : > { %v324_v35 = vrot.slane %v322_v30, 1  ;;  %v3021_v36 = vld [vmem:[%s3932_s2] ss:$8 sps:$4 sm:$0xff]   ;;  %v3033_v38 = vld [vmem:[%s3932_s2 + $0x1f4] ss:$8 sps:$4 sm:$0xff]   ;;  %s2151_s25 = sshll.u32 %s4182_s15, 1 }
  0x1d   : > { %414 = vmatpush1.bf16.msra.mxu0 %v2910_v15  ;;  %535 = vmatpush1.bf16.msra.mxu1 %v2917_v16  ;;  %v297_v40 = vld [vmem:[%s2960_s12] sm:$0x3]  ;;  %v3039_v41 = vld [vmem:[%s3932_s2 + $0x170] ss:$8 sps:$4 sm:$0xff]   ;;  %v3051_v43 = vld [vmem:[%s3932_s2 + $0x164] ss:$8 sps:$4 sm:$0xff]  }
  0x1e   : > { %415 = vmatprep.subr.bf16.mxu0 %v2922_v17  ;;  %536 = vmatprep.subr.bf16.mxu1 %v2931_v18  ;;  %v325_v39 = vor.u32 %v324_v35, %v320_v34  ;;  %v3046_v42 = vld [vmem:[%s3932_s2 + $0x1f0] ss:$8 sps:$4 sm:$0xff]   ;;  %v3058_v44 = vld [vmem:[%s3932_s2 + $0x1e4] ss:$8 sps:$4 sm:$0xff]   ;;  %v3063_v45 = vld [vmem:[%s3932_s2 + $0x160] ss:$8 sps:$4 sm:$0xff]  }
  0x1f   : > { %4013 = vst [vmem:[#allocation3_spill] sm:$0xff] %v3046_v42  ;;  %4014 = vst [vmem:[#allocation4_spill] sm:$0xff] %v3058_v44  ;;  %v3070_v46 = vld [vmem:[%s3932_s2 + $0x1e0] ss:$8 sps:$4 sm:$0xff]   ;;  %v3075_v47 = vld [vmem:[%s3932_s2 + $0x154] ss:$8 sps:$4 sm:$0xff]  }
  0x20   : > { %4015 = vst [vmem:[#allocation5_spill] sm:$0xff] %v3070_v46  ;;  %v3082_v48 = vld [vmem:[%s3932_s2 + $0x1d4] ss:$8 sps:$4 sm:$0xff]   ;;  %v3089_v49 = vld [vmem:[%s3932_s2 + $0x150] ss:$8 sps:$4 sm:$0xff]   ;;  %s2152_s27 = sshll.u32 %s4176_s16, 3 }
  0x21   : > { %416 = vmatpush1.bf16.msra.mxu0 %v2936_v19  ;;  %537 = vmatpush1.bf16.msra.mxu1 %v2941_v20  ;;  %4016 = vst [vmem:[#allocation6_spill] sm:$0xff] %v3082_v48  ;;  %v3096_v50 = vld [vmem:[%s3932_s2 + $0x1d0] ss:$8 sps:$4 sm:$0xff]   ;;  %v3101_v51 = vld [vmem:[%s3932_s2 + $0x144] ss:$8 sps:$4 sm:$0xff]   ;;  %s276_s28 = sadd.s32 %s2152_s27, %s2151_s25 }
  0x22   : > { %417 = vmatprep.subr.bf16.mxu0 %v2948_v21  ;;  %538 = vmatprep.subr.bf16.mxu1 %v2955_v22  ;;  %4017 = vst [vmem:[#allocation7_spill] sm:$0xff] %v3096_v50  ;;  %v3108_v52 = vld [vmem:[%s3932_s2 + $0x1c4] ss:$8 sps:$4 sm:$0xff]   ;;  %v3115_v53 = vld [vmem:[%s3932_s2 + $0x140] ss:$8 sps:$4 sm:$0xff]   ;;  %s2153_s23 = sshll.u32 %s276_s28, 1 }
  0x23   : > { %4018 = vst [vmem:[#allocation8_spill] sm:$0xff] %v3108_v52  ;;  %v3120_v54 = vld [vmem:[%s3932_s2 + $0x1c0] ss:$8 sps:$4 sm:$0xff]   ;;  %v3127_v55 = vld [vmem:[%s3932_s2 + $0x134] ss:$8 sps:$4 sm:$0xff]   ;;  %s278_s15 = scalar_lea.vmem %s3934_s4, %s2153_s23 }
  0x24   : > { %4019 = vst [vmem:[#allocation9_spill] sm:$0xff] %v3120_v54  ;;  %v3132_v56 = vld [vmem:[%s3932_s2 + $0x1b4] ss:$8 sps:$4 sm:$0xff]   ;;  %v3139_v57 = vld [vmem:[%s3932_s2 + $0x130] ss:$8 sps:$4 sm:$0xff]  }
  0x25   : > { %418 = vmatpush1.bf16.msra.mxu0 %v2967_v23  ;;  %539 = vmatpush1.bf16.msra.mxu1 %v2972_v24  ;;  %4020 = vst [vmem:[#allocation10_spill] sm:$0xff] %v3132_v56  ;;  %v3144_v58 = vld [vmem:[%s3932_s2 + $0x1b0] ss:$8 sps:$4 sm:$0xff]   ;;  %v3151_v59 = vld [vmem:[%s3932_s2 + $0x124] ss:$8 sps:$4 sm:$0xff]  }
  0x26   : > { %419 = vmatprep.subr.bf16.mxu0 %v2979_v25  ;;  %540 = vmatprep.subr.bf16.mxu1 %v2984_v26  ;;  %4021 = vst [vmem:[#allocation11_spill] sm:$0xff] %v3144_v58  ;;  %v3156_v60 = vld [vmem:[%s3932_s2 + $0x1a4] ss:$8 sps:$4 sm:$0xff]   ;;  %v3163_v61 = vld [vmem:[%s3932_s2 + $0x120] ss:$8 sps:$4 sm:$0xff]  }
  0x27   : > { %4022 = vst [vmem:[#allocation12_spill] sm:$0xff] %v3156_v60  ;;  %v3168_v62 = vld [vmem:[%s3932_s2 + $0x1a0] ss:$8 sps:$4 sm:$0xff]   ;;  %v3175_v63 = vld [vmem:[%s3932_s2 + $0x114] ss:$8 sps:$4 sm:$0xff]  }
  0x28   : > { %4023 = vst [vmem:[#allocation13_spill] sm:$0xff] %v3168_v62  ;;  %v3180_v27 = vld [vmem:[%s3932_s2 + $0x194] ss:$8 sps:$4 sm:$0xff]   ;;  %v3187_v30 = vld [vmem:[%s3932_s2 + $0x110] ss:$8 sps:$4 sm:$0xff]  }
  0x29   : > { %420 = vmatpush1.bf16.msra.mxu0 %v2990_v28  ;;  %541 = vmatpush1.bf16.msra.mxu1 %v2997_v29  ;;  %4024 = vst [vmem:[#allocation14_spill] sm:$0xff] %v3180_v27  ;;  %v3192_v34 = vld [vmem:[%s3932_s2 + $0x190] ss:$8 sps:$4 sm:$0xff]   ;;  %v3199_v35 = vld [vmem:[%s3932_s2 + $0x104] ss:$8 sps:$4 sm:$0xff]  }
  0x2a   : > { %421 = vmatprep.subr.bf16.mxu0 %v3004_v31  ;;  %542 = vmatprep.subr.bf16.mxu1 %v3009_v32  ;;  %4025 = vst [vmem:[#allocation15_spill] sm:$0xff] %v3192_v34 }
  0x2d   : > { %422 = vmatpush1.bf16.msra.mxu0 %v3014_v33  ;;  %543 = vmatpush1.bf16.msra.mxu1 %v3021_v36 }
  0x2e   : > { %672 = vmatprep.subr.bf16.mxu0 %v3026_v37  ;;  %814 = vmatprep.subr.bf16.mxu1 %v3033_v38 }
  0x30   : > { %440 = vmatmul.mubr.bf16.vlgmr.msra.gmra.mxu0 %v325_v39  ;;  %561 = vmatmul.mubr.bf16.vlgmr.msra.gmra.mxu1 %v297_v40  ;;  %v3204_v39 = vld [vmem:[%s3932_s2 + $0x184] ss:$8 sps:$4 sm:$0xff]   ;;  %v2585_v40 = vld [vmem:[%s2960_s12] ss:$0 sps:$4 sm:$0x66]  }
  0x31   : > { %673 = vmatpush1.bf16.msra.mxu0 %v3039_v41  ;;  %815 = vmatpush1.bf16.msra.mxu1 %v3046_v42  ;;  %4026 = vst [vmem:[#allocation16_spill] sm:$0xff] %v3204_v39  ;;  %v3420_v42 = vld [vmem:[%s3932_s2 + $0x200] ss:$8 sps:$4 sm:$0xff]  }
  0x32   : > { %674 = vmatprep.subr.bf16.mxu0 %v3051_v43  ;;  %816 = vmatprep.subr.bf16.mxu1 %v3058_v44  ;;  %4058 = vst [vmem:[#allocation47_spill] sm:$0xff] %v3420_v42 }
  0x33   : > { %704 = vmatprep.mubr.bf16.mxu0 %v3935_v2  ;;  %846 = vmatprep.mubr.bf16.mxu1 %v3935_v2  ;;  %v3212_v2 = vld [vmem:[%s3932_s2 + $0x100] ss:$8 sps:$4 sm:$0xff]  }
  0x35   : > { %675 = vmatpush1.bf16.msra.mxu0 %v3063_v45  ;;  %817 = vmatpush1.bf16.msra.mxu1 %v3070_v46  ;;  %v2634_v46 = vld [vmem:[%s2960_s12 + $0x4] ss:$0 sps:$4 sm:$0x77]  }
  0x36   : > { %676 = vmatprep.subr.bf16.mxu0 %v3075_v47  ;;  %818 = vmatprep.subr.bf16.mxu1 %v3082_v48  ;;  %v3300_v48 = vld [vmem:[%s3932_s2 + $0x244] ss:$8 sps:$4 sm:$0xff]   ;;  %v879_v44 = vshrl.u32 %v2634_v46, 16 }
  0x37   : > { %4040 = vst [vmem:[#allocation29_spill] sm:$0xff] %v3300_v48 }
  0x39   : > { %677 = vmatpush1.bf16.msra.mxu0 %v3089_v49  ;;  %819 = vmatpush1.bf16.msra.mxu1 %v3096_v50  ;;  %v3288_v50 = vld [vmem:[%s3932_s2 + $0x250] ss:$8 sps:$4 sm:$0xff]  }
  0x3a   : > { %678 = vmatprep.subr.bf16.mxu0 %v3101_v51  ;;  %820 = vmatprep.subr.bf16.mxu1 %v3108_v52  ;;  %v4037_v52 = vmov 0   ;;  %4038 = vst [vmem:[#allocation27_spill] sm:$0xff] %v3288_v50 }
  0x3d   : > { %679 = vmatpush1.bf16.msra.mxu0 %v3115_v53  ;;  %821 = vmatpush1.bf16.msra.mxu1 %v3120_v54  ;;  %v3269_v54 = vld [vmem:[%s3932_s2 + $0x2e0] ss:$8 sps:$4 sm:$0xff]  }
  0x3e   : > { %680 = vmatprep.subr.bf16.mxu0 %v3127_v55  ;;  %822 = vmatprep.subr.bf16.mxu1 %v3132_v56  ;;  %v3244_v56 = vld [vmem:[%s3932_s2 + $0x2f0] ss:$8 sps:$4 sm:$0xff]   ;;  %4034 = vst [vmem:[#allocation24_spill] sm:$0xff] %v3269_v54 }
  0x3f   : > { %4030 = vst [vmem:[#allocation20_spill] sm:$0xff] %v3244_v56 }
  0x41   : > { %681 = vmatpush1.bf16.msra.mxu0 %v3139_v57  ;;  %823 = vmatpush1.bf16.msra.mxu1 %v3144_v58  ;;  %v3232_v58 = vld [vmem:[%s2960_s12 + $0x4] sm:$0x3] }
  0x42   : > { %682 = vmatprep.subr.bf16.mxu0 %v3151_v59  ;;  %824 = vmatprep.subr.bf16.mxu1 %v3156_v60  ;;  %v590_v60 = vrot.slane %v2585_v40, 1  ;;  %v3251_v40 = vld [vmem:[%s3932_s2 + $0x264] ss:$8 sps:$4 sm:$0xff]  }
  0x43   : > { %4031 = vst [vmem:[#allocation21_spill] sm:$0xff] %v3251_v40 }
  0x45   : > { %683 = vmatpush1.bf16.msra.mxu0 %v3163_v61  ;;  %825 = vmatpush1.bf16.msra.mxu1 %v3168_v62  ;;  %v3224_v62 = vld [vmem:[%s3932_s2 + $0x274] ss:$8 sps:$4 sm:$0xff]  }
  0x46   : > { %684 = vmatprep.subr.bf16.mxu0 %v3175_v63  ;;  %826 = vmatprep.subr.bf16.mxu1 %v3180_v27  ;;  %v3217_v27 = vld [vmem:[%s3932_s2 + $0x180] ss:$8 sps:$4 sm:$0xff]  }
  0x47   : > { %4027 = vst [vmem:[#allocation17_spill] sm:$0xff] %v3217_v27 }
  0x49   : > { %685 = vmatpush1.bf16.msra.mxu0 %v3187_v30  ;;  %827 = vmatpush1.bf16.msra.mxu1 %v3192_v34  ;;  %v3229_v34 = vld [vmem:[%s3932_s2 + $0x2f4] ss:$8 sps:$4 sm:$0xff]  }
  0x4a   : > { %686 = vmatprep.subr.bf16.mxu0 %v3199_v35  ;;  %828 = vmatprep.subr.bf16.mxu1 %v3204_v39  ;;  %4028 = vst [vmem:[#allocation18_spill] sm:$0xff] %v3229_v34  ;;  %v3239_v39 = vld [vmem:[%s3932_s2 + $0x270] ss:$8 sps:$4 sm:$0xff]  }
  0x4b   : > { %4029 = vst [vmem:[#allocation19_spill] sm:$0xff] %v3239_v39 }
  0x4d   : > { %687 = vmatpush1.bf16.msra.mxu0 %v3212_v2  ;;  %829 = vmatpush1.bf16.msra.mxu1 %v3217_v27  ;;  %v3256_v27 = vld [vmem:[%s3932_s2 + $0x2e4] ss:$8 sps:$4 sm:$0xff]  }
  0x4e   : > { %966 = vmatprep.subr.bf16.mxu0 %v3224_v62  ;;  %1112 = vmatprep.subr.bf16.mxu1 %v3229_v34  ;;  %4032 = vst [vmem:[#allocation22_spill] sm:$0xff] %v3256_v27  ;;  %v3264_v34 = vld [vmem:[%s3932_s2 + $0x260] ss:$8 sps:$4 sm:$0xff]  }
  0x4f   : > { %4033 = vst [vmem:[#allocation23_spill] sm:$0xff] %v3264_v34 }
  0x50   : > { %705 = vmatmul.mubr.bf16.vlgmr.msra.gmra.mxu0 %v590_v60  ;;  %847 = vmatmul.mubr.bf16.vlgmr.msra.gmra.mxu1 %v3232_v58  ;;  %v3274_v60 = vld [vmem:[%s3932_s2 + $0x254] ss:$8 sps:$4 sm:$0xff]  }
  0x51   : > { %967 = vmatpush1.bf16.msra.mxu0 %v3239_v39  ;;  %1113 = vmatpush1.bf16.msra.mxu1 %v3244_v56  ;;  %4035 = vst [vmem:[#allocation25_spill] sm:$0xff] %v3274_v60  ;;  %v3281_v56 = vld [vmem:[%s3932_s2 + $0x2d4] ss:$8 sps:$4 sm:$0xff]  }
  0x52   : > { %968 = vmatprep.subr.bf16.mxu0 %v3251_v40  ;;  %1114 = vmatprep.subr.bf16.mxu1 %v3256_v27  ;;  %4036 = vst [vmem:[#allocation26_spill] sm:$0xff] %v3281_v56  ;;  %v3295_v27 = vld [vmem:[%s3932_s2 + $0x2d0] ss:$8 sps:$4 sm:$0xff]   ;;  %v881_v40 = vshll.u32 %v2634_v46, 16  ;;  %v3437_v46 = vld [vmem:[%s3932_s2 + $0x3f4] ss:$8 sps:$4 sm:$0xff]  }
  0x53   : > { %998 = vmatprep.mubr.bf16.mxu0 %v4037_v52  ;;  %1144 = vmatprep.mubr.bf16.mxu1 %v4037_v52  ;;  %4039 = vst [vmem:[#allocation28_spill] sm:$0xff] %v3295_v27  ;;  %4061 = vst [vmem:[#allocation50_spill] sm:$0xff] %v3437_v46 }
  0x54   : > { %v883_v39 = vrot.slane %v881_v40, 1 }
  0x55   : > { %969 = vmatpush1.bf16.msra.mxu0 %v3264_v34  ;;  %1115 = vmatpush1.bf16.msra.mxu1 %v3269_v54  ;;  %v3307_v34 = vld [vmem:[%s3932_s2 + $0x2c4] ss:$8 sps:$4 sm:$0xff]   ;;  %v3312_v54 = vld [vmem:[%s3932_s2 + $0x240] ss:$8 sps:$4 sm:$0xff]  }
  0x56   : > { %970 = vmatprep.subr.bf16.mxu0 %v3274_v60  ;;  %1116 = vmatprep.subr.bf16.mxu1 %v3281_v56  ;;  %4041 = vst [vmem:[#allocation30_spill] sm:$0xff] %v3307_v34  ;;  %4042 = vst [vmem:[#allocation31_spill] sm:$0xff] %v3312_v54  ;;  %v3319_v60 = vld [vmem:[%s3932_s2 + $0x2c0] ss:$8 sps:$4 sm:$0xff]   ;;  %v3324_v56 = vld [vmem:[%s3932_s2 + $0x234] ss:$8 sps:$4 sm:$0xff]   ;;  %v3439_v40 = vor.u32 %v883_v39, %v879_v44 }
  0x57   : > { %4043 = vst [vmem:[#allocation32_spill] sm:$0xff] %v3319_v60  ;;  %4044 = vst [vmem:[#allocation33_spill] sm:$0xff] %v3324_v56  ;;  %v3457_v44 = vld [vmem:[%s3932_s2 + $0x364] ss:$8 sps:$4 sm:$0xff]  }
  0x58   : > { %4064 = vst [vmem:[#allocation53_spill] sm:$0xff] %v3457_v44  ;;  %v3464_v39 = vld [vmem:[%s3932_s2 + $0x3e4] ss:$8 sps:$4 sm:$0xff]  }
  0x59   : > { %971 = vmatpush1.bf16.msra.mxu0 %v3288_v50  ;;  %1117 = vmatpush1.bf16.msra.mxu1 %v3295_v27  ;;  %v3331_v50 = vld [vmem:[%s3932_s2 + $0x2b4] ss:$8 sps:$4 sm:$0xff]   ;;  %v3336_v27 = vld [vmem:[%s3932_s2 + $0x230] ss:$8 sps:$4 sm:$0xff]   ;;  %4065 = vst [vmem:[#allocation54_spill] sm:$0xff] %v3464_v39 }
  0x5a   : > { %972 = vmatprep.subr.bf16.mxu0 %v3300_v48  ;;  %1118 = vmatprep.subr.bf16.mxu1 %v3307_v34  ;;  %4045 = vst [vmem:[#allocation34_spill] sm:$0xff] %v3331_v50  ;;  %4046 = vst [vmem:[#allocation35_spill] sm:$0xff] %v3336_v27  ;;  %v3343_v48 = vld [vmem:[%s3932_s2 + $0x2b0] ss:$8 sps:$4 sm:$0xff]   ;;  %v3348_v34 = vld [vmem:[%s3932_s2 + $0x224] ss:$8 sps:$4 sm:$0xff]  }
  0x5b   : > { %4047 = vst [vmem:[#allocation36_spill] sm:$0xff] %v3343_v48  ;;  %4048 = vst [vmem:[#allocation37_spill] sm:$0xff] %v3348_v34 }
  0x5d   : > { %973 = vmatpush1.bf16.msra.mxu0 %v3312_v54  ;;  %1119 = vmatpush1.bf16.msra.mxu1 %v3319_v60  ;;  %v3355_v54 = vld [vmem:[%s3932_s2 + $0x2a4] ss:$8 sps:$4 sm:$0xff]   ;;  %v3360_v60 = vld [vmem:[%s3932_s2 + $0x220] ss:$8 sps:$4 sm:$0xff]  }
  0x5e   : > { %974 = vmatprep.subr.bf16.mxu0 %v3324_v56  ;;  %1120 = vmatprep.subr.bf16.mxu1 %v3331_v50  ;;  %4049 = vst [vmem:[#allocation38_spill] sm:$0xff] %v3355_v54  ;;  %4050 = vst [vmem:[#allocation39_spill] sm:$0xff] %v3360_v60  ;;  %v3368_v56 = vld [vmem:[%s3932_s2 + $0x2a0] ss:$8 sps:$4 sm:$0xff]   ;;  %v3373_v50 = vld [vmem:[%s3932_s2 + $0x214] ss:$8 sps:$4 sm:$0xff]  }
  0x5f   : > { %4051 = vst [vmem:[#allocation40_spill] sm:$0xff] %v3368_v56  ;;  %4052 = vst [vmem:[#allocation41_spill] sm:$0xff] %v3373_v50 }
  0x61   : > { %975 = vmatpush1.bf16.msra.mxu0 %v3336_v27  ;;  %1121 = vmatpush1.bf16.msra.mxu1 %v3343_v48  ;;  %v3380_v27 = vld [vmem:[%s3932_s2 + $0x294] ss:$8 sps:$4 sm:$0xff]   ;;  %v3386_v48 = vld [vmem:[%s3932_s2 + $0x210] ss:$8 sps:$4 sm:$0xff]  }
  0x62   : > { %976 = vmatprep.subr.bf16.mxu0 %v3348_v34  ;;  %1122 = vmatprep.subr.bf16.mxu1 %v3355_v54  ;;  %4053 = vst [vmem:[#allocation42_spill] sm:$0xff] %v3380_v27  ;;  %4054 = vst [vmem:[#allocation43_spill] sm:$0xff] %v3386_v48  ;;  %v3393_v54 = vld [vmem:[%s3932_s2 + $0x290] ss:$8 sps:$4 sm:$0xff]   ;;  %v3398_v34 = vld [vmem:[%s3932_s2 + $0x204] ss:$8 sps:$4 sm:$0xff]  }
  0x63   : > { %4055 = vst [vmem:[#allocation44_spill] sm:$0xff] %v3393_v54  ;;  %4056 = vst [vmem:[#allocation45_spill] sm:$0xff] %v3398_v34 }
  0x65   : > { %977 = vmatpush1.bf16.msra.mxu0 %v3360_v60  ;;  %1123 = vmatpush1.bf16.msra.mxu1 %v3368_v56  ;;  %v3410_v56 = vld [vmem:[%s3932_s2 + $0x284] ss:$8 sps:$4 sm:$0xff]  }
  0x66   : > { %978 = vmatprep.subr.bf16.mxu0 %v3373_v50  ;;  %1124 = vmatprep.subr.bf16.mxu1 %v3380_v27  ;;  %4057 = vst [vmem:[#allocation46_spill] sm:$0xff] %v3410_v56  ;;  %v3413_v60 = vld [vmem:[%s2960_s12 + $0x4] ss:$0 sps:$4 sm:$0x66]   ;;  %v3425_v27 = vld [vmem:[%s3932_s2 + $0x280] ss:$8 sps:$4 sm:$0xff]  }
  0x67   : > { %4059 = vst [vmem:[#allocation48_spill] sm:$0xff] %v3425_v27  ;;  %v3430_v50 = vld [vmem:[%s3932_s2 + $0x374] ss:$8 sps:$4 sm:$0xff]  }
  0x68   : > { %4060 = vst [vmem:[#allocation49_spill] sm:$0xff] %v3430_v50 }
  0x69   : > { %979 = vmatpush1.bf16.msra.mxu0 %v3386_v48  ;;  %1125 = vmatpush1.bf16.msra.mxu1 %v3393_v54  ;;  %v3982_v54 = vrot.slane %v3413_v60, 1  ;;  %v3445_v48 = vld [vmem:[%s3932_s2 + $0x370] ss:$8 sps:$4 sm:$0xff]  }
  0x6a   : > { %980 = vmatprep.subr.bf16.mxu0 %v3398_v34  ;;  %1126 = vmatprep.subr.bf16.mxu1 %v3410_v56  ;;  %4062 = vst [vmem:[#allocation51_spill] sm:$0xff] %v3445_v48  ;;  %v3452_v56 = vld [vmem:[%s3932_s2 + $0x3f0] ss:$8 sps:$4 sm:$0xff]  }
  0x6b   : > { %4063 = vst [vmem:[#allocation52_spill] sm:$0xff] %v3452_v56 }
  0x6d   : > { %981 = vmatpush1.bf16.msra.mxu0 %v3420_v42  ;;  %1127 = vmatpush1.bf16.msra.mxu1 %v3425_v27  ;;  %v3474_v27 = vld [vmem:[%s3932_s2 + $0x360] ss:$8 sps:$4 sm:$0xff]  }
  0x6e   : > { %1253 = vmatprep.subr.bf16.mxu0 %v3430_v50  ;;  %1405 = vmatprep.subr.bf16.mxu1 %v3437_v46  ;;  %4066 = vst [vmem:[#allocation55_spill] sm:$0xff] %v3474_v27  ;;  %v3479_v46 = vld [vmem:[%s3932_s2 + $0x3e0] ss:$8 sps:$4 sm:$0xff]  }
  0x6f   : > { %4067 = vst [vmem:[#allocation56_spill] sm:$0xff] %v3479_v46 }
  0x70   : > { %999 = vmatmul.mubr.bf16.vlgmr.msra.gmra.mxu0 %v3439_v40  ;;  %1145 = vmatmul.mubr.bf16.vlgmr.msra.gmra.mxu1 %v3982_v54  ;;  %v3486_v54 = vld [vmem:[%s3932_s2 + $0x354] ss:$8 sps:$4 sm:$0xff]  }
  0x71   : > { %1254 = vmatpush1.bf16.msra.mxu0 %v3445_v48  ;;  %1406 = vmatpush1.bf16.msra.mxu1 %v3452_v56  ;;  %4068 = vst [vmem:[#allocation57_spill] sm:$0xff] %v3486_v54  ;;  %v3491_v56 = vld [vmem:[%s3932_s2 + $0x3d4] ss:$8 sps:$4 sm:$0xff]   ;;  %v2684_v48 = vld [vmem:[%s3403_s30] ss:$0 sps:$4 sm:$0x77]  }
  0x72   : > { %1255 = vmatprep.subr.bf16.mxu0 %v3457_v44  ;;  %1407 = vmatprep.subr.bf16.mxu1 %v3464_v39  ;;  %4069 = vst [vmem:[#allocation58_spill] sm:$0xff] %v3491_v56  ;;  %v3500_v39 = vld [vmem:[%s3932_s2 + $0x350] ss:$8 sps:$4 sm:$0xff]   ;;  %v1320_v50 = vshll.u32 %v2684_v48, 16  ;;  %v1318_v42 = vshrl.u32 %v2684_v48, 16 }
  0x73   : > { %1285 = vmatprep.mubr.bf16.mxu0 %v4037_v52  ;;  %1437 = vmatprep.mubr.bf16.mxu1 %v4037_v52  ;;  %4070 = vst [vmem:[#allocation59_spill] sm:$0xff] %v3500_v39  ;;  %v3505_v44 = vld [vmem:[%s3932_s2 + $0x3d0] ss:$8 sps:$4 sm:$0xff]   ;;  %v3633_v48 = vld [vmem:[%s3932_s2 + $0x474] ss:$8 sps:$4 sm:$0xff]  }
  0x74   : > { %4071 = vst [vmem:[#allocation60_spill] sm:$0xff] %v3505_v44  ;;  %v1322_v34 = vrot.slane %v1320_v50, 1 }
  0x75   : > { %1256 = vmatpush1.bf16.msra.mxu0 %v3474_v27  ;;  %1408 = vmatpush1.bf16.msra.mxu1 %v3479_v46  ;;  %v3512_v27 = vld [vmem:[%s3932_s2 + $0x344] ss:$8 sps:$4 sm:$0xff]  }
  0x76   : > { %1257 = vmatprep.subr.bf16.mxu0 %v3486_v54  ;;  %1409 = vmatprep.subr.bf16.mxu1 %v3491_v56  ;;  %4072 = vst [vmem:[#allocation61_spill] sm:$0xff] %v3512_v27  ;;  %v3517_v46 = vld [vmem:[%s3932_s2 + $0x3c4] ss:$8 sps:$4 sm:$0xff]   ;;  %v3524_v54 = vld [vmem:[%s3932_s2 + $0x340] ss:$8 sps:$4 sm:$0xff]   ;;  %v3635_v50 = vor.u32 %v1322_v34, %v1318_v42 }
  0x77   : > { %4073 = vst [vmem:[#allocation62_spill] sm:$0xff] %v3517_v46  ;;  %4074 = vst [vmem:[#allocation63_spill] sm:$0xff] %v3524_v54  ;;  %v3529_v56 = vld [vmem:[%s3932_s2 + $0x3c0] ss:$8 sps:$4 sm:$0xff]   ;;  %v3652_v42 = vld [vmem:[%s3932_s2 + $0x464] ss:$8 sps:$4 sm:$0xff]  }
  0x78   : > { %4075 = vst [vmem:[#allocation64_spill] sm:$0xff] %v3529_v56  ;;  %v3661_v34 = vld [vmem:[%s3932_s2 + $0x460] ss:$8 sps:$4 sm:$0xff]  }
  0x79   : > { %1258 = vmatpush1.bf16.msra.mxu0 %v3500_v39  ;;  %1410 = vmatpush1.bf16.msra.mxu1 %v3505_v44  ;;  %v3536_v39 = vld [vmem:[%s3932_s2 + $0x334] ss:$8 sps:$4 sm:$0xff]  }
  0x7a   : > { %1259 = vmatprep.subr.bf16.mxu0 %v3512_v27  ;;  %1411 = vmatprep.subr.bf16.mxu1 %v3517_v46  ;;  %4076 = vst [vmem:[#allocation65_spill] sm:$0xff] %v3536_v39  ;;  %v3541_v44 = vld [vmem:[%s3932_s2 + $0x3b4] ss:$8 sps:$4 sm:$0xff]   ;;  %v3548_v27 = vld [vmem:[%s3932_s2 + $0x330] ss:$8 sps:$4 sm:$0xff]  }
  0x7b   : > { %4077 = vst [vmem:[#allocation66_spill] sm:$0xff] %v3541_v44  ;;  %4078 = vst [vmem:[#allocation67_spill] sm:$0xff] %v3548_v27  ;;  %v3553_v46 = vld [vmem:[%s3932_s2 + $0x3b0] ss:$8 sps:$4 sm:$0xff]  }
  0x7c   : > { %4079 = vst [vmem:[#allocation68_spill] sm:$0xff] %v3553_v46 }
  0x7d   : > { %1260 = vmatpush1.bf16.msra.mxu0 %v3524_v54  ;;  %1412 = vmatpush1.bf16.msra.mxu1 %v3529_v56  ;;  %v3560_v54 = vld [vmem:[%s3932_s2 + $0x324] ss:$8 sps:$4 sm:$0xff]  }
  0x7e   : > { %1261 = vmatprep.subr.bf16.mxu0 %v3536_v39  ;;  %1413 = vmatprep.subr.bf16.mxu1 %v3541_v44  ;;  %4080 = vst [vmem:[#allocation69_spill] sm:$0xff] %v3560_v54  ;;  %v3565_v56 = vld [vmem:[%s3932_s2 + $0x3a4] ss:$8 sps:$4 sm:$0xff]   ;;  %v3573_v39 = vld [vmem:[%s3932_s2 + $0x320] ss:$8 sps:$4 sm:$0xff]  }
  0x7f   : > { %4081 = vst [vmem:[#allocation70_spill] sm:$0xff] %v3565_v56  ;;  %4082 = vst [vmem:[#allocation71_spill] sm:$0xff] %v3573_v39  ;;  %v3578_v44 = vld [vmem:[%s3932_s2 + $0x3a0] ss:$8 sps:$4 sm:$0xff]  }
  0x80   : > { %4083 = vst [vmem:[#allocation72_spill] sm:$0xff] %v3578_v44 }
  0x81   : > { %1262 = vmatpush1.bf16.msra.mxu0 %v3548_v27  ;;  %1414 = vmatpush1.bf16.msra.mxu1 %v3553_v46  ;;  %v3585_v27 = vld [vmem:[%s3932_s2 + $0x314] ss:$8 sps:$4 sm:$0xff]  }
  0x82   : > { %1263 = vmatprep.subr.bf16.mxu0 %v3560_v54  ;;  %1415 = vmatprep.subr.bf16.mxu1 %v3565_v56  ;;  %4084 = vst [vmem:[#allocation73_spill] sm:$0xff] %v3585_v27  ;;  %v3590_v46 = vld [vmem:[%s3932_s2 + $0x394] ss:$8 sps:$4 sm:$0xff]   ;;  %v3597_v54 = vld [vmem:[%s3932_s2 + $0x310] ss:$8 sps:$4 sm:$0xff]  }
  0x83   : > { %4085 = vst [vmem:[#allocation74_spill] sm:$0xff] %v3590_v46  ;;  %4086 = vst [vmem:[#allocation75_spill] sm:$0xff] %v3597_v54  ;;  %v3602_v56 = vld [vmem:[%s3932_s2 + $0x390] ss:$8 sps:$4 sm:$0xff]  }
  0x84   : > { %4087 = vst [vmem:[#allocation76_spill] sm:$0xff] %v3602_v56 }
  0x85   : > { %1264 = vmatpush1.bf16.msra.mxu0 %v3573_v39  ;;  %1416 = vmatpush1.bf16.msra.mxu1 %v3578_v44  ;;  %v3609_v39 = vld [vmem:[%s3932_s2 + $0x304] ss:$8 sps:$4 sm:$0xff]  }
  0x86   : > { %1265 = vmatprep.subr.bf16.mxu0 %v3585_v27  ;;  %1417 = vmatprep.subr.bf16.mxu1 %v3590_v46  ;;  %v3614_v44 = vld [vmem:[%s3932_s2 + $0x384] ss:$8 sps:$4 sm:$0xff]   ;;  %v3621_v46 = vld [vmem:[%s3932_s2 + $0x300] ss:$8 sps:$4 sm:$0xff]  }
  0x87   : > { %v3626_v27 = vld [vmem:[%s3932_s2 + $0x380] ss:$8 sps:$4 sm:$0xff]  }
  0x88   : > { %4088 = vst [vmem:[#allocation77_spill] sm:$0xff] %v3626_v27 }
  0x89   : > { %1266 = vmatpush1.bf16.msra.mxu0 %v3597_v54  ;;  %1418 = vmatpush1.bf16.msra.mxu1 %v3602_v56  ;;  %v3640_v56 = vld [vmem:[%s3403_s30] sm:$0x3]  ;;  %v3645_v54 = vld [vmem:[%s3932_s2 + $0x470] ss:$8 sps:$4 sm:$0xff]  }
  0x8a   : > { %1267 = vmatprep.subr.bf16.mxu0 %v3609_v39  ;;  %1419 = vmatprep.subr.bf16.mxu1 %v3614_v44 }
  0x8d   : > { %1268 = vmatpush1.bf16.msra.mxu0 %v3621_v46  ;;  %1420 = vmatpush1.bf16.msra.mxu1 %v3626_v27  ;;  %v3743_v27 = vld [vmem:[%s3403_s30] ss:$0 sps:$4 sm:$0x66]  }
  0x8e   : > { %1551 = vmatprep.subr.bf16.mxu0 %v3633_v48  ;;  %1609 = vmatprep.subr.bf16.mxu1 %v2815_v0  ;;  %v3668_v0 = vld [vmem:[%s3932_s2 + $0x454] ss:$8 sps:$4 sm:$0xff]  }
  0x90   : > { %1286 = vmatmul.mubr.bf16.vlgmr.msra.gmra.mxu0 %v3640_v56  ;;  %1438 = vmatmul.mubr.bf16.vlgmr.msra.gmra.mxu1 %v3635_v50 }
  0x91   : > { %1552 = vmatpush1.bf16.msra.mxu0 %v3645_v54  ;;  %1610 = vmatpush1.bf16.msra.mxu1 %v2832_v3  ;;  %v3677_v3 = vld [vmem:[%s3932_s2 + $0x450] ss:$8 sps:$4 sm:$0xff]  }
  0x92   : > { %1553 = vmatprep.subr.bf16.mxu0 %v3652_v42  ;;  %1611 = vmatprep.subr.bf16.mxu1 %v2843_v5  ;;  %v3684_v5 = vld [vmem:[%s3932_s2 + $0x444] ss:$8 sps:$4 sm:$0xff]  }
  0x93   : > { %1583 = vmatprep.mubr.bf16.mxu0 %v4037_v52  ;;  %1641 = vmatprep.mubr.bf16.mxu1 %v4037_v52 }
  0x95   : > { %1554 = vmatpush1.bf16.msra.mxu0 %v3661_v34  ;;  %1612 = vmatpush1.bf16.msra.mxu1 %v2856_v7  ;;  %v3691_v7 = vld [vmem:[%s3932_s2 + $0x440] ss:$8 sps:$4 sm:$0xff]  }
  0x96   : > { %1555 = vmatprep.subr.bf16.mxu0 %v3668_v0  ;;  %1613 = vmatprep.subr.bf16.mxu1 %v2874_v9  ;;  %v3698_v9 = vld [vmem:[%s3932_s2 + $0x434] ss:$8 sps:$4 sm:$0xff]  }
  0x99   : > { %1556 = vmatpush1.bf16.msra.mxu0 %v3677_v3  ;;  %1614 = vmatpush1.bf16.msra.mxu1 %v2884_v11  ;;  %v3705_v11 = vld [vmem:[%s3932_s2 + $0x430] ss:$8 sps:$4 sm:$0xff]  }
  0x9a   : > { %1557 = vmatprep.subr.bf16.mxu0 %v3684_v5  ;;  %1615 = vmatprep.subr.bf16.mxu1 %v2896_v13  ;;  %v3712_v13 = vld [vmem:[%s3932_s2 + $0x424] ss:$8 sps:$4 sm:$0xff]  }
  0x9d   : > { %1558 = vmatpush1.bf16.msra.mxu0 %v3691_v7  ;;  %1616 = vmatpush1.bf16.msra.mxu1 %v2910_v15  ;;  %v3719_v15 = vld [vmem:[%s3932_s2 + $0x420] ss:$8 sps:$4 sm:$0xff]  }
  0x9e   : > { %1559 = vmatprep.subr.bf16.mxu0 %v3698_v9  ;;  %1617 = vmatprep.subr.bf16.mxu1 %v2922_v17  ;;  %v3726_v17 = vld [vmem:[%s3932_s2 + $0x414] ss:$8 sps:$4 sm:$0xff]  }
  0xa1   : > { %1560 = vmatpush1.bf16.msra.mxu0 %v3705_v11  ;;  %1618 = vmatpush1.bf16.msra.mxu1 %v2936_v19  ;;  %v3733_v19 = vld [vmem:[%s3932_s2 + $0x410] ss:$8 sps:$4 sm:$0xff]  }
  0xa2   : > { %1561 = vmatprep.subr.bf16.mxu0 %v3712_v13  ;;  %1619 = vmatprep.subr.bf16.mxu1 %v2948_v21  ;;  %v3740_v21 = vld [vmem:[%s3932_s2 + $0x404] ss:$8 sps:$4 sm:$0xff]  }
  0xa5   : > { %1562 = vmatpush1.bf16.msra.mxu0 %v3719_v15  ;;  %1620 = vmatpush1.bf16.msra.mxu1 %v2967_v23  ;;  %v3750_v23 = vld [vmem:[%s3932_s2 + $0x400] ss:$8 sps:$4 sm:$0xff]  }
  0xa6   : > { %1563 = vmatprep.subr.bf16.mxu0 %v3726_v17  ;;  %1621 = vmatprep.subr.bf16.mxu1 %v2979_v25  ;;  %v1469_v25 = vrot.slane %v3743_v27, 1 }
  0xa9   : > { %1564 = vmatpush1.bf16.msra.mxu0 %v3733_v19  ;;  %1622 = vmatpush1.bf16.msra.mxu1 %v2990_v28  ;;  %v4103_v28 = vld [vmem:[#allocation31_spill] sm:$0xff] }
  0xaa   : > { %1565 = vmatprep.subr.bf16.mxu0 %v3740_v21  ;;  %1623 = vmatprep.subr.bf16.mxu1 %v3004_v31  ;;  %v4105_v31 = vld [vmem:[#allocation33_spill] sm:$0xff] }
  0xad   : > { %1566 = vmatpush1.bf16.msra.mxu0 %v3750_v23  ;;  %1624 = vmatpush1.bf16.msra.mxu1 %v3014_v33  ;;  %v4107_v33 = vld [vmem:[#allocation35_spill] sm:$0xff] }
  0xae   : > { %1650 = vmatprep.subr.bf16.mxu0 %v2820_v1  ;;  %1691 = vmatprep.subr.bf16.mxu1 %v3026_v37  ;;  %v4089_v1 = vrot.slane %v3413_v60, 1  ;;  %v4109_v37 = vld [vmem:[#allocation37_spill] sm:$0xff] }
  0xb0   : > { %1584 = vmatmul.mubr.bf16.vlgmr.msra.gmra.mxu0 %v1469_v25  ;;  %1642 = vmatmul.mubr.bf16.vlgmr.msra.gmra.mxu1 %v3439_v40 }
  0xb1   : > { %1651 = vmatpush1.bf16.msra.mxu0 %v2837_v4  ;;  %1692 = vmatpush1.bf16.msra.mxu1 %v3039_v41  ;;  %v4090_v4 = vld [vmem:[#allocation3_spill] sm:$0xff] }
  0xb2   : > { %1652 = vmatprep.subr.bf16.mxu0 %v2851_v6  ;;  %1693 = vmatprep.subr.bf16.mxu1 %v3051_v43  ;;  %v4091_v6 = vld [vmem:[#allocation19_spill] sm:$0xff]  ;;  %v4112_v43 = vld [vmem:[#allocation14_spill] sm:$0xff] }
  0xb3   : > { %1682 = vmatprep.mubr.bf16.mxu0 %v4037_v52  ;;  %1723 = vmatprep.mubr.bf16.mxu1 %v4037_v52  ;;  %v4111_v41 = vld [vmem:[#allocation39_spill] sm:$0xff] }
  0xb5   : > { %1653 = vmatpush1.bf16.msra.mxu0 %v2863_v8  ;;  %1694 = vmatpush1.bf16.msra.mxu1 %v3063_v45  ;;  %v4092_v8 = vld [vmem:[#allocation4_spill] sm:$0xff]  ;;  %v4113_v45 = vld [vmem:[#allocation41_spill] sm:$0xff] }
  0xb6   : > { %1654 = vmatprep.subr.bf16.mxu0 %v2879_v10  ;;  %1695 = vmatprep.subr.bf16.mxu1 %v3075_v47  ;;  %v4093_v10 = vld [vmem:[#allocation21_spill] sm:$0xff]  ;;  %v4114_v47 = vld [vmem:[#allocation15_spill] sm:$0xff] }
  0xb9   : > { %1655 = vmatpush1.bf16.msra.mxu0 %v2889_v12  ;;  %1696 = vmatpush1.bf16.msra.mxu1 %v3089_v49  ;;  %v4095_v12 = vld [vmem:[#allocation23_spill] sm:$0xff] }
  0xba   : > { %1656 = vmatprep.subr.bf16.mxu0 %v2904_v14  ;;  %1697 = vmatprep.subr.bf16.mxu1 %v3101_v51  ;;  %v4096_v14 = vld [vmem:[#allocation6_spill] sm:$0xff]  ;;  %v4115_v49 = vld [vmem:[#allocation43_spill] sm:$0xff]  ;;  %v4116_v51 = vld [vmem:[#allocation16_spill] sm:$0xff] }
  0xbd   : > { %1657 = vmatpush1.bf16.msra.mxu0 %v2917_v16  ;;  %1698 = vmatpush1.bf16.msra.mxu1 %v3115_v53  ;;  %v4097_v16 = vld [vmem:[#allocation25_spill] sm:$0xff] }
  0xbe   : > { %1658 = vmatprep.subr.bf16.mxu0 %v2931_v18  ;;  %1699 = vmatprep.subr.bf16.mxu1 %v3127_v55  ;;  %v4098_v18 = vld [vmem:[#allocation7_spill] sm:$0xff]  ;;  %v4117_v53 = vld [vmem:[#allocation45_spill] sm:$0xff] }
  0xbf   : > { %v4118_v55 = vld [vmem:[#allocation17_spill] sm:$0xff] }
  0xc1   : > { %1659 = vmatpush1.bf16.msra.mxu0 %v2941_v20  ;;  %1700 = vmatpush1.bf16.msra.mxu1 %v3139_v57  ;;  %v4099_v20 = vld [vmem:[#allocation27_spill] sm:$0xff] }
  0xc2   : > { %1660 = vmatprep.subr.bf16.mxu0 %v2955_v22  ;;  %1701 = vmatprep.subr.bf16.mxu1 %v3151_v59  ;;  %v4100_v22 = vld [vmem:[#allocation8_spill] sm:$0xff]  ;;  %v4119_v57 = vld [vmem:[#allocation47_spill] sm:$0xff]  ;;  %v4121_v59 = vld [vmem:[#allocation49_spill] sm:$0xff] }
  0xc5   : > { %1661 = vmatpush1.bf16.msra.mxu0 %v2972_v24  ;;  %1702 = vmatpush1.bf16.msra.mxu1 %v3163_v61  ;;  %v4101_v24 = vld [vmem:[#allocation29_spill] sm:$0xff] }
  0xc6   : > { %1662 = vmatprep.subr.bf16.mxu0 %v2984_v26  ;;  %1703 = vmatprep.subr.bf16.mxu1 %v3175_v63  ;;  %v4102_v26 = vld [vmem:[#allocation9_spill] sm:$0xff] }
  0xc9   : > { %1663 = vmatpush1.bf16.msra.mxu0 %v2997_v29  ;;  %1704 = vmatpush1.bf16.msra.mxu1 %v3187_v30  ;;  %v4104_v29 = vld [vmem:[#allocation10_spill] sm:$0xff]  ;;  %v4122_v30 = vld [vmem:[#allocation20_spill] sm:$0xff] }
  0xca   : > { %1664 = vmatprep.subr.bf16.mxu0 %v3009_v32  ;;  %1705 = vmatprep.subr.bf16.mxu1 %v3199_v35  ;;  %v4106_v32 = vld [vmem:[#allocation11_spill] sm:$0xff] }
  0xcb   : > { %v4123_v35 = vld [vmem:[#allocation51_spill] sm:$0xff] }
  0xcd   : > { %1665 = vmatpush1.bf16.msra.mxu0 %v3021_v36  ;;  %1706 = vmatpush1.bf16.msra.mxu1 %v3212_v2  ;;  %v4094_v2 = vld [vmem:[#allocation5_spill] sm:$0xff]  ;;  %v4108_v36 = vld [vmem:[#allocation12_spill] sm:$0xff] }
  0xce   : > { %1734 = vmatprep.subr.bf16.mxu0 %v3033_v38  ;;  %1777 = vmatprep.subr.bf16.mxu1 %v3224_v62  ;;  %v4110_v38 = vld [vmem:[#allocation13_spill] sm:$0xff] }
  0xd0   : > { %1683 = vmatmul.mubr.bf16.vlgmr.msra.gmra.mxu0 %v3232_v58  ;;  %1724 = vmatmul.mubr.bf16.vlgmr.msra.gmra.mxu1 %v4089_v1  ;;  %v4120_v58 = vld [vmem:[#allocation18_spill] sm:$0xff] }
  0xd1   : > { %1735 = vmatpush1.bf16.msra.mxu0 %v4090_v4  ;;  %1778 = vmatpush1.bf16.msra.mxu1 %v4091_v6  ;;  %v4124_v1 = vld [vmem:[#allocation22_spill] sm:$0xff]  ;;  %v4125_v4 = vld [vmem:[#allocation53_spill] sm:$0xff] }
  0xd2   : > { %1736 = vmatprep.subr.bf16.mxu0 %v4092_v8  ;;  %1779 = vmatprep.subr.bf16.mxu1 %v4093_v10  ;;  %v4126_v10 = vld [vmem:[#allocation24_spill] sm:$0xff] }
  0xd3   : > { %1766 = vmatprep.mubr.bf16.mxu0 %v4037_v52  ;;  %1809 = vmatprep.mubr.bf16.mxu1 %v4037_v52 }
  0xd5   : > { %1737 = vmatpush1.bf16.msra.mxu0 %v4094_v2  ;;  %1780 = vmatpush1.bf16.msra.mxu1 %v4095_v12 }
  0xd6   : > { %1738 = vmatprep.subr.bf16.mxu0 %v4096_v14  ;;  %1781 = vmatprep.subr.bf16.mxu1 %v4097_v16  ;;  %v4128_v14 = vld [vmem:[#allocation26_spill] sm:$0xff]  ;;  %v4129_v16 = vld [vmem:[#allocation57_spill] sm:$0xff] }
  0xd9   : > { %1739 = vmatpush1.bf16.msra.mxu0 %v4098_v18  ;;  %1782 = vmatpush1.bf16.msra.mxu1 %v4099_v20  ;;  %v4130_v18 = vld [vmem:[#allocation28_spill] sm:$0xff]  ;;  %v4131_v20 = vld [vmem:[#allocation59_spill] sm:$0xff] }
  0xda   : > { %1740 = vmatprep.subr.bf16.mxu0 %v4100_v22  ;;  %1783 = vmatprep.subr.bf16.mxu1 %v4101_v24  ;;  %v4132_v22 = vld [vmem:[#allocation30_spill] sm:$0xff]  ;;  %v4133_v24 = vld [vmem:[#allocation61_spill] sm:$0xff] }
  0xdd   : > { %1741 = vmatpush1.bf16.msra.mxu0 %v4102_v26  ;;  %1784 = vmatpush1.bf16.msra.mxu1 %v4103_v28  ;;  %v4134_v26 = vld [vmem:[#allocation32_spill] sm:$0xff]  ;;  %v4135_v28 = vld [vmem:[#allocation63_spill] sm:$0xff] }
  0xde   : > { %1742 = vmatprep.subr.bf16.mxu0 %v4104_v29  ;;  %1785 = vmatprep.subr.bf16.mxu1 %v4105_v31  ;;  %v4136_v29 = vld [vmem:[#allocation34_spill] sm:$0xff]  ;;  %v4137_v31 = vld [vmem:[#allocation65_spill] sm:$0xff] }
  0xe1   : > { %1743 = vmatpush1.bf16.msra.mxu0 %v4106_v32  ;;  %1786 = vmatpush1.bf16.msra.mxu1 %v4107_v33  ;;  %v4138_v32 = vld [vmem:[#allocation36_spill] sm:$0xff]  ;;  %v4139_v33 = vld [vmem:[#allocation67_spill] sm:$0xff] }
  0xe2   : > { %1744 = vmatprep.subr.bf16.mxu0 %v4108_v36  ;;  %1787 = vmatprep.subr.bf16.mxu1 %v4109_v37  ;;  %v4140_v36 = vld [vmem:[#allocation38_spill] sm:$0xff]  ;;  %v4141_v37 = vld [vmem:[#allocation69_spill] sm:$0xff] }
  0xe5   : > { %1745 = vmatpush1.bf16.msra.mxu0 %v4110_v38  ;;  %1788 = vmatpush1.bf16.msra.mxu1 %v4111_v41  ;;  %v4142_v38 = vld [vmem:[#allocation40_spill] sm:$0xff]  ;;  %v4143_v41 = vld [vmem:[#allocation71_spill] sm:$0xff] }
  0xe6   : > { %1746 = vmatprep.subr.bf16.mxu0 %v4112_v43  ;;  %1789 = vmatprep.subr.bf16.mxu1 %v4113_v45  ;;  %v4144_v43 = vld [vmem:[#allocation42_spill] sm:$0xff]  ;;  %v4145_v45 = vld [vmem:[#allocation73_spill] sm:$0xff] }
  0xe9   : > { %1747 = vmatpush1.bf16.msra.mxu0 %v4114_v47  ;;  %1790 = vmatpush1.bf16.msra.mxu1 %v4115_v49  ;;  %v4146_v47 = vld [vmem:[#allocation44_spill] sm:$0xff]  ;;  %v4147_v49 = vld [vmem:[#allocation75_spill] sm:$0xff] }
  0xea   : > { %1748 = vmatprep.subr.bf16.mxu0 %v4116_v51  ;;  %1791 = vmatprep.subr.bf16.mxu1 %v4117_v53  ;;  %v4148_v51 = vld [vmem:[#allocation46_spill] sm:$0xff]  ;;  %v4149_v53 = vld [vmem:[#allocation48_spill] sm:$0xff] }
  0xed   : > { %1749 = vmatpush1.bf16.msra.mxu0 %v4118_v55  ;;  %1792 = vmatpush1.bf16.msra.mxu1 %v4119_v57  ;;  %v2435_v55 = vld [vmem:[%s3403_s30 + $0x4] sm:$0x3]  ;;  %v4150_v57 = vld [vmem:[#allocation50_spill] sm:$0xff] }
  0xee   : > { %1820 = vmatprep.subr.bf16.mxu0 %v4120_v58  ;;  %1865 = vmatprep.subr.bf16.mxu1 %v4121_v59 }
  0xf0   : > { %v441_v61 = vpop.f32.mrf.mxu0  ;;  %v562_v62 = vpop.f32.mrf.mxu1  ;;  %1767 = vmatmul.mubr.bf16.vlgmr.msra.gmra.mxu0 %v3640_v56  ;;  %1810 = vmatmul.mubr.bf16.vlgmr.msra.gmra.mxu1 %v3635_v50  ;;  %v4127_v50 = vld [vmem:[#allocation55_spill] sm:$0xff] }
  0xf1   : > { %v563_v63 = vadd.f32 %v562_v62, %v441_v61  ;;  %1821 = vmatpush1.bf16.msra.mxu0 %v4122_v30  ;;  %1866 = vmatpush1.bf16.msra.mxu1 %v4123_v35  ;;  %v4151_v62 = vld [vmem:[#allocation52_spill] sm:$0xff]  ;;  %v4152_v35 = vld [vmem:[#allocation54_spill] sm:$0xff] }
  0xf2   : > { %v443_v60 = vpop.f32.mrf.mxu0  ;;  %v564_v40 = vpop.f32.mrf.mxu1  ;;  %1822 = vmatprep.subr.bf16.mxu0 %v4124_v1  ;;  %1867 = vmatprep.subr.bf16.mxu1 %v4125_v4  ;;  %v4154_v1 = vld [vmem:[#allocation58_spill] sm:$0xff] }
  0xf3   : > { %v565_v6 = vadd.f32 %v564_v40, %v443_v60  ;;  %1852 = vmatprep.mubr.bf16.mxu0 %v4037_v52  ;;  %1897 = vmatprep.mubr.bf16.mxu1 %v4037_v52  ;;  %v4156_v4 = vld [vmem:[#allocation62_spill] sm:$0xff] }
  0xf4   : > { %v445_v8 = vpop.f32.mrf.mxu0  ;;  %v566_v56 = vpop.f32.mrf.mxu1 }
  0xf5   : > { %1823 = vmatpush1.bf16.msra.mxu0 %v4126_v10  ;;  %1868 = vmatpush1.bf16.msra.mxu1 %v4127_v50  ;;  %v4159_v8 = vld [vmem:[#allocation68_spill] sm:$0xff]  ;;  %v4162_v56 = vld [vmem:[#allocation74_spill] sm:$0xff]  ;;  %v2711_v10 = vld [vmem:[%s3403_s30 + $0x4] ss:$0 sps:$4 sm:$0x66]  }
  0xf6   : > { %v446_v2 = vpop.f32.mrf.mxu0  ;;  %v567_v12 = vpop.f32.mrf.mxu1  ;;  %1824 = vmatprep.subr.bf16.mxu0 %v4128_v14  ;;  %1869 = vmatprep.subr.bf16.mxu1 %v4129_v16  ;;  %v4163_v50 = vld [vmem:[#allocation76_spill] sm:$0xff] }
  0xf7   : > { %v4164_v2 = vld [vmem:[#allocation77_spill] sm:$0xff] }
  0xf9   : > { %1825 = vmatpush1.bf16.msra.mxu0 %v4130_v18  ;;  %1870 = vmatpush1.bf16.msra.mxu1 %v4131_v20 }
  0xfa   : > { %1826 = vmatprep.subr.bf16.mxu0 %v4132_v22  ;;  %1871 = vmatprep.subr.bf16.mxu1 %v4133_v24 }
  0xfd   : > { %1827 = vmatpush1.bf16.msra.mxu0 %v4134_v26  ;;  %1872 = vmatpush1.bf16.msra.mxu1 %v4135_v28 }
  0xfe   : > { %1828 = vmatprep.subr.bf16.mxu0 %v4136_v29  ;;  %1873 = vmatprep.subr.bf16.mxu1 %v4137_v31 }
 0x101   : > { %1829 = vmatpush1.bf16.msra.mxu0 %v4138_v32  ;;  %1874 = vmatpush1.bf16.msra.mxu1 %v4139_v33 }
 0x102   : > { %1830 = vmatprep.subr.bf16.mxu0 %v4140_v36  ;;  %1875 = vmatprep.subr.bf16.mxu1 %v4141_v37 }
 0x105   : > { %1831 = vmatpush1.bf16.msra.mxu0 %v4142_v38  ;;  %1876 = vmatpush1.bf16.msra.mxu1 %v4143_v41 }
 0x106   : > { %1832 = vmatprep.subr.bf16.mxu0 %v4144_v43  ;;  %1877 = vmatprep.subr.bf16.mxu1 %v4145_v45 }
 0x109   : > { %1833 = vmatpush1.bf16.msra.mxu0 %v4146_v47  ;;  %1878 = vmatpush1.bf16.msra.mxu1 %v4147_v49 }
 0x10a   : > { %1834 = vmatprep.subr.bf16.mxu0 %v4148_v51  ;;  %1879 = vmatprep.subr.bf16.mxu1 %v3609_v39 }
 0x10d   : > { %1835 = vmatpush1.bf16.msra.mxu0 %v4149_v53  ;;  %1880 = vmatpush1.bf16.msra.mxu1 %v3621_v46 }
 0x10e   : > { %1920 = vmatprep.subr.bf16.mxu0 %v4150_v57  ;;  %1969 = vmatprep.subr.bf16.mxu1 %v3633_v48 }
 0x110   : > { %v706_v58 = vpop.f32.mrf.mxu0  ;;  %v848_v59 = vpop.f32.mrf.mxu1  ;;  %1853 = vmatmul.mubr.bf16.vlgmr.msra.gmra.mxu0 %v1469_v25  ;;  %1898 = vmatmul.mubr.bf16.vlgmr.msra.gmra.mxu1 %v2435_v55 }
 0x111   : > { %v713_v61 = vadd.f32 %v706_v58, %v563_v63  ;;  %1921 = vmatpush1.bf16.msra.mxu0 %v4151_v62  ;;  %1970 = vmatpush1.bf16.msra.mxu1 %v3645_v54  ;;  %v4153_v63 = vld [vmem:[#allocation56_spill] sm:$0xff] }
 0x112   : > { %v708_v39 = vpop.f32.mrf.mxu0  ;;  %v850_v30 = vpop.f32.mrf.mxu1  ;;  %1922 = vmatprep.subr.bf16.mxu0 %v4152_v35  ;;  %1971 = vmatprep.subr.bf16.mxu1 %v3652_v42  ;;  %v4155_v42 = vld [vmem:[#allocation60_spill] sm:$0xff] }
 0x113   : > { %v855_v46 = vadd.f32 %v848_v59, %v713_v61  ;;  %v714_v60 = vadd.f32 %v708_v39, %v565_v6  ;;  %1952 = vmatprep.mubr.bf16.mxu0 %v4037_v52  ;;  %2001 = vmatprep.mubr.bf16.mxu1 %v4037_v52  ;;  %v4157_v52 = vld [vmem:[#allocation64_spill] sm:$0xff]  ;;  %v2710_v6 = vld [vmem:[%s3403_s30 + $0x4] ss:$0 sps:$4 sm:$0x77]  }
 0x114   : > { %v710_v27 = vpop.f32.mrf.mxu0  ;;  %v852_v48 = vpop.f32.mrf.mxu1 }
 0x115   : > { %v856_v25 = vadd.f32 %v850_v30, %v714_v60  ;;  %1923 = vmatpush1.bf16.msra.mxu0 %v4153_v63  ;;  %1972 = vmatpush1.bf16.msra.mxu1 %v3661_v34  ;;  %v4158_v34 = vld [vmem:[#allocation66_spill] sm:$0xff] }
 0x116   : > { %v711_v54 = vpop.f32.mrf.mxu0  ;;  %v853_v40 = vpop.f32.mrf.mxu1  ;;  %1924 = vmatprep.subr.bf16.mxu0 %v4154_v1  ;;  %1973 = vmatprep.subr.bf16.mxu1 %v3668_v0  ;;  %v4160_v0 = vld [vmem:[#allocation70_spill] sm:$0xff] }
 0x119   : > { %1925 = vmatpush1.bf16.msra.mxu0 %v4155_v42  ;;  %1974 = vmatpush1.bf16.msra.mxu1 %v3677_v3  ;;  %v1915_v3 = vshll.u32 %v2710_v6, 16 }
 0x11a   : > { %1926 = vmatprep.subr.bf16.mxu0 %v4156_v4  ;;  %1975 = vmatprep.subr.bf16.mxu1 %v3684_v5  ;;  %v4161_v5 = vld [vmem:[#allocation72_spill] sm:$0xff] }
 0x11d   : > { %1927 = vmatpush1.bf16.msra.mxu0 %v4157_v52  ;;  %1976 = vmatpush1.bf16.msra.mxu1 %v3691_v7  ;;  %v1913_v7 = vshrl.u32 %v2710_v6, 16 }
 0x11e   : > { %1928 = vmatprep.subr.bf16.mxu0 %v4158_v34  ;;  %1977 = vmatprep.subr.bf16.mxu1 %v3698_v9  ;;  %v1917_v9 = vrot.slane %v1915_v3, 1 }
 0x121   : > { %1929 = vmatpush1.bf16.msra.mxu0 %v4159_v8  ;;  %1978 = vmatpush1.bf16.msra.mxu1 %v3705_v11  ;;  %v1918_v11 = vor.u32 %v1917_v9, %v1913_v7 }
 0x122   : > { %1930 = vmatprep.subr.bf16.mxu0 %v4160_v0  ;;  %1979 = vmatprep.subr.bf16.mxu1 %v3712_v13  ;;  %v1967_v13 = vrot.slane %v2711_v10, 1 }
 0x125   : > { %1931 = vmatpush1.bf16.msra.mxu0 %v4161_v5  ;;  %1980 = vmatpush1.bf16.msra.mxu1 %v3719_v15 }
 0x126   : > { %1932 = vmatprep.subr.bf16.mxu0 %v4162_v56  ;;  %1981 = vmatprep.subr.bf16.mxu1 %v3726_v17 }
 0x129   : > { %1933 = vmatpush1.bf16.msra.mxu0 %v4163_v50  ;;  %1982 = vmatpush1.bf16.msra.mxu1 %v3733_v19 }
 0x12a   : > { %1934 = vmatprep.subr.bf16.mxu0 %v3614_v44  ;;  %1983 = vmatprep.subr.bf16.mxu1 %v3740_v21 }
 0x12d   : > { %1935 = vmatpush1.bf16.msra.mxu0 %v4164_v2  ;;  %1984 = vmatpush1.bf16.msra.mxu1 %v3750_v23 }
 0x130   : > { %v1000_v15 = vpop.f32.mrf.mxu0  ;;  %v1146_v12 = vpop.f32.mrf.mxu1  ;;  %1953 = vmatmul.mubr.bf16.vlgmr.msra.gmra.mxu0 %v1918_v11  ;;  %2002 = vmatmul.mubr.bf16.vlgmr.msra.gmra.mxu1 %v1967_v13  ;;  %v1595_v13 = vlaneseq }
 0x131   : > { %v1007_v17 = vadd.f32 %v1000_v15, %v855_v46 }
 0x132   : > { %v1002_v14 = vpop.f32.mrf.mxu0  ;;  %v1148_v16 = vpop.f32.mrf.mxu1  ;;  %v1596_v15 = vshrl.u32 %v1595_v13, 7 }
 0x133   : > { %v1153_v18 = vadd.f32 %v1146_v12, %v1007_v17  ;;  %v1008_v20 = vadd.f32 %v1002_v14, %v856_v25 }
 0x134   : > { %v1004_v19 = vpop.f32.mrf.mxu0  ;;  %v1150_v22 = vpop.f32.mrf.mxu1  ;;  %v1597_v14 = vsub.s32 0, %v1596_v15 }
 0x135   : > { %v1154_v44 = vadd.f32 %v1148_v16, %v1008_v20  ;;  %v280_v20 = vld [vmem:[%s3933_s3] sm:$0x3]  ;;  %v1601_v19 = vsub.s32 1, %v1596_v15 }
 0x136   : > { %v1005_v24 = vpop.f32.mrf.mxu0  ;;  %v1151_v21 = vpop.f32.mrf.mxu1 }
 0x150   : > { %v1287_v26 = vpop.f32.mrf.mxu0  ;;  %v1439_v28 = vpop.f32.mrf.mxu1 }
 0x151   : > { %v1294_v29 = vadd.f32 %v1287_v26, %v1153_v18 }
 0x152   : > { %v1289_v31 = vpop.f32.mrf.mxu0  ;;  %v1441_v32 = vpop.f32.mrf.mxu1 }
 0x153   : > { %v1446_v23 = vadd.f32 %v1439_v28, %v1294_v29  ;;  %v1295_v33 = vadd.f32 %v1289_v31, %v1154_v44  ;;  %v1598_v44 = vrot.slane %v280_v20, %v1597_v14  ;;  %v1602_v28 = vrot.slane %v280_v20, %v1601_v19 }
 0x154   : > { %v1291_v36 = vpop.f32.mrf.mxu0  ;;  %v1443_v37 = vpop.f32.mrf.mxu1 }
 0x155   : > { %v1447_v38 = vadd.f32 %v1441_v32, %v1295_v33 }
 0x156   : > { %v1292_v41 = vpop.f32.mrf.mxu0  ;;  %v1444_v43 = vpop.f32.mrf.mxu1 }
 0x170   : > { %v1585_v45 = vpop.f32.mrf.mxu0  ;;  %v1643_v47 = vpop.f32.mrf.mxu1 }
 0x171   : > { %v1592_v49 = vadd.f32 %v1585_v45, %v1446_v23 }
 0x172   : > { %v1587_v51 = vpop.f32.mrf.mxu0  ;;  %v1645_v53 = vpop.f32.mrf.mxu1 }
 0x173   : > { %v1593_v55 = vadd.f32 %v1587_v51, %v1447_v38  ;;  %v1605_v33 = vadd.f32 %v1598_v44, %v1592_v49 }
 0x174   : > { %v1589_v57 = vpop.f32.mrf.mxu0  ;;  %v1647_v58 = vpop.f32.mrf.mxu1 }
 0x175   : > { %v1606_v43 = vadd.f32 %v1602_v28, %v1593_v55  ;;  %v1607_v57 = vmax.f32 %v1605_v33, 0.0 }
 0x176   : > { %v1590_v59 = vpop.f32.mrf.mxu0  ;;  %v1648_v61 = vpop.f32.mrf.mxu1 }
 0x177   : > { %v1608_v61 = vmax.f32 %v1606_v43, 0.0 }
 0x190   : > { %v1684_v62 = vpop.f32.mrf.mxu0  ;;  %v1725_v39 = vpop.f32.mrf.mxu1 }
 0x191   : > { %v1685_v30 = vadd.f32 %v1684_v62, %v1643_v47 }
 0x192   : > { %v1686_v35 = vpop.f32.mrf.mxu0  ;;  %v1727_v46 = vpop.f32.mrf.mxu1 }
 0x193   : > { %v1732_v60 = vadd.f32 %v1725_v39, %v1685_v30  ;;  %v1687_v27 = vadd.f32 %v1686_v35, %v1645_v53 }
 0x194   : > { %v1688_v48 = vpop.f32.mrf.mxu0  ;;  %v1729_v25 = vpop.f32.mrf.mxu1 }
 0x195   : > { %v1733_v63 = vadd.f32 %v1727_v46, %v1687_v27 }
 0x196   : > { %v1689_v54 = vpop.f32.mrf.mxu0  ;;  %v1730_v40 = vpop.f32.mrf.mxu1 }
 0x1b0   : > { %v1768_v1 = vpop.f32.mrf.mxu0  ;;  %v1811_v42 = vpop.f32.mrf.mxu1 }
 0x1b1   : > { %v1775_v2 = vadd.f32 %v1768_v1, %v1732_v60 }
 0x1b2   : > { %v1770_v4 = vpop.f32.mrf.mxu0  ;;  %v1813_v52 = vpop.f32.mrf.mxu1 }
 0x1b3   : > { %v1776_v12 = vadd.f32 %v1770_v4, %v1733_v63  ;;  %v1818_v17 = vadd.f32 %v1811_v42, %v1775_v2 }
 0x1b4   : > { %v1772_v34 = vpop.f32.mrf.mxu0  ;;  %v1815_v6 = vpop.f32.mrf.mxu1 }
 0x1b5   : > { %v1819_v16 = vadd.f32 %v1813_v52, %v1776_v12 }
 0x1b6   : > { %v1773_v8 = vpop.f32.mrf.mxu0  ;;  %v1816_v0 = vpop.f32.mrf.mxu1 }
 0x1d0   : > { %v1854_v3 = vpop.f32.mrf.mxu0  ;;  %v1899_v5 = vpop.f32.mrf.mxu1 }
 0x1d1   : > { %v1861_v18 = vadd.f32 %v1854_v3, %v1818_v17 }
 0x1d2   : > { %v1856_v56 = vpop.f32.mrf.mxu0  ;;  %v1901_v7 = vpop.f32.mrf.mxu1 }
 0x1d3   : > { %v1862_v22 = vadd.f32 %v1856_v56, %v1819_v16  ;;  %v1906_v24 = vadd.f32 %v1899_v5, %v1861_v18 }
 0x1d4   : > { %v1858_v9 = vpop.f32.mrf.mxu0  ;;  %v1903_v10 = vpop.f32.mrf.mxu1 }
 0x1d5   : > { %v1907_v29 = vadd.f32 %v1901_v7, %v1862_v22 }
 0x1d6   : > { %v1859_v50 = vpop.f32.mrf.mxu0  ;;  %v1904_v11 = vpop.f32.mrf.mxu1 }
 0x1f0   : > { %v1954_v21 = vpop.f32.mrf.mxu0  ;;  %v2003_v26 = vpop.f32.mrf.mxu1 }
 0x1f1   : > { %v1961_v31 = vadd.f32 %v1954_v21, %v1906_v24 }
 0x1f2   : > { %v1956_v32 = vpop.f32.mrf.mxu0  ;;  %v2005_v23 = vpop.f32.mrf.mxu1 }
 0x1f3   : > { %v2010_v36 = vadd.f32 %v2003_v26, %v1961_v31  ;;  %v1962_v37 = vadd.f32 %v1956_v32, %v1907_v29 }
 0x1f4   : > { %v1958_v38 = vpop.f32.mrf.mxu0  ;;  %v2007_v41 = vpop.f32.mrf.mxu1 }
 0x1f5   : > { %v2012_v45 = vadd.f32 %v2010_v36, %v1598_v44  ;;  %v2011_v47 = vadd.f32 %v2005_v23, %v1962_v37 }
 0x1f6   : > { %v1959_v51 = vpop.f32.mrf.mxu0  ;;  %v2008_v53 = vpop.f32.mrf.mxu1 }
 0x1f7   : > { %v2014_v58 = vmax.f32 %v2012_v45, 0.0  ;;  %v2013_v59 = vadd.f32 %v2011_v47, %v1602_v28 }
 0x1f9   : > { %v2016_v62 = vmax.f32 %v1607_v57, %v2014_v58  ;;  %v2015_v39 = vmax.f32 %v2013_v59, 0.0 }
 0x1fb   : > { %v2017_v49 = vmax.f32 %v1608_v61, %v2015_v39 }
 0x1fd   : > { %v2440_v30 = vpack.c.bf16 %v2017_v49, %v2016_v62 }
 0x1ff   : > { %2441 = vst.sshfl [vmem:[%s278_s15] sm:$0x33 pattern:$0x76325410] %v2440_v30 }
 0x200 PF: > { %s14_s19 = sadd.s32 1, %s2750_s19   ;;  %s4165_s15 = smov %s2742_s17 }
 0x201   : > { %p11_p9 = scmp.ge.s32.totalorder %s14_s19, 10   ;;  %s4166_s16 = smov %s2746_s18 }
 0x202   : > { %s4167_s17 = smov %s4170_s20  ;;  %s4168_s18 = smov %s4174_s21 }
 0x203   :  { %13 = sbr.rel (!%p11_p9) target bundleno = 3 (0x3), region = 79 }

// kernel: crnn_forward.10
= control target key start
LH: loop header
LB: loop body
LE: loop exit
PB: predicated region body
PF: predicated region fallthrough
CT: control target
= control target key end

     0   :  { %s4439_s15 = smov 0   ;;  %s4441_s16 = smov 0   ;;  %s6512_s0 = inlined_call_operand.vmem [shape: bf16[2,6,6,256], index: 0, kind: input, shape index: {}, may-alias: {0,1}]   ;;  %s6513_s1 = inlined_call_operand.vmem [shape: bf16[2,6,6,256], index: 1, kind: input, shape index: {}, may-alias: {0,1}]   ;;  %s6514_s2 = inlined_call_operand.vmem [shape: bf16[9,256,256], index: 2, kind: input, shape index: {}]   ;;  %s6515_s3 = inlined_call_operand.vmem [shape: f32[1,256], index: 3, kind: input, shape index: {}]   ;;  %s6516_s4 = inlined_call_operand.vmem [shape: bf16[2,2,4,256], index: 4, kind: output, shape index: {}]  }
   0x1   :  { %s4443_s17 = smov 0   ;;  %s4445_s18 = smov 0  }
   0x2   :  { %s4447_s19 = smov 0  }
   0x3 LB: > { %s23_s20 = sadd.s32 1, %s4404_s17  ;;  %s26_s21 = sadd.s32 1, %s4408_s18  ;;  %s4412_s19 = sphi %s4447_s19, %s14_s19   ;;  %s4408_s18 = sphi %s4445_s18, %s6712_s18   ;;  %s4404_s17 = sphi %s4443_s17, %s6711_s17   ;;  %s4400_s16 = sphi %s4441_s16, %s6710_s16   ;;  %s4396_s15 = sphi %s4439_s15, %s6709_s15  }
   0x4   : > { %p24_p0 = scmp.ge.s32.totalorder %s23_s20, 2  ;;  %p3105_p1 = scmp.ge.s32.totalorder %s4412_s19, 1 }
   0x5   : > { %p206_p2 = scmp.lt.s32.totalorder %s4412_s19, 5 }
   0x6   : > { %s6714_s20 = smov (%p24_p0, %s23_s20), 0  ;;  %s6716_s21 = smov (!%p24_p0, %s26_s21), %s4408_s18 }
   0x7   : > { %p207_p3 = pnand %p3105_p1, %p206_p2  ;;  %p28_p4 = scmp.ge.s32.totalorder %s6716_s21, 2 }
   0x9   : > { %s6718_s21 = smov (%p28_p4, %s6716_s21), 0  ;;  %210 = sbr.rel (%p207_p3) target bundleno = 799 (0x31f), region = 36 }
   0xe   : > { %v3736_v0 = vld [vmem:[%s6514_s2 + $0x174] ss:$8 sps:$4 sm:$0xff]   ;;  %v3740_v2 = vld [vmem:[%s6514_s2 + $0x170] ss:$8 sps:$4 sm:$0xff]   ;;  %v3742_v4 = vld [vmem:[%s6514_s2 + $0x164] ss:$8 sps:$4 sm:$0xff]  }
   0xf   : > { %v3738_v1 = vld [vmem:[%s6514_s2 + $0x74] ss:$8 sps:$4 sm:$0xff]   ;;  %534 = vmatprep.subr.bf16.mxu0 %v3736_v0  ;;  %v3741_v3 = vld [vmem:[%s6514_s2 + $0x70] ss:$8 sps:$4 sm:$0xff]   ;;  %v3744_v5 = vld [vmem:[%s6514_s2 + $0x64] ss:$8 sps:$4 sm:$0xff]  }
  0x10   : > { %742 = vmatprep.subr.bf16.mxu1 %v3738_v1  ;;  %535 = vmatpush1.bf16.msra.mxu0 %v3740_v2  ;;  %v3746_v6 = vld [vmem:[%s6514_s2 + $0x160] ss:$8 sps:$4 sm:$0xff]   ;;  %v3748_v8 = vld [vmem:[%s6514_s2 + $0x154] ss:$8 sps:$4 sm:$0xff]   ;;  %v3752_v10 = vld [vmem:[%s6514_s2 + $0x150] ss:$8 sps:$4 sm:$0xff]  }
  0x11   : > { %743 = vmatpush1.bf16.msra.mxu1 %v3741_v3  ;;  %536 = vmatprep.subr.bf16.mxu0 %v3742_v4  ;;  %v3747_v7 = vld [vmem:[%s6514_s2 + $0x60] ss:$8 sps:$4 sm:$0xff]   ;;  %v3750_v9 = vld [vmem:[%s6514_s2 + $0x54] ss:$8 sps:$4 sm:$0xff]   ;;  %v3753_v11 = vld [vmem:[%s6514_s2 + $0x50] ss:$8 sps:$4 sm:$0xff]  }
  0x12   : > { %744 = vmatprep.subr.bf16.mxu1 %v3744_v5  ;;  %v3754_v12 = vld [vmem:[%s6514_s2 + $0x144] ss:$8 sps:$4 sm:$0xff]   ;;  %v3758_v14 = vld [vmem:[%s6514_s2 + $0x140] ss:$8 sps:$4 sm:$0xff]   ;;  %v3760_v16 = vld [vmem:[%s6514_s2 + $0x134] ss:$8 sps:$4 sm:$0xff]  }
  0x13   : > { %v3756_v13 = vld [vmem:[%s6514_s2 + $0x44] ss:$8 sps:$4 sm:$0xff]   ;;  %v3759_v15 = vld [vmem:[%s6514_s2 + $0x40] ss:$8 sps:$4 sm:$0xff]   ;;  %v3762_v17 = vld [vmem:[%s6514_s2 + $0x34] ss:$8 sps:$4 sm:$0xff]  }
  0x14   : > { %537 = vmatpush1.bf16.msra.mxu0 %v3746_v6  ;;  %v3764_v18 = vld [vmem:[%s6514_s2 + $0x130] ss:$8 sps:$4 sm:$0xff]   ;;  %v3766_v20 = vld [vmem:[%s6514_s2 + $0x124] ss:$8 sps:$4 sm:$0xff]   ;;  %v3770_v22 = vld [vmem:[%s6514_s2 + $0x120] ss:$8 sps:$4 sm:$0xff]  }
  0x15   : > { %745 = vmatpush1.bf16.msra.mxu1 %v3747_v7  ;;  %538 = vmatprep.subr.bf16.mxu0 %v3748_v8  ;;  %v3765_v19 = vld [vmem:[%s6514_s2 + $0x30] ss:$8 sps:$4 sm:$0xff]   ;;  %v3768_v21 = vld [vmem:[%s6514_s2 + $0x24] ss:$8 sps:$4 sm:$0xff]   ;;  %s4543_s30 = sshll.u32 %s4396_s15, 1  ;;  %p253_p5 = scmp.lt.s32.totalorder %s4400_s16, 1 }
  0x16   : > { %746 = vmatprep.subr.bf16.mxu1 %v3750_v9  ;;  %v3771_v23 = vld [vmem:[%s6514_s2 + $0x20] ss:$8 sps:$4 sm:$0xff]   ;;  %v3772_v24 = vld [vmem:[%s6514_s2 + $0x114] ss:$8 sps:$4 sm:$0xff]   ;;  %p255_p6 = scmp.lt.s32.totalorder %s4543_s30, 5  ;;  %s3694_s7 = sadd.s32 2, %s4543_s30 }
  0x17   : > { %v3774_v25 = vld [vmem:[%s6514_s2 + $0x14] ss:$8 sps:$4 sm:$0xff]   ;;  %v3776_v26 = vld [vmem:[%s6514_s2 + $0x110] ss:$8 sps:$4 sm:$0xff]   ;;  %v3778_v28 = vld [vmem:[%s6514_s2 + $0x104] ss:$8 sps:$4 sm:$0xff]  }
  0x18   : > { %539 = vmatpush1.bf16.msra.mxu0 %v3752_v10  ;;  %v3777_v27 = vld [vmem:[%s6514_s2 + $0x10] ss:$8 sps:$4 sm:$0xff]   ;;  %v3780_v29 = vld [vmem:[%s6514_s2 + $0x4] ss:$8 sps:$4 sm:$0xff]   ;;  %s6720_s16 = smov (!%p253_p5, %s4400_s16), 1  ;;  %p267_p7 = scmp.lt.s32.totalorder %s3694_s7, 5 }
  0x19   : > { %747 = vmatpush1.bf16.msra.mxu1 %v3753_v11  ;;  %540 = vmatprep.subr.bf16.mxu0 %v3754_v12  ;;  %s256_s26 = scalar_select %p255_p6, %s4543_s30, 5  ;;  %v3782_v30 = vld [vmem:[%s6514_s2 + $0x100] ss:$8 sps:$4 sm:$0xff]   ;;  %v3784_v32 = vld [vmem:[%s6514_s2 + $0x1f4] ss:$8 sps:$4 sm:$0xff]  }
  0x1a   : > { %748 = vmatprep.subr.bf16.mxu1 %v3756_v13  ;;  %v3783_v31 = vld [vmem:[%s6514_s2] ss:$8 sps:$4 sm:$0xff]   ;;  %v3786_v33 = vld [vmem:[%s6514_s2 + $0xf4] ss:$8 sps:$4 sm:$0xff]   ;;  %s3695_s10 = smul.u32 12, %s6720_s16  ;;  %s6722_s7 = smov (!%p267_p7, %s3694_s7), 5 }
  0x1b   : > { %s3107_s11 = sshll.u32 %s256_s26, 1  ;;  %v3788_v34 = vld [vmem:[%s6514_s2 + $0x1f0] ss:$8 sps:$4 sm:$0xff]   ;;  %v3790_v36 = vld [vmem:[%s6514_s2 + $0x1e4] ss:$8 sps:$4 sm:$0xff]   ;;  %s3110_s12 = sshll.u32 %s6722_s7, 1 }
  0x1c   : > { %541 = vmatpush1.bf16.msra.mxu0 %v3758_v14  ;;  %v3789_v35 = vld [vmem:[%s6514_s2 + $0xf0] ss:$8 sps:$4 sm:$0xff]   ;;  %v3792_v37 = vld [vmem:[%s6514_s2 + $0xe4] ss:$8 sps:$4 sm:$0xff]   ;;  %s259_s26 = sadd.s32 %s3695_s10, %s3107_s11  ;;  %v3794_v38 = vld [vmem:[%s6514_s2 + $0x1e0] ss:$8 sps:$4 sm:$0xff]   ;;  %s271_s25 = sadd.s32 %s3695_s10, %s3110_s12 }
  0x1d   : > { %749 = vmatpush1.bf16.msra.mxu1 %v3759_v15  ;;  %542 = vmatprep.subr.bf16.mxu0 %v3760_v16  ;;  %v3795_v39 = vld [vmem:[%s6514_s2 + $0xe0] ss:$8 sps:$4 sm:$0xff]   ;;  %v3796_v40 = vld [vmem:[%s6514_s2 + $0x1d4] ss:$8 sps:$4 sm:$0xff]   ;;  %s3108_s9 = sshll.u32 %s259_s26, 2  ;;  %p278_p8 = scmp.lt.s32.totalorder %s4396_s15, 1 }
  0x1e   : > { %750 = vmatprep.subr.bf16.mxu1 %v3762_v17  ;;  %v3798_v41 = vld [vmem:[%s6514_s2 + $0xd4] ss:$8 sps:$4 sm:$0xff]   ;;  %v3800_v42 = vld [vmem:[%s6514_s2 + $0x1d0] ss:$8 sps:$4 sm:$0xff]   ;;  %s4620_s27 = scalar_lea.vmem %s6512_s0, %s3108_s9  ;;  %v3802_v44 = vld [vmem:[%s6514_s2 + $0x1c4] ss:$8 sps:$4 sm:$0xff]  }
  0x1f   : > { %v3801_v43 = vld [vmem:[%s6514_s2 + $0xd0] ss:$8 sps:$4 sm:$0xff]   ;;  %v3804_v45 = vld [vmem:[%s6514_s2 + $0xc4] ss:$8 sps:$4 sm:$0xff]   ;;  %v3806_v46 = vld [vmem:[%s6514_s2 + $0x1c0] ss:$8 sps:$4 sm:$0xff]  }
  0x20   : > { %543 = vmatpush1.bf16.msra.mxu0 %v3764_v18  ;;  %v352_v47 = vld [vmem:[%s4620_s27] sm:$0x77]  ;;  %v3808_v51 = vld [vmem:[%s6514_s2 + $0x1b4] ss:$8 sps:$4 sm:$0xff]   ;;  %v3812_v56 = vld [vmem:[%s6514_s2 + $0x1b0] ss:$8 sps:$4 sm:$0xff]  }
  0x21   : > { %751 = vmatpush1.bf16.msra.mxu1 %v3765_v19  ;;  %544 = vmatprep.subr.bf16.mxu0 %v3766_v20  ;;  %v3148_v48 = vcombine.high %v352_v47, %v352_v47  ;;  %v318_v49 = vld [vmem:[%s4620_s27] sm:$0x33]  ;;  %v3810_v53 = vld [vmem:[%s6514_s2 + $0xb4] ss:$8 sps:$4 sm:$0xff]   ;;  %v3813_v57 = vld [vmem:[%s6514_s2 + $0xb0] ss:$8 sps:$4 sm:$0xff]   ;;  %v3147_v0 = vcombine.low %v352_v47, %v352_v47 }
  0x22   : > { %752 = vmatprep.subr.bf16.mxu1 %v3768_v21  ;;  %v3807_v50 = vld [vmem:[%s6514_s2 + $0xc0] ss:$8 sps:$4 sm:$0xff]   ;;  %v3182_v52 = vcombine.high %v318_v49, %v318_v49  ;;  %v3814_v59 = vld [vmem:[%s6514_s2 + $0x1a4] ss:$8 sps:$4 sm:$0xff]   ;;  %v3820_v1 = vld [vmem:[%s6514_s2 + $0x194] ss:$8 sps:$4 sm:$0xff]   ;;  %v3181_v14 = vcombine.low %v318_v49, %v318_v49 }
  0x23   : > { %v366_v54 = vshrl.u32 %v3148_v48, 16  ;;  %v368_v55 = vshll.u32 %v3148_v48, 16  ;;  %v3816_v60 = vld [vmem:[%s6514_s2 + $0xa4] ss:$8 sps:$4 sm:$0xff]   ;;  %v3818_v62 = vld [vmem:[%s6514_s2 + $0x1a0] ss:$8 sps:$4 sm:$0xff]  }
  0x24   : > { %545 = vmatpush1.bf16.msra.mxu0 %v3770_v22  ;;  %774 = vmatprep.mubr.bf16.mxu1 %v3182_v52  ;;  %v3819_v63 = vld [vmem:[%s6514_s2 + $0xa0] ss:$8 sps:$4 sm:$0xff]   ;;  %v3822_v2 = vld [vmem:[%s6514_s2 + $0x94] ss:$8 sps:$4 sm:$0xff]   ;;  %v3824_v3 = vld [vmem:[%s6514_s2 + $0x190] ss:$8 sps:$4 sm:$0xff]  }
  0x25   : > { %753 = vmatpush1.bf16.msra.mxu1 %v3771_v23  ;;  %546 = vmatprep.subr.bf16.mxu0 %v3772_v24  ;;  %v370_v58 = vrot.slane %v368_v55, 1  ;;  %v3825_v4 = vld [vmem:[%s6514_s2 + $0x90] ss:$8 sps:$4 sm:$0xff]   ;;  %v361_v5 = vshll.u32 %v3147_v0, 16  ;;  %v3826_v6 = vld [vmem:[%s6514_s2 + $0x184] ss:$8 sps:$4 sm:$0xff]  }
  0x26   : > { %754 = vmatprep.subr.bf16.mxu1 %v3774_v25  ;;  %v3828_v7 = vld [vmem:[%s6514_s2 + $0x84] ss:$8 sps:$4 sm:$0xff]   ;;  %v3830_v8 = vld [vmem:[%s6514_s2 + $0x180] ss:$8 sps:$4 sm:$0xff]   ;;  %v359_v10 = vshrl.u32 %v3147_v0, 16  ;;  %s6724_s15 = smov (!%p278_p8, %s4396_s15), 1 }
  0x27   : > { %v371_v61 = vor.u32 %v370_v58, %v366_v54  ;;  %v3831_v9 = vld [vmem:[%s6514_s2 + $0x80] ss:$8 sps:$4 sm:$0xff]   ;;  %v363_v11 = vrot.slane %v361_v5, 1  ;;  %v3838_v12 = vld [vmem:[%s6514_s2 + $0x274] ss:$8 sps:$4 sm:$0xff]   ;;  %s3112_s29 = sshll.u32 %s6724_s15, 1 }
  0x28   : > { %547 = vmatpush1.bf16.msra.mxu0 %v3776_v26  ;;  %v3841_v13 = vld [vmem:[%s6514_s2 + $0x374] ss:$8 sps:$4 sm:$0xff]   ;;  %v3836_v16 = vld [vmem:[%s6514_s2 + $0x270] ss:$8 sps:$4 sm:$0xff]   ;;  %v3844_v18 = vld [vmem:[%s6514_s2 + $0x264] ss:$8 sps:$4 sm:$0xff]  }
  0x29   : > { %755 = vmatpush1.bf16.msra.mxu1 %v3777_v27  ;;  %548 = vmatprep.subr.bf16.mxu0 %v3778_v28  ;;  %v364_v15 = vor.u32 %v363_v11, %v359_v10  ;;  %v3839_v17 = vld [vmem:[%s6514_s2 + $0x370] ss:$8 sps:$4 sm:$0xff]   ;;  %v3847_v19 = vld [vmem:[%s6514_s2 + $0x364] ss:$8 sps:$4 sm:$0xff]   ;;  %v3842_v20 = vld [vmem:[%s6514_s2 + $0x260] ss:$8 sps:$4 sm:$0xff]  }
  0x2a   : > { %756 = vmatprep.subr.bf16.mxu1 %v3780_v29  ;;  %566 = vmatprep.mubr.bf16.mxu0 %v371_v61  ;;  %v3845_v21 = vld [vmem:[%s6514_s2 + $0x360] ss:$8 sps:$4 sm:$0xff]   ;;  %v3850_v22 = vld [vmem:[%s6514_s2 + $0x254] ss:$8 sps:$4 sm:$0xff]   ;;  %v3848_v24 = vld [vmem:[%s6514_s2 + $0x250] ss:$8 sps:$4 sm:$0xff]  }
  0x2b   : > { %v3853_v23 = vld [vmem:[%s6514_s2 + $0x354] ss:$8 sps:$4 sm:$0xff]   ;;  %v3851_v25 = vld [vmem:[%s6514_s2 + $0x350] ss:$8 sps:$4 sm:$0xff]   ;;  %v3856_v26 = vld [vmem:[%s6514_s2 + $0x244] ss:$8 sps:$4 sm:$0xff]  }
  0x2c   : > { %549 = vmatpush1.bf16.msra.mxu0 %v3782_v30  ;;  %v3859_v27 = vld [vmem:[%s6514_s2 + $0x344] ss:$8 sps:$4 sm:$0xff]   ;;  %v3854_v28 = vld [vmem:[%s6514_s2 + $0x240] ss:$8 sps:$4 sm:$0xff]   ;;  %v3862_v30 = vld [vmem:[%s6514_s2 + $0x234] ss:$8 sps:$4 sm:$0xff]  }
  0x2d   : > { %757 = vmatpush1.bf16.msra.mxu1 %v3783_v31  ;;  %550 = vmatprep.subr.bf16.mxu0 %v3784_v32  ;;  %v3857_v29 = vld [vmem:[%s6514_s2 + $0x340] ss:$8 sps:$4 sm:$0xff]   ;;  %v3865_v31 = vld [vmem:[%s6514_s2 + $0x334] ss:$8 sps:$4 sm:$0xff]   ;;  %v3860_v32 = vld [vmem:[%s6514_s2 + $0x230] ss:$8 sps:$4 sm:$0xff]  }
  0x2e   : > { %758 = vmatprep.subr.bf16.mxu1 %v3786_v33  ;;  %v3863_v33 = vld [vmem:[%s6514_s2 + $0x330] ss:$8 sps:$4 sm:$0xff]   ;;  %v3883_v47 = vld [vmem:[%s6514_s2 + $0x304] ss:$8 sps:$4 sm:$0xff]   ;;  %v3878_v49 = vld [vmem:[%s6514_s2 + $0x200] ss:$8 sps:$4 sm:$0xff]  }
  0x2f   : > { %v3889_v52 = vld [vmem:[%s6514_s2 + $0x3f4] ss:$8 sps:$4 sm:$0xff]   ;;  %v3887_v54 = vld [vmem:[%s6514_s2 + $0x3f0] ss:$8 sps:$4 sm:$0xff]   ;;  %v3892_v55 = vld [vmem:[%s6514_s2 + $0x2e4] ss:$8 sps:$4 sm:$0xff]  }
  0x30   : > { %551 = vmatpush2.bf16.msra.mxu0 %v3788_v34  ;;  %v3868_v34 = vld [vmem:[%s6514_s2 + $0x224] ss:$8 sps:$4 sm:$0xff]   ;;  %v3893_v58 = vld [vmem:[%s6514_s2 + $0x3e0] ss:$8 sps:$4 sm:$0xff]   ;;  %v3896_v61 = vld [vmem:[%s6514_s2 + $0x2d0] ss:$8 sps:$4 sm:$0xff]  }
  0x31   : > { %759 = vmatpush2.bf16.msra.mxu1 %v3789_v35  ;;  %552 = vmatprep.subr.bf16.mxu0 %v3790_v36  ;;  %v3871_v35 = vld [vmem:[%s6514_s2 + $0x324] ss:$8 sps:$4 sm:$0xff]   ;;  %v3866_v36 = vld [vmem:[%s6514_s2 + $0x220] ss:$8 sps:$4 sm:$0xff]   ;;  %v3908_v5 = vld [vmem:[%s6514_s2 + $0x2b0] ss:$8 sps:$4 sm:$0xff]  }
  0x32   : > { %760 = vmatprep.subr.bf16.mxu1 %v3792_v37  ;;  %v3869_v37 = vld [vmem:[%s6514_s2 + $0x320] ss:$8 sps:$4 sm:$0xff]   ;;  %v3907_v0 = vld [vmem:[%s6514_s2 + $0x3c4] ss:$8 sps:$4 sm:$0xff]   ;;  %v3922_v11 = vld [vmem:[%s6514_s2 + $0x294] ss:$8 sps:$4 sm:$0xff]  }
  0x33   : > { %v3917_v10 = vld [vmem:[%s6514_s2 + $0x3a0] ss:$8 sps:$4 sm:$0xff]   ;;  %s3113_s5 = sshll.u32 %s6720_s16, 2 }
  0x34   : > { %553 = vmatpush2.bf16.msra.mxu0 %v3794_v38  ;;  %v3874_v38 = vld [vmem:[%s6514_s2 + $0x214] ss:$8 sps:$4 sm:$0xff]   ;;  %s282_s6 = sadd.s32 %s3113_s5, %s3112_s29 }
  0x35   : > { %761 = vmatpush2.bf16.msra.mxu1 %v3795_v39  ;;  %554 = vmatprep.subr.bf16.mxu0 %v3796_v40  ;;  %v3877_v39 = vld [vmem:[%s6514_s2 + $0x314] ss:$8 sps:$4 sm:$0xff]   ;;  %v3872_v40 = vld [vmem:[%s6514_s2 + $0x210] ss:$8 sps:$4 sm:$0xff]   ;;  %s3114_s8 = sshll.u32 %s282_s6, 1 }
  0x36   : > { %762 = vmatprep.subr.bf16.mxu1 %v3798_v41  ;;  %v4766_v41 = vld [vmem:[%s4620_s27] sm:$0x66]  ;;  %s284_s16 = scalar_lea.vmem %s6516_s4, %s3114_s8 }
  0x38   : > { %555 = vmatpush2.bf16.msra.mxu0 %v3800_v42  ;;  %v3248_v42 = vcombine.high %v4766_v41, %v4766_v41 }
  0x39   : > { %763 = vmatpush2.bf16.msra.mxu1 %v3801_v43  ;;  %556 = vmatprep.subr.bf16.mxu0 %v3802_v44  ;;  %v4771_v43 = vld [vmem:[%s4620_s27 + $0x8] sm:$0x33]  ;;  %v3875_v44 = vld [vmem:[%s6514_s2 + $0x310] ss:$8 sps:$4 sm:$0xff]  }
  0x3a   : > { %764 = vmatprep.subr.bf16.mxu1 %v3804_v45  ;;  %v3880_v45 = vld [vmem:[%s6514_s2 + $0x204] ss:$8 sps:$4 sm:$0xff]   ;;  %v823_v48 = vrot.slane %v3248_v42, 1 }
  0x3b   : > { %v3956_v42 = vld [vmem:[%s6514_s2 + $0x444] ss:$8 sps:$4 sm:$0xff]  }
  0x3c   : > { %557 = vmatpush2.bf16.msra.mxu0 %v3806_v46  ;;  %v4781_v46 = vcombine.high %v4771_v43, %v4771_v43 }
  0x3d   : > { %765 = vmatpush2.bf16.msra.mxu1 %v3807_v50  ;;  %558 = vmatprep.subr.bf16.mxu0 %v3808_v51  ;;  %v3881_v50 = vld [vmem:[%s6514_s2 + $0x300] ss:$8 sps:$4 sm:$0xff]   ;;  %v3886_v51 = vld [vmem:[%s6514_s2 + $0x2f4] ss:$8 sps:$4 sm:$0xff]  }
  0x3e   : > { %766 = vmatprep.subr.bf16.mxu1 %v3810_v53  ;;  %v3884_v53 = vld [vmem:[%s6514_s2 + $0x2f0] ss:$8 sps:$4 sm:$0xff]  }
  0x40   : > { %559 = vmatpush2.bf16.msra.mxu0 %v3812_v56  ;;  %v3895_v56 = vld [vmem:[%s6514_s2 + $0x3e4] ss:$8 sps:$4 sm:$0xff]  }
  0x41   : > { %767 = vmatpush2.bf16.msra.mxu1 %v3813_v57  ;;  %560 = vmatprep.subr.bf16.mxu0 %v3814_v59  ;;  %v3890_v57 = vld [vmem:[%s6514_s2 + $0x2e0] ss:$8 sps:$4 sm:$0xff]   ;;  %v3898_v59 = vld [vmem:[%s6514_s2 + $0x2d4] ss:$8 sps:$4 sm:$0xff]  }
  0x42   : > { %768 = vmatprep.subr.bf16.mxu1 %v3816_v60  ;;  %v3901_v60 = vld [vmem:[%s6514_s2 + $0x3d4] ss:$8 sps:$4 sm:$0xff]  }
  0x44   : > { %561 = vmatpush2.bf16.msra.mxu0 %v3818_v62  ;;  %v3899_v62 = vld [vmem:[%s6514_s2 + $0x3d0] ss:$8 sps:$4 sm:$0xff]  }
  0x45   : > { %769 = vmatpush2.bf16.msra.mxu1 %v3819_v63  ;;  %562 = vmatprep.subr.bf16.mxu0 %v3820_v1  ;;  %v3904_v63 = vld [vmem:[%s6514_s2 + $0x2c4] ss:$8 sps:$4 sm:$0xff]   ;;  %v3902_v1 = vld [vmem:[%s6514_s2 + $0x2c0] ss:$8 sps:$4 sm:$0xff]  }
  0x46   : > { %770 = vmatprep.subr.bf16.mxu1 %v3822_v2  ;;  %v3905_v2 = vld [vmem:[%s6514_s2 + $0x3c0] ss:$8 sps:$4 sm:$0xff]  }
  0x48   : > { %563 = vmatpush2.bf16.msra.mxu0 %v3824_v3  ;;  %v3910_v3 = vld [vmem:[%s6514_s2 + $0x2b4] ss:$8 sps:$4 sm:$0xff]  }
  0x49   : > { %771 = vmatpush2.bf16.msra.mxu1 %v3825_v4  ;;  %564 = vmatprep.subr.bf16.mxu0 %v3826_v6  ;;  %v3913_v4 = vld [vmem:[%s6514_s2 + $0x3b4] ss:$8 sps:$4 sm:$0xff]   ;;  %v3911_v6 = vld [vmem:[%s6514_s2 + $0x3b0] ss:$8 sps:$4 sm:$0xff]  }
  0x4a   : > { %772 = vmatprep.subr.bf16.mxu1 %v3828_v7  ;;  %v3916_v7 = vld [vmem:[%s6514_s2 + $0x2a4] ss:$8 sps:$4 sm:$0xff]  }
  0x4c   : > { %565 = vmatpush2.bf16.msra.mxu0 %v3830_v8  ;;  %v3919_v8 = vld [vmem:[%s6514_s2 + $0x3a4] ss:$8 sps:$4 sm:$0xff]  }
  0x4d   : > { %773 = vmatpush2.bf16.msra.mxu1 %v3831_v9  ;;  %986 = vmatprep.subr.bf16.mxu0 %v3838_v12  ;;  %v3914_v9 = vld [vmem:[%s6514_s2 + $0x2a0] ss:$8 sps:$4 sm:$0xff]   ;;  %v3925_v12 = vld [vmem:[%s6514_s2 + $0x394] ss:$8 sps:$4 sm:$0xff]  }
  0x4e   : > { %1231 = vmatprep.subr.bf16.mxu1 %v3841_v13  ;;  %v3920_v13 = vld [vmem:[%s6514_s2 + $0x290] ss:$8 sps:$4 sm:$0xff]  }
  0x4f   : > { %567 = vmatmul.mubr.bf16.vlgmr.msra.gmra.mxu0 %v364_v15  ;;  %v3928_v15 = vld [vmem:[%s6514_s2 + $0x284] ss:$8 sps:$4 sm:$0xff]  }
  0x50   : > { %775 = vmatmul.mubr.bf16.vlgmr.msra.gmra.mxu1 %v3181_v14  ;;  %987 = vmatpush1.bf16.msra.mxu0 %v3836_v16  ;;  %v3923_v14 = vld [vmem:[%s6514_s2 + $0x390] ss:$8 sps:$4 sm:$0xff]   ;;  %v3931_v16 = vld [vmem:[%s6514_s2 + $0x384] ss:$8 sps:$4 sm:$0xff]  }
  0x51   : > { %1232 = vmatpush1.bf16.msra.mxu1 %v3839_v17  ;;  %988 = vmatprep.subr.bf16.mxu0 %v3844_v18  ;;  %v3247_v17 = vcombine.low %v4766_v41, %v4766_v41  ;;  %v3926_v18 = vld [vmem:[%s6514_s2 + $0x280] ss:$8 sps:$4 sm:$0xff]   ;;  %v3951_v41 = vld [vmem:[%s6514_s2 + $0x550] ss:$8 sps:$4 sm:$0xff]  }
  0x52   : > { %1233 = vmatprep.subr.bf16.mxu1 %v3847_v19  ;;  %1263 = vmatprep.mubr.bf16.mxu1 %v4781_v46  ;;  %v3929_v19 = vld [vmem:[%s6514_s2 + $0x380] ss:$8 sps:$4 sm:$0xff]  }
  0x53   : > { %1018 = vmatprep.mubr.bf16.mxu0 %v823_v48  ;;  %v3962_v48 = vld [vmem:[%s6514_s2 + $0x434] ss:$8 sps:$4 sm:$0xff]  }
  0x54   : > { %989 = vmatpush1.bf16.msra.mxu0 %v3842_v20  ;;  %v3938_v20 = vld [vmem:[%s6514_s2 + $0x474] ss:$8 sps:$4 sm:$0xff]  }
  0x55   : > { %1234 = vmatpush1.bf16.msra.mxu1 %v3845_v21  ;;  %990 = vmatprep.subr.bf16.mxu0 %v3850_v22  ;;  %v3941_v21 = vld [vmem:[%s6514_s2 + $0x574] ss:$8 sps:$4 sm:$0xff]   ;;  %v822_v22 = vrot.slane %v3247_v17, 1 }
  0x56   : > { %1235 = vmatprep.subr.bf16.mxu1 %v3853_v23  ;;  %v4899_v23 = vcombine.low %v4771_v43, %v4771_v43  ;;  %v3959_v43 = vld [vmem:[%s6514_s2 + $0x544] ss:$8 sps:$4 sm:$0xff]   ;;  %v4013_v17 = vld [vmem:[%s6514_s2 + $0x5b4] ss:$8 sps:$4 sm:$0xff]  }
  0x58   : > { %991 = vmatpush1.bf16.msra.mxu0 %v3848_v24  ;;  %v3936_v24 = vld [vmem:[%s6514_s2 + $0x470] ss:$8 sps:$4 sm:$0xff]  }
  0x59   : > { %1236 = vmatpush1.bf16.msra.mxu1 %v3851_v25  ;;  %992 = vmatprep.subr.bf16.mxu0 %v3856_v26  ;;  %v3939_v25 = vld [vmem:[%s6514_s2 + $0x570] ss:$8 sps:$4 sm:$0xff]   ;;  %v3944_v26 = vld [vmem:[%s6514_s2 + $0x464] ss:$8 sps:$4 sm:$0xff]  }
  0x5a   : > { %1237 = vmatprep.subr.bf16.mxu1 %v3859_v27  ;;  %v3947_v27 = vld [vmem:[%s6514_s2 + $0x564] ss:$8 sps:$4 sm:$0xff]  }
  0x5c   : > { %993 = vmatpush1.bf16.msra.mxu0 %v3854_v28  ;;  %v4914_v28 = vld [vmem:[%s4620_s27 + $0x8] sm:$0x77] }
  0x5d   : > { %1238 = vmatpush1.bf16.msra.mxu1 %v3857_v29  ;;  %994 = vmatprep.subr.bf16.mxu0 %v3862_v30  ;;  %v4917_v29 = vld [vmem:[%s4620_s27 + $0x8] sm:$0x66]  ;;  %s3111_s27 = sshll.u32 %s271_s25, 2 }
  0x5e   : > { %1239 = vmatprep.subr.bf16.mxu1 %v3865_v31  ;;  %v3942_v30 = vld [vmem:[%s6514_s2 + $0x460] ss:$8 sps:$4 sm:$0xff]   ;;  %v3382_v31 = vcombine.high %v4914_v28, %v4914_v28  ;;  %s5093_s23 = scalar_lea.vmem %s6513_s1, %s3111_s27 }
  0x60   : > { %995 = vmatpush1.bf16.msra.mxu0 %v3860_v32  ;;  %v3945_v32 = vld [vmem:[%s6514_s2 + $0x560] ss:$8 sps:$4 sm:$0xff]  }
  0x61   : > { %1240 = vmatpush1.bf16.msra.mxu1 %v3863_v33  ;;  %996 = vmatprep.subr.bf16.mxu0 %v3868_v34  ;;  %v3449_v33 = vcombine.high %v4917_v29, %v4917_v29  ;;  %v3950_v34 = vld [vmem:[%s6514_s2 + $0x454] ss:$8 sps:$4 sm:$0xff]  }
  0x62   : > { %1241 = vmatprep.subr.bf16.mxu1 %v3871_v35  ;;  %v3953_v35 = vld [vmem:[%s6514_s2 + $0x554] ss:$8 sps:$4 sm:$0xff]  }
  0x64   : > { %997 = vmatpush1.bf16.msra.mxu0 %v3866_v36  ;;  %v1321_v36 = vshrl.u32 %v3382_v31, 16 }
  0x65   : > { %1242 = vmatpush1.bf16.msra.mxu1 %v3869_v37  ;;  %998 = vmatprep.subr.bf16.mxu0 %v3874_v38  ;;  %v1323_v37 = vshll.u32 %v3382_v31, 16  ;;  %v4936_v38 = vrot.slane %v3449_v33, 1  ;;  %v4023_v33 = vld [vmem:[%s6514_s2 + $0x590] ss:$8 sps:$4 sm:$0xff]  }
  0x66   : > { %1243 = vmatprep.subr.bf16.mxu1 %v3877_v39 }
  0x67   : > { %v1325_v39 = vrot.slane %v1323_v37, 1  ;;  %v3448_v37 = vcombine.low %v4917_v29, %v4917_v29  ;;  %v5162_v29 = vld [vmem:[%s6514_s2 + $0x674] ss:$8 sps:$4 sm:$0xff]  }
  0x68   : > { %999 = vmatpush1.bf16.msra.mxu0 %v3872_v40  ;;  %v3948_v40 = vld [vmem:[%s6514_s2 + $0x450] ss:$8 sps:$4 sm:$0xff]  }
  0x69   : > { %1244 = vmatpush1.bf16.msra.mxu1 %v3875_v44  ;;  %1000 = vmatprep.subr.bf16.mxu0 %v3880_v45  ;;  %v4950_v44 = vor.u32 %v1325_v39, %v1321_v36  ;;  %v3954_v45 = vld [vmem:[%s6514_s2 + $0x440] ss:$8 sps:$4 sm:$0xff]  }
  0x6a   : > { %1245 = vmatprep.subr.bf16.mxu1 %v3883_v47  ;;  %v3957_v47 = vld [vmem:[%s6514_s2 + $0x540] ss:$8 sps:$4 sm:$0xff]  }
  0x6c   : > { %1001 = vmatpush1.bf16.msra.mxu0 %v3878_v49  ;;  %v3965_v49 = vld [vmem:[%s6514_s2 + $0x534] ss:$8 sps:$4 sm:$0xff]  }
  0x6d   : > { %1246 = vmatpush1.bf16.msra.mxu1 %v3881_v50  ;;  %1002 = vmatprep.subr.bf16.mxu0 %v3886_v51  ;;  %v3960_v50 = vld [vmem:[%s6514_s2 + $0x430] ss:$8 sps:$4 sm:$0xff]  }
  0x6e   : > { %1247 = vmatprep.subr.bf16.mxu1 %v3889_v52  ;;  %v3963_v51 = vld [vmem:[%s6514_s2 + $0x530] ss:$8 sps:$4 sm:$0xff]   ;;  %v3968_v52 = vld [vmem:[%s6514_s2 + $0x424] ss:$8 sps:$4 sm:$0xff]  }
  0x70   : > { %1003 = vmatpush2.bf16.msra.mxu0 %v3884_v53  ;;  %v3971_v53 = vld [vmem:[%s6514_s2 + $0x524] ss:$8 sps:$4 sm:$0xff]  }
  0x71   : > { %1248 = vmatpush2.bf16.msra.mxu1 %v3887_v54  ;;  %1004 = vmatprep.subr.bf16.mxu0 %v3892_v55  ;;  %v3966_v54 = vld [vmem:[%s6514_s2 + $0x420] ss:$8 sps:$4 sm:$0xff]  }
  0x72   : > { %1249 = vmatprep.subr.bf16.mxu1 %v3895_v56  ;;  %v3969_v55 = vld [vmem:[%s6514_s2 + $0x520] ss:$8 sps:$4 sm:$0xff]   ;;  %v3974_v56 = vld [vmem:[%s6514_s2 + $0x414] ss:$8 sps:$4 sm:$0xff]  }
  0x74   : > { %1005 = vmatpush2.bf16.msra.mxu0 %v3890_v57  ;;  %v3977_v57 = vld [vmem:[%s6514_s2 + $0x514] ss:$8 sps:$4 sm:$0xff]  }
  0x75   : > { %1250 = vmatpush2.bf16.msra.mxu1 %v3893_v58  ;;  %1006 = vmatprep.subr.bf16.mxu0 %v3898_v59  ;;  %v3972_v58 = vld [vmem:[%s6514_s2 + $0x410] ss:$8 sps:$4 sm:$0xff]  }
  0x76   : > { %1251 = vmatprep.subr.bf16.mxu1 %v3901_v60  ;;  %v3975_v59 = vld [vmem:[%s6514_s2 + $0x510] ss:$8 sps:$4 sm:$0xff]   ;;  %v3980_v60 = vld [vmem:[%s6514_s2 + $0x404] ss:$8 sps:$4 sm:$0xff]  }
  0x78   : > { %1007 = vmatpush2.bf16.msra.mxu0 %v3896_v61  ;;  %v3983_v61 = vld [vmem:[%s6514_s2 + $0x504] ss:$8 sps:$4 sm:$0xff]  }
  0x79   : > { %1252 = vmatpush2.bf16.msra.mxu1 %v3899_v62  ;;  %1008 = vmatprep.subr.bf16.mxu0 %v3904_v63  ;;  %v3978_v62 = vld [vmem:[%s6514_s2 + $0x400] ss:$8 sps:$4 sm:$0xff]  }
  0x7a   : > { %1253 = vmatprep.subr.bf16.mxu1 %v3907_v0  ;;  %v3981_v63 = vld [vmem:[%s6514_s2 + $0x500] ss:$8 sps:$4 sm:$0xff]   ;;  %v3986_v0 = vld [vmem:[%s6514_s2 + $0x4f4] ss:$8 sps:$4 sm:$0xff]  }
  0x7c   : > { %1009 = vmatpush2.bf16.msra.mxu0 %v3902_v1  ;;  %v3989_v1 = vld [vmem:[%s6514_s2 + $0x5f4] ss:$8 sps:$4 sm:$0xff]  }
  0x7d   : > { %1254 = vmatpush2.bf16.msra.mxu1 %v3905_v2  ;;  %1010 = vmatprep.subr.bf16.mxu0 %v3910_v3  ;;  %v3984_v2 = vld [vmem:[%s6514_s2 + $0x4f0] ss:$8 sps:$4 sm:$0xff]  }
  0x7e   : > { %1255 = vmatprep.subr.bf16.mxu1 %v3913_v4  ;;  %v3987_v3 = vld [vmem:[%s6514_s2 + $0x5f0] ss:$8 sps:$4 sm:$0xff]   ;;  %v3992_v4 = vld [vmem:[%s6514_s2 + $0x4e4] ss:$8 sps:$4 sm:$0xff]  }
  0x80   : > { %1011 = vmatpush2.bf16.msra.mxu0 %v3908_v5  ;;  %v3995_v5 = vld [vmem:[%s6514_s2 + $0x5e4] ss:$8 sps:$4 sm:$0xff]  }
  0x81   : > { %1256 = vmatpush2.bf16.msra.mxu1 %v3911_v6  ;;  %1012 = vmatprep.subr.bf16.mxu0 %v3916_v7  ;;  %v5030_v6 = vld [vmem:[%s6514_s2 + $0x4e0] ss:$8 sps:$4 sm:$0xff]  }
  0x82   : > { %1257 = vmatprep.subr.bf16.mxu1 %v3919_v8  ;;  %v3993_v7 = vld [vmem:[%s6514_s2 + $0x5e0] ss:$8 sps:$4 sm:$0xff]   ;;  %v5038_v8 = vld [vmem:[%s6514_s2 + $0x4d4] ss:$8 sps:$4 sm:$0xff]  }
  0x84   : > { %1013 = vmatpush2.bf16.msra.mxu0 %v3914_v9  ;;  %v4001_v9 = vld [vmem:[%s6514_s2 + $0x5d4] ss:$8 sps:$4 sm:$0xff]  }
  0x85   : > { %1258 = vmatpush2.bf16.msra.mxu1 %v3917_v10  ;;  %1014 = vmatprep.subr.bf16.mxu0 %v3922_v11  ;;  %v5047_v10 = vld [vmem:[%s6514_s2 + $0x4d0] ss:$8 sps:$4 sm:$0xff]  }
  0x86   : > { %1259 = vmatprep.subr.bf16.mxu1 %v3925_v12  ;;  %v3999_v11 = vld [vmem:[%s6514_s2 + $0x5d0] ss:$8 sps:$4 sm:$0xff]   ;;  %v5056_v12 = vld [vmem:[%s6514_s2 + $0x4c4] ss:$8 sps:$4 sm:$0xff]  }
  0x88   : > { %1015 = vmatpush2.bf16.msra.mxu0 %v3920_v13  ;;  %v4007_v13 = vld [vmem:[%s6514_s2 + $0x5c4] ss:$8 sps:$4 sm:$0xff]  }
  0x89   : > { %1260 = vmatpush2.bf16.msra.mxu1 %v3923_v14  ;;  %1016 = vmatprep.subr.bf16.mxu0 %v3928_v15  ;;  %v5067_v14 = vld [vmem:[%s6514_s2 + $0x4c0] ss:$8 sps:$4 sm:$0xff]  }
  0x8a   : > { %1261 = vmatprep.subr.bf16.mxu1 %v3931_v16  ;;  %v4005_v15 = vld [vmem:[%s6514_s2 + $0x5c0] ss:$8 sps:$4 sm:$0xff]   ;;  %v5076_v16 = vld [vmem:[%s6514_s2 + $0x4b4] ss:$8 sps:$4 sm:$0xff]  }
  0x8c   : > { %1017 = vmatpush2.bf16.msra.mxu0 %v3926_v18  ;;  %v5084_v18 = vld [vmem:[%s6514_s2 + $0x4b0] ss:$8 sps:$4 sm:$0xff]  }
  0x8d   : > { %1262 = vmatpush2.bf16.msra.mxu1 %v3929_v19  ;;  %1489 = vmatprep.subr.bf16.mxu0 %v3938_v20  ;;  %v4011_v19 = vld [vmem:[%s6514_s2 + $0x5b0] ss:$8 sps:$4 sm:$0xff]   ;;  %v5099_v20 = vld [vmem:[%s6514_s2 + $0x4a4] ss:$8 sps:$4 sm:$0xff]  }
  0x8e   : > { %1735 = vmatprep.subr.bf16.mxu1 %v3941_v21  ;;  %v4019_v21 = vld [vmem:[%s6514_s2 + $0x5a4] ss:$8 sps:$4 sm:$0xff]  }
  0x8f   : > { %1019 = vmatmul.mubr.bf16.vlgmr.msra.gmra.mxu0 %v822_v22  ;;  %v3381_v22 = vcombine.low %v4914_v28, %v4914_v28  ;;  %v4025_v28 = vld [vmem:[%s6514_s2 + $0x594] ss:$8 sps:$4 sm:$0xff]  }
  0x90   : > { %1264 = vmatmul.mubr.bf16.vlgmr.msra.gmra.mxu1 %v4899_v23  ;;  %1490 = vmatpush1.bf16.msra.mxu0 %v3936_v24  ;;  %v5107_v24 = vld [vmem:[%s5093_s23] sm:$0x77] }
  0x91   : > { %1736 = vmatpush1.bf16.msra.mxu1 %v3939_v25  ;;  %1491 = vmatprep.subr.bf16.mxu0 %v3944_v26  ;;  %v5113_v25 = vld [vmem:[%s6514_s2 + $0x4a0] ss:$8 sps:$4 sm:$0xff]   ;;  %v1316_v31 = vshll.u32 %v3381_v22, 16  ;;  %v1314_v39 = vshrl.u32 %v3381_v22, 16  ;;  %v5330_v22 = vld [vmem:[%s6514_s2 + $0x710] ss:$8 sps:$4 sm:$0xff]  }
  0x92   : > { %1737 = vmatprep.subr.bf16.mxu1 %v3947_v27  ;;  %1767 = vmatprep.mubr.bf16.mxu1 %v4936_v38  ;;  %v4017_v26 = vld [vmem:[%s6514_s2 + $0x5a0] ss:$8 sps:$4 sm:$0xff]   ;;  %v5122_v27 = vld [vmem:[%s6514_s2 + $0x494] ss:$8 sps:$4 sm:$0xff]   ;;  %6591 = vst [vmem:[#allocation13_spill] sm:$0xff] %v5330_v22 }
  0x93   : > { %1521 = vmatprep.mubr.bf16.mxu0 %v4950_v44 }
  0x94   : > { %1492 = vmatpush1.bf16.msra.mxu0 %v3942_v30  ;;  %v3581_v30 = vcombine.high %v5107_v24, %v5107_v24 }
  0x95   : > { %1738 = vmatpush1.bf16.msra.mxu1 %v3945_v32  ;;  %1493 = vmatprep.subr.bf16.mxu0 %v3950_v34  ;;  %v5133_v32 = vld [vmem:[%s6514_s2 + $0x490] ss:$8 sps:$4 sm:$0xff]   ;;  %v5142_v34 = vld [vmem:[%s6514_s2 + $0x484] ss:$8 sps:$4 sm:$0xff]  }
  0x96   : > { %1739 = vmatprep.subr.bf16.mxu1 %v3953_v35  ;;  %v4031_v35 = vld [vmem:[%s6514_s2 + $0x584] ss:$8 sps:$4 sm:$0xff]   ;;  %v2071_v36 = vshll.u32 %v3581_v30, 16 }
  0x98   : > { %1494 = vmatpush1.bf16.msra.mxu0 %v3948_v40  ;;  %v1318_v40 = vrot.slane %v1316_v31, 1  ;;  %v5354_v31 = vld [vmem:[%s6514_s2 + $0x700] ss:$8 sps:$4 sm:$0xff]  }
  0x99   : > { %1740 = vmatpush1.bf16.msra.mxu1 %v3951_v41  ;;  %1495 = vmatprep.subr.bf16.mxu0 %v3956_v42  ;;  %v5153_v41 = vld [vmem:[%s6514_s2 + $0x480] ss:$8 sps:$4 sm:$0xff]   ;;  %6593 = vst [vmem:[#allocation15_spill] sm:$0xff] %v5354_v31 }
  0x9a   : > { %1741 = vmatprep.subr.bf16.mxu1 %v3959_v43  ;;  %v4029_v42 = vld [vmem:[%s6514_s2 + $0x580] ss:$8 sps:$4 sm:$0xff]   ;;  %v4041_v43 = vld [vmem:[%s6514_s2 + $0x774] ss:$8 sps:$4 sm:$0xff]  }
  0x9c   : > { %1496 = vmatpush1.bf16.msra.mxu0 %v3954_v45  ;;  %v2069_v45 = vshrl.u32 %v3581_v30, 16  ;;  %v5349_v30 = vld [vmem:[%s6514_s2 + $0x600] ss:$8 sps:$4 sm:$0xff]  }
  0x9d   : > { %1742 = vmatpush1.bf16.msra.mxu1 %v3957_v47  ;;  %1497 = vmatprep.subr.bf16.mxu0 %v3962_v48  ;;  %v2073_v47 = vrot.slane %v2071_v36, 1  ;;  %v5167_v48 = vrot.slane %v3448_v37, 1  ;;  %v5373_v36 = vld [vmem:[%s6514_s2 + $0x6f0] ss:$8 sps:$4 sm:$0xff]  }
  0x9e   : > { %1743 = vmatprep.subr.bf16.mxu1 %v3965_v49  ;;  %v5169_v49 = vor.u32 %v1318_v40, %v1314_v39  ;;  %v5378_v37 = vld [vmem:[%s6514_s2 + $0x7f0] ss:$8 sps:$4 sm:$0xff]   ;;  %v5385_v39 = vld [vmem:[%s6514_s2 + $0x6e4] ss:$8 sps:$4 sm:$0xff]  }
  0x9f   : > { %6595 = vst [vmem:[#allocation17_spill] sm:$0xff] %v5378_v37  ;;  %v5390_v40 = vld [vmem:[%s6514_s2 + $0x7e4] ss:$8 sps:$4 sm:$0xff]  }
  0xa0   : > { %1498 = vmatpush1.bf16.msra.mxu0 %v3960_v50  ;;  %v5172_v50 = vld [vmem:[%s5093_s23] sm:$0x33]  ;;  %6596 = vst [vmem:[#allocation18_spill] sm:$0xff] %v5390_v40 }
  0xa1   : > { %1744 = vmatpush1.bf16.msra.mxu1 %v3963_v51  ;;  %1499 = vmatprep.subr.bf16.mxu0 %v3968_v52  ;;  %v5178_v51 = vld [vmem:[%s6514_s2 + $0x670] ss:$8 sps:$4 sm:$0xff]  }
  0xa2   : > { %1745 = vmatprep.subr.bf16.mxu1 %v3971_v53  ;;  %v4039_v52 = vld [vmem:[%s6514_s2 + $0x770] ss:$8 sps:$4 sm:$0xff]   ;;  %v5187_v53 = vld [vmem:[%s6514_s2 + $0x664] ss:$8 sps:$4 sm:$0xff]  }
  0xa4   : > { %1500 = vmatpush1.bf16.msra.mxu0 %v3966_v54  ;;  %v4047_v54 = vld [vmem:[%s6514_s2 + $0x764] ss:$8 sps:$4 sm:$0xff]  }
  0xa5   : > { %1746 = vmatpush1.bf16.msra.mxu1 %v3969_v55  ;;  %1501 = vmatprep.subr.bf16.mxu0 %v3974_v56  ;;  %v5194_v55 = vcombine.high %v5172_v50, %v5172_v50  ;;  %v5196_v56 = vor.u32 %v2073_v47, %v2069_v45  ;;  %v5409_v45 = vld [vmem:[%s6514_s2 + $0x6d4] ss:$8 sps:$4 sm:$0xff]  }
  0xa6   : > { %1747 = vmatprep.subr.bf16.mxu1 %v3977_v57  ;;  %v5204_v57 = vld [vmem:[%s6514_s2 + $0x660] ss:$8 sps:$4 sm:$0xff]   ;;  %v5414_v47 = vld [vmem:[%s6514_s2 + $0x7d4] ss:$8 sps:$4 sm:$0xff]  }
  0xa7   : > { %6598 = vst [vmem:[#allocation20_spill] sm:$0xff] %v5414_v47 }
  0xa8   : > { %1502 = vmatpush1.bf16.msra.mxu0 %v3972_v58  ;;  %v5209_v58 = vld [vmem:[%s6514_s2 + $0x760] ss:$8 sps:$4 sm:$0xff]  }
  0xa9   : > { %1748 = vmatpush1.bf16.msra.mxu1 %v3975_v59  ;;  %1503 = vmatprep.subr.bf16.mxu0 %v3980_v60  ;;  %6581 = vst [vmem:[#allocation3_spill] sm:$0xff] %v5209_v58  ;;  %v5215_v59 = vld [vmem:[%s6514_s2 + $0x654] ss:$8 sps:$4 sm:$0xff]  }
  0xaa   : > { %1749 = vmatprep.subr.bf16.mxu1 %v3983_v61  ;;  %v5220_v60 = vld [vmem:[%s6514_s2 + $0x754] ss:$8 sps:$4 sm:$0xff]   ;;  %v5229_v61 = vld [vmem:[%s6514_s2 + $0x650] ss:$8 sps:$4 sm:$0xff]  }
  0xab   : > { %6582 = vst [vmem:[#allocation4_spill] sm:$0xff] %v5220_v60 }
  0xac   : > { %1504 = vmatpush1.bf16.msra.mxu0 %v3978_v62  ;;  %v5234_v62 = vld [vmem:[%s6514_s2 + $0x750] ss:$8 sps:$4 sm:$0xff]  }
  0xad   : > { %1750 = vmatpush1.bf16.msra.mxu1 %v3981_v63  ;;  %1505 = vmatprep.subr.bf16.mxu0 %v3986_v0  ;;  %6583 = vst [vmem:[#allocation5_spill] sm:$0xff] %v5234_v62  ;;  %v5241_v63 = vld [vmem:[%s6514_s2 + $0x644] ss:$8 sps:$4 sm:$0xff]  }
  0xae   : > { %1751 = vmatprep.subr.bf16.mxu1 %v3989_v1  ;;  %v5246_v0 = vld [vmem:[%s6514_s2 + $0x744] ss:$8 sps:$4 sm:$0xff]   ;;  %v5253_v1 = vld [vmem:[%s6514_s2 + $0x640] ss:$8 sps:$4 sm:$0xff]  }
  0xaf   : > { %6584 = vst [vmem:[#allocation6_spill] sm:$0xff] %v5246_v0 }
  0xb0   : > { %1506 = vmatpush2.bf16.msra.mxu0 %v3984_v2  ;;  %v5258_v2 = vld [vmem:[%s6514_s2 + $0x740] ss:$8 sps:$4 sm:$0xff]  }
  0xb1   : > { %1752 = vmatpush2.bf16.msra.mxu1 %v3987_v3  ;;  %1507 = vmatprep.subr.bf16.mxu0 %v3992_v4  ;;  %6585 = vst [vmem:[#allocation7_spill] sm:$0xff] %v5258_v2  ;;  %v5265_v3 = vld [vmem:[%s6514_s2 + $0x634] ss:$8 sps:$4 sm:$0xff]  }
  0xb2   : > { %1753 = vmatprep.subr.bf16.mxu1 %v3995_v5  ;;  %v5270_v4 = vld [vmem:[%s6514_s2 + $0x734] ss:$8 sps:$4 sm:$0xff]   ;;  %v5277_v5 = vld [vmem:[%s6514_s2 + $0x630] ss:$8 sps:$4 sm:$0xff]  }
  0xb3   : > { %6586 = vst [vmem:[#allocation8_spill] sm:$0xff] %v5270_v4 }
  0xb4   : > { %1508 = vmatpush2.bf16.msra.mxu0 %v5030_v6 }
  0xb5   : > { %1754 = vmatpush2.bf16.msra.mxu1 %v3993_v7  ;;  %1509 = vmatprep.subr.bf16.mxu0 %v5038_v8  ;;  %v5282_v7 = vld [vmem:[%s6514_s2 + $0x730] ss:$8 sps:$4 sm:$0xff]  }
  0xb6   : > { %1755 = vmatprep.subr.bf16.mxu1 %v4001_v9  ;;  %6587 = vst [vmem:[#allocation9_spill] sm:$0xff] %v5282_v7  ;;  %v5289_v9 = vld [vmem:[%s6514_s2 + $0x624] ss:$8 sps:$4 sm:$0xff]  }
  0xb8   : > { %1510 = vmatpush2.bf16.msra.mxu0 %v5047_v10 }
  0xb9   : > { %1756 = vmatpush2.bf16.msra.mxu1 %v3999_v11  ;;  %1511 = vmatprep.subr.bf16.mxu0 %v5056_v12  ;;  %v5294_v11 = vld [vmem:[%s6514_s2 + $0x724] ss:$8 sps:$4 sm:$0xff]  }
  0xba   : > { %1757 = vmatprep.subr.bf16.mxu1 %v4007_v13  ;;  %6588 = vst [vmem:[#allocation10_spill] sm:$0xff] %v5294_v11  ;;  %v5301_v13 = vld [vmem:[%s6514_s2 + $0x620] ss:$8 sps:$4 sm:$0xff]  }
  0xbc   : > { %1512 = vmatpush2.bf16.msra.mxu0 %v5067_v14 }
  0xbd   : > { %1758 = vmatpush2.bf16.msra.mxu1 %v4005_v15  ;;  %1513 = vmatprep.subr.bf16.mxu0 %v5076_v16  ;;  %v5306_v15 = vld [vmem:[%s6514_s2 + $0x720] ss:$8 sps:$4 sm:$0xff]  }
  0xbe   : > { %1759 = vmatprep.subr.bf16.mxu1 %v4013_v17  ;;  %6589 = vst [vmem:[#allocation11_spill] sm:$0xff] %v5306_v15  ;;  %v5313_v17 = vld [vmem:[%s6514_s2 + $0x614] ss:$8 sps:$4 sm:$0xff]  }
  0xc0   : > { %1514 = vmatpush2.bf16.msra.mxu0 %v5084_v18 }
  0xc1   : > { %1760 = vmatpush2.bf16.msra.mxu1 %v4011_v19  ;;  %1515 = vmatprep.subr.bf16.mxu0 %v5099_v20  ;;  %v5318_v19 = vld [vmem:[%s6514_s2 + $0x714] ss:$8 sps:$4 sm:$0xff]  }
  0xc2   : > { %1761 = vmatprep.subr.bf16.mxu1 %v4019_v21  ;;  %6590 = vst [vmem:[#allocation12_spill] sm:$0xff] %v5318_v19  ;;  %v5325_v21 = vld [vmem:[%s6514_s2 + $0x610] ss:$8 sps:$4 sm:$0xff]  }
  0xc4   : > { %1516 = vmatpush2.bf16.msra.mxu0 %v5113_v25 }
  0xc5   : > { %1762 = vmatpush2.bf16.msra.mxu1 %v4017_v26  ;;  %1517 = vmatprep.subr.bf16.mxu0 %v5122_v27  ;;  %v5337_v26 = vld [vmem:[%s6514_s2 + $0x604] ss:$8 sps:$4 sm:$0xff]  }
  0xc6   : > { %1763 = vmatprep.subr.bf16.mxu1 %v4025_v28  ;;  %v5342_v28 = vld [vmem:[%s6514_s2 + $0x704] ss:$8 sps:$4 sm:$0xff]  }
  0xc7   : > { %6592 = vst [vmem:[#allocation14_spill] sm:$0xff] %v5342_v28 }
  0xc8   : > { %1518 = vmatpush2.bf16.msra.mxu0 %v5133_v32 }
  0xc9   : > { %1764 = vmatpush2.bf16.msra.mxu1 %v4023_v33  ;;  %1519 = vmatprep.subr.bf16.mxu0 %v5142_v34  ;;  %v5361_v33 = vld [vmem:[%s6514_s2 + $0x6f4] ss:$8 sps:$4 sm:$0xff]  }
  0xca   : > { %1765 = vmatprep.subr.bf16.mxu1 %v4031_v35  ;;  %v5366_v35 = vld [vmem:[%s6514_s2 + $0x7f4] ss:$8 sps:$4 sm:$0xff]  }
  0xcb   : > { %6594 = vst [vmem:[#allocation16_spill] sm:$0xff] %v5366_v35 }
  0xcc   : > { %1520 = vmatpush2.bf16.msra.mxu0 %v5153_v41 }
  0xcd   : > { %1766 = vmatpush2.bf16.msra.mxu1 %v4029_v42  ;;  %1979 = vmatprep.subr.bf16.mxu0 %v5162_v29  ;;  %v5397_v42 = vld [vmem:[%s6514_s2 + $0x6e0] ss:$8 sps:$4 sm:$0xff]  }
  0xce   : > { %2237 = vmatprep.subr.bf16.mxu1 %v4041_v43  ;;  %v5402_v43 = vld [vmem:[%s6514_s2 + $0x7e0] ss:$8 sps:$4 sm:$0xff]  }
  0xcf   : > { %1522 = vmatmul.mubr.bf16.vlgmr.msra.gmra.mxu0 %v5169_v49  ;;  %6597 = vst [vmem:[#allocation19_spill] sm:$0xff] %v5402_v43 }
  0xd0   : > { %1768 = vmatmul.mubr.bf16.vlgmr.msra.gmra.mxu1 %v5167_v48  ;;  %1980 = vmatpush1.bf16.msra.mxu0 %v5178_v51 }
  0xd1   : > { %2238 = vmatpush1.bf16.msra.mxu1 %v4039_v52  ;;  %1981 = vmatprep.subr.bf16.mxu0 %v5187_v53  ;;  %v5421_v52 = vld [vmem:[%s6514_s2 + $0x6d0] ss:$8 sps:$4 sm:$0xff]  }
  0xd2   : > { %2239 = vmatprep.subr.bf16.mxu1 %v4047_v54  ;;  %2011 = vmatprep.mubr.bf16.mxu0 %v5194_v55  ;;  %v5426_v54 = vld [vmem:[%s6514_s2 + $0x7d0] ss:$8 sps:$4 sm:$0xff]  }
  0xd3   : > { %2269 = vmatprep.mubr.bf16.mxu1 %v5196_v56  ;;  %6599 = vst [vmem:[#allocation21_spill] sm:$0xff] %v5426_v54 }
  0xd4   : > { %1982 = vmatpush1.bf16.msra.mxu0 %v5204_v57 }
  0xd5   : > { %2240 = vmatpush1.bf16.msra.mxu1 %v5209_v58  ;;  %1983 = vmatprep.subr.bf16.mxu0 %v5215_v59  ;;  %v4192_v58 = vld [vmem:[%s6514_s2 + $0x174] ss:$8 sps:$4 sm:$0xff]  }
  0xd6   : > { %2241 = vmatprep.subr.bf16.mxu1 %v5220_v60 }
  0xd8   : > { %1984 = vmatpush1.bf16.msra.mxu0 %v5229_v61 }
  0xd9   : > { %2242 = vmatpush1.bf16.msra.mxu1 %v5234_v62  ;;  %1985 = vmatprep.subr.bf16.mxu0 %v5241_v63  ;;  %v5551_v62 = vld [vmem:[%s6514_s2 + $0x780] ss:$8 sps:$4 sm:$0xff]  }
  0xda   : > { %2243 = vmatprep.subr.bf16.mxu1 %v5246_v0  ;;  %v5539_v0 = vld [vmem:[%s5093_s23] sm:$0x66]  ;;  %6612 = vst [vmem:[#allocation34_spill] sm:$0xff] %v5551_v62 }
  0xdc   : > { %1986 = vmatpush1.bf16.msra.mxu0 %v5253_v1 }
  0xdd   : > { %2244 = vmatpush1.bf16.msra.mxu1 %v5258_v2  ;;  %1987 = vmatprep.subr.bf16.mxu0 %v5265_v3 }
  0xde   : > { %2245 = vmatprep.subr.bf16.mxu1 %v5270_v4 }
  0xe0   : > { %1988 = vmatpush1.bf16.msra.mxu0 %v5277_v5 }
  0xe1   : > { %2246 = vmatpush1.bf16.msra.mxu1 %v5282_v7  ;;  %1989 = vmatprep.subr.bf16.mxu0 %v5289_v9  ;;  %v5531_v7 = vld [vmem:[%s6514_s2 + $0x684] ss:$8 sps:$4 sm:$0xff]  }
  0xe2   : > { %2247 = vmatprep.subr.bf16.mxu1 %v5294_v11  ;;  %v5519_v11 = vld [vmem:[%s6514_s2 + $0x690] ss:$8 sps:$4 sm:$0xff]   ;;  %6609 = vst [vmem:[#allocation31_spill] sm:$0xff] %v5531_v7 }
  0xe3   : > { %6607 = vst [vmem:[#allocation29_spill] sm:$0xff] %v5519_v11 }
  0xe4   : > { %1990 = vmatpush1.bf16.msra.mxu0 %v5301_v13 }
  0xe5   : > { %2248 = vmatpush1.bf16.msra.mxu1 %v5306_v15  ;;  %1991 = vmatprep.subr.bf16.mxu0 %v5313_v17 }
  0xe6   : > { %2249 = vmatprep.subr.bf16.mxu1 %v5318_v19  ;;  %v5500_v19 = vld [vmem:[%s6514_s2 + $0x7a0] ss:$8 sps:$4 sm:$0xff]  }
  0xe7   : > { %6605 = vst [vmem:[#allocation27_spill] sm:$0xff] %v5500_v19 }
  0xe8   : > { %1992 = vmatpush1.bf16.msra.mxu0 %v5325_v21 }
  0xe9   : > { %2250 = vmatpush1.bf16.msra.mxu1 %v5330_v22  ;;  %1993 = vmatprep.subr.bf16.mxu0 %v5337_v26  ;;  %v3580_v22 = vcombine.low %v5107_v24, %v5107_v24  ;;  %v5507_v24 = vld [vmem:[%s6514_s2 + $0x694] ss:$8 sps:$4 sm:$0xff]  }
  0xea   : > { %2251 = vmatprep.subr.bf16.mxu1 %v5342_v28  ;;  %v5481_v28 = vld [vmem:[%s6514_s2 + $0x6a4] ss:$8 sps:$4 sm:$0xff]  }
  0xeb   : > { %v2064_v15 = vshll.u32 %v3580_v22, 16  ;;  %v2062_v4 = vshrl.u32 %v3580_v22, 16  ;;  %v3647_v22 = vcombine.high %v5539_v0, %v5539_v0 }
  0xec   : > { %1994 = vmatpush1.bf16.msra.mxu0 %v5349_v30 }
  0xed   : > { %2252 = vmatpush1.bf16.msra.mxu1 %v5354_v31  ;;  %1995 = vmatprep.subr.bf16.mxu0 %v5361_v33  ;;  %v5469_v31 = vld [vmem:[%s6514_s2 + $0x6b0] ss:$8 sps:$4 sm:$0xff]   ;;  %v2066_v2 = vrot.slane %v2064_v15, 1  ;;  %v5558_v15 = vld [vmem:[%s6514_s2 + $0x874] ss:$8 sps:$4 sm:$0xff]  }
  0xee   : > { %2253 = vmatprep.subr.bf16.mxu1 %v5366_v35  ;;  %v5457_v35 = vld [vmem:[%s6514_s2 + $0x6b4] ss:$8 sps:$4 sm:$0xff]   ;;  %6613 = vst [vmem:[#allocation35_spill] sm:$0xff] %v5558_v15 }
  0xef   : > { %v5566_v60 = vor.u32 %v2066_v2, %v2062_v4  ;;  %v5584_v2 = vrot.slane %v3647_v22, 1  ;;  %v5597_v22 = vld [vmem:[%s6514_s2 + $0x860] ss:$8 sps:$4 sm:$0xff]  }
  0xf0   : > { %1996 = vmatpush2.bf16.msra.mxu0 %v5373_v36  ;;  %6616 = vst [vmem:[#allocation38_spill] sm:$0xff] %v5597_v22 }
  0xf1   : > { %2254 = vmatpush2.bf16.msra.mxu1 %v5378_v37  ;;  %1997 = vmatprep.subr.bf16.mxu0 %v5385_v39  ;;  %v5445_v37 = vld [vmem:[%s6514_s2 + $0x6c0] ss:$8 sps:$4 sm:$0xff]  }
  0xf2   : > { %2255 = vmatprep.subr.bf16.mxu1 %v5390_v40  ;;  %v5433_v40 = vld [vmem:[%s6514_s2 + $0x6c4] ss:$8 sps:$4 sm:$0xff]  }
  0xf4   : > { %1998 = vmatpush2.bf16.msra.mxu0 %v5397_v42 }
  0xf5   : > { %2256 = vmatpush2.bf16.msra.mxu1 %v5402_v43  ;;  %1999 = vmatprep.subr.bf16.mxu0 %v5409_v45  ;;  %v5438_v43 = vld [vmem:[%s6514_s2 + $0x7c4] ss:$8 sps:$4 sm:$0xff]  }
  0xf6   : > { %2257 = vmatprep.subr.bf16.mxu1 %v5414_v47  ;;  %6600 = vst [vmem:[#allocation22_spill] sm:$0xff] %v5438_v43  ;;  %v5450_v47 = vld [vmem:[%s6514_s2 + $0x7c0] ss:$8 sps:$4 sm:$0xff]  }
  0xf7   : > { %6601 = vst [vmem:[#allocation23_spill] sm:$0xff] %v5450_v47 }
  0xf8   : > { %2000 = vmatpush2.bf16.msra.mxu0 %v5421_v52 }
  0xf9   : > { %2258 = vmatpush2.bf16.msra.mxu1 %v5426_v54  ;;  %2001 = vmatprep.subr.bf16.mxu0 %v5433_v40  ;;  %v5462_v54 = vld [vmem:[%s6514_s2 + $0x7b4] ss:$8 sps:$4 sm:$0xff]  }
  0xfa   : > { %2259 = vmatprep.subr.bf16.mxu1 %v5438_v43  ;;  %6602 = vst [vmem:[#allocation24_spill] sm:$0xff] %v5462_v54  ;;  %v5474_v43 = vld [vmem:[%s6514_s2 + $0x7b0] ss:$8 sps:$4 sm:$0xff]  }
  0xfb   : > { %6603 = vst [vmem:[#allocation25_spill] sm:$0xff] %v5474_v43 }
  0xfc   : > { %2002 = vmatpush2.bf16.msra.mxu0 %v5445_v37 }
  0xfd   : > { %2260 = vmatpush2.bf16.msra.mxu1 %v5450_v47  ;;  %2003 = vmatprep.subr.bf16.mxu0 %v5457_v35  ;;  %v5486_v47 = vld [vmem:[%s6514_s2 + $0x7a4] ss:$8 sps:$4 sm:$0xff]  }
  0xfe   : > { %2261 = vmatprep.subr.bf16.mxu1 %v5462_v54  ;;  %6604 = vst [vmem:[#allocation26_spill] sm:$0xff] %v5486_v47  ;;  %v5495_v54 = vld [vmem:[%s6514_s2 + $0x6a0] ss:$8 sps:$4 sm:$0xff]  }
 0x100   : > { %2004 = vmatpush2.bf16.msra.mxu0 %v5469_v31 }
 0x101   : > { %2262 = vmatpush2.bf16.msra.mxu1 %v5474_v43  ;;  %2005 = vmatprep.subr.bf16.mxu0 %v5481_v28  ;;  %v5512_v43 = vld [vmem:[%s6514_s2 + $0x794] ss:$8 sps:$4 sm:$0xff]  }
 0x102   : > { %2263 = vmatprep.subr.bf16.mxu1 %v5486_v47  ;;  %6606 = vst [vmem:[#allocation28_spill] sm:$0xff] %v5512_v43  ;;  %v5524_v47 = vld [vmem:[%s6514_s2 + $0x790] ss:$8 sps:$4 sm:$0xff]  }
 0x103   : > { %6608 = vst [vmem:[#allocation30_spill] sm:$0xff] %v5524_v47 }
 0x104   : > { %2006 = vmatpush2.bf16.msra.mxu0 %v5495_v54 }
 0x105   : > { %2264 = vmatpush2.bf16.msra.mxu1 %v5500_v19  ;;  %2007 = vmatprep.subr.bf16.mxu0 %v5507_v24  ;;  %v5536_v19 = vld [vmem:[%s6514_s2 + $0x784] ss:$8 sps:$4 sm:$0xff]  }
 0x106   : > { %2265 = vmatprep.subr.bf16.mxu1 %v5512_v43  ;;  %6610 = vst [vmem:[#allocation32_spill] sm:$0xff] %v5536_v19  ;;  %v5546_v43 = vld [vmem:[%s6514_s2 + $0x680] ss:$8 sps:$4 sm:$0xff]  }
 0x107   : > { %6611 = vst [vmem:[#allocation33_spill] sm:$0xff] %v5546_v43 }
 0x108   : > { %2008 = vmatpush2.bf16.msra.mxu0 %v5519_v11 }
 0x109   : > { %2266 = vmatpush2.bf16.msra.mxu1 %v5524_v47  ;;  %2009 = vmatprep.subr.bf16.mxu0 %v5531_v7  ;;  %v5564_v47 = vcombine.low %v5172_v50, %v5172_v50  ;;  %v5582_v50 = vld [vmem:[%s6514_s2 + $0x864] ss:$8 sps:$4 sm:$0xff]  }
 0x10a   : > { %2267 = vmatprep.subr.bf16.mxu1 %v5536_v19  ;;  %v5573_v19 = vld [vmem:[%s6514_s2 + $0x870] ss:$8 sps:$4 sm:$0xff]   ;;  %6615 = vst [vmem:[#allocation37_spill] sm:$0xff] %v5582_v50 }
 0x10b   : > { %6614 = vst [vmem:[#allocation36_spill] sm:$0xff] %v5573_v19 }
 0x10c   : > { %2010 = vmatpush2.bf16.msra.mxu0 %v5546_v43 }
 0x10d   : > { %2268 = vmatpush2.bf16.msra.mxu1 %v5551_v62  ;;  %2483 = vmatprep.subr.bf16.mxu0 %v5558_v15 }
 0x10e   : > { %2541 = vmatprep.subr.bf16.mxu1 %v4192_v58  ;;  %v4193_v58 = vld [vmem:[%s6514_s2 + $0x170] ss:$8 sps:$4 sm:$0xff]  }
 0x10f   : > { %v568_v4 = vpop.f32.mrf.mxu0  ;;  %2012 = vmatmul.mubr.bf16.vlgmr.msra.gmra.mxu0 %v5564_v47 }
 0x110   : > { %v776_v62 = vpop.f32.mrf.mxu1  ;;  %2270 = vmatmul.mubr.bf16.vlgmr.msra.gmra.mxu1 %v5566_v60  ;;  %2484 = vmatpush1.bf16.msra.mxu0 %v5573_v19 }
 0x111   : > { %v5588_v43 = vadd.f32 %v776_v62, %v568_v4  ;;  %2542 = vmatpush1.bf16.msra.mxu1 %v4193_v58  ;;  %v570_v15 = vpop.f32.mrf.mxu0  ;;  %2485 = vmatprep.subr.bf16.mxu0 %v5582_v50  ;;  %v4194_v62 = vld [vmem:[%s6514_s2 + $0x164] ss:$8 sps:$4 sm:$0xff]   ;;  %v5606_v4 = vld [vmem:[%s6514_s2 + $0x854] ss:$8 sps:$4 sm:$0xff]   ;;  %v4195_v50 = vld [vmem:[%s6514_s2 + $0x160] ss:$8 sps:$4 sm:$0xff]  }
 0x112   : > { %v778_v7 = vpop.f32.mrf.mxu1  ;;  %2543 = vmatprep.subr.bf16.mxu1 %v4194_v62  ;;  %6617 = vst [vmem:[#allocation39_spill] sm:$0xff] %v5606_v4  ;;  %2515 = vmatprep.mubr.bf16.mxu0 %v5584_v2  ;;  %v5619_v62 = vld [vmem:[%s6514_s2 + $0x850] ss:$8 sps:$4 sm:$0xff]  }
 0x113   : > { %v5608_v58 = vadd.f32 %v778_v7, %v570_v15  ;;  %2573 = vmatprep.mubr.bf16.mxu1 %v4950_v44  ;;  %v572_v19 = vpop.f32.mrf.mxu0  ;;  %6618 = vst [vmem:[#allocation40_spill] sm:$0xff] %v5619_v62  ;;  %v4196_v44 = vld [vmem:[%s6514_s2 + $0x154] ss:$8 sps:$4 sm:$0xff]  }
 0x114   : > { %v780_v11 = vpop.f32.mrf.mxu1  ;;  %2486 = vmatpush1.bf16.msra.mxu0 %v5597_v22  ;;  %v4197_v19 = vld [vmem:[%s6514_s2 + $0x150] ss:$8 sps:$4 sm:$0xff]  }
 0x115   : > { %2544 = vmatpush1.bf16.msra.mxu1 %v4195_v50  ;;  %v573_v7 = vpop.f32.mrf.mxu0  ;;  %2487 = vmatprep.subr.bf16.mxu0 %v5606_v4  ;;  %v5628_v11 = vld [vmem:[%s6514_s2 + $0x844] ss:$8 sps:$4 sm:$0xff]   ;;  %v5637_v50 = vld [vmem:[%s6514_s2 + $0x840] ss:$8 sps:$4 sm:$0xff]  }
 0x116   : > { %v781_v15 = vpop.f32.mrf.mxu1  ;;  %2545 = vmatprep.subr.bf16.mxu1 %v4196_v44  ;;  %6619 = vst [vmem:[#allocation41_spill] sm:$0xff] %v5628_v11  ;;  %6620 = vst [vmem:[#allocation42_spill] sm:$0xff] %v5637_v50  ;;  %v4198_v7 = vld [vmem:[%s6514_s2 + $0x144] ss:$8 sps:$4 sm:$0xff]   ;;  %v4199_v44 = vld [vmem:[%s6514_s2 + $0x140] ss:$8 sps:$4 sm:$0xff]  }
 0x117   : > { %v5646_v15 = vld [vmem:[%s6514_s2 + $0x834] ss:$8 sps:$4 sm:$0xff]   ;;  %v4228_v4 = vld [vmem:[%s6514_s2 + $0x64] ss:$8 sps:$4 sm:$0xff]  }
 0x118   : > { %2488 = vmatpush1.bf16.msra.mxu0 %v5619_v62  ;;  %6621 = vst [vmem:[#allocation43_spill] sm:$0xff] %v5646_v15 }
 0x119   : > { %2546 = vmatpush1.bf16.msra.mxu1 %v4197_v19  ;;  %2489 = vmatprep.subr.bf16.mxu0 %v5628_v11  ;;  %v5655_v19 = vld [vmem:[%s6514_s2 + $0x830] ss:$8 sps:$4 sm:$0xff]  }
 0x11a   : > { %2547 = vmatprep.subr.bf16.mxu1 %v4198_v7  ;;  %6622 = vst [vmem:[#allocation44_spill] sm:$0xff] %v5655_v19  ;;  %v4200_v7 = vld [vmem:[%s6514_s2 + $0x134] ss:$8 sps:$4 sm:$0xff]   ;;  %v4221_v11 = vld [vmem:[%s6514_s2 + $0x190] ss:$8 sps:$4 sm:$0xff]  }
 0x11c   : > { %2490 = vmatpush1.bf16.msra.mxu0 %v5637_v50  ;;  %v5664_v50 = vld [vmem:[%s6514_s2 + $0x824] ss:$8 sps:$4 sm:$0xff]  }
 0x11d   : > { %2548 = vmatpush1.bf16.msra.mxu1 %v4199_v44  ;;  %2491 = vmatprep.subr.bf16.mxu0 %v5646_v15  ;;  %6623 = vst [vmem:[#allocation45_spill] sm:$0xff] %v5664_v50  ;;  %v4201_v44 = vld [vmem:[%s6514_s2 + $0x130] ss:$8 sps:$4 sm:$0xff]   ;;  %v5673_v15 = vld [vmem:[%s6514_s2 + $0x820] ss:$8 sps:$4 sm:$0xff]  }
 0x11e   : > { %2549 = vmatprep.subr.bf16.mxu1 %v4200_v7  ;;  %6624 = vst [vmem:[#allocation46_spill] sm:$0xff] %v5673_v15  ;;  %v4202_v7 = vld [vmem:[%s6514_s2 + $0x124] ss:$8 sps:$4 sm:$0xff]  }
 0x120   : > { %2492 = vmatpush1.bf16.msra.mxu0 %v5655_v19  ;;  %v5682_v19 = vld [vmem:[%s6514_s2 + $0x814] ss:$8 sps:$4 sm:$0xff]  }
 0x121   : > { %2550 = vmatpush1.bf16.msra.mxu1 %v4201_v44  ;;  %2493 = vmatprep.subr.bf16.mxu0 %v5664_v50  ;;  %6625 = vst [vmem:[#allocation47_spill] sm:$0xff] %v5682_v19  ;;  %v4203_v44 = vld [vmem:[%s6514_s2 + $0x120] ss:$8 sps:$4 sm:$0xff]   ;;  %v5691_v50 = vld [vmem:[%s6514_s2 + $0x810] ss:$8 sps:$4 sm:$0xff]  }
 0x122   : > { %2551 = vmatprep.subr.bf16.mxu1 %v4202_v7  ;;  %6626 = vst [vmem:[#allocation48_spill] sm:$0xff] %v5691_v50  ;;  %v4204_v7 = vld [vmem:[%s6514_s2 + $0x114] ss:$8 sps:$4 sm:$0xff]  }
 0x124   : > { %2494 = vmatpush1.bf16.msra.mxu0 %v5673_v15  ;;  %v5700_v15 = vld [vmem:[%s6514_s2 + $0x804] ss:$8 sps:$4 sm:$0xff]  }
 0x125   : > { %2552 = vmatpush1.bf16.msra.mxu1 %v4203_v44  ;;  %2495 = vmatprep.subr.bf16.mxu0 %v5682_v19  ;;  %6627 = vst [vmem:[#allocation49_spill] sm:$0xff] %v5700_v15  ;;  %v4205_v44 = vld [vmem:[%s6514_s2 + $0x110] ss:$8 sps:$4 sm:$0xff]   ;;  %v5709_v19 = vld [vmem:[%s6514_s2 + $0x800] ss:$8 sps:$4 sm:$0xff]  }
 0x126   : > { %2553 = vmatprep.subr.bf16.mxu1 %v4204_v7  ;;  %6628 = vst [vmem:[#allocation50_spill] sm:$0xff] %v5709_v19  ;;  %v4206_v7 = vld [vmem:[%s6514_s2 + $0x104] ss:$8 sps:$4 sm:$0xff]  }
 0x128   : > { %2496 = vmatpush1.bf16.msra.mxu0 %v5691_v50  ;;  %v5718_v50 = vld [vmem:[%s6514_s2 + $0x8f4] ss:$8 sps:$4 sm:$0xff]  }
 0x129   : > { %2554 = vmatpush1.bf16.msra.mxu1 %v4205_v44  ;;  %2497 = vmatprep.subr.bf16.mxu0 %v5700_v15  ;;  %6629 = vst [vmem:[#allocation51_spill] sm:$0xff] %v5718_v50  ;;  %v4207_v44 = vld [vmem:[%s6514_s2 + $0x100] ss:$8 sps:$4 sm:$0xff]   ;;  %v5727_v15 = vld [vmem:[%s6514_s2 + $0x8f0] ss:$8 sps:$4 sm:$0xff]  }
 0x12a   : > { %2555 = vmatprep.subr.bf16.mxu1 %v4206_v7  ;;  %6630 = vst [vmem:[#allocation52_spill] sm:$0xff] %v5727_v15  ;;  %v4208_v7 = vld [vmem:[%s6514_s2 + $0x1f4] ss:$8 sps:$4 sm:$0xff]  }
 0x12c   : > { %2498 = vmatpush1.bf16.msra.mxu0 %v5709_v19  ;;  %v5736_v19 = vld [vmem:[%s6514_s2 + $0x8e4] ss:$8 sps:$4 sm:$0xff]  }
 0x12d   : > { %2556 = vmatpush1.bf16.msra.mxu1 %v4207_v44  ;;  %2499 = vmatprep.subr.bf16.mxu0 %v5718_v50  ;;  %6631 = vst [vmem:[#allocation53_spill] sm:$0xff] %v5736_v19  ;;  %v4209_v44 = vld [vmem:[%s6514_s2 + $0x1f0] ss:$8 sps:$4 sm:$0xff]   ;;  %v5745_v50 = vld [vmem:[%s6514_s2 + $0x8e0] ss:$8 sps:$4 sm:$0xff]  }
 0x12e   : > { %2557 = vmatprep.subr.bf16.mxu1 %v4208_v7  ;;  %6632 = vst [vmem:[#allocation54_spill] sm:$0xff] %v5745_v50  ;;  %v4210_v7 = vld [vmem:[%s6514_s2 + $0x1e4] ss:$8 sps:$4 sm:$0xff]  }
 0x130   : > { %2500 = vmatpush2.bf16.msra.mxu0 %v5727_v15  ;;  %v5754_v15 = vld [vmem:[%s6514_s2 + $0x8d4] ss:$8 sps:$4 sm:$0xff]  }
 0x131   : > { %2558 = vmatpush2.bf16.msra.mxu1 %v4209_v44  ;;  %2501 = vmatprep.subr.bf16.mxu0 %v5736_v19  ;;  %6633 = vst [vmem:[#allocation55_spill] sm:$0xff] %v5754_v15  ;;  %v4211_v44 = vld [vmem:[%s6514_s2 + $0x1e0] ss:$8 sps:$4 sm:$0xff]   ;;  %v5763_v19 = vld [vmem:[%s6514_s2 + $0x8d0] ss:$8 sps:$4 sm:$0xff]  }
 0x132   : > { %2559 = vmatprep.subr.bf16.mxu1 %v4210_v7  ;;  %6634 = vst [vmem:[#allocation56_spill] sm:$0xff] %v5763_v19  ;;  %v4212_v7 = vld [vmem:[%s6514_s2 + $0x1d4] ss:$8 sps:$4 sm:$0xff]  }
 0x134   : > { %2502 = vmatpush2.bf16.msra.mxu0 %v5745_v50  ;;  %v5772_v50 = vld [vmem:[%s6514_s2 + $0x8c4] ss:$8 sps:$4 sm:$0xff]  }
 0x135   : > { %2560 = vmatpush2.bf16.msra.mxu1 %v4211_v44  ;;  %2503 = vmatprep.subr.bf16.mxu0 %v5754_v15  ;;  %6635 = vst [vmem:[#allocation57_spill] sm:$0xff] %v5772_v50  ;;  %v4213_v44 = vld [vmem:[%s6514_s2 + $0x1d0] ss:$8 sps:$4 sm:$0xff]   ;;  %v5781_v15 = vld [vmem:[%s6514_s2 + $0x8c0] ss:$8 sps:$4 sm:$0xff]  }
 0x136   : > { %2561 = vmatprep.subr.bf16.mxu1 %v4212_v7  ;;  %6636 = vst [vmem:[#allocation58_spill] sm:$0xff] %v5781_v15  ;;  %v4214_v7 = vld [vmem:[%s6514_s2 + $0x1c4] ss:$8 sps:$4 sm:$0xff]  }
 0x138   : > { %2504 = vmatpush2.bf16.msra.mxu0 %v5763_v19  ;;  %v5790_v19 = vld [vmem:[%s6514_s2 + $0x8b4] ss:$8 sps:$4 sm:$0xff]  }
 0x139   : > { %2562 = vmatpush2.bf16.msra.mxu1 %v4213_v44  ;;  %2505 = vmatprep.subr.bf16.mxu0 %v5772_v50  ;;  %6637 = vst [vmem:[#allocation59_spill] sm:$0xff] %v5790_v19  ;;  %v4215_v44 = vld [vmem:[%s6514_s2 + $0x1c0] ss:$8 sps:$4 sm:$0xff]   ;;  %v5799_v50 = vld [vmem:[%s6514_s2 + $0x8b0] ss:$8 sps:$4 sm:$0xff]  }
 0x13a   : > { %2563 = vmatprep.subr.bf16.mxu1 %v4214_v7  ;;  %6638 = vst [vmem:[#allocation60_spill] sm:$0xff] %v5799_v50  ;;  %v4216_v7 = vld [vmem:[%s6514_s2 + $0x1b4] ss:$8 sps:$4 sm:$0xff]  }
 0x13c   : > { %2506 = vmatpush2.bf16.msra.mxu0 %v5781_v15  ;;  %v5808_v15 = vld [vmem:[%s6514_s2 + $0x8a4] ss:$8 sps:$4 sm:$0xff]  }
 0x13d   : > { %2564 = vmatpush2.bf16.msra.mxu1 %v4215_v44  ;;  %2507 = vmatprep.subr.bf16.mxu0 %v5790_v19  ;;  %6639 = vst [vmem:[#allocation61_spill] sm:$0xff] %v5808_v15  ;;  %v4217_v44 = vld [vmem:[%s6514_s2 + $0x1b0] ss:$8 sps:$4 sm:$0xff]   ;;  %v5817_v19 = vld [vmem:[%s6514_s2 + $0x8a0] ss:$8 sps:$4 sm:$0xff]  }
 0x13e   : > { %2565 = vmatprep.subr.bf16.mxu1 %v4216_v7  ;;  %6640 = vst [vmem:[#allocation62_spill] sm:$0xff] %v5817_v19  ;;  %v4218_v7 = vld [vmem:[%s6514_s2 + $0x1a4] ss:$8 sps:$4 sm:$0xff]  }
 0x140   : > { %2508 = vmatpush2.bf16.msra.mxu0 %v5799_v50  ;;  %v5826_v50 = vld [vmem:[%s6514_s2 + $0x894] ss:$8 sps:$4 sm:$0xff]  }
 0x141   : > { %2566 = vmatpush2.bf16.msra.mxu1 %v4217_v44  ;;  %2509 = vmatprep.subr.bf16.mxu0 %v5808_v15  ;;  %6641 = vst [vmem:[#allocation63_spill] sm:$0xff] %v5826_v50  ;;  %v4219_v44 = vld [vmem:[%s6514_s2 + $0x1a0] ss:$8 sps:$4 sm:$0xff]   ;;  %v5835_v15 = vld [vmem:[%s6514_s2 + $0x890] ss:$8 sps:$4 sm:$0xff]  }
 0x142   : > { %2567 = vmatprep.subr.bf16.mxu1 %v4218_v7  ;;  %6642 = vst [vmem:[#allocation64_spill] sm:$0xff] %v5835_v15  ;;  %v4220_v7 = vld [vmem:[%s6514_s2 + $0x194] ss:$8 sps:$4 sm:$0xff]  }
 0x144   : > { %2510 = vmatpush2.bf16.msra.mxu0 %v5817_v19  ;;  %v5844_v19 = vld [vmem:[%s6514_s2 + $0x884] ss:$8 sps:$4 sm:$0xff]  }
 0x145   : > { %2568 = vmatpush2.bf16.msra.mxu1 %v4219_v44  ;;  %2511 = vmatprep.subr.bf16.mxu0 %v5826_v50  ;;  %6643 = vst [vmem:[#allocation65_spill] sm:$0xff] %v5844_v19  ;;  %v3646_v44 = vcombine.low %v5539_v0, %v5539_v0  ;;  %v5855_v50 = vld [vmem:[%s6514_s2 + $0x880] ss:$8 sps:$4 sm:$0xff]  }
 0x146   : > { %2569 = vmatprep.subr.bf16.mxu1 %v4220_v7  ;;  %6644 = vst [vmem:[#allocation66_spill] sm:$0xff] %v5855_v50  ;;  %v4222_v7 = vld [vmem:[%s6514_s2 + $0x184] ss:$8 sps:$4 sm:$0xff]  }
 0x147   : > { %v5861_v0 = vrot.slane %v3646_v44, 1 }
 0x148   : > { %2512 = vmatpush2.bf16.msra.mxu0 %v5835_v15  ;;  %v4224_v15 = vld [vmem:[%s6514_s2 + $0x74] ss:$8 sps:$4 sm:$0xff]  }
 0x149   : > { %2570 = vmatpush2.bf16.msra.mxu1 %v4221_v11  ;;  %2513 = vmatprep.subr.bf16.mxu0 %v5844_v19  ;;  %v4223_v11 = vld [vmem:[%s6514_s2 + $0x180] ss:$8 sps:$4 sm:$0xff]   ;;  %v4225_v19 = vld [vmem:[%s6514_s2 + $0x274] ss:$8 sps:$4 sm:$0xff]  }
 0x14a   : > { %2571 = vmatprep.subr.bf16.mxu1 %v4222_v7 }
 0x14c   : > { %2514 = vmatpush2.bf16.msra.mxu0 %v5855_v50 }
 0x14d   : > { %2572 = vmatpush2.bf16.msra.mxu1 %v4223_v11  ;;  %2582 = vmatprep.subr.bf16.mxu0 %v4224_v15  ;;  %v4226_v11 = vld [vmem:[%s6514_s2 + $0x70] ss:$8 sps:$4 sm:$0xff]  }
 0x14e   : > { %2623 = vmatprep.subr.bf16.mxu1 %v4225_v19  ;;  %v4227_v15 = vld [vmem:[%s6514_s2 + $0x270] ss:$8 sps:$4 sm:$0xff]  }
 0x14f   : > { %v1020_v7 = vpop.f32.mrf.mxu0  ;;  %2516 = vmatmul.mubr.bf16.vlgmr.msra.gmra.mxu0 %v5861_v0 }
 0x150   : > { %v1265_v44 = vpop.f32.mrf.mxu1  ;;  %2574 = vmatmul.mubr.bf16.vlgmr.msra.gmra.mxu1 %v5169_v49  ;;  %v1027_v50 = vadd.f32 %v1020_v7, %v5588_v43  ;;  %2583 = vmatpush1.bf16.msra.mxu0 %v4226_v11  ;;  %v4229_v49 = vld [vmem:[%s6514_s2 + $0x264] ss:$8 sps:$4 sm:$0xff]  }
 0x151   : > { %2624 = vmatpush1.bf16.msra.mxu1 %v4227_v15  ;;  %v1022_v62 = vpop.f32.mrf.mxu0  ;;  %2584 = vmatprep.subr.bf16.mxu0 %v4228_v4  ;;  %v4230_v4 = vld [vmem:[%s6514_s2 + $0x60] ss:$8 sps:$4 sm:$0xff]  }
 0x152   : > { %v1267_v19 = vpop.f32.mrf.mxu1  ;;  %2625 = vmatprep.subr.bf16.mxu1 %v4229_v49  ;;  %v5888_v43 = vadd.f32 %v1265_v44, %v1027_v50  ;;  %v1028_v7 = vadd.f32 %v1022_v62, %v5608_v58  ;;  %2614 = vmatprep.mubr.bf16.mxu0 %v4781_v46  ;;  %v4231_v50 = vld [vmem:[%s6514_s2 + $0x260] ss:$8 sps:$4 sm:$0xff]   ;;  %v4232_v46 = vld [vmem:[%s6514_s2 + $0x54] ss:$8 sps:$4 sm:$0xff]   ;;  %v4234_v62 = vld [vmem:[%s6514_s2 + $0x50] ss:$8 sps:$4 sm:$0xff]  }
 0x153   : > { %2655 = vmatprep.mubr.bf16.mxu1 %v4936_v38  ;;  %v1024_v11 = vpop.f32.mrf.mxu0  ;;  %v4233_v38 = vld [vmem:[%s6514_s2 + $0x254] ss:$8 sps:$4 sm:$0xff]   ;;  %v4236_v49 = vld [vmem:[%s6514_s2 + $0x44] ss:$8 sps:$4 sm:$0xff]  }
 0x154   : > { %v1269_v15 = vpop.f32.mrf.mxu1  ;;  %v5893_v22 = vadd.f32 %v1267_v19, %v1028_v7  ;;  %2585 = vmatpush1.bf16.msra.mxu0 %v4230_v4  ;;  %v4235_v19 = vld [vmem:[%s6514_s2 + $0x250] ss:$8 sps:$4 sm:$0xff]   ;;  %v4237_v7 = vld [vmem:[%s6514_s2 + $0x244] ss:$8 sps:$4 sm:$0xff]   ;;  %v4238_v11 = vld [vmem:[%s6514_s2 + $0x40] ss:$8 sps:$4 sm:$0xff]  }
 0x155   : > { %2626 = vmatpush1.bf16.msra.mxu1 %v4231_v50  ;;  %v1025_v44 = vpop.f32.mrf.mxu0  ;;  %2586 = vmatprep.subr.bf16.mxu0 %v4232_v46  ;;  %v4239_v15 = vld [vmem:[%s6514_s2 + $0x240] ss:$8 sps:$4 sm:$0xff]   ;;  %v4240_v4 = vld [vmem:[%s6514_s2 + $0x34] ss:$8 sps:$4 sm:$0xff]   ;;  %v4244_v46 = vld [vmem:[%s6514_s2 + $0x24] ss:$8 sps:$4 sm:$0xff]  }
 0x156   : > { %v1270_v58 = vpop.f32.mrf.mxu1  ;;  %2627 = vmatprep.subr.bf16.mxu1 %v4233_v38  ;;  %v4241_v50 = vld [vmem:[%s6514_s2 + $0x234] ss:$8 sps:$4 sm:$0xff]   ;;  %v4242_v44 = vld [vmem:[%s6514_s2 + $0x30] ss:$8 sps:$4 sm:$0xff]   ;;  %v4245_v38 = vld [vmem:[%s6514_s2 + $0x224] ss:$8 sps:$4 sm:$0xff]  }
 0x157   : > { %v4243_v58 = vld [vmem:[%s6514_s2 + $0x230] ss:$8 sps:$4 sm:$0xff]  }
 0x158   : > { %2587 = vmatpush1.bf16.msra.mxu0 %v4234_v62  ;;  %v4246_v62 = vld [vmem:[%s6514_s2 + $0x20] ss:$8 sps:$4 sm:$0xff]  }
 0x159   : > { %2628 = vmatpush1.bf16.msra.mxu1 %v4235_v19  ;;  %2588 = vmatprep.subr.bf16.mxu0 %v4236_v49  ;;  %v4247_v19 = vld [vmem:[%s6514_s2 + $0x220] ss:$8 sps:$4 sm:$0xff]   ;;  %v4248_v49 = vld [vmem:[%s6514_s2 + $0x14] ss:$8 sps:$4 sm:$0xff]  }
 0x15a   : > { %2629 = vmatprep.subr.bf16.mxu1 %v4237_v7  ;;  %v4249_v7 = vld [vmem:[%s6514_s2 + $0x214] ss:$8 sps:$4 sm:$0xff]  }
 0x15c   : > { %2589 = vmatpush1.bf16.msra.mxu0 %v4238_v11  ;;  %v4250_v11 = vld [vmem:[%s6514_s2 + $0x10] ss:$8 sps:$4 sm:$0xff]  }
 0x15d   : > { %2630 = vmatpush1.bf16.msra.mxu1 %v4239_v15  ;;  %2590 = vmatprep.subr.bf16.mxu0 %v4240_v4  ;;  %v4251_v15 = vld [vmem:[%s6514_s2 + $0x210] ss:$8 sps:$4 sm:$0xff]   ;;  %v4252_v4 = vld [vmem:[%s6514_s2 + $0x4] ss:$8 sps:$4 sm:$0xff]  }
 0x15e   : > { %2631 = vmatprep.subr.bf16.mxu1 %v4241_v50  ;;  %v4253_v50 = vld [vmem:[%s6514_s2 + $0x204] ss:$8 sps:$4 sm:$0xff]  }
 0x160   : > { %2591 = vmatpush1.bf16.msra.mxu0 %v4242_v44  ;;  %v4254_v44 = vld [vmem:[%s6514_s2] ss:$8 sps:$4 sm:$0xff]  }
 0x161   : > { %2632 = vmatpush1.bf16.msra.mxu1 %v4243_v58  ;;  %2592 = vmatprep.subr.bf16.mxu0 %v4244_v46  ;;  %v4255_v58 = vld [vmem:[%s6514_s2 + $0x200] ss:$8 sps:$4 sm:$0xff]   ;;  %v4256_v46 = vld [vmem:[%s6514_s2 + $0xf4] ss:$8 sps:$4 sm:$0xff]  }
 0x162   : > { %2633 = vmatprep.subr.bf16.mxu1 %v4245_v38  ;;  %v4257_v38 = vld [vmem:[%s6514_s2 + $0x2f4] ss:$8 sps:$4 sm:$0xff]  }
 0x164   : > { %2593 = vmatpush1.bf16.msra.mxu0 %v4246_v62  ;;  %v4258_v62 = vld [vmem:[%s6514_s2 + $0xf0] ss:$8 sps:$4 sm:$0xff]  }
 0x165   : > { %2634 = vmatpush1.bf16.msra.mxu1 %v4247_v19  ;;  %2594 = vmatprep.subr.bf16.mxu0 %v4248_v49  ;;  %v4259_v19 = vld [vmem:[%s6514_s2 + $0x2f0] ss:$8 sps:$4 sm:$0xff]   ;;  %v4260_v49 = vld [vmem:[%s6514_s2 + $0xe4] ss:$8 sps:$4 sm:$0xff]  }
 0x166   : > { %2635 = vmatprep.subr.bf16.mxu1 %v4249_v7  ;;  %v4261_v7 = vld [vmem:[%s6514_s2 + $0x2e4] ss:$8 sps:$4 sm:$0xff]  }
 0x168   : > { %2595 = vmatpush1.bf16.msra.mxu0 %v4250_v11  ;;  %v4262_v11 = vld [vmem:[%s6514_s2 + $0xe0] ss:$8 sps:$4 sm:$0xff]  }
 0x169   : > { %2636 = vmatpush1.bf16.msra.mxu1 %v4251_v15  ;;  %2596 = vmatprep.subr.bf16.mxu0 %v4252_v4  ;;  %v4263_v15 = vld [vmem:[%s6514_s2 + $0x2e0] ss:$8 sps:$4 sm:$0xff]   ;;  %v4264_v4 = vld [vmem:[%s6514_s2 + $0xd4] ss:$8 sps:$4 sm:$0xff]  }
 0x16a   : > { %2637 = vmatprep.subr.bf16.mxu1 %v4253_v50  ;;  %v4265_v50 = vld [vmem:[%s6514_s2 + $0x2d4] ss:$8 sps:$4 sm:$0xff]  }
 0x16c   : > { %2597 = vmatpush1.bf16.msra.mxu0 %v4254_v44  ;;  %v4266_v44 = vld [vmem:[%s6514_s2 + $0xd0] ss:$8 sps:$4 sm:$0xff]  }
 0x16d   : > { %2638 = vmatpush1.bf16.msra.mxu1 %v4255_v58  ;;  %2598 = vmatprep.subr.bf16.mxu0 %v4256_v46  ;;  %v4267_v58 = vld [vmem:[%s6514_s2 + $0x2d0] ss:$8 sps:$4 sm:$0xff]   ;;  %v4268_v46 = vld [vmem:[%s6514_s2 + $0xc4] ss:$8 sps:$4 sm:$0xff]  }
 0x16e   : > { %2639 = vmatprep.subr.bf16.mxu1 %v4257_v38  ;;  %v4269_v38 = vld [vmem:[%s6514_s2 + $0x2c4] ss:$8 sps:$4 sm:$0xff]  }
 0x170   : > { %2599 = vmatpush2.bf16.msra.mxu0 %v4258_v62  ;;  %v4270_v62 = vld [vmem:[%s6514_s2 + $0xc0] ss:$8 sps:$4 sm:$0xff]  }
 0x171   : > { %2640 = vmatpush2.bf16.msra.mxu1 %v4259_v19  ;;  %2600 = vmatprep.subr.bf16.mxu0 %v4260_v49  ;;  %v4271_v19 = vld [vmem:[%s6514_s2 + $0x2c0] ss:$8 sps:$4 sm:$0xff]   ;;  %v4272_v49 = vld [vmem:[%s6514_s2 + $0xb4] ss:$8 sps:$4 sm:$0xff]  }
 0x172   : > { %2641 = vmatprep.subr.bf16.mxu1 %v4261_v7  ;;  %v4273_v7 = vld [vmem:[%s6514_s2 + $0x2b4] ss:$8 sps:$4 sm:$0xff]  }
 0x174   : > { %2601 = vmatpush2.bf16.msra.mxu0 %v4262_v11  ;;  %v4274_v11 = vld [vmem:[%s6514_s2 + $0xb0] ss:$8 sps:$4 sm:$0xff]  }
 0x175   : > { %2642 = vmatpush2.bf16.msra.mxu1 %v4263_v15  ;;  %2602 = vmatprep.subr.bf16.mxu0 %v4264_v4  ;;  %v4275_v15 = vld [vmem:[%s6514_s2 + $0x2b0] ss:$8 sps:$4 sm:$0xff]   ;;  %v4276_v4 = vld [vmem:[%s6514_s2 + $0xa4] ss:$8 sps:$4 sm:$0xff]  }
 0x176   : > { %2643 = vmatprep.subr.bf16.mxu1 %v4265_v50  ;;  %v4277_v50 = vld [vmem:[%s6514_s2 + $0x2a4] ss:$8 sps:$4 sm:$0xff]  }
 0x178   : > { %2603 = vmatpush2.bf16.msra.mxu0 %v4266_v44  ;;  %v4278_v44 = vld [vmem:[%s6514_s2 + $0xa0] ss:$8 sps:$4 sm:$0xff]  }
 0x179   : > { %2644 = vmatpush2.bf16.msra.mxu1 %v4267_v58  ;;  %2604 = vmatprep.subr.bf16.mxu0 %v4268_v46  ;;  %v4279_v58 = vld [vmem:[%s6514_s2 + $0x2a0] ss:$8 sps:$4 sm:$0xff]   ;;  %v4280_v46 = vld [vmem:[%s6514_s2 + $0x94] ss:$8 sps:$4 sm:$0xff]  }
 0x17a   : > { %2645 = vmatprep.subr.bf16.mxu1 %v4269_v38  ;;  %v4281_v38 = vld [vmem:[%s6514_s2 + $0x294] ss:$8 sps:$4 sm:$0xff]  }
 0x17c   : > { %2605 = vmatpush2.bf16.msra.mxu0 %v4270_v62  ;;  %v4282_v62 = vld [vmem:[%s6514_s2 + $0x90] ss:$8 sps:$4 sm:$0xff]  }
 0x17d   : > { %2646 = vmatpush2.bf16.msra.mxu1 %v4271_v19  ;;  %2606 = vmatprep.subr.bf16.mxu0 %v4272_v49  ;;  %v4283_v19 = vld [vmem:[%s6514_s2 + $0x290] ss:$8 sps:$4 sm:$0xff]   ;;  %v4284_v49 = vld [vmem:[%s6514_s2 + $0x84] ss:$8 sps:$4 sm:$0xff]  }
 0x17e   : > { %2647 = vmatprep.subr.bf16.mxu1 %v4273_v7  ;;  %v4285_v7 = vld [vmem:[%s6514_s2 + $0x284] ss:$8 sps:$4 sm:$0xff]  }
 0x180   : > { %2607 = vmatpush2.bf16.msra.mxu0 %v4274_v11  ;;  %v4286_v11 = vld [vmem:[%s6514_s2 + $0x80] ss:$8 sps:$4 sm:$0xff]  }
 0x181   : > { %2648 = vmatpush2.bf16.msra.mxu1 %v4275_v15  ;;  %2608 = vmatprep.subr.bf16.mxu0 %v4276_v4  ;;  %v4287_v15 = vld [vmem:[%s6514_s2 + $0x280] ss:$8 sps:$4 sm:$0xff]   ;;  %v4288_v4 = vld [vmem:[%s6514_s2 + $0x374] ss:$8 sps:$4 sm:$0xff]  }
 0x182   : > { %2649 = vmatprep.subr.bf16.mxu1 %v4277_v50  ;;  %v4289_v50 = vld [vmem:[%s6514_s2 + $0x474] ss:$8 sps:$4 sm:$0xff]  }
 0x184   : > { %2609 = vmatpush2.bf16.msra.mxu0 %v4278_v44 }
 0x185   : > { %2650 = vmatpush2.bf16.msra.mxu1 %v4279_v58  ;;  %2610 = vmatprep.subr.bf16.mxu0 %v4280_v46 }
 0x186   : > { %2651 = vmatprep.subr.bf16.mxu1 %v4281_v38  ;;  %v4290_v38 = vld [vmem:[%s6514_s2 + $0x370] ss:$8 sps:$4 sm:$0xff]  }
 0x188   : > { %2611 = vmatpush2.bf16.msra.mxu0 %v4282_v62  ;;  %v4291_v62 = vld [vmem:[%s6514_s2 + $0x470] ss:$8 sps:$4 sm:$0xff]  }
 0x189   : > { %2652 = vmatpush2.bf16.msra.mxu1 %v4283_v19  ;;  %2612 = vmatprep.subr.bf16.mxu0 %v4284_v49 }
 0x18a   : > { %2653 = vmatprep.subr.bf16.mxu1 %v4285_v7 }
 0x18c   : > { %2613 = vmatpush2.bf16.msra.mxu0 %v4286_v11 }
 0x18d   : > { %2654 = vmatpush2.bf16.msra.mxu1 %v4287_v15  ;;  %2666 = vmatprep.subr.bf16.mxu0 %v4288_v4 }
 0x18e   : > { %2709 = vmatprep.subr.bf16.mxu1 %v4289_v50  ;;  %v4294_v50 = vld [vmem:[%s6514_s2 + $0x360] ss:$8 sps:$4 sm:$0xff]  }
 0x18f   : > { %v1523_v44 = vpop.f32.mrf.mxu0  ;;  %2615 = vmatmul.mubr.bf16.vlgmr.msra.gmra.mxu0 %v4899_v23  ;;  %v4292_v23 = vld [vmem:[%s6514_s2 + $0x364] ss:$8 sps:$4 sm:$0xff]  }
 0x190   : > { %v1769_v58 = vpop.f32.mrf.mxu1  ;;  %2656 = vmatmul.mubr.bf16.vlgmr.msra.gmra.mxu1 %v5167_v48  ;;  %v1530_v46 = vadd.f32 %v1523_v44, %v5888_v43  ;;  %2667 = vmatpush1.bf16.msra.mxu0 %v4290_v38  ;;  %v4293_v48 = vld [vmem:[%s6514_s2 + $0x464] ss:$8 sps:$4 sm:$0xff]   ;;  %v4295_v44 = vld [vmem:[%s6514_s2 + $0x460] ss:$8 sps:$4 sm:$0xff]   ;;  %v4299_v38 = vld [vmem:[%s6514_s2 + $0x450] ss:$8 sps:$4 sm:$0xff]  }
 0x191   : > { %2710 = vmatpush1.bf16.msra.mxu1 %v4291_v62  ;;  %v1525_v19 = vpop.f32.mrf.mxu0  ;;  %2668 = vmatprep.subr.bf16.mxu0 %v4292_v23  ;;  %v4300_v62 = vld [vmem:[%s6514_s2 + $0x344] ss:$8 sps:$4 sm:$0xff]   ;;  %v4303_v23 = vld [vmem:[%s6514_s2 + $0x440] ss:$8 sps:$4 sm:$0xff]  }
 0x192   : > { %v1771_v49 = vpop.f32.mrf.mxu1  ;;  %2711 = vmatprep.subr.bf16.mxu1 %v4293_v48  ;;  %v6090_v43 = vadd.f32 %v1769_v58, %v1530_v46  ;;  %v1531_v7 = vadd.f32 %v1525_v19, %v5893_v22  ;;  %2698 = vmatprep.mubr.bf16.mxu0 %v5194_v55  ;;  %v4296_v55 = vld [vmem:[%s6514_s2 + $0x354] ss:$8 sps:$4 sm:$0xff]   ;;  %v4298_v46 = vld [vmem:[%s6514_s2 + $0x350] ss:$8 sps:$4 sm:$0xff]   ;;  %v4301_v19 = vld [vmem:[%s6514_s2 + $0x444] ss:$8 sps:$4 sm:$0xff]  }
 0x193   : > { %2741 = vmatprep.mubr.bf16.mxu1 %v5196_v56  ;;  %v1527_v11 = vpop.f32.mrf.mxu0  ;;  %v4297_v56 = vld [vmem:[%s6514_s2 + $0x454] ss:$8 sps:$4 sm:$0xff]  }
 0x194   : > { %v1773_v15 = vpop.f32.mrf.mxu1  ;;  %v6095_v4 = vadd.f32 %v1771_v49, %v1531_v7  ;;  %2669 = vmatpush1.bf16.msra.mxu0 %v4294_v50  ;;  %v4302_v49 = vld [vmem:[%s6514_s2 + $0x340] ss:$8 sps:$4 sm:$0xff]   ;;  %v4304_v48 = vld [vmem:[%s6514_s2 + $0x334] ss:$8 sps:$4 sm:$0xff]   ;;  %v4306_v11 = vld [vmem:[%s6514_s2 + $0x330] ss:$8 sps:$4 sm:$0xff]  }
 0x195   : > { %2712 = vmatpush1.bf16.msra.mxu1 %v4295_v44  ;;  %v1528_v58 = vpop.f32.mrf.mxu0  ;;  %2670 = vmatprep.subr.bf16.mxu0 %v4296_v55  ;;  %v4305_v7 = vld [vmem:[%s6514_s2 + $0x434] ss:$8 sps:$4 sm:$0xff]   ;;  %v4307_v15 = vld [vmem:[%s6514_s2 + $0x430] ss:$8 sps:$4 sm:$0xff]   ;;  %v4308_v50 = vld [vmem:[%s6514_s2 + $0x324] ss:$8 sps:$4 sm:$0xff]  }
 0x196   : > { %v1774_v22 = vpop.f32.mrf.mxu1  ;;  %2713 = vmatprep.subr.bf16.mxu1 %v4297_v56  ;;  %v4309_v44 = vld [vmem:[%s6514_s2 + $0x424] ss:$8 sps:$4 sm:$0xff]   ;;  %v4310_v58 = vld [vmem:[%s6514_s2 + $0x320] ss:$8 sps:$4 sm:$0xff]   ;;  %v4312_v55 = vld [vmem:[%s6514_s2 + $0x314] ss:$8 sps:$4 sm:$0xff]  }
 0x197   : > { %v4311_v22 = vld [vmem:[%s6514_s2 + $0x420] ss:$8 sps:$4 sm:$0xff]   ;;  %v4313_v56 = vld [vmem:[%s6514_s2 + $0x414] ss:$8 sps:$4 sm:$0xff]  }
 0x198   : > { %2671 = vmatpush1.bf16.msra.mxu0 %v4298_v46  ;;  %v4314_v46 = vld [vmem:[%s6514_s2 + $0x310] ss:$8 sps:$4 sm:$0xff]  }
 0x199   : > { %2714 = vmatpush1.bf16.msra.mxu1 %v4299_v38  ;;  %2672 = vmatprep.subr.bf16.mxu0 %v4300_v62  ;;  %v4315_v38 = vld [vmem:[%s6514_s2 + $0x410] ss:$8 sps:$4 sm:$0xff]   ;;  %v4316_v62 = vld [vmem:[%s6514_s2 + $0x304] ss:$8 sps:$4 sm:$0xff]  }
 0x19a   : > { %2715 = vmatprep.subr.bf16.mxu1 %v4301_v19  ;;  %v4317_v19 = vld [vmem:[%s6514_s2 + $0x404] ss:$8 sps:$4 sm:$0xff]  }
 0x19c   : > { %2673 = vmatpush1.bf16.msra.mxu0 %v4302_v49  ;;  %v4318_v49 = vld [vmem:[%s6514_s2 + $0x300] ss:$8 sps:$4 sm:$0xff]  }
 0x19d   : > { %2716 = vmatpush1.bf16.msra.mxu1 %v4303_v23  ;;  %2674 = vmatprep.subr.bf16.mxu0 %v4304_v48  ;;  %v4319_v23 = vld [vmem:[%s6514_s2 + $0x400] ss:$8 sps:$4 sm:$0xff]   ;;  %v4320_v48 = vld [vmem:[%s6514_s2 + $0x3f4] ss:$8 sps:$4 sm:$0xff]  }
 0x19e   : > { %2717 = vmatprep.subr.bf16.mxu1 %v4305_v7  ;;  %v4321_v7 = vld [vmem:[%s6514_s2 + $0x4f4] ss:$8 sps:$4 sm:$0xff]  }
 0x1a0   : > { %2675 = vmatpush1.bf16.msra.mxu0 %v4306_v11  ;;  %v4322_v11 = vld [vmem:[%s6514_s2 + $0x3f0] ss:$8 sps:$4 sm:$0xff]  }
 0x1a1   : > { %2718 = vmatpush1.bf16.msra.mxu1 %v4307_v15  ;;  %2676 = vmatprep.subr.bf16.mxu0 %v4308_v50  ;;  %v4323_v15 = vld [vmem:[%s6514_s2 + $0x4f0] ss:$8 sps:$4 sm:$0xff]   ;;  %v4324_v50 = vld [vmem:[%s6514_s2 + $0x3e4] ss:$8 sps:$4 sm:$0xff]  }
 0x1a2   : > { %2719 = vmatprep.subr.bf16.mxu1 %v4309_v44  ;;  %v4325_v44 = vld [vmem:[%s6514_s2 + $0x4e4] ss:$8 sps:$4 sm:$0xff]  }
 0x1a4   : > { %2677 = vmatpush1.bf16.msra.mxu0 %v4310_v58  ;;  %v4326_v58 = vld [vmem:[%s6514_s2 + $0x3e0] ss:$8 sps:$4 sm:$0xff]  }
 0x1a5   : > { %2720 = vmatpush1.bf16.msra.mxu1 %v4311_v22  ;;  %2678 = vmatprep.subr.bf16.mxu0 %v4312_v55  ;;  %v4327_v22 = vld [vmem:[%s6514_s2 + $0x3d4] ss:$8 sps:$4 sm:$0xff]   ;;  %v4328_v55 = vld [vmem:[%s6514_s2 + $0x3d0] ss:$8 sps:$4 sm:$0xff]  }
 0x1a6   : > { %2721 = vmatprep.subr.bf16.mxu1 %v4313_v56  ;;  %v4329_v56 = vld [vmem:[%s6514_s2 + $0x3c4] ss:$8 sps:$4 sm:$0xff]  }
 0x1a8   : > { %2679 = vmatpush1.bf16.msra.mxu0 %v4314_v46 }
 0x1a9   : > { %2722 = vmatpush1.bf16.msra.mxu1 %v4315_v38  ;;  %2680 = vmatprep.subr.bf16.mxu0 %v4316_v62 }
 0x1aa   : > { %2723 = vmatprep.subr.bf16.mxu1 %v4317_v19 }
 0x1ac   : > { %2681 = vmatpush1.bf16.msra.mxu0 %v4318_v49  ;;  %v4341_v49 = vld [vmem:[%s6514_s2 + $0x564] ss:$8 sps:$4 sm:$0xff]  }
 0x1ad   : > { %2724 = vmatpush1.bf16.msra.mxu1 %v4319_v23  ;;  %2682 = vmatprep.subr.bf16.mxu0 %v4320_v48 }
 0x1ae   : > { %2725 = vmatprep.subr.bf16.mxu1 %v4321_v7 }
 0x1b0   : > { %2683 = vmatpush2.bf16.msra.mxu0 %v4322_v11  ;;  %v4346_v11 = vld [vmem:[%s6514_s2 + $0x540] ss:$8 sps:$4 sm:$0xff]  }
 0x1b1   : > { %2726 = vmatpush2.bf16.msra.mxu1 %v4323_v15  ;;  %2684 = vmatprep.subr.bf16.mxu0 %v4324_v50  ;;  %v4366_v15 = vld [vmem:[%s6514_s2 + $0x5a0] ss:$8 sps:$4 sm:$0xff]  }
 0x1b2   : > { %2727 = vmatprep.subr.bf16.mxu1 %v4325_v44  ;;  %v6381_v44 = vld [vmem:[%s5093_s23 + $0x8] sm:$0x66] }
 0x1b4   : > { %2685 = vmatpush2.bf16.msra.mxu0 %v4326_v58  ;;  %v6645_v58 = vld [vmem:[#allocation29_spill] sm:$0xff] }
 0x1b5   : > { %2728 = vmatpush2.bf16.msra.mxu1 %v5030_v6  ;;  %2686 = vmatprep.subr.bf16.mxu0 %v4327_v22  ;;  %v4330_v6 = vld [vmem:[%s6514_s2 + $0x3c0] ss:$8 sps:$4 sm:$0xff]  }
 0x1b6   : > { %2729 = vmatprep.subr.bf16.mxu1 %v5038_v8  ;;  %v4331_v8 = vld [vmem:[%s6514_s2 + $0x3b4] ss:$8 sps:$4 sm:$0xff]   ;;  %v6646_v22 = vld [vmem:[#allocation31_spill] sm:$0xff] }
 0x1b8   : > { %2687 = vmatpush2.bf16.msra.mxu0 %v4328_v55 }
 0x1b9   : > { %2730 = vmatpush2.bf16.msra.mxu1 %v5047_v10  ;;  %2688 = vmatprep.subr.bf16.mxu0 %v4329_v56  ;;  %v4332_v10 = vld [vmem:[%s6514_s2 + $0x3b0] ss:$8 sps:$4 sm:$0xff]  }
 0x1ba   : > { %2731 = vmatprep.subr.bf16.mxu1 %v5056_v12  ;;  %v4333_v12 = vld [vmem:[%s6514_s2 + $0x3a4] ss:$8 sps:$4 sm:$0xff]  }
 0x1bc   : > { %2689 = vmatpush2.bf16.msra.mxu0 %v4330_v6 }
 0x1bd   : > { %2732 = vmatpush2.bf16.msra.mxu1 %v5067_v14  ;;  %2690 = vmatprep.subr.bf16.mxu0 %v4331_v8  ;;  %v4334_v14 = vld [vmem:[%s6514_s2 + $0x3a0] ss:$8 sps:$4 sm:$0xff]  }
 0x1be   : > { %2733 = vmatprep.subr.bf16.mxu1 %v5076_v16  ;;  %v4335_v16 = vld [vmem:[%s6514_s2 + $0x394] ss:$8 sps:$4 sm:$0xff]   ;;  %v4370_v8 = vld [vmem:[%s6514_s2 + $0x580] ss:$8 sps:$4 sm:$0xff]  }
 0x1c0   : > { %2691 = vmatpush2.bf16.msra.mxu0 %v4332_v10  ;;  %v6647_v10 = vld [vmem:[#allocation33_spill] sm:$0xff] }
 0x1c1   : > { %2734 = vmatpush2.bf16.msra.mxu1 %v5084_v18  ;;  %2692 = vmatprep.subr.bf16.mxu0 %v4333_v12  ;;  %v4336_v18 = vld [vmem:[%s6514_s2 + $0x390] ss:$8 sps:$4 sm:$0xff]   ;;  %v4371_v12 = vld [vmem:[%s6514_s2 + $0x774] ss:$8 sps:$4 sm:$0xff]  }
 0x1c2   : > { %2735 = vmatprep.subr.bf16.mxu1 %v5099_v20  ;;  %v4337_v20 = vld [vmem:[%s6514_s2 + $0x384] ss:$8 sps:$4 sm:$0xff]  }
 0x1c4   : > { %2693 = vmatpush2.bf16.msra.mxu0 %v4334_v14  ;;  %v6648_v14 = vld [vmem:[#allocation35_spill] sm:$0xff] }
 0x1c5   : > { %2736 = vmatpush2.bf16.msra.mxu1 %v5113_v25  ;;  %2694 = vmatprep.subr.bf16.mxu0 %v4335_v16  ;;  %v6242_v25 = vld [vmem:[%s5093_s23 + $0x8] sm:$0x33] }
 0x1c6   : > { %2737 = vmatprep.subr.bf16.mxu1 %v5122_v27  ;;  %v4338_v27 = vld [vmem:[%s6514_s2 + $0x380] ss:$8 sps:$4 sm:$0xff]   ;;  %v3682_v46 = vcombine.high %v6242_v25, %v6242_v25  ;;  %v3681_v6 = vcombine.low %v6242_v25, %v6242_v25 }
 0x1c8   : > { %2695 = vmatpush2.bf16.msra.mxu0 %v4336_v18 }
 0x1c9   : > { %2738 = vmatpush2.bf16.msra.mxu1 %v5133_v32  ;;  %2696 = vmatprep.subr.bf16.mxu0 %v4337_v20  ;;  %v4339_v32 = vld [vmem:[%s6514_s2 + $0x574] ss:$8 sps:$4 sm:$0xff]  }
 0x1ca   : > { %2739 = vmatprep.subr.bf16.mxu1 %v5142_v34 }
 0x1cc   : > { %2697 = vmatpush2.bf16.msra.mxu0 %v4338_v27 }
 0x1cd   : > { %2740 = vmatpush2.bf16.msra.mxu1 %v5153_v41  ;;  %2752 = vmatprep.subr.bf16.mxu0 %v4339_v32  ;;  %v4340_v41 = vld [vmem:[%s6514_s2 + $0x570] ss:$8 sps:$4 sm:$0xff]  }
 0x1ce   : > { %2804 = vmatprep.subr.bf16.mxu1 %v5162_v29  ;;  %v4372_v32 = vld [vmem:[%s6514_s2 + $0x770] ss:$8 sps:$4 sm:$0xff]  }
 0x1cf   : > { %v2013_v34 = vpop.f32.mrf.mxu0  ;;  %2699 = vmatmul.mubr.bf16.vlgmr.msra.gmra.mxu0 %v5564_v47 }
 0x1d0   : > { %v2271_v38 = vpop.f32.mrf.mxu1  ;;  %2742 = vmatmul.mubr.bf16.vlgmr.msra.gmra.mxu1 %v5566_v60  ;;  %v2020_v62 = vadd.f32 %v2013_v34, %v6090_v43  ;;  %2753 = vmatpush1.bf16.msra.mxu0 %v4340_v41 }
 0x1d1   : > { %2805 = vmatpush1.bf16.msra.mxu1 %v5178_v51  ;;  %v2015_v19 = vpop.f32.mrf.mxu0  ;;  %2754 = vmatprep.subr.bf16.mxu0 %v4341_v49  ;;  %v4342_v51 = vld [vmem:[%s6514_s2 + $0x560] ss:$8 sps:$4 sm:$0xff]  }
 0x1d2   : > { %v2273_v29 = vpop.f32.mrf.mxu1  ;;  %2806 = vmatprep.subr.bf16.mxu1 %v5187_v53  ;;  %v6265_v47 = vadd.f32 %v2271_v38, %v2020_v62  ;;  %v2021_v60 = vadd.f32 %v2015_v19, %v6095_v4  ;;  %2784 = vmatprep.mubr.bf16.mxu0 %v5584_v2  ;;  %v4343_v4 = vld [vmem:[%s6514_s2 + $0x554] ss:$8 sps:$4 sm:$0xff]   ;;  %v4344_v2 = vld [vmem:[%s6514_s2 + $0x550] ss:$8 sps:$4 sm:$0xff]   ;;  %v4373_v62 = vld [vmem:[%s6514_s2 + $0x764] ss:$8 sps:$4 sm:$0xff]  }
 0x1d3   : > { %2836 = vmatprep.mubr.bf16.mxu1 %v3682_v46  ;;  %v2017_v43 = vpop.f32.mrf.mxu0  ;;  %v6649_v46 = vld [vmem:[#allocation36_spill] sm:$0xff]  ;;  %v6651_v49 = vld [vmem:[#allocation3_spill] sm:$0xff] }
 0x1d4   : > { %v2275_v23 = vpop.f32.mrf.mxu1  ;;  %v6269_v48 = vadd.f32 %v2273_v29, %v2021_v60  ;;  %2755 = vmatpush1.bf16.msra.mxu0 %v4342_v51  ;;  %v6654_v51 = vld [vmem:[#allocation39_spill] sm:$0xff] }
 0x1d5   : > { %2807 = vmatpush1.bf16.msra.mxu1 %v5204_v57  ;;  %v2018_v7 = vpop.f32.mrf.mxu0  ;;  %2756 = vmatprep.subr.bf16.mxu0 %v4343_v4  ;;  %v4345_v57 = vld [vmem:[%s6514_s2 + $0x544] ss:$8 sps:$4 sm:$0xff]   ;;  %v6658_v4 = vld [vmem:[#allocation41_spill] sm:$0xff] }
 0x1d6   : > { %v2276_v53 = vpop.f32.mrf.mxu1  ;;  %2808 = vmatprep.subr.bf16.mxu1 %v5215_v59  ;;  %v4347_v59 = vld [vmem:[%s6514_s2 + $0x534] ss:$8 sps:$4 sm:$0xff]   ;;  %v6653_v23 = vld [vmem:[#allocation4_spill] sm:$0xff] }
 0x1d7   : > { %v6655_v7 = vld [vmem:[#allocation5_spill] sm:$0xff]  ;;  %v6656_v53 = vld [vmem:[#allocation40_spill] sm:$0xff] }
 0x1d8   : > { %2757 = vmatpush1.bf16.msra.mxu0 %v4344_v2  ;;  %v6659_v2 = vld [vmem:[#allocation7_spill] sm:$0xff] }
 0x1d9   : > { %2809 = vmatpush1.bf16.msra.mxu1 %v5229_v61  ;;  %2758 = vmatprep.subr.bf16.mxu0 %v4345_v57  ;;  %v4348_v61 = vld [vmem:[%s6514_s2 + $0x530] ss:$8 sps:$4 sm:$0xff]  }
 0x1da   : > { %2810 = vmatprep.subr.bf16.mxu1 %v5241_v63  ;;  %v4349_v63 = vld [vmem:[%s6514_s2 + $0x524] ss:$8 sps:$4 sm:$0xff]   ;;  %v6660_v57 = vld [vmem:[#allocation42_spill] sm:$0xff] }
 0x1dc   : > { %2759 = vmatpush1.bf16.msra.mxu0 %v4346_v11  ;;  %v6661_v11 = vld [vmem:[#allocation8_spill] sm:$0xff] }
 0x1dd   : > { %2811 = vmatpush1.bf16.msra.mxu1 %v5253_v1  ;;  %2760 = vmatprep.subr.bf16.mxu0 %v4347_v59  ;;  %v4350_v1 = vld [vmem:[%s6514_s2 + $0x520] ss:$8 sps:$4 sm:$0xff]  }
 0x1de   : > { %2812 = vmatprep.subr.bf16.mxu1 %v5265_v3  ;;  %v4351_v3 = vld [vmem:[%s6514_s2 + $0x514] ss:$8 sps:$4 sm:$0xff]   ;;  %v6662_v59 = vld [vmem:[#allocation43_spill] sm:$0xff] }
 0x1e0   : > { %2761 = vmatpush1.bf16.msra.mxu0 %v4348_v61  ;;  %v6663_v61 = vld [vmem:[#allocation9_spill] sm:$0xff] }
 0x1e1   : > { %2813 = vmatpush1.bf16.msra.mxu1 %v5277_v5  ;;  %2762 = vmatprep.subr.bf16.mxu0 %v4349_v63  ;;  %v4352_v5 = vld [vmem:[%s6514_s2 + $0x510] ss:$8 sps:$4 sm:$0xff]   ;;  %v6664_v63 = vld [vmem:[#allocation44_spill] sm:$0xff] }
 0x1e2   : > { %2814 = vmatprep.subr.bf16.mxu1 %v5289_v9  ;;  %v4353_v9 = vld [vmem:[%s6514_s2 + $0x504] ss:$8 sps:$4 sm:$0xff]  }
 0x1e4   : > { %2763 = vmatpush1.bf16.msra.mxu0 %v4350_v1  ;;  %v6665_v1 = vld [vmem:[#allocation10_spill] sm:$0xff] }
 0x1e5   : > { %2815 = vmatpush1.bf16.msra.mxu1 %v5301_v13  ;;  %2764 = vmatprep.subr.bf16.mxu0 %v4351_v3  ;;  %v4354_v13 = vld [vmem:[%s6514_s2 + $0x500] ss:$8 sps:$4 sm:$0xff]   ;;  %v6666_v3 = vld [vmem:[#allocation45_spill] sm:$0xff] }
 0x1e6   : > { %2816 = vmatprep.subr.bf16.mxu1 %v5313_v17  ;;  %v4355_v17 = vld [vmem:[%s6514_s2 + $0x5f4] ss:$8 sps:$4 sm:$0xff]  }
 0x1e8   : > { %2765 = vmatpush1.bf16.msra.mxu0 %v4352_v5  ;;  %v6667_v5 = vld [vmem:[#allocation11_spill] sm:$0xff] }
 0x1e9   : > { %2817 = vmatpush1.bf16.msra.mxu1 %v5325_v21  ;;  %2766 = vmatprep.subr.bf16.mxu0 %v4353_v9  ;;  %v4356_v21 = vld [vmem:[%s6514_s2 + $0x5f0] ss:$8 sps:$4 sm:$0xff]  }
 0x1ea   : > { %2818 = vmatprep.subr.bf16.mxu1 %v5337_v26  ;;  %v4357_v26 = vld [vmem:[%s6514_s2 + $0x5e4] ss:$8 sps:$4 sm:$0xff]   ;;  %v6668_v9 = vld [vmem:[#allocation46_spill] sm:$0xff] }
 0x1ec   : > { %2767 = vmatpush1.bf16.msra.mxu0 %v4354_v13  ;;  %v6669_v13 = vld [vmem:[#allocation12_spill] sm:$0xff] }
 0x1ed   : > { %2819 = vmatpush1.bf16.msra.mxu1 %v5349_v30  ;;  %2768 = vmatprep.subr.bf16.mxu0 %v4355_v17  ;;  %v4358_v30 = vld [vmem:[%s6514_s2 + $0x5e0] ss:$8 sps:$4 sm:$0xff]  }
 0x1ee   : > { %2820 = vmatprep.subr.bf16.mxu1 %v5361_v33  ;;  %v4359_v33 = vld [vmem:[%s6514_s2 + $0x5d4] ss:$8 sps:$4 sm:$0xff]   ;;  %v6670_v17 = vld [vmem:[#allocation47_spill] sm:$0xff] }
 0x1f0   : > { %2769 = vmatpush2.bf16.msra.mxu0 %v4356_v21  ;;  %v6671_v21 = vld [vmem:[#allocation13_spill] sm:$0xff] }
 0x1f1   : > { %2821 = vmatpush2.bf16.msra.mxu1 %v5373_v36  ;;  %2770 = vmatprep.subr.bf16.mxu0 %v4357_v26  ;;  %v4360_v36 = vld [vmem:[%s6514_s2 + $0x5d0] ss:$8 sps:$4 sm:$0xff]   ;;  %v6672_v26 = vld [vmem:[#allocation48_spill] sm:$0xff] }
 0x1f2   : > { %2822 = vmatprep.subr.bf16.mxu1 %v5385_v39  ;;  %v4361_v39 = vld [vmem:[%s6514_s2 + $0x5c4] ss:$8 sps:$4 sm:$0xff]  }
 0x1f4   : > { %2771 = vmatpush2.bf16.msra.mxu0 %v4358_v30  ;;  %v6673_v30 = vld [vmem:[#allocation14_spill] sm:$0xff] }
 0x1f5   : > { %2823 = vmatpush2.bf16.msra.mxu1 %v5397_v42  ;;  %2772 = vmatprep.subr.bf16.mxu0 %v4359_v33  ;;  %v4362_v42 = vld [vmem:[%s6514_s2 + $0x5c0] ss:$8 sps:$4 sm:$0xff]   ;;  %v6674_v33 = vld [vmem:[#allocation49_spill] sm:$0xff] }
 0x1f6   : > { %2824 = vmatprep.subr.bf16.mxu1 %v5409_v45  ;;  %v4363_v45 = vld [vmem:[%s6514_s2 + $0x5b4] ss:$8 sps:$4 sm:$0xff]  }
 0x1f8   : > { %2773 = vmatpush2.bf16.msra.mxu0 %v4360_v36  ;;  %v6675_v36 = vld [vmem:[#allocation15_spill] sm:$0xff] }
 0x1f9   : > { %2825 = vmatpush2.bf16.msra.mxu1 %v5421_v52  ;;  %2774 = vmatprep.subr.bf16.mxu0 %v4361_v39  ;;  %v6360_v52 = vld [vmem:[%s5093_s23 + $0x8] sm:$0x77]  ;;  %v6676_v39 = vld [vmem:[#allocation50_spill] sm:$0xff] }
 0x1fa   : > { %2826 = vmatprep.subr.bf16.mxu1 %v5433_v40  ;;  %v4364_v40 = vld [vmem:[%s6514_s2 + $0x5b0] ss:$8 sps:$4 sm:$0xff]  }
 0x1fc   : > { %2775 = vmatpush2.bf16.msra.mxu0 %v4362_v42  ;;  %v6677_v42 = vld [vmem:[#allocation16_spill] sm:$0xff] }
 0x1fd   : > { %2827 = vmatpush2.bf16.msra.mxu1 %v5445_v37  ;;  %2776 = vmatprep.subr.bf16.mxu0 %v4363_v45  ;;  %v4365_v37 = vld [vmem:[%s6514_s2 + $0x5a4] ss:$8 sps:$4 sm:$0xff]  }
 0x1fe   : > { %2828 = vmatprep.subr.bf16.mxu1 %v5457_v35  ;;  %v3685_v35 = vcombine.high %v6360_v52, %v6360_v52  ;;  %v6678_v45 = vld [vmem:[#allocation51_spill] sm:$0xff] }
 0x200   : > { %2777 = vmatpush2.bf16.msra.mxu0 %v4364_v40  ;;  %v2863_v50 = vshll.u32 %v3685_v35, 16  ;;  %v2861_v55 = vshrl.u32 %v3685_v35, 16  ;;  %v6679_v40 = vld [vmem:[#allocation17_spill] sm:$0xff]  ;;  %v6681_v35 = vld [vmem:[#allocation18_spill] sm:$0xff] }
 0x201   : > { %2829 = vmatpush2.bf16.msra.mxu1 %v5469_v31  ;;  %2778 = vmatprep.subr.bf16.mxu0 %v4365_v37  ;;  %v4367_v31 = vld [vmem:[%s6514_s2 + $0x594] ss:$8 sps:$4 sm:$0xff]   ;;  %v6680_v37 = vld [vmem:[#allocation52_spill] sm:$0xff] }
 0x202   : > { %2830 = vmatprep.subr.bf16.mxu1 %v5481_v28  ;;  %v4368_v28 = vld [vmem:[%s6514_s2 + $0x590] ss:$8 sps:$4 sm:$0xff]   ;;  %v2865_v56 = vrot.slane %v2863_v50, 1 }
 0x203   : > { %v6684_v50 = vld [vmem:[#allocation54_spill] sm:$0xff] }
 0x204   : > { %2779 = vmatpush2.bf16.msra.mxu0 %v4366_v15  ;;  %v2866_v16 = vor.u32 %v2865_v56, %v2861_v55  ;;  %v6682_v15 = vld [vmem:[#allocation53_spill] sm:$0xff]  ;;  %v6689_v55 = vld [vmem:[#allocation22_spill] sm:$0xff] }
 0x205   : > { %2831 = vmatpush2.bf16.msra.mxu1 %v5495_v54  ;;  %2780 = vmatprep.subr.bf16.mxu0 %v4367_v31  ;;  %v4369_v54 = vld [vmem:[%s6514_s2 + $0x584] ss:$8 sps:$4 sm:$0xff]   ;;  %v6690_v56 = vld [vmem:[#allocation57_spill] sm:$0xff] }
 0x206   : > { %2832 = vmatprep.subr.bf16.mxu1 %v5507_v24  ;;  %v3688_v24 = vcombine.high %v6381_v44, %v6381_v44  ;;  %v6683_v31 = vld [vmem:[#allocation19_spill] sm:$0xff] }
 0x208   : > { %2781 = vmatpush2.bf16.msra.mxu0 %v4368_v28  ;;  %v2919_v18 = vrot.slane %v3688_v24, 1  ;;  %v6685_v28 = vld [vmem:[#allocation20_spill] sm:$0xff]  ;;  %v6691_v24 = vld [vmem:[#allocation23_spill] sm:$0xff] }
 0x209   : > { %2833 = vmatpush2.bf16.msra.mxu1 %v6645_v58  ;;  %2782 = vmatprep.subr.bf16.mxu0 %v4369_v54  ;;  %v6686_v58 = vld [vmem:[#allocation55_spill] sm:$0xff]  ;;  %v6687_v54 = vld [vmem:[#allocation21_spill] sm:$0xff] }
 0x20a   : > { %2834 = vmatprep.subr.bf16.mxu1 %v6646_v22  ;;  %v6688_v22 = vld [vmem:[#allocation56_spill] sm:$0xff] }
 0x20c   : > { %2783 = vmatpush2.bf16.msra.mxu0 %v4370_v8  ;;  %v6693_v8 = vld [vmem:[#allocation24_spill] sm:$0xff] }
 0x20d   : > { %2835 = vmatpush2.bf16.msra.mxu1 %v6647_v10  ;;  %2869 = vmatprep.subr.bf16.mxu0 %v4371_v12  ;;  %v6694_v10 = vld [vmem:[#allocation59_spill] sm:$0xff]  ;;  %v3684_v12 = vcombine.low %v6360_v52, %v6360_v52  ;;  %v3687_v52 = vcombine.low %v6381_v44, %v6381_v44 }
 0x20e   : > { %2922 = vmatprep.subr.bf16.mxu1 %v6648_v14  ;;  %v6695_v14 = vld [vmem:[#allocation25_spill] sm:$0xff] }
 0x20f   : > { %v2517_v20 = vpop.f32.mrf.mxu0  ;;  %2785 = vmatmul.mubr.bf16.vlgmr.msra.gmra.mxu0 %v5861_v0  ;;  %v6650_v0 = vld [vmem:[#allocation37_spill] sm:$0xff] }
 0x210   : > { %v6403_v27 = vpop.f32.mrf.mxu1  ;;  %2837 = vmatmul.mubr.bf16.vlgmr.msra.gmra.mxu1 %v3681_v6  ;;  %v6407_v25 = vadd.f32 %v2517_v20, %v6265_v47  ;;  %2870 = vmatpush1.bf16.msra.mxu0 %v4372_v32  ;;  %v6652_v47 = vld [vmem:[#allocation38_spill] sm:$0xff]  ;;  %v6698_v20 = vld [vmem:[#allocation61_spill] sm:$0xff]  ;;  %v2856_v32 = vshll.u32 %v3684_v12, 16 }
 0x211   : > { %2923 = vmatpush1.bf16.msra.mxu1 %v6649_v46  ;;  %v2519_v34 = vpop.f32.mrf.mxu0  ;;  %2871 = vmatprep.subr.bf16.mxu0 %v4373_v62  ;;  %v6692_v6 = vld [vmem:[#allocation58_spill] sm:$0xff]  ;;  %v6699_v46 = vld [vmem:[#allocation27_spill] sm:$0xff]  ;;  %v6701_v62 = vld [vmem:[#allocation28_spill] sm:$0xff] }
 0x212   : > { %v6413_v38 = vpop.f32.mrf.mxu1  ;;  %2924 = vmatprep.subr.bf16.mxu1 %v6650_v0  ;;  %v6420_v41 = vadd.f32 %v2519_v34, %v6269_v48  ;;  %2901 = vmatprep.mubr.bf16.mxu0 %v2866_v16  ;;  %v6657_v48 = vld [vmem:[#allocation6_spill] sm:$0xff]  ;;  %v6696_v16 = vld [vmem:[#allocation60_spill] sm:$0xff]  ;;  %v6702_v0 = vld [vmem:[#allocation63_spill] sm:$0xff] }
 0x213   : > { %2954 = vmatprep.mubr.bf16.mxu1 %v2919_v18  ;;  %v2521_v19 = vpop.f32.mrf.mxu0  ;;  %v6697_v18 = vld [vmem:[#allocation26_spill] sm:$0xff] }
 0x214   : > { %v2579_v29 = vpop.f32.mrf.mxu1  ;;  %2872 = vmatpush1.bf16.msra.mxu0 %v6651_v49  ;;  %v6700_v34 = vld [vmem:[#allocation62_spill] sm:$0xff]  ;;  %v2854_v19 = vshrl.u32 %v3684_v12, 16 }
 0x215   : > { %2925 = vmatpush1.bf16.msra.mxu1 %v6652_v47  ;;  %v2522_v60 = vpop.f32.mrf.mxu0  ;;  %2873 = vmatprep.subr.bf16.mxu0 %v6653_v23  ;;  %v2858_v29 = vrot.slane %v2856_v32, 1  ;;  %v6703_v49 = vld [vmem:[#allocation30_spill] sm:$0xff]  ;;  %v6704_v47 = vld [vmem:[#allocation64_spill] sm:$0xff]  ;;  %v2918_v23 = vrot.slane %v3687_v52, 1 }
 0x216   : > { %v2580_v43 = vpop.f32.mrf.mxu1  ;;  %2926 = vmatprep.subr.bf16.mxu1 %v6654_v51  ;;  %v6705_v60 = vld [vmem:[#allocation32_spill] sm:$0xff] }
 0x217   : > { %v6706_v43 = vld [vmem:[#allocation65_spill] sm:$0xff]  ;;  %v2859_v51 = vor.u32 %v2858_v29, %v2854_v19 }
 0x218   : > { %2874 = vmatpush1.bf16.msra.mxu0 %v6655_v7  ;;  %v6707_v7 = vld [vmem:[#allocation34_spill] sm:$0xff] }
 0x219   : > { %2927 = vmatpush1.bf16.msra.mxu1 %v6656_v53  ;;  %2875 = vmatprep.subr.bf16.mxu0 %v6657_v48  ;;  %v6708_v53 = vld [vmem:[#allocation66_spill] sm:$0xff] }
 0x21a   : > { %2928 = vmatprep.subr.bf16.mxu1 %v6658_v4 }
 0x21c   : > { %2876 = vmatpush1.bf16.msra.mxu0 %v6659_v2 }
 0x21d   : > { %2929 = vmatpush1.bf16.msra.mxu1 %v6660_v57  ;;  %2877 = vmatprep.subr.bf16.mxu0 %v6661_v11 }
 0x21e   : > { %2930 = vmatprep.subr.bf16.mxu1 %v6662_v59 }
 0x220   : > { %2878 = vmatpush1.bf16.msra.mxu0 %v6663_v61 }
 0x221   : > { %2931 = vmatpush1.bf16.msra.mxu1 %v6664_v63  ;;  %2879 = vmatprep.subr.bf16.mxu0 %v6665_v1 }
 0x222   : > { %2932 = vmatprep.subr.bf16.mxu1 %v6666_v3 }
 0x224   : > { %2880 = vmatpush1.bf16.msra.mxu0 %v6667_v5 }
 0x225   : > { %2933 = vmatpush1.bf16.msra.mxu1 %v6668_v9  ;;  %2881 = vmatprep.subr.bf16.mxu0 %v6669_v13 }
 0x226   : > { %2934 = vmatprep.subr.bf16.mxu1 %v6670_v17 }
 0x228   : > { %2882 = vmatpush1.bf16.msra.mxu0 %v6671_v21 }
 0x229   : > { %2935 = vmatpush1.bf16.msra.mxu1 %v6672_v26  ;;  %2883 = vmatprep.subr.bf16.mxu0 %v6673_v30 }
 0x22a   : > { %2936 = vmatprep.subr.bf16.mxu1 %v6674_v33 }
 0x22c   : > { %2884 = vmatpush1.bf16.msra.mxu0 %v6675_v36 }
 0x22d   : > { %2937 = vmatpush1.bf16.msra.mxu1 %v6676_v39  ;;  %2885 = vmatprep.subr.bf16.mxu0 %v6677_v42 }
 0x22e   : > { %2938 = vmatprep.subr.bf16.mxu1 %v6678_v45 }
 0x230   : > { %2886 = vmatpush2.bf16.msra.mxu0 %v6679_v40 }
 0x231   : > { %2939 = vmatpush2.bf16.msra.mxu1 %v6680_v37  ;;  %2887 = vmatprep.subr.bf16.mxu0 %v6681_v35 }
 0x232   : > { %2940 = vmatprep.subr.bf16.mxu1 %v6682_v15 }
 0x234   : > { %2888 = vmatpush2.bf16.msra.mxu0 %v6683_v31 }
 0x235   : > { %2941 = vmatpush2.bf16.msra.mxu1 %v6684_v50  ;;  %2889 = vmatprep.subr.bf16.mxu0 %v6685_v28 }
 0x236   : > { %2942 = vmatprep.subr.bf16.mxu1 %v6686_v58 }
 0x238   : > { %2890 = vmatpush2.bf16.msra.mxu0 %v6687_v54 }
 0x239   : > { %2943 = vmatpush2.bf16.msra.mxu1 %v6688_v22  ;;  %2891 = vmatprep.subr.bf16.mxu0 %v6689_v55  ;;  %v2527_v22 = vlaneseq }
 0x23a   : > { %2944 = vmatprep.subr.bf16.mxu1 %v6690_v56 }
 0x23b   : > { %v2528_v55 = vshrl.u32 %v2527_v22, 7 }
 0x23c   : > { %2892 = vmatpush2.bf16.msra.mxu0 %v6691_v24  ;;  %v285_v24 = vld [vmem:[%s6515_s3] sm:$0x3] }
 0x23d   : > { %2945 = vmatpush2.bf16.msra.mxu1 %v6692_v6  ;;  %2893 = vmatprep.subr.bf16.mxu0 %v6693_v8  ;;  %v2529_v56 = vsub.s32 0, %v2528_v55  ;;  %v2533_v6 = vsub.s32 1, %v2528_v55 }
 0x23e   : > { %2946 = vmatprep.subr.bf16.mxu1 %v6694_v10 }
 0x23f   : > { %v2530_v10 = vrot.slane %v285_v24, %v2529_v56 }
 0x240   : > { %2894 = vmatpush2.bf16.msra.mxu0 %v6695_v14 }
 0x241   : > { %2947 = vmatpush2.bf16.msra.mxu1 %v6696_v16  ;;  %2895 = vmatprep.subr.bf16.mxu0 %v6697_v18  ;;  %v2534_v16 = vrot.slane %v285_v24, %v2533_v6 }
 0x242   : > { %2948 = vmatprep.subr.bf16.mxu1 %v6698_v20 }
 0x243   : > { %v2538_v29 = vadd.f32 %v2534_v16, %v6420_v41 }
 0x244   : > { %2896 = vmatpush2.bf16.msra.mxu0 %v6699_v46 }
 0x245   : > { %2949 = vmatpush2.bf16.msra.mxu1 %v6700_v34  ;;  %2897 = vmatprep.subr.bf16.mxu0 %v6701_v62  ;;  %v2537_v34 = vadd.f32 %v2530_v10, %v6407_v25 }
 0x246   : > { %2950 = vmatprep.subr.bf16.mxu1 %v6702_v0 }
 0x248   : > { %2898 = vmatpush2.bf16.msra.mxu0 %v6703_v49 }
 0x249   : > { %2951 = vmatpush2.bf16.msra.mxu1 %v6704_v47  ;;  %2899 = vmatprep.subr.bf16.mxu0 %v6705_v60 }
 0x24a   : > { %2952 = vmatprep.subr.bf16.mxu1 %v6706_v43 }
 0x24c   : > { %2900 = vmatpush2.bf16.msra.mxu0 %v6707_v7 }
 0x24d   : > { %2953 = vmatpush2.bf16.msra.mxu1 %v6708_v53  ;;  %v2540_v53 = vmax.f32 %v2538_v29, 0.0 }
 0x24f   : > { %v2616_v48 = vpop.f32.mrf.mxu0  ;;  %2902 = vmatmul.mubr.bf16.vlgmr.msra.gmra.mxu0 %v2859_v51 }
 0x250   : > { %v2657_v4 = vpop.f32.mrf.mxu1  ;;  %2955 = vmatmul.mubr.bf16.vlgmr.msra.gmra.mxu1 %v2918_v23  ;;  %v2617_v44 = vadd.f32 %v2616_v48, %v6403_v27  ;;  %v2539_v23 = vmax.f32 %v2537_v34, 0.0 }
 0x251   : > { %v2618_v2 = vpop.f32.mrf.mxu0 }
 0x252   : > { %v2659_v57 = vpop.f32.mrf.mxu1  ;;  %v2664_v11 = vadd.f32 %v2657_v4, %v2617_v44  ;;  %v2619_v59 = vadd.f32 %v2618_v2, %v6413_v38 }
 0x253   : > { %v2620_v61 = vpop.f32.mrf.mxu0 }
 0x254   : > { %v2661_v63 = vpop.f32.mrf.mxu1  ;;  %v2665_v1 = vadd.f32 %v2659_v57, %v2619_v59 }
 0x255   : > { %v2621_v3 = vpop.f32.mrf.mxu0 }
 0x256   : > { %v2662_v5 = vpop.f32.mrf.mxu1 }
 0x28f   : > { %v2700_v9 = vpop.f32.mrf.mxu0 }
 0x290   : > { %v2743_v13 = vpop.f32.mrf.mxu1  ;;  %v2707_v17 = vadd.f32 %v2700_v9, %v2664_v11 }
 0x291   : > { %v2702_v21 = vpop.f32.mrf.mxu0 }
 0x292   : > { %v2745_v26 = vpop.f32.mrf.mxu1  ;;  %v2750_v30 = vadd.f32 %v2743_v13, %v2707_v17  ;;  %v2708_v33 = vadd.f32 %v2702_v21, %v2665_v1 }
 0x293   : > { %v2704_v36 = vpop.f32.mrf.mxu0 }
 0x294   : > { %v2747_v39 = vpop.f32.mrf.mxu1  ;;  %v2751_v27 = vadd.f32 %v2745_v26, %v2708_v33 }
 0x295   : > { %v2705_v42 = vpop.f32.mrf.mxu0 }
 0x296   : > { %v2748_v45 = vpop.f32.mrf.mxu1 }
 0x2cf   : > { %v2786_v40 = vpop.f32.mrf.mxu0 }
 0x2d0   : > { %v2838_v38 = vpop.f32.mrf.mxu1  ;;  %v2793_v37 = vadd.f32 %v2786_v40, %v2750_v30 }
 0x2d1   : > { %v2788_v35 = vpop.f32.mrf.mxu0 }
 0x2d2   : > { %v2840_v15 = vpop.f32.mrf.mxu1  ;;  %v2845_v31 = vadd.f32 %v2838_v38, %v2793_v37  ;;  %v2794_v8 = vadd.f32 %v2788_v35, %v2751_v27 }
 0x2d3   : > { %v2790_v50 = vpop.f32.mrf.mxu0 }
 0x2d4   : > { %v2842_v28 = vpop.f32.mrf.mxu1  ;;  %v2846_v18 = vadd.f32 %v2840_v15, %v2794_v8 }
 0x2d5   : > { %v2791_v58 = vpop.f32.mrf.mxu0 }
 0x2d6   : > { %v2843_v54 = vpop.f32.mrf.mxu1 }
 0x30f   : > { %v2903_v12 = vpop.f32.mrf.mxu0 }
 0x310   : > { %v2956_v14 = vpop.f32.mrf.mxu1  ;;  %v2910_v20 = vadd.f32 %v2903_v12, %v2845_v31 }
 0x311   : > { %v2905_v32 = vpop.f32.mrf.mxu0 }
 0x312   : > { %v2958_v46 = vpop.f32.mrf.mxu1  ;;  %v2963_v62 = vadd.f32 %v2956_v14, %v2910_v20  ;;  %v2911_v0 = vadd.f32 %v2905_v32, %v2846_v18 }
 0x313   : > { %v2907_v52 = vpop.f32.mrf.mxu0 }
 0x314   : > { %v2960_v19 = vpop.f32.mrf.mxu1  ;;  %v2965_v49 = vadd.f32 %v2963_v62, %v2530_v10  ;;  %v2964_v47 = vadd.f32 %v2958_v46, %v2911_v0 }
 0x315   : > { %v2908_v60 = vpop.f32.mrf.mxu0 }
 0x316   : > { %v2961_v43 = vpop.f32.mrf.mxu1  ;;  %v2967_v51 = vmax.f32 %v2965_v49, 0.0  ;;  %v2966_v7 = vadd.f32 %v2964_v47, %v2534_v16 }
 0x318   : > { %v2969_v48 = vmax.f32 %v2539_v23, %v2967_v51  ;;  %v2968_v25 = vmax.f32 %v2966_v7, 0.0 }
 0x31a   : > { %v2970_v4 = vmax.f32 %v2540_v53, %v2968_v25 }
 0x31c   : > { %v3689_v44 = vpack.c.bf16 %v2970_v4, %v2969_v48 }
 0x31e   : > { %3690 = vst.sshfl [vmem:[%s284_s16] sm:$0x33 pattern:$0x76325410] %v3689_v44 }
 0x31f PF: > { %s14_s19 = sadd.s32 1, %s4412_s19   ;;  %s6709_s15 = smov %s4404_s17 }
 0x320   : > { %p11_p9 = scmp.ge.s32.totalorder %s14_s19, 6   ;;  %s6710_s16 = smov %s4408_s18 }
 0x321   : > { %s6711_s17 = smov %s6714_s20  ;;  %s6712_s18 = smov %s6718_s21 }
 0x322   :  { %13 = sbr.rel (!%p11_p9) target bundleno = 3 (0x3), region = 79 }

// kernel: crnn_forward.12
= control target key start
LH: loop header
LB: loop body
LE: loop exit
PB: predicated region body
PF: predicated region fallthrough
CT: control target
= control target key end

     0   :  { %s1672_s9 = smov 0   ;;  %s1674_s10 = smov 0   ;;  %s1886_s0 = inlined_call_operand.vmem [shape: f32[2,4,2,1024], index: 0, kind: input, shape index: {}]   ;;  %s1887_s1 = inlined_call_operand.vmem [shape: bf16[2,256,1024], index: 1, kind: input, shape index: {}]   ;;  %s1888_s2 = inlined_call_operand.vmem [shape: f32[2,4,2,256], index: 2, kind: output, shape index: {}]  }
   0x1   :  { %s1676_s11 = smov 0   ;;  %s1678_s12 = smov 0  }
   0x2   :  { %s1680_s13 = smov 0  }
   0x3 LB: > { %s21_s14 = sadd.s32 1, %s1645_s11  ;;  %s24_s15 = sadd.s32 1, %s1649_s12  ;;  %s1653_s13 = sphi %s1680_s13, %s12_s13   ;;  %s1649_s12 = sphi %s1678_s12, %s1892_s12   ;;  %s1645_s11 = sphi %s1676_s11, %s1891_s11   ;;  %s1641_s10 = sphi %s1674_s10, %s1890_s10   ;;  %s1637_s9 = sphi %s1672_s9, %s1889_s9  }
   0x4   : > { %p22_p0 = scmp.ge.s32.totalorder %s21_s14, 4  ;;  %p1410_p1 = scmp.ge.s32.totalorder %s1653_s13, 1 }
   0x5   : > { %p166_p2 = scmp.lt.s32.totalorder %s1653_s13, 9 }
   0x6   : > { %s1894_s14 = smov (%p22_p0, %s21_s14), 0  ;;  %s1896_s15 = smov (!%p22_p0, %s24_s15), %s1649_s12 }
   0x7   : > { %p167_p3 = pnand %p1410_p1, %p166_p2  ;;  %p26_p4 = scmp.ge.s32.totalorder %s1896_s15, 2 }
   0x8   : > { %s1411_s16 = sshll.u32 (!%p167_p3), %s1637_s9, 1  ;;  %p213_p5 = scmp.lt.s32.totalorder (!%p167_p3), %s1641_s10, 1 }
   0x9   : > { %s1898_s15 = smov (%p26_p4, %s1896_s15), 0  ;;  %170 = sbr.rel (%p167_p3) target bundleno = 400 (0x190), region = 28 }
   0xa   : > { %s210_s17 = ssub.s32 (!%p167_p3), 3, %s1411_s16  ;;  %p1421_p7 = scmp.ne.s32.totalorder (!%p167_p3), %s1637_s9, 0 }
   0xb   : > { %s211_s18 = smul.u32 (!%p167_p3), %s1641_s10, %s210_s17 }
   0xd   : > { %s212_s19 = sadd.s32 (!%p167_p3), %s1637_s9, %s211_s18 }
   0xe   : > { %s1900_s10 = smov (!%p213_p5, %s1641_s10), 1  ;;  %p215_p6 = scmp.lt.s32.totalorder %s212_s19, 3 }
   0xf   : > { %s1413_s20 = sshll.u32 %s1900_s10, 5  ;;  %s1556_s21 = sshll.u32 %s1900_s10, 10 }
  0x10   : > { %s1419_s22 = sshll.u32 %s1900_s10, 3  ;;  %s1902_s19 = smov (!%p215_p6, %s212_s19), 3 }
  0x11   : > { %s1709_s25 = scalar_lea.vmem %s1887_s1, %s1556_s21  ;;  %s1412_s26 = sshll.u32 %s1902_s19, 3 }
  0x12   : > { %s1418_s27 = sshll.u32 %s1902_s19, 1  ;;  %s219_s28 = sadd.s32 %s1413_s20, %s1412_s26 }
  0x13   : > { %s241_s29 = sadd.s32 %s1419_s22, %s1418_s27  ;;  %s1414_s30 = sshll.u32 %s219_s28, 1 }
  0x14   : > { %s1420_s3 = sshll.u32 %s241_s29, 1  ;;  %s1714_s6 = scalar_lea.vmem %s1886_s0, %s1414_s30 }
  0x15   : > { %s1719_s10 = scalar_lea.vmem %s1888_s2, %s1420_s3  ;;  %251 = sbr.rel (%p1421_p7) target bundleno = 28 (0x1c), region = 32 }
  0x1a   : > { %v1655_v0 = vmov 0.0  }
  0x1b   : > { %252 = vst [vmem:[#allocation2] sm:$0xf] %v1655_v0  ;;  %253 = vst [vmem:[#allocation3] sm:$0xf] %v1655_v0 }
  0x1c PF: > { %v326_v1 = vld [vmem:[%s1709_s25 + $0x1c0] sm:$0xff]  ;;  %v327_v3 = vld [vmem:[%s1709_s25 + $0x1c8] sm:$0xff] }
  0x1d   : > { %v330_v2 = vld [vmem:[%s1709_s25 + $0x1e0] sm:$0xff]  ;;  %v331_v5 = vld [vmem:[%s1709_s25 + $0x1e8] sm:$0xff] }
  0x1e   : > { %v1480_v4 = vcombine.high %v326_v1, %v330_v2  ;;  %v1479_v6 = vcombine.low %v326_v1, %v330_v2  ;;  %v318_v7 = vld [vmem:[%s1709_s25 + $0x180] sm:$0xff]  ;;  %v1482_v9 = vcombine.high %v327_v3, %v331_v5  ;;  %v1481_v10 = vcombine.low %v327_v3, %v331_v5  ;;  %v319_v12 = vld [vmem:[%s1709_s25 + $0x188] sm:$0xff] }
  0x1f   : > { %v322_v8 = vld [vmem:[%s1709_s25 + $0x1a0] sm:$0xff]  ;;  %v323_v13 = vld [vmem:[%s1709_s25 + $0x1a8] sm:$0xff] }
  0x20   : > { %v1472_v11 = vcombine.high %v318_v7, %v322_v8  ;;  %v310_v14 = vld [vmem:[%s1709_s25 + $0x140] sm:$0xff]  ;;  %1038 = vmatprep.subr.bf16.mxu0 %v1480_v4  ;;  %v1474_v15 = vcombine.high %v319_v12, %v323_v13  ;;  %v311_v17 = vld [vmem:[%s1709_s25 + $0x148] sm:$0xff]  ;;  %1079 = vmatprep.subr.bf16.mxu1 %v1482_v9  ;;  %v1471_v19 = vcombine.low %v318_v7, %v322_v8 }
  0x21   : > { %v314_v16 = vld [vmem:[%s1709_s25 + $0x160] sm:$0xff]  ;;  %v315_v18 = vld [vmem:[%s1709_s25 + $0x168] sm:$0xff]  ;;  %1039 = vmatpush1.bf16.msra.mxu0 %v1479_v6  ;;  %1080 = vmatpush1.bf16.msra.mxu1 %v1481_v10  ;;  %v1473_v20 = vcombine.low %v319_v12, %v323_v13 }
  0x22   : > { %1040 = vmatprep.subr.bf16.mxu0 %v1472_v11  ;;  %v1464_v21 = vcombine.high %v310_v14, %v314_v16  ;;  %1081 = vmatprep.subr.bf16.mxu1 %v1474_v15  ;;  %v1466_v22 = vcombine.high %v311_v17, %v315_v18  ;;  %v302_v23 = vld [vmem:[%s1709_s25 + $0x100] sm:$0xff]  ;;  %v303_v25 = vld [vmem:[%s1709_s25 + $0x108] sm:$0xff]  ;;  %v1463_v27 = vcombine.low %v310_v14, %v314_v16 }
  0x23   : > { %v306_v24 = vld [vmem:[%s1709_s25 + $0x120] sm:$0xff]  ;;  %v307_v26 = vld [vmem:[%s1709_s25 + $0x128] sm:$0xff]  ;;  %v1465_v28 = vcombine.low %v311_v17, %v315_v18 }
  0x24   : > { %v1456_v29 = vcombine.high %v302_v23, %v306_v24  ;;  %v1458_v30 = vcombine.high %v303_v25, %v307_v26  ;;  %v294_v31 = vld [vmem:[%s1709_s25 + $0xc0] sm:$0xff]  ;;  %v295_v33 = vld [vmem:[%s1709_s25 + $0xc8] sm:$0xff]  ;;  %v1455_v35 = vcombine.low %v302_v23, %v306_v24  ;;  %v1457_v36 = vcombine.low %v303_v25, %v307_v26 }
  0x25   : > { %1041 = vmatpush1.bf16.msra.mxu0 %v1471_v19  ;;  %1082 = vmatpush1.bf16.msra.mxu1 %v1473_v20  ;;  %v298_v32 = vld [vmem:[%s1709_s25 + $0xe0] sm:$0xff]  ;;  %v299_v34 = vld [vmem:[%s1709_s25 + $0xe8] sm:$0xff] }
  0x26   : > { %1042 = vmatprep.subr.bf16.mxu0 %v1464_v21  ;;  %1083 = vmatprep.subr.bf16.mxu1 %v1466_v22  ;;  %v1448_v37 = vcombine.high %v294_v31, %v298_v32  ;;  %v1450_v38 = vcombine.high %v295_v33, %v299_v34  ;;  %v286_v39 = vld [vmem:[%s1709_s25 + $0x80] sm:$0xff]  ;;  %v287_v41 = vld [vmem:[%s1709_s25 + $0x88] sm:$0xff]  ;;  %v1447_v43 = vcombine.low %v294_v31, %v298_v32 }
  0x27   : > { %v290_v40 = vld [vmem:[%s1709_s25 + $0xa0] sm:$0xff]  ;;  %v291_v42 = vld [vmem:[%s1709_s25 + $0xa8] sm:$0xff]  ;;  %v1449_v44 = vcombine.low %v295_v33, %v299_v34 }
  0x28   : > { %v1440_v45 = vcombine.high %v286_v39, %v290_v40  ;;  %v1442_v46 = vcombine.high %v287_v41, %v291_v42  ;;  %v278_v47 = vld [vmem:[%s1709_s25 + $0x40] sm:$0xff]  ;;  %v279_v49 = vld [vmem:[%s1709_s25 + $0x48] sm:$0xff]  ;;  %v1439_v51 = vcombine.low %v286_v39, %v290_v40  ;;  %v1441_v52 = vcombine.low %v287_v41, %v291_v42 }
  0x29   : > { %1043 = vmatpush1.bf16.msra.mxu0 %v1463_v27  ;;  %1084 = vmatpush1.bf16.msra.mxu1 %v1465_v28  ;;  %v282_v48 = vld [vmem:[%s1709_s25 + $0x60] sm:$0xff]  ;;  %v283_v50 = vld [vmem:[%s1709_s25 + $0x68] sm:$0xff] }
  0x2a   : > { %1044 = vmatprep.subr.bf16.mxu0 %v1456_v29  ;;  %1085 = vmatprep.subr.bf16.mxu1 %v1458_v30  ;;  %v1432_v53 = vcombine.high %v278_v47, %v282_v48  ;;  %v1750_v54 = vld.sshfl [vmem:[#allocation2] sm:$0x33 pattern:$0x76325410]  ;;  %v1434_v55 = vcombine.high %v279_v49, %v283_v50  ;;  %v271_v59 = vld [vmem:[%s1709_s25 + $0x8] sm:$0xff]  ;;  %v1431_v61 = vcombine.low %v278_v47, %v282_v48 }
  0x2b   : > { %v270_v56 = vld [vmem:[%s1709_s25] sm:$0xff]  ;;  %v265_v58 = vcombine.high %v1750_v54, %v1750_v54  ;;  %v275_v60 = vld [vmem:[%s1709_s25 + $0x28] sm:$0xff]  ;;  %v1433_v63 = vcombine.low %v279_v49, %v283_v50 }
  0x2c   : > { %v274_v57 = vld [vmem:[%s1709_s25 + $0x20] sm:$0xff]  ;;  %v1426_v1 = vcombine.high %v271_v59, %v275_v60  ;;  %v391_v4 = vld [vmem:[%s1709_s25 + $0x3c8] sm:$0xff]  ;;  %v1425_v7 = vcombine.low %v271_v59, %v275_v60 }
  0x2d   : > { %1045 = vmatpush1.bf16.msra.mxu0 %v1455_v35  ;;  %1086 = vmatpush1.bf16.msra.mxu1 %v1457_v36  ;;  %v1758_v62 = vpack.c.bf16 %v265_v58, %v265_v58  ;;  %v1424_v0 = vcombine.high %v270_v56, %v274_v57  ;;  %v390_v2 = vld [vmem:[%s1709_s25 + $0x3c0] sm:$0xff]  ;;  %v395_v5 = vld [vmem:[%s1709_s25 + $0x3e8] sm:$0xff]  ;;  %v1423_v6 = vcombine.low %v270_v56, %v274_v57 }
  0x2e   : > { %1046 = vmatprep.subr.bf16.mxu0 %v1448_v37  ;;  %1087 = vmatprep.subr.bf16.mxu1 %v1450_v38  ;;  %v394_v3 = vld [vmem:[%s1709_s25 + $0x3e0] sm:$0xff]  ;;  %v1546_v9 = vcombine.high %v391_v4, %v395_v5  ;;  %v383_v12 = vld [vmem:[%s1709_s25 + $0x388] sm:$0xff]  ;;  %v1545_v15 = vcombine.low %v391_v4, %v395_v5  ;;  %v328_v4 = vld [vmem:[%s1709_s25 + $0x1d0] sm:$0xff] }
  0x2f   : > { %1070 = vmatprep.mubr.bf16.mxu0 %v1758_v62  ;;  %1111 = vmatprep.mubr.bf16.mxu1 %v1758_v62  ;;  %v1544_v8 = vcombine.high %v390_v2, %v394_v3  ;;  %v382_v10 = vld [vmem:[%s1709_s25 + $0x380] sm:$0xff]  ;;  %v387_v13 = vld [vmem:[%s1709_s25 + $0x3a8] sm:$0xff]  ;;  %v1543_v14 = vcombine.low %v390_v2, %v394_v3  ;;  %v332_v5 = vld [vmem:[%s1709_s25 + $0x1f0] sm:$0xff] }
  0x30   : > { %v386_v11 = vld [vmem:[%s1709_s25 + $0x3a0] sm:$0xff]  ;;  %v1538_v17 = vcombine.high %v383_v12, %v387_v13  ;;  %v375_v20 = vld [vmem:[%s1709_s25 + $0x348] sm:$0xff]  ;;  %v1537_v23 = vcombine.low %v383_v12, %v387_v13  ;;  %v320_v12 = vld [vmem:[%s1709_s25 + $0x190] sm:$0xff] }
  0x31   : > { %1047 = vmatpush1.bf16.msra.mxu0 %v1447_v43  ;;  %1088 = vmatpush1.bf16.msra.mxu1 %v1449_v44  ;;  %v1536_v16 = vcombine.high %v382_v10, %v386_v11  ;;  %v374_v18 = vld [vmem:[%s1709_s25 + $0x340] sm:$0xff]  ;;  %v379_v21 = vld [vmem:[%s1709_s25 + $0x368] sm:$0xff]  ;;  %v1535_v22 = vcombine.low %v382_v10, %v386_v11  ;;  %v1484_v10 = vcombine.high %v328_v4, %v332_v5  ;;  %v324_v13 = vld [vmem:[%s1709_s25 + $0x1b0] sm:$0xff] }
  0x32   : > { %1048 = vmatprep.subr.bf16.mxu0 %v1440_v45  ;;  %1089 = vmatprep.subr.bf16.mxu1 %v1442_v46  ;;  %v378_v19 = vld [vmem:[%s1709_s25 + $0x360] sm:$0xff]  ;;  %v1530_v25 = vcombine.high %v375_v20, %v379_v21  ;;  %v367_v28 = vld [vmem:[%s1709_s25 + $0x308] sm:$0xff]  ;;  %v1529_v31 = vcombine.low %v375_v20, %v379_v21  ;;  %v312_v21 = vld [vmem:[%s1709_s25 + $0x150] sm:$0xff] }
  0x33   : > { %v1528_v24 = vcombine.high %v374_v18, %v378_v19  ;;  %v366_v26 = vld [vmem:[%s1709_s25 + $0x300] sm:$0xff]  ;;  %v371_v29 = vld [vmem:[%s1709_s25 + $0x328] sm:$0xff]  ;;  %v1527_v30 = vcombine.low %v374_v18, %v378_v19  ;;  %v1476_v19 = vcombine.high %v320_v12, %v324_v13 }
  0x34   : > { %v370_v27 = vld [vmem:[%s1709_s25 + $0x320] sm:$0xff]  ;;  %v1522_v33 = vcombine.high %v367_v28, %v371_v29  ;;  %v359_v36 = vld [vmem:[%s1709_s25 + $0x2c8] sm:$0xff]  ;;  %v1521_v39 = vcombine.low %v367_v28, %v371_v29  ;;  %v304_v28 = vld [vmem:[%s1709_s25 + $0x110] sm:$0xff] }
  0x35   : > { %1049 = vmatpush1.bf16.msra.mxu0 %v1439_v51  ;;  %1090 = vmatpush1.bf16.msra.mxu1 %v1441_v52  ;;  %v1520_v32 = vcombine.high %v366_v26, %v370_v27  ;;  %v358_v34 = vld [vmem:[%s1709_s25 + $0x2c0] sm:$0xff]  ;;  %v363_v37 = vld [vmem:[%s1709_s25 + $0x2e8] sm:$0xff]  ;;  %v1519_v38 = vcombine.low %v366_v26, %v370_v27  ;;  %v308_v29 = vld [vmem:[%s1709_s25 + $0x130] sm:$0xff] }
  0x36   : > { %1050 = vmatprep.subr.bf16.mxu0 %v1432_v53  ;;  %1091 = vmatprep.subr.bf16.mxu1 %v1434_v55  ;;  %v362_v35 = vld [vmem:[%s1709_s25 + $0x2e0] sm:$0xff]  ;;  %v1514_v41 = vcombine.high %v359_v36, %v363_v37  ;;  %v351_v44 = vld [vmem:[%s1709_s25 + $0x288] sm:$0xff]  ;;  %v1513_v47 = vcombine.low %v359_v36, %v363_v37  ;;  %v296_v36 = vld [vmem:[%s1709_s25 + $0xd0] sm:$0xff] }
  0x37   : > { %v1512_v40 = vcombine.high %v358_v34, %v362_v35  ;;  %v350_v42 = vld [vmem:[%s1709_s25 + $0x280] sm:$0xff]  ;;  %v355_v45 = vld [vmem:[%s1709_s25 + $0x2a8] sm:$0xff]  ;;  %v1511_v46 = vcombine.low %v358_v34, %v362_v35  ;;  %v1460_v34 = vcombine.high %v304_v28, %v308_v29  ;;  %v300_v37 = vld [vmem:[%s1709_s25 + $0xf0] sm:$0xff] }
  0x38   : > { %v354_v43 = vld [vmem:[%s1709_s25 + $0x2a0] sm:$0xff]  ;;  %v1506_v49 = vcombine.high %v351_v44, %v355_v45  ;;  %v343_v52 = vld [vmem:[%s1709_s25 + $0x248] sm:$0xff]  ;;  %v1505_v56 = vcombine.low %v351_v44, %v355_v45  ;;  %v292_v44 = vld [vmem:[%s1709_s25 + $0xb0] sm:$0xff] }
  0x39   : > { %1051 = vmatpush1.bf16.msra.mxu0 %v1431_v61  ;;  %1092 = vmatpush1.bf16.msra.mxu1 %v1433_v63  ;;  %v1504_v48 = vcombine.high %v350_v42, %v354_v43  ;;  %v342_v50 = vld [vmem:[%s1709_s25 + $0x240] sm:$0xff]  ;;  %v347_v53 = vld [vmem:[%s1709_s25 + $0x268] sm:$0xff]  ;;  %v1503_v55 = vcombine.low %v350_v42, %v354_v43  ;;  %v288_v43 = vld [vmem:[%s1709_s25 + $0x90] sm:$0xff] }
  0x3a   : > { %1052 = vmatprep.subr.bf16.mxu0 %v1424_v0  ;;  %1093 = vmatprep.subr.bf16.mxu1 %v1426_v1  ;;  %v346_v51 = vld [vmem:[%s1709_s25 + $0x260] sm:$0xff]  ;;  %v1498_v58 = vcombine.high %v343_v52, %v347_v53  ;;  %v335_v61 = vld [vmem:[%s1709_s25 + $0x208] sm:$0xff]  ;;  %v1497_v1 = vcombine.low %v343_v52, %v347_v53  ;;  %v289_v45 = vld [vmem:[%s1709_s25 + $0x98] sm:$0xff] }
  0x3b   : > { %v1496_v57 = vcombine.high %v342_v50, %v346_v51  ;;  %v334_v59 = vld [vmem:[%s1709_s25 + $0x200] sm:$0xff]  ;;  %v339_v63 = vld [vmem:[%s1709_s25 + $0x228] sm:$0xff]  ;;  %v1495_v0 = vcombine.low %v342_v50, %v346_v51  ;;  %v280_v51 = vld [vmem:[%s1709_s25 + $0x50] sm:$0xff] }
  0x3c   : > { %v338_v60 = vld [vmem:[%s1709_s25 + $0x220] sm:$0xff]  ;;  %v1490_v3 = vcombine.high %v335_v61, %v339_v63  ;;  %v284_v52 = vld [vmem:[%s1709_s25 + $0x70] sm:$0xff]  ;;  %v281_v53 = vld [vmem:[%s1709_s25 + $0x58] sm:$0xff] }
  0x3d   : > { %1053 = vmatpush1.bf16.msra.mxu0 %v1423_v6  ;;  %1094 = vmatpush1.bf16.msra.mxu1 %v1425_v7  ;;  %v1488_v2 = vcombine.high %v334_v59, %v338_v60  ;;  %v329_v6 = vld [vmem:[%s1709_s25 + $0x1d8] sm:$0xff] }
  0x3e   : > { %1054 = vmatprep.subr.bf16.mxu0 %v1544_v8  ;;  %1095 = vmatprep.subr.bf16.mxu1 %v1546_v9  ;;  %v333_v7 = vld [vmem:[%s1709_s25 + $0x1f8] sm:$0xff]  ;;  %v1487_v8 = vcombine.low %v334_v59, %v338_v60  ;;  %v1489_v9 = vcombine.low %v335_v61, %v339_v63  ;;  %v272_v60 = vld [vmem:[%s1709_s25 + $0x10] sm:$0xff] }
  0x3f   : > { %v1486_v11 = vcombine.high %v329_v6, %v333_v7  ;;  %v1485_v18 = vcombine.low %v329_v6, %v333_v7  ;;  %v276_v61 = vld [vmem:[%s1709_s25 + $0x30] sm:$0xff]  ;;  %v273_v63 = vld [vmem:[%s1709_s25 + $0x18] sm:$0xff] }
  0x40   : > { %v396_v6 = vld [vmem:[%s1709_s25 + $0x3f0] sm:$0xff]  ;;  %v393_v7 = vld [vmem:[%s1709_s25 + $0x3d8] sm:$0xff] }
  0x41   : > { %1055 = vmatpush2.bf16.msra.mxu0 %v1543_v14  ;;  %1096 = vmatpush2.bf16.msra.mxu1 %v1545_v15  ;;  %v1802_v14 = vpack.c.bf16 %v1750_v54, %v1750_v54  ;;  %v321_v15 = vld [vmem:[%s1709_s25 + $0x198] sm:$0xff] }
  0x42   : > { %1056 = vmatprep.subr.bf16.mxu0 %v1536_v16  ;;  %1097 = vmatprep.subr.bf16.mxu1 %v1538_v17  ;;  %v325_v16 = vld [vmem:[%s1709_s25 + $0x1b8] sm:$0xff]  ;;  %v1483_v17 = vcombine.low %v328_v4, %v332_v5  ;;  %v392_v5 = vld [vmem:[%s1709_s25 + $0x3d0] sm:$0xff] }
  0x43   : > { %v1478_v20 = vcombine.high %v321_v15, %v325_v16  ;;  %v313_v54 = vld [vmem:[%s1709_s25 + $0x158] sm:$0xff] }
  0x45   : > { %1057 = vmatpush2.bf16.msra.mxu0 %v1535_v22  ;;  %1098 = vmatpush2.bf16.msra.mxu1 %v1537_v23  ;;  %v316_v22 = vld [vmem:[%s1709_s25 + $0x170] sm:$0xff]  ;;  %v317_v23 = vld [vmem:[%s1709_s25 + $0x178] sm:$0xff] }
  0x46   : > { %1058 = vmatprep.subr.bf16.mxu0 %v1528_v24  ;;  %1099 = vmatprep.subr.bf16.mxu1 %v1530_v25  ;;  %v1475_v24 = vcombine.low %v320_v12, %v324_v13  ;;  %v1477_v25 = vcombine.low %v321_v15, %v325_v16  ;;  %v1468_v26 = vcombine.high %v312_v21, %v316_v22  ;;  %v384_v13 = vld [vmem:[%s1709_s25 + $0x390] sm:$0xff]  ;;  %v385_v16 = vld [vmem:[%s1709_s25 + $0x398] sm:$0xff] }
  0x47   : > { %v1470_v27 = vcombine.high %v313_v54, %v317_v23  ;;  %v388_v15 = vld [vmem:[%s1709_s25 + $0x3b0] sm:$0xff] }
  0x49   : > { %1059 = vmatpush2.bf16.msra.mxu0 %v1527_v30  ;;  %1100 = vmatpush2.bf16.msra.mxu1 %v1529_v31  ;;  %v305_v30 = vld [vmem:[%s1709_s25 + $0x118] sm:$0xff] }
  0x4a   : > { %1060 = vmatprep.subr.bf16.mxu0 %v1520_v32  ;;  %1101 = vmatprep.subr.bf16.mxu1 %v1522_v33  ;;  %v309_v31 = vld [vmem:[%s1709_s25 + $0x138] sm:$0xff]  ;;  %v1467_v32 = vcombine.low %v312_v21, %v316_v22  ;;  %v1469_v33 = vcombine.low %v313_v54, %v317_v23  ;;  %v376_v22 = vld [vmem:[%s1709_s25 + $0x350] sm:$0xff] }
  0x4b   : > { %v1462_v35 = vcombine.high %v305_v30, %v309_v31  ;;  %v380_v54 = vld [vmem:[%s1709_s25 + $0x370] sm:$0xff]  ;;  %v377_v23 = vld [vmem:[%s1709_s25 + $0x358] sm:$0xff] }
  0x4d   : > { %1061 = vmatpush2.bf16.msra.mxu0 %v1519_v38  ;;  %1102 = vmatpush2.bf16.msra.mxu1 %v1521_v39  ;;  %v297_v38 = vld [vmem:[%s1709_s25 + $0xd8] sm:$0xff] }
  0x4e   : > { %1062 = vmatprep.subr.bf16.mxu0 %v1512_v40  ;;  %1103 = vmatprep.subr.bf16.mxu1 %v1514_v41  ;;  %v301_v39 = vld [vmem:[%s1709_s25 + $0xf8] sm:$0xff]  ;;  %v1459_v40 = vcombine.low %v304_v28, %v308_v29  ;;  %v1452_v41 = vcombine.high %v296_v36, %v300_v37  ;;  %v368_v29 = vld [vmem:[%s1709_s25 + $0x310] sm:$0xff] }
  0x4f   : > { %v1454_v42 = vcombine.high %v297_v38, %v301_v39 }
  0x51   : > { %1063 = vmatpush2.bf16.msra.mxu0 %v1511_v46  ;;  %1104 = vmatpush2.bf16.msra.mxu1 %v1513_v47  ;;  %v293_v46 = vld [vmem:[%s1709_s25 + $0xb8] sm:$0xff]  ;;  %v1451_v47 = vcombine.low %v296_v36, %v300_v37  ;;  %v360_v37 = vld [vmem:[%s1709_s25 + $0x2d0] sm:$0xff] }
  0x52   : > { %1064 = vmatprep.subr.bf16.mxu0 %v1504_v48  ;;  %1105 = vmatprep.subr.bf16.mxu1 %v1506_v49  ;;  %v1453_v48 = vcombine.low %v297_v38, %v301_v39  ;;  %v1444_v49 = vcombine.high %v288_v43, %v292_v44  ;;  %v1446_v50 = vcombine.high %v289_v45, %v293_v46  ;;  %v364_v38 = vld [vmem:[%s1709_s25 + $0x2f0] sm:$0xff]  ;;  %v361_v39 = vld [vmem:[%s1709_s25 + $0x2d8] sm:$0xff] }
  0x55   : > { %1065 = vmatpush2.bf16.msra.mxu0 %v1503_v55  ;;  %1106 = vmatpush2.bf16.msra.mxu1 %v1505_v56  ;;  %v285_v55 = vld [vmem:[%s1709_s25 + $0x78] sm:$0xff]  ;;  %v1443_v56 = vcombine.low %v288_v43, %v292_v44  ;;  %v352_v44 = vld [vmem:[%s1709_s25 + $0x290] sm:$0xff] }
  0x56   : > { %1066 = vmatprep.subr.bf16.mxu0 %v1496_v57  ;;  %1107 = vmatprep.subr.bf16.mxu1 %v1498_v58  ;;  %v1445_v57 = vcombine.low %v289_v45, %v293_v46  ;;  %v1436_v58 = vcombine.high %v280_v51, %v284_v52  ;;  %v1438_v59 = vcombine.high %v281_v53, %v285_v55  ;;  %v356_v45 = vld [vmem:[%s1709_s25 + $0x2b0] sm:$0xff]  ;;  %v353_v46 = vld [vmem:[%s1709_s25 + $0x298] sm:$0xff] }
  0x59   : > { %1067 = vmatpush2.bf16.msra.mxu0 %v1495_v0  ;;  %1108 = vmatpush2.bf16.msra.mxu1 %v1497_v1  ;;  %v277_v0 = vld [vmem:[%s1709_s25 + $0x38] sm:$0xff]  ;;  %v1435_v1 = vcombine.low %v280_v51, %v284_v52  ;;  %v344_v52 = vld [vmem:[%s1709_s25 + $0x250] sm:$0xff] }
  0x5a   : > { %1068 = vmatprep.subr.bf16.mxu0 %v1488_v2  ;;  %1109 = vmatprep.subr.bf16.mxu1 %v1490_v3  ;;  %v1437_v2 = vcombine.low %v281_v53, %v285_v55  ;;  %v1428_v3 = vcombine.high %v272_v60, %v276_v61  ;;  %v1430_v4 = vcombine.high %v273_v63, %v277_v0  ;;  %v348_v53 = vld [vmem:[%s1709_s25 + $0x270] sm:$0xff]  ;;  %v345_v55 = vld [vmem:[%s1709_s25 + $0x258] sm:$0xff] }
  0x5d   : > { %1069 = vmatpush2.bf16.msra.mxu0 %v1487_v8  ;;  %1110 = vmatpush2.bf16.msra.mxu1 %v1489_v9  ;;  %v397_v8 = vld [vmem:[%s1709_s25 + $0x3f8] sm:$0xff]  ;;  %v1427_v9 = vcombine.low %v272_v60, %v276_v61  ;;  %v336_v61 = vld [vmem:[%s1709_s25 + $0x210] sm:$0xff] }
  0x5e   : > { %1120 = vmatprep.subr.bf16.mxu0 %v1484_v10  ;;  %1161 = vmatprep.subr.bf16.mxu1 %v1486_v11  ;;  %v1429_v10 = vcombine.low %v273_v63, %v277_v0  ;;  %v1548_v11 = vcombine.high %v392_v5, %v396_v6  ;;  %v1550_v12 = vcombine.high %v393_v7, %v397_v8  ;;  %v340_v63 = vld [vmem:[%s1709_s25 + $0x230] sm:$0xff]  ;;  %v337_v0 = vld [vmem:[%s1709_s25 + $0x218] sm:$0xff] }
  0x60   : > { %1071 = vmatmul.mubr.bf16.vlgmr.msra.gmra.mxu0 %v1802_v14  ;;  %1112 = vmatmul.mubr.bf16.vlgmr.msra.gmra.mxu1 %v1802_v14 }
  0x61   : > { %1121 = vmatpush1.bf16.msra.mxu0 %v1483_v17  ;;  %1162 = vmatpush1.bf16.msra.mxu1 %v1485_v18  ;;  %v389_v17 = vld [vmem:[%s1709_s25 + $0x3b8] sm:$0xff]  ;;  %v1547_v18 = vcombine.low %v392_v5, %v396_v6  ;;  %v1491_v6 = vcombine.low %v336_v61, %v340_v63 }
  0x62   : > { %1122 = vmatprep.subr.bf16.mxu0 %v1476_v19  ;;  %1163 = vmatprep.subr.bf16.mxu1 %v1478_v20  ;;  %v1549_v19 = vcombine.low %v393_v7, %v397_v8  ;;  %v1540_v20 = vcombine.high %v384_v13, %v388_v15  ;;  %v1542_v21 = vcombine.high %v385_v16, %v389_v17 }
  0x63   : > { %1152 = vmatprep.mubr.bf16.mxu0 %v1758_v62  ;;  %1193 = vmatprep.mubr.bf16.mxu1 %v1758_v62  ;;  %v1461_v62 = vcombine.low %v305_v30, %v309_v31  ;;  %v372_v30 = vld [vmem:[%s1709_s25 + $0x330] sm:$0xff]  ;;  %v369_v31 = vld [vmem:[%s1709_s25 + $0x318] sm:$0xff] }
  0x65   : > { %1123 = vmatpush1.bf16.msra.mxu0 %v1475_v24  ;;  %1164 = vmatpush1.bf16.msra.mxu1 %v1477_v25  ;;  %v381_v24 = vld [vmem:[%s1709_s25 + $0x378] sm:$0xff]  ;;  %v1539_v25 = vcombine.low %v384_v13, %v388_v15 }
  0x66   : > { %1124 = vmatprep.subr.bf16.mxu0 %v1468_v26  ;;  %1165 = vmatprep.subr.bf16.mxu1 %v1470_v27  ;;  %v1541_v26 = vcombine.low %v385_v16, %v389_v17  ;;  %v1532_v27 = vcombine.high %v376_v22, %v380_v54  ;;  %v1534_v28 = vcombine.high %v377_v23, %v381_v24  ;;  %v1656_v17 = vmov 1983009808  }
  0x69   : > { %1125 = vmatpush1.bf16.msra.mxu0 %v1467_v32  ;;  %1166 = vmatpush1.bf16.msra.mxu1 %v1469_v33  ;;  %v373_v32 = vld [vmem:[%s1709_s25 + $0x338] sm:$0xff]  ;;  %v1531_v33 = vcombine.low %v376_v22, %v380_v54 }
  0x6a   : > { %1126 = vmatprep.subr.bf16.mxu0 %v1460_v34  ;;  %1167 = vmatprep.subr.bf16.mxu1 %v1462_v35  ;;  %v1533_v34 = vcombine.low %v377_v23, %v381_v24  ;;  %v1524_v35 = vcombine.high %v368_v29, %v372_v30  ;;  %v1526_v36 = vcombine.high %v369_v31, %v373_v32 }
  0x6d   : > { %1127 = vmatpush1.bf16.msra.mxu0 %v1459_v40  ;;  %1168 = vmatpush1.bf16.msra.mxu1 %v1461_v62  ;;  %v365_v40 = vld [vmem:[%s1709_s25 + $0x2f8] sm:$0xff]  ;;  %v1523_v62 = vcombine.low %v368_v29, %v372_v30 }
  0x6e   : > { %1128 = vmatprep.subr.bf16.mxu0 %v1452_v41  ;;  %1169 = vmatprep.subr.bf16.mxu1 %v1454_v42  ;;  %v1525_v41 = vcombine.low %v369_v31, %v373_v32  ;;  %v1516_v42 = vcombine.high %v360_v37, %v364_v38  ;;  %v1518_v43 = vcombine.high %v361_v39, %v365_v40 }
  0x71   : > { %1129 = vmatpush1.bf16.msra.mxu0 %v1451_v47  ;;  %1170 = vmatpush1.bf16.msra.mxu1 %v1453_v48  ;;  %v357_v47 = vld [vmem:[%s1709_s25 + $0x2b8] sm:$0xff]  ;;  %v1515_v48 = vcombine.low %v360_v37, %v364_v38 }
  0x72   : > { %1130 = vmatprep.subr.bf16.mxu0 %v1444_v49  ;;  %1171 = vmatprep.subr.bf16.mxu1 %v1446_v50  ;;  %v1517_v49 = vcombine.low %v361_v39, %v365_v40  ;;  %v1508_v50 = vcombine.high %v352_v44, %v356_v45  ;;  %v1510_v51 = vcombine.high %v353_v46, %v357_v47 }
  0x75   : > { %1131 = vmatpush1.bf16.msra.mxu0 %v1443_v56  ;;  %1172 = vmatpush1.bf16.msra.mxu1 %v1445_v57  ;;  %v349_v56 = vld [vmem:[%s1709_s25 + $0x278] sm:$0xff]  ;;  %v1507_v57 = vcombine.low %v352_v44, %v356_v45  ;;  %v255_v45 = vld [vmem:[%s1714_s6 + $0x8] sm:$0xff] }
  0x76   : > { %1132 = vmatprep.subr.bf16.mxu0 %v1436_v58  ;;  %1173 = vmatprep.subr.bf16.mxu1 %v1438_v59  ;;  %v1509_v58 = vcombine.low %v353_v46, %v357_v47  ;;  %v1500_v59 = vcombine.high %v344_v52, %v348_v53  ;;  %v1502_v60 = vcombine.high %v345_v55, %v349_v56 }
  0x79   : > { %1133 = vmatpush1.bf16.msra.mxu0 %v1435_v1  ;;  %1174 = vmatpush1.bf16.msra.mxu1 %v1437_v2  ;;  %v341_v1 = vld [vmem:[%s1709_s25 + $0x238] sm:$0xff]  ;;  %v1499_v2 = vcombine.low %v344_v52, %v348_v53  ;;  %v1273_v52 = vld [vmem:[#allocation3] sm:$0xf] }
  0x7a   : > { %1134 = vmatprep.subr.bf16.mxu0 %v1428_v3  ;;  %1175 = vmatprep.subr.bf16.mxu1 %v1430_v4  ;;  %v1501_v3 = vcombine.low %v345_v55, %v349_v56  ;;  %v1492_v4 = vcombine.high %v336_v61, %v340_v63  ;;  %v1494_v5 = vcombine.high %v337_v0, %v341_v1 }
  0x7b   : > { %v1493_v7 = vcombine.low %v337_v0, %v341_v1 }
  0x7d   : > { %1135 = vmatpush1.bf16.msra.mxu0 %v1427_v9  ;;  %1176 = vmatpush1.bf16.msra.mxu1 %v1429_v10 }
  0x7e   : > { %1136 = vmatprep.subr.bf16.mxu0 %v1548_v11  ;;  %1177 = vmatprep.subr.bf16.mxu1 %v1550_v12 }
  0x81   : > { %1137 = vmatpush2.bf16.msra.mxu0 %v1547_v18  ;;  %1178 = vmatpush2.bf16.msra.mxu1 %v1549_v19  ;;  %v1213_v18 = vunpack.c.l.s4 %v1656_v17  ;;  %v1215_v19 = vlaneseq }
  0x82   : > { %1138 = vmatprep.subr.bf16.mxu0 %v1540_v20  ;;  %1179 = vmatprep.subr.bf16.mxu1 %v1542_v21 }
  0x83   : > { %v1214_v20 = vunpack.c.0.s8 %v1213_v18  ;;  %v1216_v21 = vshrl.u32 %v1215_v19, 7 }
  0x85   : > { %1139 = vmatpush2.bf16.msra.mxu0 %v1539_v25  ;;  %1180 = vmatpush2.bf16.msra.mxu1 %v1541_v26  ;;  %v1217_v54 = vsub.s32 %v1214_v20, %v1216_v21  ;;  %v254_v26 = vld [vmem:[%s1714_s6] sm:$0xff] }
  0x86   : > { %1140 = vmatprep.subr.bf16.mxu0 %v1532_v27  ;;  %1181 = vmatprep.subr.bf16.mxu1 %v1534_v28 }
  0x89   : > { %1141 = vmatpush2.bf16.msra.mxu0 %v1531_v33  ;;  %1182 = vmatpush2.bf16.msra.mxu1 %v1533_v34 }
  0x8a   : > { %1142 = vmatprep.subr.bf16.mxu0 %v1524_v35  ;;  %1183 = vmatprep.subr.bf16.mxu1 %v1526_v36 }
  0x8d   : > { %1143 = vmatpush2.bf16.msra.mxu0 %v1523_v62  ;;  %1184 = vmatpush2.bf16.msra.mxu1 %v1525_v41 }
  0x8e   : > { %1144 = vmatprep.subr.bf16.mxu0 %v1516_v42  ;;  %1185 = vmatprep.subr.bf16.mxu1 %v1518_v43 }
  0x91   : > { %1145 = vmatpush2.bf16.msra.mxu0 %v1515_v48  ;;  %1186 = vmatpush2.bf16.msra.mxu1 %v1517_v49 }
  0x92   : > { %1146 = vmatprep.subr.bf16.mxu0 %v1508_v50  ;;  %1187 = vmatprep.subr.bf16.mxu1 %v1510_v51 }
  0x95   : > { %1147 = vmatpush2.bf16.msra.mxu0 %v1507_v57  ;;  %1188 = vmatpush2.bf16.msra.mxu1 %v1509_v58 }
  0x96   : > { %1148 = vmatprep.subr.bf16.mxu0 %v1500_v59  ;;  %1189 = vmatprep.subr.bf16.mxu1 %v1502_v60 }
  0x99   : > { %1149 = vmatpush2.bf16.msra.mxu0 %v1499_v2  ;;  %1190 = vmatpush2.bf16.msra.mxu1 %v1501_v3 }
  0x9a   : > { %1150 = vmatprep.subr.bf16.mxu0 %v1492_v4  ;;  %1191 = vmatprep.subr.bf16.mxu1 %v1494_v5 }
  0x9d   : > { %1151 = vmatpush2.bf16.msra.mxu0 %v1491_v6  ;;  %1192 = vmatpush2.bf16.msra.mxu1 %v1493_v7 }
  0xa0   : > { %1153 = vmatmul.mubr.bf16.vlgmr.msra.gmra.mxu0 %v1802_v14  ;;  %1194 = vmatmul.mubr.bf16.vlgmr.msra.gmra.mxu1 %v1802_v14 }
 0x120   : > { %v1072_v8 = vpop.f32.mrf.mxu0  ;;  %v1113_v9 = vpop.f32.mrf.mxu1 }
 0x122   : > { %v1074_v10 = vpop.f32.mrf.mxu0  ;;  %v1115_v11 = vpop.f32.mrf.mxu1 }
 0x123   : > { %v1210_v22 = vcombine.low %v1072_v8, %v1074_v10  ;;  %v1211_v23 = vcombine.low %v1113_v9, %v1115_v11 }
 0x124   : > { %v1076_v12 = vpop.f32.mrf.mxu0  ;;  %v1117_v13 = vpop.f32.mrf.mxu1 }
 0x125   : > { %v1218_v24 = vrot.slane %v1210_v22, %v1217_v54  ;;  %v1225_v25 = vrot.slane %v1211_v23, %v1217_v54 }
 0x126   : > { %v1077_v15 = vpop.f32.mrf.mxu0  ;;  %v1118_v16 = vpop.f32.mrf.mxu1 }
 0x127   : > { %v1226_v14 = vcombine.low %v1218_v24, %v1225_v25 }
 0x129   : > { %v1246_v27 = vadd.f32 %v1226_v14, %v254_v26 }
 0x12b   : > { %v1255_v28 = vrot.slane %v1246_v27, 4  ;;  %v1551_v30 = vmul.f32 -1.442695, %v1246_v27 }
 0x12d   : > { %v1552_v29 = vmul.f32 -1.442695, %v1255_v28 }
 0x12f   : > { %1599 = vpow2.f32 %v1552_v29 }
 0x130   : > { %1601 = vpow2.f32 %v1551_v30 }
 0x13c   : > { %v1600_v34 = vpop.eup %1599 }
 0x13d   : > { %v1602_v37 = vpop.eup %1601  ;;  %v1260_v41 = vadd.f32 1.0, %v1600_v34 }
 0x13e   : > { %v1251_v44 = vadd.f32 1.0, %v1602_v37 }
 0x13f   : > { %1603 = vrcp.f32 %v1260_v41 }
 0x140   : > { %1605 = vrcp.f32 %v1251_v44 }
 0x14c   : > { %v1604_v51 = vpop.eup %1603 }
 0x14d   : > { %v1606_v53 = vpop.eup %1605  ;;  %v1274_v56 = vmul.f32 %v1604_v51, %v1273_v52 }
 0x160   : > { %v1154_v31 = vpop.f32.mrf.mxu0  ;;  %v1195_v32 = vpop.f32.mrf.mxu1 }
 0x162   : > { %v1156_v33 = vpop.f32.mrf.mxu0  ;;  %v1197_v36 = vpop.f32.mrf.mxu1 }
 0x163   : > { %v1227_v35 = vcombine.low %v1154_v31, %v1156_v33  ;;  %v1228_v38 = vcombine.low %v1195_v32, %v1197_v36 }
 0x164   : > { %v1158_v39 = vpop.f32.mrf.mxu0  ;;  %v1199_v62 = vpop.f32.mrf.mxu1 }
 0x165   : > { %v1235_v40 = vrot.slane %v1227_v35, %v1217_v54  ;;  %v1242_v42 = vrot.slane %v1228_v38, %v1217_v54 }
 0x166   : > { %v1159_v43 = vpop.f32.mrf.mxu0  ;;  %v1200_v46 = vpop.f32.mrf.mxu1 }
 0x167   : > { %v1243_v47 = vcombine.low %v1235_v40, %v1242_v42 }
 0x169   : > { %v1247_v48 = vadd.f32 %v1243_v47, %v255_v45 }
 0x16b   : > { %1607 = vtanh.f32 %v1247_v48  ;;  %v1265_v49 = vrot.slane %v1247_v48, 4 }
 0x16d   : > { %v1553_v50 = vmul.f32 -1.442695, %v1265_v49 }
 0x16f   : > { %1609 = vpow2.f32 %v1553_v50 }
 0x178   : > { %v1608_v55 = vpop.eup %1607 }
 0x179   : > { %v1275_v57 = vmul.f32 %v1608_v55, %v1606_v53 }
 0x17b   : > { %v1276_v58 = vadd.f32 %v1275_v57, %v1274_v56 }
 0x17c   : > { %v1610_v59 = vpop.eup %1609 }
 0x17d   : > { %v1270_v60 = vadd.f32 1.0, %v1610_v59  ;;  %1279 = vst [vmem:[#allocation3] sm:$0xf] %v1276_v58  ;;  %1611 = vtanh.f32 %v1276_v58 }
 0x17f   : > { %1613 = vrcp.f32 %v1270_v60 }
 0x18a   : > { %v1612_v61 = vpop.eup %1611 }
 0x18c   : > { %v1614_v63 = vpop.eup %1613 }
 0x18d   : > { %v1278_v0 = vmul.f32 %v1614_v63, %v1612_v61 }
 0x18f   : > { %1280 = vst [vmem:[#allocation2] sm:$0xf] %v1278_v0  ;;  %1281 = vst [vmem:[%s1719_s10] sm:$0xf] %v1278_v0 }
 0x190 PF: > { %s12_s13 = sadd.s32 1, %s1653_s13   ;;  %s1889_s9 = smov %s1645_s11 }
 0x191   : > { %p9_p8 = scmp.ge.s32.totalorder %s12_s13, 10   ;;  %s1890_s10 = smov %s1649_s12 }
 0x192   : > { %s1891_s11 = smov %s1894_s14  ;;  %s1892_s12 = smov %s1898_s15 }
 0x193   :  { %11 = sbr.rel (!%p9_p8) target bundleno = 3 (0x3), region = 65 }

// kernel: crnn_forward.11
= control target key start
LH: loop header
LB: loop body
LE: loop exit
PB: predicated region body
PF: predicated region fallthrough
CT: control target
= control target key end

     0   :  { %s6104_s1 = inlined_call_operand.vmem [shape: bf16[512,2048], index: 1, kind: input, shape index: {}]   ;;  %s6105_s0 = inlined_call_operand.vmem [shape: bf16[8,512], index: 0, kind: input, shape index: {}]   ;;  %s6106_s2 = inlined_call_operand.vmem [shape: f32[1,2048], index: 2, kind: input, shape index: {}]   ;;  %s6107_s3 = inlined_call_operand.vmem [shape: f32[8,2048], index: 3, kind: output, shape index: {}]  }
   0x1   :  { %v128_v0 = vld [vmem:[%s6104_s1 + $0x380] sm:$0xff]  ;;  %v4495_v54 = vld [vmem:[%s6105_s0 + $0x8] sm:$0xff] }
   0x2   :  { %v136_v1 = vld [vmem:[%s6104_s1 + $0x3c0] sm:$0xff]  ;;  %v4509_v59 = vcombine.high %v4495_v54, %v4495_v54 }
   0x3   :  { %v384_v2 = vld [vmem:[%s6104_s1 + $0xb80] sm:$0xff]  ;;  %v3979_v3 = vcombine.high %v128_v0, %v136_v1  ;;  %v3978_v5 = vcombine.low %v128_v0, %v136_v1 }
   0x4   :  { %v392_v4 = vld [vmem:[%s6104_s1 + $0xbc0] sm:$0xff]  ;;  %3259 = vmatprep.mubr.bf16.mxu1 %v4509_v59 }
   0x5   :  { %v112_v6 = vld [vmem:[%s6104_s1 + $0x300] sm:$0xff]  ;;  %v4235_v8 = vcombine.high %v384_v2, %v392_v4  ;;  %v4234_v9 = vcombine.low %v384_v2, %v392_v4  ;;  %3186 = vmatprep.subr.bf16.mxu0 %v3979_v3 }
   0x6   :  { %v120_v7 = vld [vmem:[%s6104_s1 + $0x340] sm:$0xff]  ;;  %3187 = vmatpush1.bf16.msra.mxu0 %v3978_v5 }
   0x7   :  { %v3963_v10 = vcombine.high %v112_v6, %v120_v7  ;;  %v368_v11 = vld [vmem:[%s6104_s1 + $0xb00] sm:$0xff]  ;;  %3227 = vmatprep.subr.bf16.mxu1 %v4235_v8  ;;  %v3962_v18 = vcombine.low %v112_v6, %v120_v7 }
   0x8   :  { %v376_v12 = vld [vmem:[%s6104_s1 + $0xb40] sm:$0xff]  ;;  %3228 = vmatpush1.bf16.msra.mxu1 %v4234_v9 }
   0x9   :  { %v96_v13 = vld [vmem:[%s6104_s1 + $0x280] sm:$0xff]  ;;  %v4219_v14 = vcombine.high %v368_v11, %v376_v12  ;;  %3188 = vmatprep.subr.bf16.mxu0 %v3963_v10  ;;  %v4218_v19 = vcombine.low %v368_v11, %v376_v12 }
   0xa   :  { %v104_v15 = vld [vmem:[%s6104_s1 + $0x2c0] sm:$0xff]  ;;  %3189 = vmatpush1.bf16.msra.mxu0 %v3962_v18 }
   0xb   :  { %v352_v16 = vld [vmem:[%s6104_s1 + $0xa80] sm:$0xff]  ;;  %v3947_v20 = vcombine.high %v96_v13, %v104_v15  ;;  %3229 = vmatprep.subr.bf16.mxu1 %v4219_v14  ;;  %v3946_v26 = vcombine.low %v96_v13, %v104_v15 }
   0xc   :  { %v360_v17 = vld [vmem:[%s6104_s1 + $0xac0] sm:$0xff]  ;;  %3230 = vmatpush1.bf16.msra.mxu1 %v4218_v19 }
   0xd   :  { %v4203_v21 = vcombine.high %v352_v16, %v360_v17  ;;  %v80_v22 = vld [vmem:[%s6104_s1 + $0x200] sm:$0xff]  ;;  %3190 = vmatprep.subr.bf16.mxu0 %v3947_v20  ;;  %v4202_v27 = vcombine.low %v352_v16, %v360_v17 }
   0xe   :  { %v88_v23 = vld [vmem:[%s6104_s1 + $0x240] sm:$0xff]  ;;  %3191 = vmatpush1.bf16.msra.mxu0 %v3946_v26 }
   0xf   :  { %v336_v24 = vld [vmem:[%s6104_s1 + $0xa00] sm:$0xff]  ;;  %v3931_v28 = vcombine.high %v80_v22, %v88_v23  ;;  %3231 = vmatprep.subr.bf16.mxu1 %v4203_v21  ;;  %v3930_v34 = vcombine.low %v80_v22, %v88_v23 }
  0x10   :  { %v344_v25 = vld [vmem:[%s6104_s1 + $0xa40] sm:$0xff]  ;;  %3232 = vmatpush1.bf16.msra.mxu1 %v4202_v27 }
  0x11   :  { %v4187_v29 = vcombine.high %v336_v24, %v344_v25  ;;  %v64_v30 = vld [vmem:[%s6104_s1 + $0x180] sm:$0xff]  ;;  %3192 = vmatprep.subr.bf16.mxu0 %v3931_v28  ;;  %v4186_v35 = vcombine.low %v336_v24, %v344_v25 }
  0x12   :  { %v72_v31 = vld [vmem:[%s6104_s1 + $0x1c0] sm:$0xff]  ;;  %3193 = vmatpush1.bf16.msra.mxu0 %v3930_v34 }
  0x13   :  { %v320_v32 = vld [vmem:[%s6104_s1 + $0x980] sm:$0xff]  ;;  %v3915_v36 = vcombine.high %v64_v30, %v72_v31  ;;  %3233 = vmatprep.subr.bf16.mxu1 %v4187_v29  ;;  %v3914_v42 = vcombine.low %v64_v30, %v72_v31 }
  0x14   :  { %v328_v33 = vld [vmem:[%s6104_s1 + $0x9c0] sm:$0xff]  ;;  %3234 = vmatpush1.bf16.msra.mxu1 %v4186_v35 }
  0x15   :  { %v4171_v37 = vcombine.high %v320_v32, %v328_v33  ;;  %v48_v38 = vld [vmem:[%s6104_s1 + $0x100] sm:$0xff]  ;;  %3194 = vmatprep.subr.bf16.mxu0 %v3915_v36  ;;  %v4170_v43 = vcombine.low %v320_v32, %v328_v33 }
  0x16   :  { %v56_v39 = vld [vmem:[%s6104_s1 + $0x140] sm:$0xff]  ;;  %3195 = vmatpush1.bf16.msra.mxu0 %v3914_v42 }
  0x17   :  { %v304_v40 = vld [vmem:[%s6104_s1 + $0x900] sm:$0xff]  ;;  %v3899_v44 = vcombine.high %v48_v38, %v56_v39  ;;  %3235 = vmatprep.subr.bf16.mxu1 %v4171_v37  ;;  %v3898_v50 = vcombine.low %v48_v38, %v56_v39 }
  0x18   :  { %v312_v41 = vld [vmem:[%s6104_s1 + $0x940] sm:$0xff]  ;;  %3236 = vmatpush1.bf16.msra.mxu1 %v4170_v43 }
  0x19   :  { %v4155_v45 = vcombine.high %v304_v40, %v312_v41  ;;  %v32_v46 = vld [vmem:[%s6104_s1 + $0x80] sm:$0xff]  ;;  %3196 = vmatprep.subr.bf16.mxu0 %v3899_v44  ;;  %v4154_v51 = vcombine.low %v304_v40, %v312_v41 }
  0x1a   :  { %v40_v47 = vld [vmem:[%s6104_s1 + $0xc0] sm:$0xff]  ;;  %3197 = vmatpush1.bf16.msra.mxu0 %v3898_v50 }
  0x1b   :  { %v288_v48 = vld [vmem:[%s6104_s1 + $0x880] sm:$0xff]  ;;  %v3883_v52 = vcombine.high %v32_v46, %v40_v47  ;;  %3237 = vmatprep.subr.bf16.mxu1 %v4155_v45  ;;  %v3882_v62 = vcombine.low %v32_v46, %v40_v47 }
  0x1c   :  { %v296_v49 = vld [vmem:[%s6104_s1 + $0x8c0] sm:$0xff]  ;;  %3238 = vmatpush1.bf16.msra.mxu1 %v4154_v51 }
  0x1d   :  { %v4490_v53 = vld [vmem:[%s6105_s0] sm:$0xff]  ;;  %v4139_v55 = vcombine.high %v288_v48, %v296_v49  ;;  %3198 = vmatprep.subr.bf16.mxu0 %v3883_v52  ;;  %v4138_v63 = vcombine.low %v288_v48, %v296_v49 }
  0x1e   :  { %v16_v56 = vld [vmem:[%s6104_s1] sm:$0xff]  ;;  %v4505_v58 = vcombine.high %v4490_v53, %v4490_v53  ;;  %3199 = vmatpush1.bf16.msra.mxu0 %v3882_v62 }
  0x1f   :  { %v24_v57 = vld [vmem:[%s6104_s1 + $0x40] sm:$0xff]  ;;  %3239 = vmatprep.subr.bf16.mxu1 %v4139_v55 }
  0x20   :  { %v272_v60 = vld [vmem:[%s6104_s1 + $0x800] sm:$0xff]  ;;  %3218 = vmatprep.mubr.bf16.mxu0 %v4505_v58  ;;  %v3867_v0 = vcombine.high %v16_v56, %v24_v57  ;;  %v3866_v6 = vcombine.low %v16_v56, %v24_v57  ;;  %3240 = vmatpush1.bf16.msra.mxu1 %v4138_v63 }
  0x21   :  { %v280_v61 = vld [vmem:[%s6104_s1 + $0x840] sm:$0xff] }
  0x22   :  { %v4123_v1 = vcombine.high %v272_v60, %v280_v61  ;;  %v256_v2 = vld [vmem:[%s6104_s1 + $0x780] sm:$0xff]  ;;  %3200 = vmatprep.subr.bf16.mxu0 %v3867_v0  ;;  %v4122_v7 = vcombine.low %v272_v60, %v280_v61 }
  0x23   :  { %v264_v3 = vld [vmem:[%s6104_s1 + $0x7c0] sm:$0xff]  ;;  %3201 = vmatpush1.bf16.msra.mxu0 %v3866_v6  ;;  %v129_v6 = vld [vmem:[%s6104_s1 + $0x388] sm:$0xff] }
  0x24   :  { %v512_v4 = vld [vmem:[%s6104_s1 + $0xf80] sm:$0xff]  ;;  %v4107_v8 = vcombine.high %v256_v2, %v264_v3  ;;  %3241 = vmatprep.subr.bf16.mxu1 %v4123_v1  ;;  %v4106_v14 = vcombine.low %v256_v2, %v264_v3 }
  0x25   :  { %v520_v5 = vld [vmem:[%s6104_s1 + $0xfc0] sm:$0xff]  ;;  %3242 = vmatpush1.bf16.msra.mxu1 %v4122_v7  ;;  %v137_v7 = vld [vmem:[%s6104_s1 + $0x3c8] sm:$0xff] }
  0x26   :  { %v4363_v9 = vcombine.high %v512_v4, %v520_v5  ;;  %v240_v10 = vld [vmem:[%s6104_s1 + $0x700] sm:$0xff]  ;;  %3202 = vmatprep.subr.bf16.mxu0 %v4107_v8  ;;  %v4362_v15 = vcombine.low %v512_v4, %v520_v5  ;;  %v385_v8 = vld [vmem:[%s6104_s1 + $0xb88] sm:$0xff] }
  0x27   :  { %v248_v11 = vld [vmem:[%s6104_s1 + $0x740] sm:$0xff]  ;;  %3203 = vmatpush2.bf16.msra.mxu0 %v4106_v14  ;;  %v113_v14 = vld [vmem:[%s6104_s1 + $0x308] sm:$0xff] }
  0x28   :  { %v496_v12 = vld [vmem:[%s6104_s1 + $0xf00] sm:$0xff]  ;;  %v4091_v16 = vcombine.high %v240_v10, %v248_v11  ;;  %3243 = vmatprep.subr.bf16.mxu1 %v4363_v9  ;;  %v4090_v22 = vcombine.low %v240_v10, %v248_v11  ;;  %v393_v9 = vld [vmem:[%s6104_s1 + $0xbc8] sm:$0xff] }
  0x29   :  { %v504_v13 = vld [vmem:[%s6104_s1 + $0xf40] sm:$0xff]  ;;  %3244 = vmatpush2.bf16.msra.mxu1 %v4362_v15  ;;  %v121_v15 = vld [vmem:[%s6104_s1 + $0x348] sm:$0xff] }
  0x2a   :  { %v4347_v17 = vcombine.high %v496_v12, %v504_v13  ;;  %v224_v18 = vld [vmem:[%s6104_s1 + $0x680] sm:$0xff]  ;;  %3204 = vmatprep.subr.bf16.mxu0 %v4091_v16  ;;  %v4346_v23 = vcombine.low %v496_v12, %v504_v13  ;;  %v3981_v12 = vcombine.high %v129_v6, %v137_v7  ;;  %v4237_v13 = vcombine.high %v385_v8, %v393_v9 }
  0x2b   :  { %v232_v19 = vld [vmem:[%s6104_s1 + $0x6c0] sm:$0xff]  ;;  %3205 = vmatpush2.bf16.msra.mxu0 %v4090_v22  ;;  %v4635_v16 = vcombine.low %v4490_v53, %v4490_v53  ;;  %v3965_v22 = vcombine.high %v113_v14, %v121_v15 }
  0x2c   :  { %v480_v20 = vld [vmem:[%s6104_s1 + $0xe80] sm:$0xff]  ;;  %v4075_v24 = vcombine.high %v224_v18, %v232_v19  ;;  %3245 = vmatprep.subr.bf16.mxu1 %v4347_v17  ;;  %v4074_v30 = vcombine.low %v224_v18, %v232_v19  ;;  %v369_v17 = vld [vmem:[%s6104_s1 + $0xb08] sm:$0xff]  ;;  %v4645_v19 = vcombine.low %v4495_v54, %v4495_v54 }
  0x2d   :  { %v488_v21 = vld [vmem:[%s6104_s1 + $0xec0] sm:$0xff]  ;;  %3246 = vmatpush2.bf16.msra.mxu1 %v4346_v23  ;;  %v377_v18 = vld [vmem:[%s6104_s1 + $0xb48] sm:$0xff] }
  0x2e   :  { %v4331_v25 = vcombine.high %v480_v20, %v488_v21  ;;  %v208_v26 = vld [vmem:[%s6104_s1 + $0x600] sm:$0xff]  ;;  %3206 = vmatprep.subr.bf16.mxu0 %v4075_v24  ;;  %v4330_v31 = vcombine.low %v480_v20, %v488_v21  ;;  %v3980_v20 = vcombine.low %v129_v6, %v137_v7  ;;  %v4236_v21 = vcombine.low %v385_v8, %v393_v9  ;;  %v97_v23 = vld [vmem:[%s6104_s1 + $0x288] sm:$0xff] }
  0x2f   :  { %v216_v27 = vld [vmem:[%s6104_s1 + $0x640] sm:$0xff]  ;;  %3207 = vmatpush2.bf16.msra.mxu0 %v4074_v30  ;;  %v4221_v53 = vcombine.high %v369_v17, %v377_v18  ;;  %v105_v24 = vld [vmem:[%s6104_s1 + $0x2c8] sm:$0xff] }
  0x30   :  { %v464_v28 = vld [vmem:[%s6104_s1 + $0xe00] sm:$0xff]  ;;  %v4059_v32 = vcombine.high %v208_v26, %v216_v27  ;;  %3247 = vmatprep.subr.bf16.mxu1 %v4331_v25  ;;  %v4058_v38 = vcombine.low %v208_v26, %v216_v27  ;;  %v353_v54 = vld [vmem:[%s6104_s1 + $0xa88] sm:$0xff]  ;;  %v3964_v26 = vcombine.low %v113_v14, %v121_v15  ;;  %v4220_v27 = vcombine.low %v369_v17, %v377_v18 }
  0x31   :  { %v472_v29 = vld [vmem:[%s6104_s1 + $0xe40] sm:$0xff]  ;;  %3248 = vmatpush2.bf16.msra.mxu1 %v4330_v31  ;;  %v361_v25 = vld [vmem:[%s6104_s1 + $0xac8] sm:$0xff] }
  0x32   :  { %v4315_v33 = vcombine.high %v464_v28, %v472_v29  ;;  %v192_v34 = vld [vmem:[%s6104_s1 + $0x580] sm:$0xff]  ;;  %3208 = vmatprep.subr.bf16.mxu0 %v4059_v32  ;;  %v4314_v39 = vcombine.low %v464_v28, %v472_v29  ;;  %v3949_v28 = vcombine.high %v97_v23, %v105_v24  ;;  %v4205_v29 = vcombine.high %v353_v54, %v361_v25  ;;  %v81_v30 = vld [vmem:[%s6104_s1 + $0x208] sm:$0xff] }
  0x33   :  { %v200_v35 = vld [vmem:[%s6104_s1 + $0x5c0] sm:$0xff]  ;;  %3209 = vmatpush2.bf16.msra.mxu0 %v4058_v38  ;;  %v89_v31 = vld [vmem:[%s6104_s1 + $0x248] sm:$0xff] }
  0x34   :  { %v448_v36 = vld [vmem:[%s6104_s1 + $0xd80] sm:$0xff]  ;;  %v4043_v40 = vcombine.high %v192_v34, %v200_v35  ;;  %3249 = vmatprep.subr.bf16.mxu1 %v4315_v33  ;;  %v4042_v46 = vcombine.low %v192_v34, %v200_v35  ;;  %v337_v32 = vld [vmem:[%s6104_s1 + $0xa08] sm:$0xff]  ;;  %v3948_v34 = vcombine.low %v97_v23, %v105_v24  ;;  %v4204_v35 = vcombine.low %v353_v54, %v361_v25 }
  0x35   :  { %v456_v37 = vld [vmem:[%s6104_s1 + $0xdc0] sm:$0xff]  ;;  %3250 = vmatpush2.bf16.msra.mxu1 %v4314_v39  ;;  %v345_v33 = vld [vmem:[%s6104_s1 + $0xa48] sm:$0xff] }
  0x36   :  { %v4299_v41 = vcombine.high %v448_v36, %v456_v37  ;;  %v176_v42 = vld [vmem:[%s6104_s1 + $0x500] sm:$0xff]  ;;  %3210 = vmatprep.subr.bf16.mxu0 %v4043_v40  ;;  %v4298_v47 = vcombine.low %v448_v36, %v456_v37  ;;  %v3933_v36 = vcombine.high %v81_v30, %v89_v31  ;;  %v4189_v37 = vcombine.high %v337_v32, %v345_v33  ;;  %v65_v38 = vld [vmem:[%s6104_s1 + $0x188] sm:$0xff] }
  0x37   :  { %v184_v43 = vld [vmem:[%s6104_s1 + $0x540] sm:$0xff]  ;;  %3211 = vmatpush2.bf16.msra.mxu0 %v4042_v46  ;;  %v73_v39 = vld [vmem:[%s6104_s1 + $0x1c8] sm:$0xff] }
  0x38   :  { %v432_v44 = vld [vmem:[%s6104_s1 + $0xd00] sm:$0xff]  ;;  %v4027_v48 = vcombine.high %v176_v42, %v184_v43  ;;  %3251 = vmatprep.subr.bf16.mxu1 %v4299_v41  ;;  %v4026_v56 = vcombine.low %v176_v42, %v184_v43  ;;  %v321_v40 = vld [vmem:[%s6104_s1 + $0x988] sm:$0xff]  ;;  %v3932_v42 = vcombine.low %v81_v30, %v89_v31  ;;  %v4188_v43 = vcombine.low %v337_v32, %v345_v33 }
  0x39   :  { %v440_v45 = vld [vmem:[%s6104_s1 + $0xd40] sm:$0xff]  ;;  %3252 = vmatpush2.bf16.msra.mxu1 %v4298_v47  ;;  %v329_v41 = vld [vmem:[%s6104_s1 + $0x9c8] sm:$0xff] }
  0x3a   :  { %v4283_v49 = vcombine.high %v432_v44, %v440_v45  ;;  %v160_v50 = vld [vmem:[%s6104_s1 + $0x480] sm:$0xff]  ;;  %3212 = vmatprep.subr.bf16.mxu0 %v4027_v48  ;;  %v4282_v57 = vcombine.low %v432_v44, %v440_v45  ;;  %v3917_v44 = vcombine.high %v65_v38, %v73_v39  ;;  %v4173_v45 = vcombine.high %v321_v40, %v329_v41  ;;  %v49_v46 = vld [vmem:[%s6104_s1 + $0x108] sm:$0xff] }
  0x3b   :  { %v168_v51 = vld [vmem:[%s6104_s1 + $0x4c0] sm:$0xff]  ;;  %3213 = vmatpush2.bf16.msra.mxu0 %v4026_v56  ;;  %v57_v47 = vld [vmem:[%s6104_s1 + $0x148] sm:$0xff] }
  0x3c   :  { %v416_v52 = vld [vmem:[%s6104_s1 + $0xc80] sm:$0xff]  ;;  %v4011_v60 = vcombine.high %v160_v50, %v168_v51  ;;  %3253 = vmatprep.subr.bf16.mxu1 %v4283_v49  ;;  %v4010_v2 = vcombine.low %v160_v50, %v168_v51  ;;  %v305_v48 = vld [vmem:[%s6104_s1 + $0x908] sm:$0xff]  ;;  %v3916_v50 = vcombine.low %v65_v38, %v73_v39  ;;  %v4172_v51 = vcombine.low %v321_v40, %v329_v41 }
  0x3d   :  { %v424_v55 = vld [vmem:[%s6104_s1 + $0xcc0] sm:$0xff]  ;;  %3254 = vmatpush2.bf16.msra.mxu1 %v4282_v57  ;;  %v313_v49 = vld [vmem:[%s6104_s1 + $0x948] sm:$0xff] }
  0x3e   :  { %v4267_v61 = vcombine.high %v416_v52, %v424_v55  ;;  %v144_v62 = vld [vmem:[%s6104_s1 + $0x400] sm:$0xff]  ;;  %3214 = vmatprep.subr.bf16.mxu0 %v4011_v60  ;;  %v4266_v3 = vcombine.low %v416_v52, %v424_v55  ;;  %v3901_v52 = vcombine.high %v49_v46, %v57_v47  ;;  %v4157_v55 = vcombine.high %v305_v48, %v313_v49  ;;  %v33_v56 = vld [vmem:[%s6104_s1 + $0x88] sm:$0xff] }
  0x3f   :  { %v152_v63 = vld [vmem:[%s6104_s1 + $0x440] sm:$0xff]  ;;  %3215 = vmatpush2.bf16.msra.mxu0 %v4010_v2  ;;  %v41_v57 = vld [vmem:[%s6104_s1 + $0xc8] sm:$0xff] }
  0x40   :  { %v400_v0 = vld [vmem:[%s6104_s1 + $0xc00] sm:$0xff]  ;;  %v3995_v4 = vcombine.high %v144_v62, %v152_v63  ;;  %3255 = vmatprep.subr.bf16.mxu1 %v4267_v61  ;;  %v3994_v10 = vcombine.low %v144_v62, %v152_v63  ;;  %v289_v60 = vld [vmem:[%s6104_s1 + $0x888] sm:$0xff]  ;;  %v3900_v62 = vcombine.low %v49_v46, %v57_v47  ;;  %v4156_v63 = vcombine.low %v305_v48, %v313_v49 }
  0x41   :  { %v408_v1 = vld [vmem:[%s6104_s1 + $0xc40] sm:$0xff]  ;;  %3256 = vmatpush2.bf16.msra.mxu1 %v4266_v3  ;;  %v297_v61 = vld [vmem:[%s6104_s1 + $0x8c8] sm:$0xff]  ;;  %v3884_v6 = vcombine.low %v33_v56, %v41_v57 }
  0x42   :  { %v4251_v5 = vcombine.high %v400_v0, %v408_v1  ;;  %3216 = vmatprep.subr.bf16.mxu0 %v3995_v4  ;;  %v4250_v11 = vcombine.low %v400_v0, %v408_v1  ;;  %v3885_v0 = vcombine.high %v33_v56, %v41_v57  ;;  %v4141_v1 = vcombine.high %v289_v60, %v297_v61  ;;  %v17_v2 = vld [vmem:[%s6104_s1 + $0x8] sm:$0xff] }
  0x43   :  { %3217 = vmatpush2.bf16.msra.mxu0 %v3994_v10  ;;  %v25_v3 = vld [vmem:[%s6104_s1 + $0x48] sm:$0xff]  ;;  %v4140_v7 = vcombine.low %v289_v60, %v297_v61 }
  0x44   :  { %3257 = vmatprep.subr.bf16.mxu1 %v4251_v5  ;;  %3268 = vmatprep.subr.bf16.mxu0 %v3981_v12  ;;  %v273_v4 = vld [vmem:[%s6104_s1 + $0x808] sm:$0xff]  ;;  %v3869_v8 = vcombine.high %v17_v2, %v25_v3  ;;  %v3868_v14 = vcombine.low %v17_v2, %v25_v3 }
  0x45   :  { %3258 = vmatpush2.bf16.msra.mxu1 %v4250_v11  ;;  %v281_v5 = vld [vmem:[%s6104_s1 + $0x848] sm:$0xff] }
  0x46   :  { %3309 = vmatprep.subr.bf16.mxu1 %v4237_v13  ;;  %3219 = vmatmul.mubr.bf16.vlgmr.msra.gmra.mxu0 %v4635_v16  ;;  %v4125_v9 = vcombine.high %v273_v4, %v281_v5  ;;  %v257_v10 = vld [vmem:[%s6104_s1 + $0x788] sm:$0xff]  ;;  %v4124_v15 = vcombine.low %v273_v4, %v281_v5 }
  0x47   :  { %3269 = vmatpush1.bf16.msra.mxu0 %v3980_v20  ;;  %3300 = vmatprep.mubr.bf16.mxu0 %v4505_v58  ;;  %v265_v11 = vld [vmem:[%s6104_s1 + $0x7c8] sm:$0xff] }
  0x48   :  { %3260 = vmatmul.mubr.bf16.vlgmr.msra.gmra.mxu1 %v4645_v19  ;;  %3270 = vmatprep.subr.bf16.mxu0 %v3965_v22  ;;  %v513_v12 = vld [vmem:[%s6104_s1 + $0xf88] sm:$0xff]  ;;  %v4109_v17 = vcombine.high %v257_v10, %v265_v11  ;;  %v4108_v23 = vcombine.low %v257_v10, %v265_v11 }
  0x49   :  { %3310 = vmatpush1.bf16.msra.mxu1 %v4236_v21  ;;  %3341 = vmatprep.mubr.bf16.mxu1 %v4509_v59  ;;  %v521_v13 = vld [vmem:[%s6104_s1 + $0xfc8] sm:$0xff] }
  0x4a   :  { %3311 = vmatprep.subr.bf16.mxu1 %v4221_v53  ;;  %v4365_v18 = vcombine.high %v513_v12, %v521_v13  ;;  %v241_v20 = vld [vmem:[%s6104_s1 + $0x708] sm:$0xff]  ;;  %v4364_v24 = vcombine.low %v513_v12, %v521_v13 }
  0x4b   :  { %3271 = vmatpush1.bf16.msra.mxu0 %v3964_v26  ;;  %v249_v21 = vld [vmem:[%s6104_s1 + $0x748] sm:$0xff] }
  0x4c   :  { %3272 = vmatprep.subr.bf16.mxu0 %v3949_v28  ;;  %v497_v22 = vld [vmem:[%s6104_s1 + $0xf08] sm:$0xff]  ;;  %v4093_v54 = vcombine.high %v241_v20, %v249_v21  ;;  %v4092_v30 = vcombine.low %v241_v20, %v249_v21 }
  0x4d   :  { %3312 = vmatpush1.bf16.msra.mxu1 %v4220_v27  ;;  %v505_v53 = vld [vmem:[%s6104_s1 + $0xf48] sm:$0xff] }
  0x4e   :  { %3313 = vmatprep.subr.bf16.mxu1 %v4205_v29  ;;  %v4349_v25 = vcombine.high %v497_v22, %v505_v53  ;;  %v225_v26 = vld [vmem:[%s6104_s1 + $0x688] sm:$0xff]  ;;  %v4348_v31 = vcombine.low %v497_v22, %v505_v53 }
  0x4f   :  { %3273 = vmatpush1.bf16.msra.mxu0 %v3948_v34  ;;  %v233_v27 = vld [vmem:[%s6104_s1 + $0x6c8] sm:$0xff] }
  0x50   :  { %3274 = vmatprep.subr.bf16.mxu0 %v3933_v36  ;;  %v481_v28 = vld [vmem:[%s6104_s1 + $0xe88] sm:$0xff]  ;;  %v4077_v32 = vcombine.high %v225_v26, %v233_v27  ;;  %v4076_v38 = vcombine.low %v225_v26, %v233_v27 }
  0x51   :  { %3314 = vmatpush1.bf16.msra.mxu1 %v4204_v35  ;;  %v489_v29 = vld [vmem:[%s6104_s1 + $0xec8] sm:$0xff] }
  0x52   :  { %3315 = vmatprep.subr.bf16.mxu1 %v4189_v37  ;;  %v4333_v33 = vcombine.high %v481_v28, %v489_v29  ;;  %v209_v34 = vld [vmem:[%s6104_s1 + $0x608] sm:$0xff]  ;;  %v4332_v39 = vcombine.low %v481_v28, %v489_v29 }
  0x53   :  { %3275 = vmatpush1.bf16.msra.mxu0 %v3932_v42  ;;  %v217_v35 = vld [vmem:[%s6104_s1 + $0x648] sm:$0xff] }
  0x54   :  { %3276 = vmatprep.subr.bf16.mxu0 %v3917_v44  ;;  %v465_v36 = vld [vmem:[%s6104_s1 + $0xe08] sm:$0xff]  ;;  %v4061_v40 = vcombine.high %v209_v34, %v217_v35  ;;  %v4060_v46 = vcombine.low %v209_v34, %v217_v35 }
  0x55   :  { %3316 = vmatpush1.bf16.msra.mxu1 %v4188_v43  ;;  %v473_v37 = vld [vmem:[%s6104_s1 + $0xe48] sm:$0xff] }
  0x56   :  { %3317 = vmatprep.subr.bf16.mxu1 %v4173_v45  ;;  %v4317_v41 = vcombine.high %v465_v36, %v473_v37  ;;  %v193_v42 = vld [vmem:[%s6104_s1 + $0x588] sm:$0xff]  ;;  %v4316_v47 = vcombine.low %v465_v36, %v473_v37 }
  0x57   :  { %3277 = vmatpush1.bf16.msra.mxu0 %v3916_v50  ;;  %v201_v43 = vld [vmem:[%s6104_s1 + $0x5c8] sm:$0xff] }
  0x58   :  { %3278 = vmatprep.subr.bf16.mxu0 %v3901_v52  ;;  %v449_v44 = vld [vmem:[%s6104_s1 + $0xd88] sm:$0xff]  ;;  %v4045_v48 = vcombine.high %v193_v42, %v201_v43  ;;  %v4044_v56 = vcombine.low %v193_v42, %v201_v43 }
  0x59   :  { %3318 = vmatpush1.bf16.msra.mxu1 %v4172_v51  ;;  %v457_v45 = vld [vmem:[%s6104_s1 + $0xdc8] sm:$0xff] }
  0x5a   :  { %3319 = vmatprep.subr.bf16.mxu1 %v4157_v55  ;;  %v4301_v49 = vcombine.high %v449_v44, %v457_v45  ;;  %v177_v50 = vld [vmem:[%s6104_s1 + $0x508] sm:$0xff]  ;;  %v4300_v57 = vcombine.low %v449_v44, %v457_v45 }
  0x5b   :  { %3279 = vmatpush1.bf16.msra.mxu0 %v3900_v62  ;;  %v185_v51 = vld [vmem:[%s6104_s1 + $0x548] sm:$0xff] }
  0x5c   :  { %3280 = vmatprep.subr.bf16.mxu0 %v3885_v0  ;;  %v433_v52 = vld [vmem:[%s6104_s1 + $0xd08] sm:$0xff]  ;;  %v4029_v60 = vcombine.high %v177_v50, %v185_v51  ;;  %v4028_v2 = vcombine.low %v177_v50, %v185_v51 }
  0x5d   :  { %3320 = vmatpush1.bf16.msra.mxu1 %v4156_v63  ;;  %v441_v55 = vld [vmem:[%s6104_s1 + $0xd48] sm:$0xff] }
  0x5e   :  { %3321 = vmatprep.subr.bf16.mxu1 %v4141_v1  ;;  %v4285_v61 = vcombine.high %v433_v52, %v441_v55  ;;  %v161_v62 = vld [vmem:[%s6104_s1 + $0x488] sm:$0xff]  ;;  %v4284_v3 = vcombine.low %v433_v52, %v441_v55 }
  0x5f   :  { %3281 = vmatpush1.bf16.msra.mxu0 %v3884_v6  ;;  %v169_v63 = vld [vmem:[%s6104_s1 + $0x4c8] sm:$0xff] }
  0x60   :  { %3282 = vmatprep.subr.bf16.mxu0 %v3869_v8  ;;  %v417_v0 = vld [vmem:[%s6104_s1 + $0xc88] sm:$0xff]  ;;  %v4013_v4 = vcombine.high %v161_v62, %v169_v63  ;;  %v4012_v10 = vcombine.low %v161_v62, %v169_v63 }
  0x61   :  { %3322 = vmatpush1.bf16.msra.mxu1 %v4140_v7  ;;  %v425_v1 = vld [vmem:[%s6104_s1 + $0xcc8] sm:$0xff] }
  0x62   :  { %3323 = vmatprep.subr.bf16.mxu1 %v4125_v9  ;;  %v4269_v5 = vcombine.high %v417_v0, %v425_v1  ;;  %v145_v6 = vld [vmem:[%s6104_s1 + $0x408] sm:$0xff]  ;;  %v4268_v11 = vcombine.low %v417_v0, %v425_v1 }
  0x63   :  { %3283 = vmatpush1.bf16.msra.mxu0 %v3868_v14  ;;  %v153_v7 = vld [vmem:[%s6104_s1 + $0x448] sm:$0xff]  ;;  %v130_v14 = vld [vmem:[%s6104_s1 + $0x390] sm:$0xff] }
  0x64   :  { %3284 = vmatprep.subr.bf16.mxu0 %v4109_v17  ;;  %v401_v8 = vld [vmem:[%s6104_s1 + $0xc08] sm:$0xff]  ;;  %v3997_v12 = vcombine.high %v145_v6, %v153_v7  ;;  %v386_v17 = vld [vmem:[%s6104_s1 + $0xb90] sm:$0xff]  ;;  %v3996_v20 = vcombine.low %v145_v6, %v153_v7 }
  0x65   :  { %3324 = vmatpush1.bf16.msra.mxu1 %v4124_v15  ;;  %v409_v9 = vld [vmem:[%s6104_s1 + $0xc48] sm:$0xff]  ;;  %v138_v15 = vld [vmem:[%s6104_s1 + $0x3d0] sm:$0xff] }
  0x66   :  { %3325 = vmatprep.subr.bf16.mxu1 %v4365_v18  ;;  %v4253_v13 = vcombine.high %v401_v8, %v409_v9  ;;  %v394_v18 = vld [vmem:[%s6104_s1 + $0xbd0] sm:$0xff]  ;;  %v4252_v21 = vcombine.low %v401_v8, %v409_v9  ;;  %v3983_v22 = vcombine.high %v130_v14, %v138_v15  ;;  %v3982_v26 = vcombine.low %v130_v14, %v138_v15 }
  0x67   :  { %3285 = vmatpush2.bf16.msra.mxu0 %v4108_v23  ;;  %v4239_v53 = vcombine.high %v386_v17, %v394_v18  ;;  %v114_v23 = vld [vmem:[%s6104_s1 + $0x310] sm:$0xff]  ;;  %v4238_v27 = vcombine.low %v386_v17, %v394_v18 }
  0x68   :  { %3286 = vmatprep.subr.bf16.mxu0 %v4093_v54  ;;  %v370_v54 = vld [vmem:[%s6104_s1 + $0xb10] sm:$0xff] }
  0x69   :  { %3326 = vmatpush2.bf16.msra.mxu1 %v4364_v24  ;;  %v122_v24 = vld [vmem:[%s6104_s1 + $0x350] sm:$0xff] }
  0x6a   :  { %3327 = vmatprep.subr.bf16.mxu1 %v4349_v25  ;;  %v378_v25 = vld [vmem:[%s6104_s1 + $0xb50] sm:$0xff]  ;;  %v3967_v28 = vcombine.high %v114_v23, %v122_v24  ;;  %v3966_v34 = vcombine.low %v114_v23, %v122_v24 }
  0x6b   :  { %3287 = vmatpush2.bf16.msra.mxu0 %v4092_v30  ;;  %v4223_v29 = vcombine.high %v370_v54, %v378_v25  ;;  %v98_v30 = vld [vmem:[%s6104_s1 + $0x290] sm:$0xff]  ;;  %v4222_v35 = vcombine.low %v370_v54, %v378_v25 }
  0x6c   :  { %3288 = vmatprep.subr.bf16.mxu0 %v4077_v32  ;;  %v354_v32 = vld [vmem:[%s6104_s1 + $0xa90] sm:$0xff] }
  0x6d   :  { %3328 = vmatpush2.bf16.msra.mxu1 %v4348_v31  ;;  %v106_v31 = vld [vmem:[%s6104_s1 + $0x2d0] sm:$0xff] }
  0x6e   :  { %3329 = vmatprep.subr.bf16.mxu1 %v4333_v33  ;;  %v362_v33 = vld [vmem:[%s6104_s1 + $0xad0] sm:$0xff]  ;;  %v3951_v36 = vcombine.high %v98_v30, %v106_v31  ;;  %v3950_v42 = vcombine.low %v98_v30, %v106_v31 }
  0x6f   :  { %3289 = vmatpush2.bf16.msra.mxu0 %v4076_v38  ;;  %v4207_v37 = vcombine.high %v354_v32, %v362_v33  ;;  %v82_v38 = vld [vmem:[%s6104_s1 + $0x210] sm:$0xff]  ;;  %v4206_v43 = vcombine.low %v354_v32, %v362_v33 }
  0x70   :  { %3290 = vmatprep.subr.bf16.mxu0 %v4061_v40  ;;  %v338_v40 = vld [vmem:[%s6104_s1 + $0xa10] sm:$0xff] }
  0x71   :  { %3330 = vmatpush2.bf16.msra.mxu1 %v4332_v39  ;;  %v90_v39 = vld [vmem:[%s6104_s1 + $0x250] sm:$0xff] }
  0x72   :  { %3331 = vmatprep.subr.bf16.mxu1 %v4317_v41  ;;  %v346_v41 = vld [vmem:[%s6104_s1 + $0xa50] sm:$0xff]  ;;  %v3935_v44 = vcombine.high %v82_v38, %v90_v39  ;;  %v3934_v50 = vcombine.low %v82_v38, %v90_v39 }
  0x73   :  { %3291 = vmatpush2.bf16.msra.mxu0 %v4060_v46  ;;  %v4191_v45 = vcombine.high %v338_v40, %v346_v41  ;;  %v66_v46 = vld [vmem:[%s6104_s1 + $0x190] sm:$0xff]  ;;  %v4190_v51 = vcombine.low %v338_v40, %v346_v41 }
  0x74   :  { %3292 = vmatprep.subr.bf16.mxu0 %v4045_v48  ;;  %v322_v48 = vld [vmem:[%s6104_s1 + $0x990] sm:$0xff] }
  0x75   :  { %3332 = vmatpush2.bf16.msra.mxu1 %v4316_v47  ;;  %v74_v47 = vld [vmem:[%s6104_s1 + $0x1d0] sm:$0xff] }
  0x76   :  { %3333 = vmatprep.subr.bf16.mxu1 %v4301_v49  ;;  %v330_v49 = vld [vmem:[%s6104_s1 + $0x9d0] sm:$0xff]  ;;  %v3919_v52 = vcombine.high %v66_v46, %v74_v47  ;;  %v3918_v62 = vcombine.low %v66_v46, %v74_v47 }
  0x77   :  { %3293 = vmatpush2.bf16.msra.mxu0 %v4044_v56  ;;  %v4175_v55 = vcombine.high %v322_v48, %v330_v49  ;;  %v50_v56 = vld [vmem:[%s6104_s1 + $0x110] sm:$0xff]  ;;  %v4174_v63 = vcombine.low %v322_v48, %v330_v49 }
  0x78   :  { %3294 = vmatprep.subr.bf16.mxu0 %v4029_v60  ;;  %v306_v60 = vld [vmem:[%s6104_s1 + $0x910] sm:$0xff] }
  0x79   :  { %3334 = vmatpush2.bf16.msra.mxu1 %v4300_v57  ;;  %v58_v57 = vld [vmem:[%s6104_s1 + $0x150] sm:$0xff] }
  0x7a   :  { %3335 = vmatprep.subr.bf16.mxu1 %v4285_v61  ;;  %v314_v61 = vld [vmem:[%s6104_s1 + $0x950] sm:$0xff]  ;;  %v3903_v0 = vcombine.high %v50_v56, %v58_v57  ;;  %v3902_v6 = vcombine.low %v50_v56, %v58_v57 }
  0x7b   :  { %3295 = vmatpush2.bf16.msra.mxu0 %v4028_v2  ;;  %v4159_v1 = vcombine.high %v306_v60, %v314_v61  ;;  %v34_v2 = vld [vmem:[%s6104_s1 + $0x90] sm:$0xff]  ;;  %v4158_v7 = vcombine.low %v306_v60, %v314_v61 }
  0x7c   :  { %3296 = vmatprep.subr.bf16.mxu0 %v4013_v4  ;;  %v290_v4 = vld [vmem:[%s6104_s1 + $0x890] sm:$0xff] }
  0x7d   :  { %3336 = vmatpush2.bf16.msra.mxu1 %v4284_v3  ;;  %v42_v3 = vld [vmem:[%s6104_s1 + $0xd0] sm:$0xff] }
  0x7e   :  { %3337 = vmatprep.subr.bf16.mxu1 %v4269_v5  ;;  %v298_v5 = vld [vmem:[%s6104_s1 + $0x8d0] sm:$0xff]  ;;  %v3887_v8 = vcombine.high %v34_v2, %v42_v3  ;;  %v3886_v14 = vcombine.low %v34_v2, %v42_v3 }
  0x7f   :  { %3297 = vmatpush2.bf16.msra.mxu0 %v4012_v10  ;;  %v4143_v9 = vcombine.high %v290_v4, %v298_v5  ;;  %v18_v10 = vld [vmem:[%s6104_s1 + $0x10] sm:$0xff]  ;;  %v4142_v15 = vcombine.low %v290_v4, %v298_v5 }
  0x80   :  { %3298 = vmatprep.subr.bf16.mxu0 %v3997_v12  ;;  %v274_v12 = vld [vmem:[%s6104_s1 + $0x810] sm:$0xff] }
  0x81   :  { %3338 = vmatpush2.bf16.msra.mxu1 %v4268_v11  ;;  %v26_v11 = vld [vmem:[%s6104_s1 + $0x50] sm:$0xff] }
  0x82   :  { %3339 = vmatprep.subr.bf16.mxu1 %v4253_v13  ;;  %v282_v13 = vld [vmem:[%s6104_s1 + $0x850] sm:$0xff]  ;;  %v3871_v17 = vcombine.high %v18_v10, %v26_v11  ;;  %v3870_v23 = vcombine.low %v18_v10, %v26_v11 }
  0x83   :  { %3299 = vmatpush2.bf16.msra.mxu0 %v3996_v20  ;;  %v4127_v18 = vcombine.high %v274_v12, %v282_v13  ;;  %v258_v20 = vld [vmem:[%s6104_s1 + $0x790] sm:$0xff]  ;;  %v4126_v24 = vcombine.low %v274_v12, %v282_v13 }
  0x84   :  { %3350 = vmatprep.subr.bf16.mxu0 %v3983_v22  ;;  %v514_v22 = vld [vmem:[%s6104_s1 + $0xf90] sm:$0xff] }
  0x85   :  { %3340 = vmatpush2.bf16.msra.mxu1 %v4252_v21  ;;  %v266_v21 = vld [vmem:[%s6104_s1 + $0x7d0] sm:$0xff] }
  0x86   :  { %3391 = vmatprep.subr.bf16.mxu1 %v4239_v53  ;;  %3301 = vmatmul.mubr.bf16.vlgmr.msra.gmra.mxu0 %v4635_v16  ;;  %v522_v53 = vld [vmem:[%s6104_s1 + $0xfd0] sm:$0xff]  ;;  %v4111_v54 = vcombine.high %v258_v20, %v266_v21  ;;  %v4110_v30 = vcombine.low %v258_v20, %v266_v21 }
  0x87   :  { %3351 = vmatpush1.bf16.msra.mxu0 %v3982_v26  ;;  %3382 = vmatprep.mubr.bf16.mxu0 %v4505_v58  ;;  %v4367_v25 = vcombine.high %v514_v22, %v522_v53  ;;  %v242_v26 = vld [vmem:[%s6104_s1 + $0x710] sm:$0xff]  ;;  %v4366_v31 = vcombine.low %v514_v22, %v522_v53 }
  0x88   :  { %3342 = vmatmul.mubr.bf16.vlgmr.msra.gmra.mxu1 %v4645_v19  ;;  %3352 = vmatprep.subr.bf16.mxu0 %v3967_v28  ;;  %v498_v28 = vld [vmem:[%s6104_s1 + $0xf10] sm:$0xff] }
  0x89   :  { %3392 = vmatpush1.bf16.msra.mxu1 %v4238_v27  ;;  %3423 = vmatprep.mubr.bf16.mxu1 %v4509_v59  ;;  %v250_v27 = vld [vmem:[%s6104_s1 + $0x750] sm:$0xff] }
  0x8a   :  { %3393 = vmatprep.subr.bf16.mxu1 %v4223_v29  ;;  %v506_v29 = vld [vmem:[%s6104_s1 + $0xf50] sm:$0xff]  ;;  %v4095_v32 = vcombine.high %v242_v26, %v250_v27  ;;  %v4094_v38 = vcombine.low %v242_v26, %v250_v27 }
  0x8b   :  { %3353 = vmatpush1.bf16.msra.mxu0 %v3966_v34  ;;  %v4351_v33 = vcombine.high %v498_v28, %v506_v29  ;;  %v226_v34 = vld [vmem:[%s6104_s1 + $0x690] sm:$0xff]  ;;  %v4350_v39 = vcombine.low %v498_v28, %v506_v29 }
  0x8c   :  { %3354 = vmatprep.subr.bf16.mxu0 %v3951_v36  ;;  %v482_v36 = vld [vmem:[%s6104_s1 + $0xe90] sm:$0xff] }
  0x8d   :  { %3394 = vmatpush1.bf16.msra.mxu1 %v4222_v35  ;;  %v234_v35 = vld [vmem:[%s6104_s1 + $0x6d0] sm:$0xff] }
  0x8e   :  { %3395 = vmatprep.subr.bf16.mxu1 %v4207_v37  ;;  %v490_v37 = vld [vmem:[%s6104_s1 + $0xed0] sm:$0xff]  ;;  %v4079_v40 = vcombine.high %v226_v34, %v234_v35  ;;  %v4078_v46 = vcombine.low %v226_v34, %v234_v35 }
  0x8f   :  { %3355 = vmatpush1.bf16.msra.mxu0 %v3950_v42  ;;  %v4335_v41 = vcombine.high %v482_v36, %v490_v37  ;;  %v210_v42 = vld [vmem:[%s6104_s1 + $0x610] sm:$0xff]  ;;  %v4334_v47 = vcombine.low %v482_v36, %v490_v37 }
  0x90   :  { %3356 = vmatprep.subr.bf16.mxu0 %v3935_v44  ;;  %v466_v44 = vld [vmem:[%s6104_s1 + $0xe10] sm:$0xff] }
  0x91   :  { %3396 = vmatpush1.bf16.msra.mxu1 %v4206_v43  ;;  %v218_v43 = vld [vmem:[%s6104_s1 + $0x650] sm:$0xff] }
  0x92   :  { %3397 = vmatprep.subr.bf16.mxu1 %v4191_v45  ;;  %v474_v45 = vld [vmem:[%s6104_s1 + $0xe50] sm:$0xff]  ;;  %v4063_v48 = vcombine.high %v210_v42, %v218_v43  ;;  %v4062_v56 = vcombine.low %v210_v42, %v218_v43 }
  0x93   :  { %3357 = vmatpush1.bf16.msra.mxu0 %v3934_v50  ;;  %v4319_v49 = vcombine.high %v466_v44, %v474_v45  ;;  %v194_v50 = vld [vmem:[%s6104_s1 + $0x590] sm:$0xff]  ;;  %v4318_v57 = vcombine.low %v466_v44, %v474_v45 }
  0x94   :  { %3358 = vmatprep.subr.bf16.mxu0 %v3919_v52  ;;  %v450_v52 = vld [vmem:[%s6104_s1 + $0xd90] sm:$0xff] }
  0x95   :  { %3398 = vmatpush1.bf16.msra.mxu1 %v4190_v51  ;;  %v202_v51 = vld [vmem:[%s6104_s1 + $0x5d0] sm:$0xff] }
  0x96   :  { %3399 = vmatprep.subr.bf16.mxu1 %v4175_v55  ;;  %v458_v55 = vld [vmem:[%s6104_s1 + $0xdd0] sm:$0xff]  ;;  %v4047_v60 = vcombine.high %v194_v50, %v202_v51  ;;  %v4046_v2 = vcombine.low %v194_v50, %v202_v51 }
  0x97   :  { %3359 = vmatpush1.bf16.msra.mxu0 %v3918_v62  ;;  %v4303_v61 = vcombine.high %v450_v52, %v458_v55  ;;  %v178_v62 = vld [vmem:[%s6104_s1 + $0x510] sm:$0xff]  ;;  %v4302_v3 = vcombine.low %v450_v52, %v458_v55 }
  0x98   :  { %3360 = vmatprep.subr.bf16.mxu0 %v3903_v0  ;;  %v434_v0 = vld [vmem:[%s6104_s1 + $0xd10] sm:$0xff] }
  0x99   :  { %3400 = vmatpush1.bf16.msra.mxu1 %v4174_v63  ;;  %v186_v63 = vld [vmem:[%s6104_s1 + $0x550] sm:$0xff] }
  0x9a   :  { %3401 = vmatprep.subr.bf16.mxu1 %v4159_v1  ;;  %v442_v1 = vld [vmem:[%s6104_s1 + $0xd50] sm:$0xff]  ;;  %v4031_v4 = vcombine.high %v178_v62, %v186_v63  ;;  %v4030_v10 = vcombine.low %v178_v62, %v186_v63 }
  0x9b   :  { %3361 = vmatpush1.bf16.msra.mxu0 %v3902_v6  ;;  %v4287_v5 = vcombine.high %v434_v0, %v442_v1  ;;  %v162_v6 = vld [vmem:[%s6104_s1 + $0x490] sm:$0xff]  ;;  %v4286_v11 = vcombine.low %v434_v0, %v442_v1 }
  0x9c   :  { %3362 = vmatprep.subr.bf16.mxu0 %v3887_v8  ;;  %v418_v8 = vld [vmem:[%s6104_s1 + $0xc90] sm:$0xff] }
  0x9d   :  { %3402 = vmatpush1.bf16.msra.mxu1 %v4158_v7  ;;  %v170_v7 = vld [vmem:[%s6104_s1 + $0x4d0] sm:$0xff] }
  0x9e   :  { %3403 = vmatprep.subr.bf16.mxu1 %v4143_v9  ;;  %v426_v9 = vld [vmem:[%s6104_s1 + $0xcd0] sm:$0xff]  ;;  %v4015_v12 = vcombine.high %v162_v6, %v170_v7  ;;  %v4014_v20 = vcombine.low %v162_v6, %v170_v7 }
  0x9f   :  { %3363 = vmatpush1.bf16.msra.mxu0 %v3886_v14  ;;  %v4271_v13 = vcombine.high %v418_v8, %v426_v9  ;;  %v146_v14 = vld [vmem:[%s6104_s1 + $0x410] sm:$0xff]  ;;  %v4270_v21 = vcombine.low %v418_v8, %v426_v9 }
  0xa0   :  { %3364 = vmatprep.subr.bf16.mxu0 %v3871_v17  ;;  %v402_v17 = vld [vmem:[%s6104_s1 + $0xc10] sm:$0xff] }
  0xa1   :  { %3404 = vmatpush1.bf16.msra.mxu1 %v4142_v15  ;;  %v154_v15 = vld [vmem:[%s6104_s1 + $0x450] sm:$0xff] }
  0xa2   :  { %3405 = vmatprep.subr.bf16.mxu1 %v4127_v18  ;;  %v410_v18 = vld [vmem:[%s6104_s1 + $0xc50] sm:$0xff]  ;;  %v3999_v22 = vcombine.high %v146_v14, %v154_v15  ;;  %v3998_v26 = vcombine.low %v146_v14, %v154_v15 }
  0xa3   :  { %3365 = vmatpush1.bf16.msra.mxu0 %v3870_v23  ;;  %v4255_v53 = vcombine.high %v402_v17, %v410_v18  ;;  %v131_v23 = vld [vmem:[%s6104_s1 + $0x398] sm:$0xff]  ;;  %v4254_v27 = vcombine.low %v402_v17, %v410_v18 }
  0xa4   :  { %3366 = vmatprep.subr.bf16.mxu0 %v4111_v54  ;;  %v387_v54 = vld [vmem:[%s6104_s1 + $0xb98] sm:$0xff] }
  0xa5   :  { %3406 = vmatpush1.bf16.msra.mxu1 %v4126_v24  ;;  %v139_v24 = vld [vmem:[%s6104_s1 + $0x3d8] sm:$0xff] }
  0xa6   :  { %3407 = vmatprep.subr.bf16.mxu1 %v4367_v25  ;;  %v395_v25 = vld [vmem:[%s6104_s1 + $0xbd8] sm:$0xff]  ;;  %v3985_v28 = vcombine.high %v131_v23, %v139_v24  ;;  %v3984_v34 = vcombine.low %v131_v23, %v139_v24 }
  0xa7   :  { %3367 = vmatpush2.bf16.msra.mxu0 %v4110_v30  ;;  %v4241_v29 = vcombine.high %v387_v54, %v395_v25  ;;  %v115_v30 = vld [vmem:[%s6104_s1 + $0x318] sm:$0xff]  ;;  %v4240_v35 = vcombine.low %v387_v54, %v395_v25 }
  0xa8   :  { %3368 = vmatprep.subr.bf16.mxu0 %v4095_v32  ;;  %v371_v32 = vld [vmem:[%s6104_s1 + $0xb18] sm:$0xff] }
  0xa9   :  { %3408 = vmatpush2.bf16.msra.mxu1 %v4366_v31  ;;  %v123_v31 = vld [vmem:[%s6104_s1 + $0x358] sm:$0xff] }
  0xaa   :  { %3409 = vmatprep.subr.bf16.mxu1 %v4351_v33  ;;  %v379_v33 = vld [vmem:[%s6104_s1 + $0xb58] sm:$0xff]  ;;  %v3969_v36 = vcombine.high %v115_v30, %v123_v31  ;;  %v3968_v42 = vcombine.low %v115_v30, %v123_v31 }
  0xab   :  { %3369 = vmatpush2.bf16.msra.mxu0 %v4094_v38  ;;  %v4225_v37 = vcombine.high %v371_v32, %v379_v33  ;;  %v99_v38 = vld [vmem:[%s6104_s1 + $0x298] sm:$0xff]  ;;  %v4224_v43 = vcombine.low %v371_v32, %v379_v33 }
  0xac   :  { %3370 = vmatprep.subr.bf16.mxu0 %v4079_v40  ;;  %v355_v40 = vld [vmem:[%s6104_s1 + $0xa98] sm:$0xff] }
  0xad   :  { %3410 = vmatpush2.bf16.msra.mxu1 %v4350_v39  ;;  %v107_v39 = vld [vmem:[%s6104_s1 + $0x2d8] sm:$0xff] }
  0xae   :  { %3411 = vmatprep.subr.bf16.mxu1 %v4335_v41  ;;  %v363_v41 = vld [vmem:[%s6104_s1 + $0xad8] sm:$0xff]  ;;  %v3953_v44 = vcombine.high %v99_v38, %v107_v39  ;;  %v3952_v50 = vcombine.low %v99_v38, %v107_v39 }
  0xaf   :  { %3371 = vmatpush2.bf16.msra.mxu0 %v4078_v46  ;;  %v4209_v45 = vcombine.high %v355_v40, %v363_v41  ;;  %v83_v46 = vld [vmem:[%s6104_s1 + $0x218] sm:$0xff]  ;;  %v4208_v51 = vcombine.low %v355_v40, %v363_v41 }
  0xb0   :  { %3372 = vmatprep.subr.bf16.mxu0 %v4063_v48  ;;  %v339_v48 = vld [vmem:[%s6104_s1 + $0xa18] sm:$0xff] }
  0xb1   :  { %3412 = vmatpush2.bf16.msra.mxu1 %v4334_v47  ;;  %v91_v47 = vld [vmem:[%s6104_s1 + $0x258] sm:$0xff] }
  0xb2   :  { %3413 = vmatprep.subr.bf16.mxu1 %v4319_v49  ;;  %v347_v49 = vld [vmem:[%s6104_s1 + $0xa58] sm:$0xff]  ;;  %v3937_v52 = vcombine.high %v83_v46, %v91_v47  ;;  %v3936_v62 = vcombine.low %v83_v46, %v91_v47 }
  0xb3   :  { %3373 = vmatpush2.bf16.msra.mxu0 %v4062_v56  ;;  %v4193_v55 = vcombine.high %v339_v48, %v347_v49  ;;  %v67_v56 = vld [vmem:[%s6104_s1 + $0x198] sm:$0xff]  ;;  %v4192_v63 = vcombine.low %v339_v48, %v347_v49 }
  0xb4   :  { %3374 = vmatprep.subr.bf16.mxu0 %v4047_v60  ;;  %v323_v60 = vld [vmem:[%s6104_s1 + $0x998] sm:$0xff] }
  0xb5   :  { %3414 = vmatpush2.bf16.msra.mxu1 %v4318_v57  ;;  %v75_v57 = vld [vmem:[%s6104_s1 + $0x1d8] sm:$0xff] }
  0xb6   :  { %3415 = vmatprep.subr.bf16.mxu1 %v4303_v61  ;;  %v331_v61 = vld [vmem:[%s6104_s1 + $0x9d8] sm:$0xff]  ;;  %v3921_v0 = vcombine.high %v67_v56, %v75_v57  ;;  %v3920_v6 = vcombine.low %v67_v56, %v75_v57 }
  0xb7   :  { %3375 = vmatpush2.bf16.msra.mxu0 %v4046_v2  ;;  %v4177_v1 = vcombine.high %v323_v60, %v331_v61  ;;  %v51_v2 = vld [vmem:[%s6104_s1 + $0x118] sm:$0xff]  ;;  %v4176_v7 = vcombine.low %v323_v60, %v331_v61 }
  0xb8   :  { %3376 = vmatprep.subr.bf16.mxu0 %v4031_v4  ;;  %v307_v4 = vld [vmem:[%s6104_s1 + $0x918] sm:$0xff] }
  0xb9   :  { %3416 = vmatpush2.bf16.msra.mxu1 %v4302_v3  ;;  %v59_v3 = vld [vmem:[%s6104_s1 + $0x158] sm:$0xff] }
  0xba   :  { %3417 = vmatprep.subr.bf16.mxu1 %v4287_v5  ;;  %v315_v5 = vld [vmem:[%s6104_s1 + $0x958] sm:$0xff]  ;;  %v3905_v8 = vcombine.high %v51_v2, %v59_v3  ;;  %v3904_v14 = vcombine.low %v51_v2, %v59_v3 }
  0xbb   :  { %3377 = vmatpush2.bf16.msra.mxu0 %v4030_v10  ;;  %v4161_v9 = vcombine.high %v307_v4, %v315_v5  ;;  %v35_v10 = vld [vmem:[%s6104_s1 + $0x98] sm:$0xff]  ;;  %v4160_v15 = vcombine.low %v307_v4, %v315_v5 }
  0xbc   :  { %3378 = vmatprep.subr.bf16.mxu0 %v4015_v12  ;;  %v291_v12 = vld [vmem:[%s6104_s1 + $0x898] sm:$0xff] }
  0xbd   :  { %3418 = vmatpush2.bf16.msra.mxu1 %v4286_v11  ;;  %v43_v11 = vld [vmem:[%s6104_s1 + $0xd8] sm:$0xff] }
  0xbe   :  { %3419 = vmatprep.subr.bf16.mxu1 %v4271_v13  ;;  %v299_v13 = vld [vmem:[%s6104_s1 + $0x8d8] sm:$0xff]  ;;  %v3889_v17 = vcombine.high %v35_v10, %v43_v11  ;;  %v3888_v23 = vcombine.low %v35_v10, %v43_v11 }
  0xbf   :  { %3379 = vmatpush2.bf16.msra.mxu0 %v4014_v20  ;;  %v4145_v18 = vcombine.high %v291_v12, %v299_v13  ;;  %v19_v20 = vld [vmem:[%s6104_s1 + $0x18] sm:$0xff]  ;;  %v4144_v24 = vcombine.low %v291_v12, %v299_v13 }
  0xc0   :  { %3380 = vmatprep.subr.bf16.mxu0 %v3999_v22  ;;  %v275_v22 = vld [vmem:[%s6104_s1 + $0x818] sm:$0xff] }
  0xc1   :  { %3420 = vmatpush2.bf16.msra.mxu1 %v4270_v21  ;;  %v27_v21 = vld [vmem:[%s6104_s1 + $0x58] sm:$0xff] }
  0xc2   :  { %3421 = vmatprep.subr.bf16.mxu1 %v4255_v53  ;;  %v283_v53 = vld [vmem:[%s6104_s1 + $0x858] sm:$0xff]  ;;  %v3873_v54 = vcombine.high %v19_v20, %v27_v21  ;;  %v3872_v30 = vcombine.low %v19_v20, %v27_v21  ;;  %v532_v21 = vlaneseq }
  0xc3   :  { %3381 = vmatpush2.bf16.msra.mxu0 %v3998_v26  ;;  %v4129_v25 = vcombine.high %v275_v22, %v283_v53  ;;  %v259_v26 = vld [vmem:[%s6104_s1 + $0x798] sm:$0xff]  ;;  %v4128_v31 = vcombine.low %v275_v22, %v283_v53 }
  0xc4   :  { %3432 = vmatprep.subr.bf16.mxu0 %v3985_v28  ;;  %v515_v28 = vld [vmem:[%s6104_s1 + $0xf98] sm:$0xff] }
  0xc5   :  { %3422 = vmatpush2.bf16.msra.mxu1 %v4254_v27  ;;  %v267_v27 = vld [vmem:[%s6104_s1 + $0x7d8] sm:$0xff] }
  0xc6   :  { %3473 = vmatprep.subr.bf16.mxu1 %v4241_v29  ;;  %3383 = vmatmul.mubr.bf16.vlgmr.msra.gmra.mxu0 %v4635_v16  ;;  %v523_v29 = vld [vmem:[%s6104_s1 + $0xfd8] sm:$0xff]  ;;  %v4113_v32 = vcombine.high %v259_v26, %v267_v27  ;;  %v4112_v38 = vcombine.low %v259_v26, %v267_v27 }
  0xc7   :  { %3433 = vmatpush1.bf16.msra.mxu0 %v3984_v34  ;;  %3464 = vmatprep.mubr.bf16.mxu0 %v4505_v58  ;;  %v4369_v33 = vcombine.high %v515_v28, %v523_v29  ;;  %v243_v34 = vld [vmem:[%s6104_s1 + $0x718] sm:$0xff]  ;;  %v4368_v39 = vcombine.low %v515_v28, %v523_v29  ;;  %v5211_v28 = vshrl.u32 %v532_v21, 7 }
  0xc8   :  { %3424 = vmatmul.mubr.bf16.vlgmr.msra.gmra.mxu1 %v4645_v19  ;;  %3434 = vmatprep.subr.bf16.mxu0 %v3969_v36  ;;  %v499_v36 = vld [vmem:[%s6104_s1 + $0xf18] sm:$0xff] }
  0xc9   :  { %3474 = vmatpush1.bf16.msra.mxu1 %v4240_v35  ;;  %3505 = vmatprep.mubr.bf16.mxu1 %v4509_v59  ;;  %v251_v35 = vld [vmem:[%s6104_s1 + $0x758] sm:$0xff] }
  0xca   :  { %3475 = vmatprep.subr.bf16.mxu1 %v4225_v37  ;;  %v507_v37 = vld [vmem:[%s6104_s1 + $0xf58] sm:$0xff]  ;;  %v4097_v40 = vcombine.high %v243_v34, %v251_v35  ;;  %v4096_v46 = vcombine.low %v243_v34, %v251_v35  ;;  %v388_v34 = vld [vmem:[%s6104_s1 + $0xba0] sm:$0xff] }
  0xcb   :  { %3435 = vmatpush1.bf16.msra.mxu0 %v3968_v42  ;;  %v4353_v41 = vcombine.high %v499_v36, %v507_v37  ;;  %v227_v42 = vld [vmem:[%s6104_s1 + $0x698] sm:$0xff]  ;;  %v4352_v47 = vcombine.low %v499_v36, %v507_v37  ;;  %v396_v35 = vld [vmem:[%s6104_s1 + $0xbe0] sm:$0xff]  ;;  %v534_v37 = vsub.s32 0, %v5211_v28 }
  0xcc   :  { %3436 = vmatprep.subr.bf16.mxu0 %v3953_v44  ;;  %v483_v44 = vld [vmem:[%s6104_s1 + $0xe98] sm:$0xff] }
  0xcd   :  { %3476 = vmatpush1.bf16.msra.mxu1 %v4224_v43  ;;  %v235_v43 = vld [vmem:[%s6104_s1 + $0x6d8] sm:$0xff] }
  0xce   :  { %3477 = vmatprep.subr.bf16.mxu1 %v4209_v45  ;;  %v491_v45 = vld [vmem:[%s6104_s1 + $0xed8] sm:$0xff]  ;;  %v4081_v48 = vcombine.high %v227_v42, %v235_v43  ;;  %v4080_v56 = vcombine.low %v227_v42, %v235_v43  ;;  %v538_v42 = vsub.s32 1, %v5211_v28  ;;  %v116_v43 = vld [vmem:[%s6104_s1 + $0x320] sm:$0xff] }
  0xcf   :  { %3437 = vmatpush1.bf16.msra.mxu0 %v3952_v50  ;;  %v4337_v49 = vcombine.high %v483_v44, %v491_v45  ;;  %v211_v50 = vld [vmem:[%s6104_s1 + $0x618] sm:$0xff]  ;;  %v4336_v57 = vcombine.low %v483_v44, %v491_v45  ;;  %v124_v44 = vld [vmem:[%s6104_s1 + $0x360] sm:$0xff] }
  0xd0   :  { %3438 = vmatprep.subr.bf16.mxu0 %v3937_v52  ;;  %v467_v52 = vld [vmem:[%s6104_s1 + $0xe18] sm:$0xff]  ;;  %v372_v45 = vld [vmem:[%s6104_s1 + $0xb20] sm:$0xff] }
  0xd1   :  { %3478 = vmatpush1.bf16.msra.mxu1 %v4208_v51  ;;  %v219_v51 = vld [vmem:[%s6104_s1 + $0x658] sm:$0xff] }
  0xd2   :  { %3479 = vmatprep.subr.bf16.mxu1 %v4193_v55  ;;  %v475_v55 = vld [vmem:[%s6104_s1 + $0xe58] sm:$0xff]  ;;  %v4065_v60 = vcombine.high %v211_v50, %v219_v51  ;;  %v4064_v2 = vcombine.low %v211_v50, %v219_v51  ;;  %v3971_v50 = vcombine.high %v116_v43, %v124_v44 }
  0xd3   :  { %3439 = vmatpush1.bf16.msra.mxu0 %v3936_v62  ;;  %v4321_v61 = vcombine.high %v467_v52, %v475_v55  ;;  %v195_v62 = vld [vmem:[%s6104_s1 + $0x598] sm:$0xff]  ;;  %v4320_v3 = vcombine.low %v467_v52, %v475_v55  ;;  %v100_v55 = vld [vmem:[%s6104_s1 + $0x2a0] sm:$0xff] }
  0xd4   :  { %3440 = vmatprep.subr.bf16.mxu0 %v3921_v0  ;;  %v451_v0 = vld [vmem:[%s6104_s1 + $0xd98] sm:$0xff] }
  0xd5   :  { %3480 = vmatpush1.bf16.msra.mxu1 %v4192_v63  ;;  %v203_v63 = vld [vmem:[%s6104_s1 + $0x5d8] sm:$0xff] }
  0xd6   :  { %3481 = vmatprep.subr.bf16.mxu1 %v4177_v1  ;;  %v459_v1 = vld [vmem:[%s6104_s1 + $0xdd8] sm:$0xff]  ;;  %v4049_v4 = vcombine.high %v195_v62, %v203_v63  ;;  %v4048_v10 = vcombine.low %v195_v62, %v203_v63 }
  0xd7   :  { %3441 = vmatpush1.bf16.msra.mxu0 %v3920_v6  ;;  %v4305_v5 = vcombine.high %v451_v0, %v459_v1  ;;  %v179_v6 = vld [vmem:[%s6104_s1 + $0x518] sm:$0xff]  ;;  %v4304_v11 = vcombine.low %v451_v0, %v459_v1  ;;  %v3970_v0 = vcombine.low %v116_v43, %v124_v44  ;;  %v292_v43 = vld [vmem:[%s6104_s1 + $0x8a0] sm:$0xff] }
  0xd8   :  { %3442 = vmatprep.subr.bf16.mxu0 %v3905_v8  ;;  %v435_v8 = vld [vmem:[%s6104_s1 + $0xd18] sm:$0xff]  ;;  %v300_v44 = vld [vmem:[%s6104_s1 + $0x8e0] sm:$0xff] }
  0xd9   :  { %3482 = vmatpush1.bf16.msra.mxu1 %v4176_v7  ;;  %v187_v7 = vld [vmem:[%s6104_s1 + $0x558] sm:$0xff] }
  0xda   :  { %3483 = vmatprep.subr.bf16.mxu1 %v4161_v9  ;;  %v443_v9 = vld [vmem:[%s6104_s1 + $0xd58] sm:$0xff]  ;;  %v4033_v12 = vcombine.high %v179_v6, %v187_v7  ;;  %v4032_v20 = vcombine.low %v179_v6, %v187_v7 }
  0xdb   :  { %3443 = vmatpush1.bf16.msra.mxu0 %v3904_v14  ;;  %v4289_v13 = vcombine.high %v435_v8, %v443_v9  ;;  %v163_v14 = vld [vmem:[%s6104_s1 + $0x498] sm:$0xff]  ;;  %v4288_v22 = vcombine.low %v435_v8, %v443_v9  ;;  %v84_v8 = vld [vmem:[%s6104_s1 + $0x220] sm:$0xff] }
  0xdc   :  { %3444 = vmatprep.subr.bf16.mxu0 %v3889_v17  ;;  %v419_v17 = vld [vmem:[%s6104_s1 + $0xc98] sm:$0xff]  ;;  %v92_v9 = vld [vmem:[%s6104_s1 + $0x260] sm:$0xff] }
  0xdd   :  { %3484 = vmatpush1.bf16.msra.mxu1 %v4160_v15  ;;  %v171_v15 = vld [vmem:[%s6104_s1 + $0x4d8] sm:$0xff] }
  0xde   :  { %3485 = vmatprep.subr.bf16.mxu1 %v4145_v18  ;;  %v427_v18 = vld [vmem:[%s6104_s1 + $0xcd8] sm:$0xff]  ;;  %v4017_v53 = vcombine.high %v163_v14, %v171_v15  ;;  %v4016_v27 = vcombine.low %v163_v14, %v171_v15 }
  0xdf   :  { %3445 = vmatpush1.bf16.msra.mxu0 %v3888_v23  ;;  %v4273_v23 = vcombine.high %v419_v17, %v427_v18  ;;  %v411_v26 = vld [vmem:[%s6104_s1 + $0xc58] sm:$0xff]  ;;  %v4272_v29 = vcombine.low %v419_v17, %v427_v18 }
  0xe0   :  { %3446 = vmatprep.subr.bf16.mxu0 %v3873_v54  ;;  %v155_v54 = vld [vmem:[%s6104_s1 + $0x458] sm:$0xff] }
  0xe1   :  { %3486 = vmatpush1.bf16.msra.mxu1 %v4144_v24  ;;  %v147_v24 = vld [vmem:[%s6104_s1 + $0x418] sm:$0xff] }
  0xe2   :  { %3487 = vmatprep.subr.bf16.mxu1 %v4129_v25  ;;  %v403_v25 = vld [vmem:[%s6104_s1 + $0xc18] sm:$0xff]  ;;  %v4000_v36 = vcombine.low %v147_v24, %v155_v54 }
  0xe3   :  { %3447 = vmatpush1.bf16.msra.mxu0 %v3872_v30  ;;  %v4001_v30 = vcombine.high %v147_v24, %v155_v54  ;;  %v324_v24 = vld [vmem:[%s6104_s1 + $0x9a0] sm:$0xff] }
  0xe4   :  { %3448 = vmatprep.subr.bf16.mxu0 %v4113_v32  ;;  %v132_v32 = vld [vmem:[%s6104_s1 + $0x3a0] sm:$0xff] }
  0xe5   :  { %3488 = vmatpush1.bf16.msra.mxu1 %v4128_v31  ;;  %v4257_v31 = vcombine.high %v403_v25, %v411_v26  ;;  %v332_v54 = vld [vmem:[%s6104_s1 + $0x9e0] sm:$0xff] }
  0xe6   :  { %3489 = vmatprep.subr.bf16.mxu1 %v4369_v33  ;;  %v140_v33 = vld [vmem:[%s6104_s1 + $0x3e0] sm:$0xff] }
  0xe7   :  { %3449 = vmatpush2.bf16.msra.mxu0 %v4112_v38  ;;  %v4256_v38 = vcombine.low %v403_v25, %v411_v26  ;;  %v3938_v25 = vcombine.low %v84_v8, %v92_v9 }
  0xe8   :  { %3450 = vmatprep.subr.bf16.mxu0 %v4097_v40  ;;  %v3987_v40 = vcombine.high %v132_v32, %v140_v33 }
  0xe9   :  { %3490 = vmatpush2.bf16.msra.mxu1 %v4368_v39  ;;  %v5229_v39 = vld [vmem:[%s6106_s2] sm:$0xff] }
  0xea   :  { %3491 = vmatprep.subr.bf16.mxu1 %v4353_v41  ;;  %v4243_v41 = vcombine.high %v388_v34, %v396_v35  ;;  %v539_v51 = vrot.slane %v5229_v39, %v538_v42 }
  0xeb   :  { %3451 = vmatpush2.bf16.msra.mxu0 %v4096_v46  ;;  %v380_v46 = vld [vmem:[%s6104_s1 + $0xb60] sm:$0xff] }
  0xec   :  { %3452 = vmatprep.subr.bf16.mxu0 %v4081_v48  ;;  %v3986_v48 = vcombine.low %v132_v32, %v140_v33  ;;  %v4227_v52 = vcombine.high %v372_v45, %v380_v46  ;;  %v308_v32 = vld [vmem:[%s6104_s1 + $0x920] sm:$0xff] }
  0xed   :  { %3492 = vmatpush2.bf16.msra.mxu1 %v4352_v47  ;;  %v535_v47 = vrot.slane %v5229_v39, %v534_v37  ;;  %v316_v33 = vld [vmem:[%s6104_s1 + $0x960] sm:$0xff] }
  0xee   :  { %3493 = vmatprep.subr.bf16.mxu1 %v4337_v49  ;;  %v4242_v49 = vcombine.low %v388_v34, %v396_v35  ;;  %v4178_v35 = vcombine.low %v324_v24, %v332_v54 }
  0xef   :  { %3453 = vmatpush2.bf16.msra.mxu0 %v4080_v56  ;;  %v108_v56 = vld [vmem:[%s6104_s1 + $0x2e0] sm:$0xff] }
  0xf0   :  { %3454 = vmatprep.subr.bf16.mxu0 %v4065_v60  ;;  %v356_v60 = vld [vmem:[%s6104_s1 + $0xaa0] sm:$0xff]  ;;  %v3954_v15 = vcombine.low %v100_v55, %v108_v56 }
  0xf1   :  { %3494 = vmatpush2.bf16.msra.mxu1 %v4336_v57 }
  0xf2   :  { %3495 = vmatprep.subr.bf16.mxu1 %v4321_v61  ;;  %v364_v61 = vld [vmem:[%s6104_s1 + $0xae0] sm:$0xff] }
  0xf3   :  { %3455 = vmatpush2.bf16.msra.mxu0 %v4064_v2  ;;  %v4226_v2 = vcombine.low %v372_v45, %v380_v46  ;;  %v4211_v7 = vcombine.high %v356_v60, %v364_v61  ;;  %v4210_v18 = vcombine.low %v356_v60, %v364_v61  ;;  %v4162_v46 = vcombine.low %v308_v32, %v316_v33  ;;  %v260_v61 = vld [vmem:[%s6104_s1 + $0x7a0] sm:$0xff] }
  0xf4   :  { %3456 = vmatprep.subr.bf16.mxu0 %v4049_v4 }
  0xf5   :  { %3496 = vmatpush2.bf16.msra.mxu1 %v4320_v3  ;;  %v3955_v3 = vcombine.high %v100_v55, %v108_v56  ;;  %v4146_v56 = vcombine.low %v292_v43, %v300_v44 }
  0xf6   :  { %3497 = vmatprep.subr.bf16.mxu1 %v4305_v5 }
  0xf7   :  { %3457 = vmatpush2.bf16.msra.mxu0 %v4048_v10 }
  0xf8   :  { %3458 = vmatprep.subr.bf16.mxu0 %v4033_v12  ;;  %v348_v12 = vld [vmem:[%s6104_s1 + $0xa60] sm:$0xff] }
  0xf9   :  { %3498 = vmatpush2.bf16.msra.mxu1 %v4304_v11  ;;  %v340_v11 = vld [vmem:[%s6104_s1 + $0xa20] sm:$0xff] }
  0xfa   :  { %3499 = vmatprep.subr.bf16.mxu1 %v4289_v13  ;;  %v4194_v26 = vcombine.low %v340_v11, %v348_v12 }
  0xfb   :  { %3459 = vmatpush2.bf16.msra.mxu0 %v4032_v20  ;;  %v3939_v20 = vcombine.high %v84_v8, %v92_v9  ;;  %v508_v8 = vld [vmem:[%s6104_s1 + $0xf60] sm:$0xff] }
  0xfc   :  { %3460 = vmatprep.subr.bf16.mxu0 %v4017_v53  ;;  %v68_v53 = vld [vmem:[%s6104_s1 + $0x1a0] sm:$0xff] }
  0xfd   :  { %3500 = vmatpush2.bf16.msra.mxu1 %v4288_v22  ;;  %v4195_v22 = vcombine.high %v340_v11, %v348_v12 }
  0xfe   :  { %3501 = vmatprep.subr.bf16.mxu1 %v4273_v23  ;;  %v76_v23 = vld [vmem:[%s6104_s1 + $0x1e0] sm:$0xff] }
  0xff   :  { %3461 = vmatpush2.bf16.msra.mxu0 %v4016_v27  ;;  %v3923_v27 = vcombine.high %v68_v53, %v76_v23  ;;  %v3922_v34 = vcombine.low %v68_v53, %v76_v23  ;;  %v212_v53 = vld [vmem:[%s6104_s1 + $0x620] sm:$0xff] }
 0x100   :  { %3462 = vmatprep.subr.bf16.mxu0 %v4001_v30  ;;  %v52_v30 = vld [vmem:[%s6104_s1 + $0x120] sm:$0xff] }
 0x101   :  { %3502 = vmatpush2.bf16.msra.mxu1 %v4272_v29  ;;  %v4179_v29 = vcombine.high %v324_v24, %v332_v54  ;;  %v220_v23 = vld [vmem:[%s6104_s1 + $0x660] sm:$0xff] }
 0x102   :  { %3503 = vmatprep.subr.bf16.mxu1 %v4257_v31  ;;  %v60_v31 = vld [vmem:[%s6104_s1 + $0x160] sm:$0xff] }
 0x103   :  { %3463 = vmatpush2.bf16.msra.mxu0 %v4000_v36  ;;  %v3907_v36 = vcombine.high %v52_v30, %v60_v31  ;;  %v3906_v45 = vcombine.low %v52_v30, %v60_v31  ;;  %v468_v24 = vld [vmem:[%s6104_s1 + $0xe20] sm:$0xff] }
 0x104   :  { %3514 = vmatprep.subr.bf16.mxu0 %v3987_v40  ;;  %v36_v40 = vld [vmem:[%s6104_s1 + $0xa0] sm:$0xff] }
 0x105   :  { %3504 = vmatpush2.bf16.msra.mxu1 %v4256_v38  ;;  %v4163_v38 = vcombine.high %v308_v32, %v316_v33  ;;  %v476_v54 = vld [vmem:[%s6104_s1 + $0xe60] sm:$0xff] }
 0x106   :  { %3555 = vmatprep.subr.bf16.mxu1 %v4243_v41  ;;  %v3220_v57 = vpop.f32.mrf.mxu0  ;;  %3465 = vmatmul.mubr.bf16.vlgmr.msra.gmra.mxu0 %v4635_v16  ;;  %v44_v41 = vld [vmem:[%s6104_s1 + $0xe0] sm:$0xff] }
 0x107   :  { %v3221_v62 = vadd.f32 %v3220_v57, %v535_v47  ;;  %3515 = vmatpush1.bf16.msra.mxu0 %v3986_v48  ;;  %3546 = vmatprep.mubr.bf16.mxu0 %v4505_v58  ;;  %v3891_v47 = vcombine.high %v36_v40, %v44_v41  ;;  %v4147_v48 = vcombine.high %v292_v43, %v300_v44  ;;  %v196_v30 = vld [vmem:[%s6104_s1 + $0x5a0] sm:$0xff] }
 0x108   :  { %v3261_v63 = vpop.f32.mrf.mxu1  ;;  %3506 = vmatmul.mubr.bf16.vlgmr.msra.gmra.mxu1 %v4645_v19  ;;  %v3222_v1 = vpop.f32.mrf.mxu0  ;;  %3516 = vmatprep.subr.bf16.mxu0 %v3971_v50  ;;  %v28_v50 = vld [vmem:[%s6104_s1 + $0x60] sm:$0xff]  ;;  %v3890_v55 = vcombine.low %v36_v40, %v44_v41 }
 0x109   :  { %3556 = vmatpush1.bf16.msra.mxu1 %v4242_v49  ;;  %v3262_v4 = vadd.f32 %v3261_v63, %v3221_v62  ;;  %v3223_v5 = vadd.f32 %v3222_v1, %v539_v51  ;;  %3587 = vmatprep.mubr.bf16.mxu1 %v4509_v59  ;;  %v20_v49 = vld [vmem:[%s6104_s1 + $0x20] sm:$0xff] }
 0x10a   :  { %v3263_v6 = vpop.f32.mrf.mxu1  ;;  %3557 = vmatprep.subr.bf16.mxu1 %v4227_v52  ;;  %v3224_v10 = vpop.f32.mrf.mxu0  ;;  %v276_v51 = vld [vmem:[%s6104_s1 + $0x820] sm:$0xff]  ;;  %v3875_v57 = vcombine.high %v20_v49, %v28_v50  ;;  %v3874_v1 = vcombine.low %v20_v49, %v28_v50 }
 0x10b   :  { %3842 = vst [vmem:[%s6107_s3] sm:$0xff] %v3262_v4  ;;  %v3264_v13 = vadd.f32 %v3263_v6, %v3223_v5  ;;  %3517 = vmatpush1.bf16.msra.mxu0 %v3970_v0  ;;  %v284_v52 = vld [vmem:[%s6104_s1 + $0x860] sm:$0xff] }
 0x10c   :  { %v3265_v14 = vpop.f32.mrf.mxu1  ;;  %v3225_v17 = vpop.f32.mrf.mxu0  ;;  %3518 = vmatprep.subr.bf16.mxu0 %v3955_v3  ;;  %v4131_v60 = vcombine.high %v276_v51, %v284_v52  ;;  %v268_v62 = vld [vmem:[%s6104_s1 + $0x7e0] sm:$0xff] }
 0x10d   :  { %3558 = vmatpush1.bf16.msra.mxu1 %v4226_v2  ;;  %3843 = vst [vmem:[%s6107_s3 + $0x8] sm:$0xff] %v3264_v13  ;;  %v516_v63 = vld [vmem:[%s6104_s1 + $0xfa0] sm:$0xff]  ;;  %v4130_v2 = vcombine.low %v276_v51, %v284_v52  ;;  %v4115_v3 = vcombine.high %v260_v61, %v268_v62  ;;  %v4114_v9 = vcombine.low %v260_v61, %v268_v62 }
 0x10e   :  { %v3266_v21 = vpop.f32.mrf.mxu1  ;;  %3559 = vmatprep.subr.bf16.mxu1 %v4211_v7  ;;  %v524_v0 = vld [vmem:[%s6104_s1 + $0xfe0] sm:$0xff] }
 0x10f   :  { %3519 = vmatpush1.bf16.msra.mxu0 %v3954_v15  ;;  %v4371_v4 = vcombine.high %v516_v63, %v524_v0  ;;  %v244_v5 = vld [vmem:[%s6104_s1 + $0x720] sm:$0xff]  ;;  %v4370_v10 = vcombine.low %v516_v63, %v524_v0 }
 0x110   :  { %3520 = vmatprep.subr.bf16.mxu0 %v3939_v20  ;;  %v252_v6 = vld [vmem:[%s6104_s1 + $0x760] sm:$0xff] }
 0x111   :  { %3560 = vmatpush1.bf16.msra.mxu1 %v4210_v18  ;;  %v500_v7 = vld [vmem:[%s6104_s1 + $0xf20] sm:$0xff]  ;;  %v4099_v11 = vcombine.high %v244_v5, %v252_v6  ;;  %v4098_v18 = vcombine.low %v244_v5, %v252_v6  ;;  %v133_v5 = vld [vmem:[%s6104_s1 + $0x3a8] sm:$0xff] }
 0x112   :  { %3561 = vmatprep.subr.bf16.mxu1 %v4195_v22  ;;  %v4355_v12 = vcombine.high %v500_v7, %v508_v8  ;;  %v228_v13 = vld [vmem:[%s6104_s1 + $0x6a0] sm:$0xff]  ;;  %v4354_v20 = vcombine.low %v500_v7, %v508_v8  ;;  %v141_v6 = vld [vmem:[%s6104_s1 + $0x3e8] sm:$0xff] }
 0x113   :  { %3521 = vmatpush1.bf16.msra.mxu0 %v3938_v25  ;;  %v236_v14 = vld [vmem:[%s6104_s1 + $0x6e0] sm:$0xff]  ;;  %v389_v7 = vld [vmem:[%s6104_s1 + $0xba8] sm:$0xff] }
 0x114   :  { %3522 = vmatprep.subr.bf16.mxu0 %v3923_v27  ;;  %v484_v15 = vld [vmem:[%s6104_s1 + $0xea0] sm:$0xff]  ;;  %v4083_v21 = vcombine.high %v228_v13, %v236_v14  ;;  %v4082_v25 = vcombine.low %v228_v13, %v236_v14  ;;  %v4067_v27 = vcombine.high %v212_v53, %v220_v23  ;;  %v397_v8 = vld [vmem:[%s6104_s1 + $0xbe8] sm:$0xff]  ;;  %v546_v14 = vsub.s32 3, %v5211_v28 }
 0x115   :  { %3562 = vmatpush1.bf16.msra.mxu1 %v4194_v26  ;;  %v492_v17 = vld [vmem:[%s6104_s1 + $0xee0] sm:$0xff]  ;;  %v4245_v13 = vcombine.high %v389_v7, %v397_v8 }
 0x116   :  { %3563 = vmatprep.subr.bf16.mxu1 %v4179_v29  ;;  %v4339_v22 = vcombine.high %v484_v15, %v492_v17  ;;  %v4338_v26 = vcombine.low %v484_v15, %v492_v17  ;;  %v4323_v29 = vcombine.high %v468_v24, %v476_v54  ;;  %v204_v31 = vld [vmem:[%s6104_s1 + $0x5e0] sm:$0xff]  ;;  %v117_v15 = vld [vmem:[%s6104_s1 + $0x328] sm:$0xff] }
 0x117   :  { %3523 = vmatpush1.bf16.msra.mxu0 %v3922_v34  ;;  %v452_v32 = vld [vmem:[%s6104_s1 + $0xda0] sm:$0xff]  ;;  %v4066_v34 = vcombine.low %v212_v53, %v220_v23  ;;  %v125_v17 = vld [vmem:[%s6104_s1 + $0x368] sm:$0xff]  ;;  %v4244_v53 = vcombine.low %v389_v7, %v397_v8 }
 0x118   :  { %3524 = vmatprep.subr.bf16.mxu0 %v3907_v36  ;;  %v460_v33 = vld [vmem:[%s6104_s1 + $0xde0] sm:$0xff]  ;;  %v4051_v36 = vcombine.high %v196_v30, %v204_v31  ;;  %v3973_v23 = vcombine.high %v117_v15, %v125_v17  ;;  %v309_v7 = vld [vmem:[%s6104_s1 + $0x928] sm:$0xff] }
 0x119   :  { %3564 = vmatpush1.bf16.msra.mxu1 %v4178_v35  ;;  %v4322_v35 = vcombine.low %v468_v24, %v476_v54  ;;  %v180_v40 = vld [vmem:[%s6104_s1 + $0x520] sm:$0xff]  ;;  %v547_v24 = vrot.slane %v5229_v39, %v546_v14  ;;  %v317_v8 = vld [vmem:[%s6104_s1 + $0x968] sm:$0xff] }
 0x11a   :  { %3565 = vmatprep.subr.bf16.mxu1 %v4163_v38  ;;  %v4307_v38 = vcombine.high %v452_v32, %v460_v33  ;;  %v188_v41 = vld [vmem:[%s6104_s1 + $0x560] sm:$0xff] }
 0x11b   :  { %3525 = vmatpush1.bf16.msra.mxu0 %v3906_v45  ;;  %v436_v43 = vld [vmem:[%s6104_s1 + $0xd20] sm:$0xff]  ;;  %v4050_v45 = vcombine.low %v196_v30, %v204_v31  ;;  %v365_v30 = vld [vmem:[%s6104_s1 + $0xae8] sm:$0xff] }
 0x11c   :  { %3526 = vmatprep.subr.bf16.mxu0 %v3891_v47  ;;  %v444_v44 = vld [vmem:[%s6104_s1 + $0xd60] sm:$0xff]  ;;  %v4035_v47 = vcombine.high %v180_v40, %v188_v41 }
 0x11d   :  { %3566 = vmatpush1.bf16.msra.mxu1 %v4162_v46  ;;  %v4306_v46 = vcombine.low %v452_v32, %v460_v33  ;;  %v164_v49 = vld [vmem:[%s6104_s1 + $0x4a0] sm:$0xff]  ;;  %v3972_v33 = vcombine.low %v117_v15, %v125_v17  ;;  %v37_v15 = vld [vmem:[%s6104_s1 + $0xa8] sm:$0xff] }
 0x11e   :  { %3567 = vmatprep.subr.bf16.mxu1 %v4147_v48  ;;  %v4291_v48 = vcombine.high %v436_v43, %v444_v44  ;;  %v172_v50 = vld [vmem:[%s6104_s1 + $0x4e0] sm:$0xff]  ;;  %v45_v17 = vld [vmem:[%s6104_s1 + $0xe8] sm:$0xff] }
 0x11f   :  { %3527 = vmatpush1.bf16.msra.mxu0 %v3890_v55  ;;  %v420_v51 = vld [vmem:[%s6104_s1 + $0xca0] sm:$0xff]  ;;  %v4034_v55 = vcombine.low %v180_v40, %v188_v41 }
 0x120   :  { %3528 = vmatprep.subr.bf16.mxu0 %v3875_v57  ;;  %v428_v52 = vld [vmem:[%s6104_s1 + $0xce0] sm:$0xff]  ;;  %v4019_v57 = vcombine.high %v164_v49, %v172_v50 }
 0x121   :  { %3568 = vmatpush1.bf16.msra.mxu1 %v4146_v56  ;;  %v4290_v56 = vcombine.low %v436_v43, %v444_v44  ;;  %v148_v61 = vld [vmem:[%s6104_s1 + $0x420] sm:$0xff]  ;;  %v85_v44 = vld [vmem:[%s6104_s1 + $0x228] sm:$0xff] }
 0x122   :  { %3569 = vmatprep.subr.bf16.mxu1 %v4131_v60  ;;  %v4275_v60 = vcombine.high %v420_v51, %v428_v52  ;;  %v156_v62 = vld [vmem:[%s6104_s1 + $0x460] sm:$0xff] }
 0x123   :  { %3529 = vmatpush1.bf16.msra.mxu0 %v3874_v1  ;;  %v404_v63 = vld [vmem:[%s6104_s1 + $0xc20] sm:$0xff]  ;;  %v4018_v1 = vcombine.low %v164_v49, %v172_v50 }
 0x124   :  { %3530 = vmatprep.subr.bf16.mxu0 %v4115_v3  ;;  %v412_v0 = vld [vmem:[%s6104_s1 + $0xc60] sm:$0xff]  ;;  %v4003_v3 = vcombine.high %v148_v61, %v156_v62 }
 0x125   :  { %3570 = vmatpush1.bf16.msra.mxu1 %v4130_v2  ;;  %v4274_v2 = vcombine.low %v420_v51, %v428_v52 }
 0x126   :  { %3571 = vmatprep.subr.bf16.mxu1 %v4371_v4  ;;  %v4259_v4 = vcombine.high %v404_v63, %v412_v0 }
 0x127   :  { %3531 = vmatpush2.bf16.msra.mxu0 %v4114_v9  ;;  %v4002_v9 = vcombine.low %v148_v61, %v156_v62  ;;  %v69_v61 = vld [vmem:[%s6104_s1 + $0x1a8] sm:$0xff] }
 0x128   :  { %3532 = vmatprep.subr.bf16.mxu0 %v4099_v11  ;;  %v4258_v11 = vcombine.low %v404_v63, %v412_v0  ;;  %v77_v62 = vld [vmem:[%s6104_s1 + $0x1e8] sm:$0xff] }
 0x129   :  { %3572 = vmatpush2.bf16.msra.mxu1 %v4370_v10  ;;  %v542_v10 = vsub.s32 2, %v5211_v28  ;;  %v325_v63 = vld [vmem:[%s6104_s1 + $0x9a8] sm:$0xff] }
 0x12a   :  { %3573 = vmatprep.subr.bf16.mxu1 %v4355_v12  ;;  %v3989_v12 = vcombine.high %v133_v5, %v141_v6  ;;  %v333_v0 = vld [vmem:[%s6104_s1 + $0x9e8] sm:$0xff] }
 0x12b   :  { %3533 = vmatpush2.bf16.msra.mxu0 %v4098_v18  ;;  %v373_v18 = vld [vmem:[%s6104_s1 + $0xb28] sm:$0xff] }
 0x12c   :  { %3534 = vmatprep.subr.bf16.mxu0 %v4083_v21  ;;  %v543_v21 = vrot.slane %v5229_v39, %v542_v10 }
 0x12d   :  { %3574 = vmatpush2.bf16.msra.mxu1 %v4354_v20  ;;  %v381_v20 = vld [vmem:[%s6104_s1 + $0xb68] sm:$0xff] }
 0x12e   :  { %3575 = vmatprep.subr.bf16.mxu1 %v4339_v22  ;;  %v3988_v22 = vcombine.low %v133_v5, %v141_v6  ;;  %v4229_v54 = vcombine.high %v373_v18, %v381_v20  ;;  %v53_v5 = vld [vmem:[%s6104_s1 + $0x128] sm:$0xff] }
 0x12f   :  { %3535 = vmatpush2.bf16.msra.mxu0 %v4082_v25  ;;  %v101_v25 = vld [vmem:[%s6104_s1 + $0x2a8] sm:$0xff] }
 0x130   :  { %3536 = vmatprep.subr.bf16.mxu0 %v4067_v27  ;;  %v61_v6 = vld [vmem:[%s6104_s1 + $0x168] sm:$0xff] }
 0x131   :  { %3576 = vmatpush2.bf16.msra.mxu1 %v4338_v26  ;;  %v109_v26 = vld [vmem:[%s6104_s1 + $0x2e8] sm:$0xff] }
 0x132   :  { %3577 = vmatprep.subr.bf16.mxu1 %v4323_v29  ;;  %v357_v29 = vld [vmem:[%s6104_s1 + $0xaa8] sm:$0xff]  ;;  %v3956_v51 = vcombine.low %v101_v25, %v109_v26 }
 0x133   :  { %3537 = vmatpush2.bf16.msra.mxu0 %v4066_v34  ;;  %v4213_v43 = vcombine.high %v357_v29, %v365_v30 }
 0x134   :  { %3538 = vmatprep.subr.bf16.mxu0 %v4051_v36  ;;  %v3957_v36 = vcombine.high %v101_v25, %v109_v26  ;;  %v277_v25 = vld [vmem:[%s6104_s1 + $0x828] sm:$0xff] }
 0x135   :  { %3578 = vmatpush2.bf16.msra.mxu1 %v4322_v35  ;;  %v4228_v35 = vcombine.low %v373_v18, %v381_v20  ;;  %v293_v18 = vld [vmem:[%s6104_s1 + $0x8a8] sm:$0xff] }
 0x136   :  { %3579 = vmatprep.subr.bf16.mxu1 %v4307_v38  ;;  %v301_v20 = vld [vmem:[%s6104_s1 + $0x8e8] sm:$0xff] }
 0x137   :  { %3539 = vmatpush2.bf16.msra.mxu0 %v4050_v45  ;;  %v93_v45 = vld [vmem:[%s6104_s1 + $0x268] sm:$0xff] }
 0x138   :  { %3540 = vmatprep.subr.bf16.mxu0 %v4035_v47  ;;  %v341_v47 = vld [vmem:[%s6104_s1 + $0xa28] sm:$0xff] }
 0x139   :  { %3580 = vmatpush2.bf16.msra.mxu1 %v4306_v46  ;;  %v285_v26 = vld [vmem:[%s6104_s1 + $0x868] sm:$0xff] }
 0x13a   :  { %3581 = vmatprep.subr.bf16.mxu1 %v4291_v48  ;;  %v349_v48 = vld [vmem:[%s6104_s1 + $0xa68] sm:$0xff] }
 0x13b   :  { %3541 = vmatpush2.bf16.msra.mxu0 %v4034_v55  ;;  %v4212_v55 = vcombine.low %v357_v29, %v365_v30  ;;  %v4148_v29 = vcombine.low %v293_v18, %v301_v20 }
 0x13c   :  { %3542 = vmatprep.subr.bf16.mxu0 %v4019_v57 }
 0x13d   :  { %3582 = vmatpush2.bf16.msra.mxu1 %v4290_v56  ;;  %v3941_v56 = vcombine.high %v85_v44, %v93_v45 }
 0x13e   :  { %3583 = vmatprep.subr.bf16.mxu1 %v4275_v60  ;;  %v4197_v60 = vcombine.high %v341_v47, %v349_v48 }
 0x13f   :  { %3543 = vmatpush2.bf16.msra.mxu0 %v4018_v1  ;;  %v3940_v1 = vcombine.low %v85_v44, %v93_v45  ;;  %v253_v44 = vld [vmem:[%s6104_s1 + $0x768] sm:$0xff] }
 0x140   :  { %3544 = vmatprep.subr.bf16.mxu0 %v4003_v3  ;;  %v3925_v3 = vcombine.high %v69_v61, %v77_v62  ;;  %v501_v45 = vld [vmem:[%s6104_s1 + $0xf28] sm:$0xff] }
 0x141   :  { %3584 = vmatpush2.bf16.msra.mxu1 %v4274_v2  ;;  %v4196_v2 = vcombine.low %v341_v47, %v349_v48 }
 0x142   :  { %3585 = vmatprep.subr.bf16.mxu1 %v4259_v4  ;;  %v4181_v4 = vcombine.high %v325_v63, %v333_v0 }
 0x143   :  { %3545 = vmatpush2.bf16.msra.mxu0 %v4002_v9  ;;  %v3924_v9 = vcombine.low %v69_v61, %v77_v62 }
 0x144   :  { %3596 = vmatprep.subr.bf16.mxu0 %v3989_v12  ;;  %v3909_v12 = vcombine.high %v53_v5, %v61_v6 }
 0x145   :  { %3586 = vmatpush2.bf16.msra.mxu1 %v4258_v11  ;;  %v4180_v11 = vcombine.low %v325_v63, %v333_v0  ;;  %v213_v63 = vld [vmem:[%s6104_s1 + $0x628] sm:$0xff] }
 0x146   :  { %3637 = vmatprep.subr.bf16.mxu1 %v4245_v13  ;;  %v3302_v27 = vpop.f32.mrf.mxu0  ;;  %3547 = vmatmul.mubr.bf16.vlgmr.msra.gmra.mxu0 %v4635_v16  ;;  %v4165_v13 = vcombine.high %v309_v7, %v317_v8  ;;  %v221_v0 = vld [vmem:[%s6104_s1 + $0x668] sm:$0xff] }
 0x147   :  { %v3303_v31 = vadd.f32 %v3302_v27, %v543_v21  ;;  %3597 = vmatpush1.bf16.msra.mxu0 %v3988_v22  ;;  %3628 = vmatprep.mubr.bf16.mxu0 %v4505_v58  ;;  %v3908_v21 = vcombine.low %v53_v5, %v61_v6  ;;  %v4164_v22 = vcombine.low %v309_v7, %v317_v8  ;;  %v197_v7 = vld [vmem:[%s6104_s1 + $0x5a8] sm:$0xff] }
 0x148   :  { %v3343_v32 = vpop.f32.mrf.mxu1  ;;  %3588 = vmatmul.mubr.bf16.vlgmr.msra.gmra.mxu1 %v4645_v19  ;;  %v3304_v34 = vpop.f32.mrf.mxu0  ;;  %3598 = vmatprep.subr.bf16.mxu0 %v3973_v23  ;;  %v4149_v23 = vcombine.high %v293_v18, %v301_v20  ;;  %v3892_v27 = vcombine.low %v37_v15, %v45_v17  ;;  %v4069_v5 = vcombine.high %v213_v63, %v221_v0  ;;  %v205_v8 = vld [vmem:[%s6104_s1 + $0x5e8] sm:$0xff] }
 0x149   :  { %3638 = vmatpush1.bf16.msra.mxu1 %v4244_v53  ;;  %v3344_v38 = vadd.f32 %v3343_v32, %v3303_v31  ;;  %v3305_v40 = vadd.f32 %v3304_v34, %v547_v24  ;;  %3669 = vmatprep.mubr.bf16.mxu1 %v4509_v59  ;;  %v3893_v53 = vcombine.high %v37_v15, %v45_v17  ;;  %v21_v24 = vld [vmem:[%s6104_s1 + $0x28] sm:$0xff] }
 0x14a   :  { %v3345_v41 = vpop.f32.mrf.mxu1  ;;  %3639 = vmatprep.subr.bf16.mxu1 %v4229_v54  ;;  %v3306_v46 = vpop.f32.mrf.mxu0  ;;  %v29_v54 = vld [vmem:[%s6104_s1 + $0x68] sm:$0xff]  ;;  %v4133_v31 = vcombine.high %v277_v25, %v285_v26  ;;  %v4053_v15 = vcombine.high %v197_v7, %v205_v8 }
 0x14b   :  { %3844 = vst [vmem:[%s6107_s3 + $0x10] sm:$0xff] %v3344_v38  ;;  %v3346_v49 = vadd.f32 %v3345_v41, %v3305_v40  ;;  %3599 = vmatpush1.bf16.msra.mxu0 %v3972_v33  ;;  %v3877_v30 = vcombine.high %v21_v24, %v29_v54  ;;  %v261_v32 = vld [vmem:[%s6104_s1 + $0x7a8] sm:$0xff]  ;;  %v4132_v38 = vcombine.low %v277_v25, %v285_v26 }
 0x14c   :  { %v3347_v50 = vpop.f32.mrf.mxu1  ;;  %v3307_v52 = vpop.f32.mrf.mxu0  ;;  %3600 = vmatprep.subr.bf16.mxu0 %v3957_v36  ;;  %v269_v33 = vld [vmem:[%s6104_s1 + $0x7e8] sm:$0xff]  ;;  %v3876_v36 = vcombine.low %v21_v24, %v29_v54 }
 0x14d   :  { %3640 = vmatpush1.bf16.msra.mxu1 %v4228_v35  ;;  %3845 = vst [vmem:[%s6107_s3 + $0x18] sm:$0xff] %v3346_v49  ;;  %v517_v34 = vld [vmem:[%s6104_s1 + $0xfa8] sm:$0xff]  ;;  %v4117_v40 = vcombine.high %v261_v32, %v269_v33  ;;  %v4116_v47 = vcombine.low %v261_v32, %v269_v33 }
 0x14e   :  { %v3348_v57 = vpop.f32.mrf.mxu1  ;;  %3641 = vmatprep.subr.bf16.mxu1 %v4213_v43  ;;  %v525_v35 = vld [vmem:[%s6104_s1 + $0xfe8] sm:$0xff] }
 0x14f   :  { %3601 = vmatpush1.bf16.msra.mxu0 %v3956_v51  ;;  %v4373_v41 = vcombine.high %v517_v34, %v525_v35  ;;  %v245_v43 = vld [vmem:[%s6104_s1 + $0x728] sm:$0xff]  ;;  %v4372_v48 = vcombine.low %v517_v34, %v525_v35 }
 0x150   :  { %3602 = vmatprep.subr.bf16.mxu0 %v3941_v56  ;;  %v509_v46 = vld [vmem:[%s6104_s1 + $0xf68] sm:$0xff]  ;;  %v4101_v49 = vcombine.high %v245_v43, %v253_v44  ;;  %v4100_v57 = vcombine.low %v245_v43, %v253_v44 }
 0x151   :  { %3642 = vmatpush1.bf16.msra.mxu1 %v4212_v55  ;;  %v4357_v50 = vcombine.high %v501_v45, %v509_v46  ;;  %v229_v51 = vld [vmem:[%s6104_s1 + $0x6a8] sm:$0xff] }
 0x152   :  { %3643 = vmatprep.subr.bf16.mxu1 %v4197_v60  ;;  %v237_v52 = vld [vmem:[%s6104_s1 + $0x6e8] sm:$0xff]  ;;  %v4356_v60 = vcombine.low %v501_v45, %v509_v46  ;;  %v134_v45 = vld [vmem:[%s6104_s1 + $0x3b0] sm:$0xff] }
 0x153   :  { %3603 = vmatpush1.bf16.msra.mxu0 %v3940_v1  ;;  %v485_v55 = vld [vmem:[%s6104_s1 + $0xea8] sm:$0xff]  ;;  %v4085_v61 = vcombine.high %v229_v51, %v237_v52  ;;  %v142_v46 = vld [vmem:[%s6104_s1 + $0x3f0] sm:$0xff] }
 0x154   :  { %3604 = vmatprep.subr.bf16.mxu0 %v3925_v3  ;;  %v493_v56 = vld [vmem:[%s6104_s1 + $0xee8] sm:$0xff]  ;;  %v4084_v3 = vcombine.low %v229_v51, %v237_v52  ;;  %v3991_v52 = vcombine.high %v134_v45, %v142_v46 }
 0x155   :  { %3644 = vmatpush1.bf16.msra.mxu1 %v4196_v2  ;;  %v4341_v62 = vcombine.high %v485_v55, %v493_v56  ;;  %v469_v1 = vld [vmem:[%s6104_s1 + $0xe28] sm:$0xff] }
 0x156   :  { %3645 = vmatprep.subr.bf16.mxu1 %v4181_v4  ;;  %v477_v2 = vld [vmem:[%s6104_s1 + $0xe68] sm:$0xff]  ;;  %v4340_v4 = vcombine.low %v485_v55, %v493_v56  ;;  %v554_v56 = vsub.s32 5, %v5211_v28 }
 0x157   :  { %3605 = vmatpush1.bf16.msra.mxu0 %v3924_v9  ;;  %v4325_v6 = vcombine.high %v469_v1, %v477_v2  ;;  %v453_v9 = vld [vmem:[%s6104_s1 + $0xda8] sm:$0xff] }
 0x158   :  { %3606 = vmatprep.subr.bf16.mxu0 %v3909_v12  ;;  %v4068_v12 = vcombine.low %v213_v63, %v221_v0  ;;  %v181_v18 = vld [vmem:[%s6104_s1 + $0x528] sm:$0xff]  ;;  %v3990_v0 = vcombine.low %v134_v45, %v142_v46  ;;  %v54_v46 = vld [vmem:[%s6104_s1 + $0x130] sm:$0xff] }
 0x159   :  { %3646 = vmatpush1.bf16.msra.mxu1 %v4180_v11  ;;  %v461_v11 = vld [vmem:[%s6104_s1 + $0xde8] sm:$0xff] }
 0x15a   :  { %3647 = vmatprep.subr.bf16.mxu1 %v4165_v13  ;;  %v4324_v13 = vcombine.low %v469_v1, %v477_v2  ;;  %v4309_v17 = vcombine.high %v453_v9, %v461_v11  ;;  %v189_v20 = vld [vmem:[%s6104_s1 + $0x568] sm:$0xff] }
 0x15b   :  { %3607 = vmatpush1.bf16.msra.mxu0 %v3908_v21  ;;  %v437_v21 = vld [vmem:[%s6104_s1 + $0xd28] sm:$0xff]  ;;  %v4037_v24 = vcombine.high %v181_v18, %v189_v20 }
 0x15c   :  { %3608 = vmatprep.subr.bf16.mxu0 %v3893_v53  ;;  %v4052_v53 = vcombine.low %v197_v7, %v205_v8  ;;  %v165_v25 = vld [vmem:[%s6104_s1 + $0x4a8] sm:$0xff]  ;;  %v358_v8 = vld [vmem:[%s6104_s1 + $0xab0] sm:$0xff] }
 0x15d   :  { %3648 = vmatpush1.bf16.msra.mxu1 %v4164_v22  ;;  %v445_v22 = vld [vmem:[%s6104_s1 + $0xd68] sm:$0xff] }
 0x15e   :  { %3649 = vmatprep.subr.bf16.mxu1 %v4149_v23  ;;  %v4308_v23 = vcombine.low %v453_v9, %v461_v11  ;;  %v4293_v54 = vcombine.high %v437_v21, %v445_v22  ;;  %v173_v26 = vld [vmem:[%s6104_s1 + $0x4e8] sm:$0xff] }
 0x15f   :  { %3609 = vmatpush1.bf16.msra.mxu0 %v3892_v27  ;;  %v421_v27 = vld [vmem:[%s6104_s1 + $0xca8] sm:$0xff]  ;;  %v4021_v32 = vcombine.high %v165_v25, %v173_v26 }
 0x160   :  { %3610 = vmatprep.subr.bf16.mxu0 %v3877_v30  ;;  %v4036_v30 = vcombine.low %v181_v18, %v189_v20  ;;  %v149_v34 = vld [vmem:[%s6104_s1 + $0x428] sm:$0xff] }
 0x161   :  { %3650 = vmatpush1.bf16.msra.mxu1 %v4148_v29  ;;  %v429_v29 = vld [vmem:[%s6104_s1 + $0xce8] sm:$0xff] }
 0x162   :  { %3651 = vmatprep.subr.bf16.mxu1 %v4133_v31  ;;  %v4292_v31 = vcombine.low %v437_v21, %v445_v22  ;;  %v4277_v33 = vcombine.high %v421_v27, %v429_v29  ;;  %v157_v35 = vld [vmem:[%s6104_s1 + $0x468] sm:$0xff] }
 0x163   :  { %3611 = vmatpush1.bf16.msra.mxu0 %v3876_v36  ;;  %v405_v36 = vld [vmem:[%s6104_s1 + $0xc28] sm:$0xff]  ;;  %v4005_v43 = vcombine.high %v149_v34, %v157_v35 }
 0x164   :  { %3612 = vmatprep.subr.bf16.mxu0 %v4117_v40  ;;  %v4020_v40 = vcombine.low %v165_v25, %v173_v26  ;;  %v350_v25 = vld [vmem:[%s6104_s1 + $0xa70] sm:$0xff] }
 0x165   :  { %3652 = vmatpush1.bf16.msra.mxu1 %v4132_v38  ;;  %v413_v38 = vld [vmem:[%s6104_s1 + $0xc68] sm:$0xff] }
 0x166   :  { %3653 = vmatprep.subr.bf16.mxu1 %v4373_v41  ;;  %v4276_v41 = vcombine.low %v421_v27, %v429_v29  ;;  %v4261_v44 = vcombine.high %v405_v36, %v413_v38  ;;  %v4260_v51 = vcombine.low %v405_v36, %v413_v38  ;;  %v78_v36 = vld [vmem:[%s6104_s1 + $0x1f0] sm:$0xff] }
 0x167   :  { %3613 = vmatpush2.bf16.msra.mxu0 %v4116_v47  ;;  %v390_v47 = vld [vmem:[%s6104_s1 + $0xbb0] sm:$0xff] }
 0x168   :  { %3614 = vmatprep.subr.bf16.mxu0 %v4101_v49  ;;  %v4004_v49 = vcombine.low %v149_v34, %v157_v35  ;;  %v70_v35 = vld [vmem:[%s6104_s1 + $0x1b0] sm:$0xff] }
 0x169   :  { %3654 = vmatpush2.bf16.msra.mxu1 %v4372_v48  ;;  %v398_v48 = vld [vmem:[%s6104_s1 + $0xbf0] sm:$0xff] }
 0x16a   :  { %3655 = vmatprep.subr.bf16.mxu1 %v4357_v50  ;;  %v550_v50 = vsub.s32 4, %v5211_v28  ;;  %v4247_v55 = vcombine.high %v390_v47, %v398_v48  ;;  %v4246_v1 = vcombine.low %v390_v47, %v398_v48  ;;  %v326_v38 = vld [vmem:[%s6104_s1 + $0x9b0] sm:$0xff] }
 0x16b   :  { %3615 = vmatpush2.bf16.msra.mxu0 %v4100_v57  ;;  %v118_v57 = vld [vmem:[%s6104_s1 + $0x330] sm:$0xff] }
 0x16c   :  { %3616 = vmatprep.subr.bf16.mxu0 %v4085_v61  ;;  %v374_v61 = vld [vmem:[%s6104_s1 + $0xb30] sm:$0xff]  ;;  %v551_v63 = vrot.slane %v5229_v39, %v550_v50 }
 0x16d   :  { %3656 = vmatpush2.bf16.msra.mxu1 %v4356_v60  ;;  %v126_v60 = vld [vmem:[%s6104_s1 + $0x370] sm:$0xff] }
 0x16e   :  { %3657 = vmatprep.subr.bf16.mxu1 %v4341_v62  ;;  %v382_v62 = vld [vmem:[%s6104_s1 + $0xb70] sm:$0xff]  ;;  %v3975_v2 = vcombine.high %v118_v57, %v126_v60 }
 0x16f   :  { %3617 = vmatpush2.bf16.msra.mxu0 %v4084_v3  ;;  %v555_v3 = vrot.slane %v5229_v39, %v554_v56  ;;  %v366_v39 = vld [vmem:[%s6104_s1 + $0xaf0] sm:$0xff] }
 0x170   :  { %3618 = vmatprep.subr.bf16.mxu0 %v4069_v5  ;;  %v102_v5 = vld [vmem:[%s6104_s1 + $0x2b0] sm:$0xff]  ;;  %v4215_v22 = vcombine.high %v358_v8, %v366_v39 }
 0x171   :  { %3658 = vmatpush2.bf16.msra.mxu1 %v4340_v4  ;;  %v4231_v4 = vcombine.high %v374_v61, %v382_v62  ;;  %v62_v47 = vld [vmem:[%s6104_s1 + $0x170] sm:$0xff] }
 0x172   :  { %3659 = vmatprep.subr.bf16.mxu1 %v4325_v6  ;;  %v110_v6 = vld [vmem:[%s6104_s1 + $0x2f0] sm:$0xff] }
 0x173   :  { %3619 = vmatpush2.bf16.msra.mxu0 %v4068_v12  ;;  %v3974_v12 = vcombine.low %v118_v57, %v126_v60  ;;  %v3958_v29 = vcombine.low %v102_v5, %v110_v6  ;;  %v310_v48 = vld [vmem:[%s6104_s1 + $0x930] sm:$0xff] }
 0x174   :  { %3620 = vmatprep.subr.bf16.mxu0 %v4053_v15  ;;  %v4230_v15 = vcombine.low %v374_v61, %v382_v62  ;;  %v38_v60 = vld [vmem:[%s6104_s1 + $0xb0] sm:$0xff] }
 0x175   :  { %3660 = vmatpush2.bf16.msra.mxu1 %v4324_v13  ;;  %v46_v61 = vld [vmem:[%s6104_s1 + $0xf0] sm:$0xff] }
 0x176   :  { %3661 = vmatprep.subr.bf16.mxu1 %v4309_v17  ;;  %v3959_v17 = vcombine.high %v102_v5, %v110_v6  ;;  %v294_v62 = vld [vmem:[%s6104_s1 + $0x8b0] sm:$0xff] }
 0x177   :  { %3621 = vmatpush2.bf16.msra.mxu0 %v4052_v53  ;;  %v86_v53 = vld [vmem:[%s6104_s1 + $0x230] sm:$0xff] }
 0x178   :  { %3622 = vmatprep.subr.bf16.mxu0 %v4037_v24  ;;  %v30_v5 = vld [vmem:[%s6104_s1 + $0x70] sm:$0xff] }
 0x179   :  { %3662 = vmatpush2.bf16.msra.mxu1 %v4308_v23  ;;  %v94_v23 = vld [vmem:[%s6104_s1 + $0x270] sm:$0xff] }
 0x17a   :  { %3663 = vmatprep.subr.bf16.mxu1 %v4293_v54  ;;  %v342_v54 = vld [vmem:[%s6104_s1 + $0xa30] sm:$0xff] }
 0x17b   :  { %3623 = vmatpush2.bf16.msra.mxu0 %v4036_v30  ;;  %v4199_v34 = vcombine.high %v342_v54, %v350_v25  ;;  %v278_v6 = vld [vmem:[%s6104_s1 + $0x830] sm:$0xff] }
 0x17c   :  { %3624 = vmatprep.subr.bf16.mxu0 %v4021_v32  ;;  %v3943_v32 = vcombine.high %v86_v53, %v94_v23 }
 0x17d   :  { %3664 = vmatpush2.bf16.msra.mxu1 %v4292_v31  ;;  %v4214_v31 = vcombine.low %v358_v8, %v366_v39  ;;  %v3894_v8 = vcombine.low %v38_v60, %v46_v61 }
 0x17e   :  { %3665 = vmatprep.subr.bf16.mxu1 %v4277_v33 }
 0x17f   :  { %3625 = vmatpush2.bf16.msra.mxu0 %v4020_v40  ;;  %v334_v40 = vld [vmem:[%s6104_s1 + $0x9f0] sm:$0xff] }
 0x180   :  { %3626 = vmatprep.subr.bf16.mxu0 %v4005_v43  ;;  %v4198_v43 = vcombine.low %v342_v54, %v350_v25  ;;  %v4183_v45 = vcombine.high %v326_v38, %v334_v40  ;;  %v510_v54 = vld [vmem:[%s6104_s1 + $0xf70] sm:$0xff] }
 0x181   :  { %3666 = vmatpush2.bf16.msra.mxu1 %v4276_v41  ;;  %v3942_v41 = vcombine.low %v86_v53, %v94_v23  ;;  %v246_v53 = vld [vmem:[%s6104_s1 + $0x730] sm:$0xff] }
 0x182   :  { %3667 = vmatprep.subr.bf16.mxu1 %v4261_v44  ;;  %v3927_v44 = vcombine.high %v70_v35, %v78_v36  ;;  %v254_v23 = vld [vmem:[%s6104_s1 + $0x770] sm:$0xff] }
 0x183   :  { %3627 = vmatpush2.bf16.msra.mxu0 %v4004_v49  ;;  %v318_v49 = vld [vmem:[%s6104_s1 + $0x970] sm:$0xff] }
 0x184   :  { %3678 = vmatprep.subr.bf16.mxu0 %v3991_v52  ;;  %v4182_v52 = vcombine.low %v326_v38, %v334_v40  ;;  %v4167_v57 = vcombine.high %v310_v48, %v318_v49  ;;  %v214_v40 = vld [vmem:[%s6104_s1 + $0x630] sm:$0xff] }
 0x185   :  { %3668 = vmatpush2.bf16.msra.mxu1 %v4260_v51  ;;  %v3926_v51 = vcombine.low %v70_v35, %v78_v36 }
 0x186   :  { %3719 = vmatprep.subr.bf16.mxu1 %v4247_v55  ;;  %v3384_v7 = vpop.f32.mrf.mxu0  ;;  %3629 = vmatmul.mubr.bf16.vlgmr.msra.gmra.mxu0 %v4635_v16  ;;  %v3911_v55 = vcombine.high %v54_v46, %v62_v47 }
 0x187   :  { %v3385_v9 = vadd.f32 %v3384_v7, %v551_v63  ;;  %3679 = vmatpush1.bf16.msra.mxu0 %v3990_v0  ;;  %3710 = vmatprep.mubr.bf16.mxu0 %v4505_v58  ;;  %v302_v63 = vld [vmem:[%s6104_s1 + $0x8f0] sm:$0xff]  ;;  %v3910_v0 = vcombine.low %v54_v46, %v62_v47 }
 0x188   :  { %v3425_v11 = vpop.f32.mrf.mxu1  ;;  %3670 = vmatmul.mubr.bf16.vlgmr.msra.gmra.mxu1 %v4645_v19  ;;  %v3386_v13 = vpop.f32.mrf.mxu0  ;;  %3680 = vmatprep.subr.bf16.mxu0 %v3975_v2  ;;  %v3895_v2 = vcombine.high %v38_v60, %v46_v61  ;;  %v286_v7 = vld [vmem:[%s6104_s1 + $0x870] sm:$0xff]  ;;  %v4150_v39 = vcombine.low %v294_v62, %v302_v63 }
 0x189   :  { %3720 = vmatpush1.bf16.msra.mxu1 %v4246_v1  ;;  %v3426_v18 = vadd.f32 %v3425_v11, %v3385_v9  ;;  %v3387_v20 = vadd.f32 %v3386_v13, %v555_v3  ;;  %3751 = vmatprep.mubr.bf16.mxu1 %v4509_v59  ;;  %v4166_v1 = vcombine.low %v310_v48, %v318_v49  ;;  %v270_v13 = vld [vmem:[%s6104_s1 + $0x7f0] sm:$0xff] }
 0x18a   :  { %v3427_v21 = vpop.f32.mrf.mxu1  ;;  %3721 = vmatprep.subr.bf16.mxu1 %v4231_v4  ;;  %v3388_v24 = vpop.f32.mrf.mxu0  ;;  %v4151_v3 = vcombine.high %v294_v62, %v302_v63  ;;  %v22_v4 = vld [vmem:[%s6104_s1 + $0x30] sm:$0xff]  ;;  %v4135_v11 = vcombine.high %v278_v6, %v286_v7 }
 0x18b   :  { %3846 = vst [vmem:[%s6107_s3 + $0x20] sm:$0xff] %v3426_v18  ;;  %v3428_v26 = vadd.f32 %v3427_v21, %v3387_v20  ;;  %3681 = vmatpush1.bf16.msra.mxu0 %v3974_v12  ;;  %v3879_v9 = vcombine.high %v22_v4, %v30_v5  ;;  %v262_v12 = vld [vmem:[%s6104_s1 + $0x7b0] sm:$0xff]  ;;  %v3878_v18 = vcombine.low %v22_v4, %v30_v5 }
 0x18c   :  { %v3429_v27 = vpop.f32.mrf.mxu1  ;;  %v3389_v30 = vpop.f32.mrf.mxu0  ;;  %3682 = vmatprep.subr.bf16.mxu0 %v3959_v17  ;;  %v526_v17 = vld [vmem:[%s6104_s1 + $0xff0] sm:$0xff]  ;;  %v4134_v20 = vcombine.low %v278_v6, %v286_v7  ;;  %v4119_v21 = vcombine.high %v262_v12, %v270_v13  ;;  %v4118_v25 = vcombine.low %v262_v12, %v270_v13 }
 0x18d   :  { %3722 = vmatpush1.bf16.msra.mxu1 %v4230_v15  ;;  %3847 = vst [vmem:[%s6107_s3 + $0x28] sm:$0xff] %v3428_v26  ;;  %v518_v15 = vld [vmem:[%s6104_s1 + $0xfb0] sm:$0xff]  ;;  %v4103_v27 = vcombine.high %v246_v53, %v254_v23 }
 0x18e   :  { %v3430_v33 = vpop.f32.mrf.mxu1  ;;  %3723 = vmatprep.subr.bf16.mxu1 %v4215_v22  ;;  %v4375_v22 = vcombine.high %v518_v15, %v526_v17  ;;  %v502_v24 = vld [vmem:[%s6104_s1 + $0xf30] sm:$0xff]  ;;  %v4374_v26 = vcombine.low %v518_v15, %v526_v17 }
 0x18f   :  { %3683 = vmatpush1.bf16.msra.mxu0 %v3958_v29  ;;  %v4359_v29 = vcombine.high %v502_v24, %v510_v54  ;;  %v230_v30 = vld [vmem:[%s6104_s1 + $0x6b0] sm:$0xff]  ;;  %v4358_v35 = vcombine.low %v502_v24, %v510_v54  ;;  %v135_v54 = vld [vmem:[%s6104_s1 + $0x3b8] sm:$0xff] }
 0x190   :  { %3684 = vmatprep.subr.bf16.mxu0 %v3943_v32  ;;  %v486_v32 = vld [vmem:[%s6104_s1 + $0xeb0] sm:$0xff] }
 0x191   :  { %3724 = vmatpush1.bf16.msra.mxu1 %v4214_v31  ;;  %v238_v31 = vld [vmem:[%s6104_s1 + $0x6f0] sm:$0xff] }
 0x192   :  { %3725 = vmatprep.subr.bf16.mxu1 %v4199_v34  ;;  %v494_v33 = vld [vmem:[%s6104_s1 + $0xef0] sm:$0xff]  ;;  %v4102_v34 = vcombine.low %v246_v53, %v254_v23  ;;  %v4087_v36 = vcombine.high %v230_v30, %v238_v31 }
 0x193   :  { %3685 = vmatpush1.bf16.msra.mxu0 %v3942_v41  ;;  %v4343_v38 = vcombine.high %v486_v32, %v494_v33  ;;  %v222_v41 = vld [vmem:[%s6104_s1 + $0x670] sm:$0xff]  ;;  %v4342_v46 = vcombine.low %v486_v32, %v494_v33 }
 0x194   :  { %3686 = vmatprep.subr.bf16.mxu0 %v3927_v44  ;;  %v478_v44 = vld [vmem:[%s6104_s1 + $0xe70] sm:$0xff]  ;;  %v4071_v47 = vcombine.high %v214_v40, %v222_v41 }
 0x195   :  { %3726 = vmatpush1.bf16.msra.mxu1 %v4198_v43  ;;  %v470_v43 = vld [vmem:[%s6104_s1 + $0xe30] sm:$0xff] }
 0x196   :  { %3727 = vmatprep.subr.bf16.mxu1 %v4183_v45  ;;  %v4086_v45 = vcombine.low %v230_v30, %v238_v31  ;;  %v4327_v48 = vcombine.high %v470_v43, %v478_v44  ;;  %v198_v49 = vld [vmem:[%s6104_s1 + $0x5b0] sm:$0xff]  ;;  %v4326_v60 = vcombine.low %v470_v43, %v478_v44  ;;  %v558_v30 = vsub.s32 6, %v5211_v28 }
 0x197   :  { %3687 = vmatpush1.bf16.msra.mxu0 %v3926_v51  ;;  %v206_v51 = vld [vmem:[%s6104_s1 + $0x5f0] sm:$0xff] }
 0x198   :  { %3688 = vmatprep.subr.bf16.mxu0 %v3911_v55  ;;  %v462_v55 = vld [vmem:[%s6104_s1 + $0xdf0] sm:$0xff]  ;;  %v4055_v61 = vcombine.high %v198_v49, %v206_v51 }
 0x199   :  { %3728 = vmatpush1.bf16.msra.mxu1 %v4182_v52  ;;  %v454_v52 = vld [vmem:[%s6104_s1 + $0xdb0] sm:$0xff] }
 0x19a   :  { %3729 = vmatprep.subr.bf16.mxu1 %v4167_v57  ;;  %v4070_v57 = vcombine.low %v214_v40, %v222_v41  ;;  %v4311_v62 = vcombine.high %v454_v52, %v462_v55  ;;  %v182_v63 = vld [vmem:[%s6104_s1 + $0x530] sm:$0xff]  ;;  %v4310_v4 = vcombine.low %v454_v52, %v462_v55  ;;  %v383_v40 = vld [vmem:[%s6104_s1 + $0xb78] sm:$0xff]  ;;  %v4382_v41 = vld [vmem:[%s6106_s2] sm:$0xff] }
 0x19b   :  { %3689 = vmatpush1.bf16.msra.mxu0 %v3910_v0  ;;  %v190_v0 = vld [vmem:[%s6104_s1 + $0x570] sm:$0xff]  ;;  %v559_v43 = vrot.slane %v4382_v41, %v558_v30  ;;  %v359_v55 = vld [vmem:[%s6104_s1 + $0xab8] sm:$0xff] }
 0x19c   :  { %3690 = vmatprep.subr.bf16.mxu0 %v3895_v2  ;;  %v446_v2 = vld [vmem:[%s6104_s1 + $0xd70] sm:$0xff]  ;;  %v4039_v5 = vcombine.high %v182_v63, %v190_v0 }
 0x19d   :  { %3730 = vmatpush1.bf16.msra.mxu1 %v4166_v1  ;;  %v438_v1 = vld [vmem:[%s6104_s1 + $0xd30] sm:$0xff] }
 0x19e   :  { %3731 = vmatprep.subr.bf16.mxu1 %v4151_v3  ;;  %v4054_v3 = vcombine.low %v198_v49, %v206_v51  ;;  %v4295_v6 = vcombine.high %v438_v1, %v446_v2  ;;  %v166_v7 = vld [vmem:[%s6104_s1 + $0x4b0] sm:$0xff]  ;;  %v4294_v12 = vcombine.low %v438_v1, %v446_v2  ;;  %v103_v49 = vld [vmem:[%s6104_s1 + $0x2b8] sm:$0xff] }
 0x19f   :  { %3691 = vmatpush1.bf16.msra.mxu0 %v3894_v8  ;;  %v174_v8 = vld [vmem:[%s6104_s1 + $0x4f0] sm:$0xff]  ;;  %v111_v51 = vld [vmem:[%s6104_s1 + $0x2f8] sm:$0xff] }
 0x1a0   :  { %3692 = vmatprep.subr.bf16.mxu0 %v3879_v9  ;;  %v430_v9 = vld [vmem:[%s6104_s1 + $0xcf0] sm:$0xff]  ;;  %v4023_v13 = vcombine.high %v166_v7, %v174_v8  ;;  %v3961_v1 = vcombine.high %v103_v49, %v111_v51 }
 0x1a1   :  { %3732 = vmatpush1.bf16.msra.mxu1 %v4150_v39  ;;  %v422_v39 = vld [vmem:[%s6104_s1 + $0xcb0] sm:$0xff] }
 0x1a2   :  { %3733 = vmatprep.subr.bf16.mxu1 %v4135_v11  ;;  %v4038_v11 = vcombine.low %v182_v63, %v190_v0  ;;  %v4279_v15 = vcombine.high %v422_v39, %v430_v9  ;;  %v150_v17 = vld [vmem:[%s6104_s1 + $0x430] sm:$0xff]  ;;  %v4278_v53 = vcombine.low %v422_v39, %v430_v9  ;;  %v343_v39 = vld [vmem:[%s6104_s1 + $0xa38] sm:$0xff] }
 0x1a3   :  { %3693 = vmatpush1.bf16.msra.mxu0 %v3878_v18  ;;  %v158_v18 = vld [vmem:[%s6104_s1 + $0x470] sm:$0xff]  ;;  %v351_v9 = vld [vmem:[%s6104_s1 + $0xa78] sm:$0xff] }
 0x1a4   :  { %3694 = vmatprep.subr.bf16.mxu0 %v4119_v21  ;;  %v414_v21 = vld [vmem:[%s6104_s1 + $0xc70] sm:$0xff]  ;;  %v4007_v23 = vcombine.high %v150_v17, %v158_v18 }
 0x1a5   :  { %3734 = vmatpush1.bf16.msra.mxu1 %v4134_v20  ;;  %v406_v20 = vld [vmem:[%s6104_s1 + $0xc30] sm:$0xff] }
 0x1a6   :  { %3735 = vmatprep.subr.bf16.mxu1 %v4375_v22  ;;  %v4022_v22 = vcombine.low %v166_v7, %v174_v8  ;;  %v4263_v24 = vcombine.high %v406_v20, %v414_v21  ;;  %v4262_v31 = vcombine.low %v406_v20, %v414_v21  ;;  %v95_v7 = vld [vmem:[%s6104_s1 + $0x278] sm:$0xff] }
 0x1a7   :  { %3695 = vmatpush2.bf16.msra.mxu0 %v4118_v25  ;;  %v143_v25 = vld [vmem:[%s6104_s1 + $0x3f8] sm:$0xff] }
 0x1a8   :  { %3696 = vmatprep.subr.bf16.mxu0 %v4103_v27  ;;  %v399_v27 = vld [vmem:[%s6104_s1 + $0xbf8] sm:$0xff]  ;;  %v3993_v32 = vcombine.high %v135_v54, %v143_v25  ;;  %v3992_v44 = vcombine.low %v135_v54, %v143_v25 }
 0x1a9   :  { %3736 = vmatpush2.bf16.msra.mxu1 %v4374_v26  ;;  %v391_v26 = vld [vmem:[%s6104_s1 + $0xbb8] sm:$0xff] }
 0x1aa   :  { %3737 = vmatprep.subr.bf16.mxu1 %v4359_v29  ;;  %v4006_v29 = vcombine.low %v150_v17, %v158_v18  ;;  %v4249_v33 = vcombine.high %v391_v26, %v399_v27  ;;  %v71_v20 = vld [vmem:[%s6104_s1 + $0x1b8] sm:$0xff] }
 0x1ab   :  { %3697 = vmatpush2.bf16.msra.mxu0 %v4102_v34  ;;  %v562_v34 = vsub.s32 7, %v5211_v28  ;;  %v79_v21 = vld [vmem:[%s6104_s1 + $0x1f8] sm:$0xff] }
 0x1ac   :  { %3698 = vmatprep.subr.bf16.mxu0 %v4087_v36  ;;  %v127_v36 = vld [vmem:[%s6104_s1 + $0x378] sm:$0xff]  ;;  %v3929_v54 = vcombine.high %v71_v20, %v79_v21 }
 0x1ad   :  { %3738 = vmatpush2.bf16.msra.mxu1 %v4358_v35  ;;  %v119_v35 = vld [vmem:[%s6104_s1 + $0x338] sm:$0xff] }
 0x1ae   :  { %3739 = vmatprep.subr.bf16.mxu1 %v4343_v38  ;;  %v375_v38 = vld [vmem:[%s6104_s1 + $0xb38] sm:$0xff] }
 0x1af   :  { %3699 = vmatpush2.bf16.msra.mxu0 %v4086_v45  ;;  %v4248_v45 = vcombine.low %v391_v26, %v399_v27  ;;  %v4232_v0 = vcombine.low %v375_v38, %v383_v40  ;;  %v55_v26 = vld [vmem:[%s6104_s1 + $0x138] sm:$0xff] }
 0x1b0   :  { %3700 = vmatprep.subr.bf16.mxu0 %v4071_v47  ;;  %v563_v47 = vrot.slane %v4382_v41, %v562_v34  ;;  %v63_v27 = vld [vmem:[%s6104_s1 + $0x178] sm:$0xff] }
 0x1b1   :  { %3740 = vmatpush2.bf16.msra.mxu1 %v4342_v46  ;;  %v3977_v46 = vcombine.high %v119_v35, %v127_v36  ;;  %v295_v41 = vld [vmem:[%s6104_s1 + $0x8b8] sm:$0xff] }
 0x1b2   :  { %3741 = vmatprep.subr.bf16.mxu1 %v4327_v48  ;;  %v4233_v48 = vcombine.high %v375_v38, %v383_v40  ;;  %v39_v38 = vld [vmem:[%s6104_s1 + $0xb8] sm:$0xff] }
 0x1b3   :  { %3701 = vmatpush2.bf16.msra.mxu0 %v4070_v57  ;;  %v367_v57 = vld [vmem:[%s6104_s1 + $0xaf8] sm:$0xff] }
 0x1b4   :  { %3702 = vmatprep.subr.bf16.mxu0 %v4055_v61  ;;  %v47_v40 = vld [vmem:[%s6104_s1 + $0xf8] sm:$0xff] }
 0x1b5   :  { %3742 = vmatpush2.bf16.msra.mxu1 %v4326_v60 }
 0x1b6   :  { %3743 = vmatprep.subr.bf16.mxu1 %v4311_v62  ;;  %v3976_v62 = vcombine.low %v119_v35, %v127_v36  ;;  %v3913_v35 = vcombine.high %v55_v26, %v63_v27 }
 0x1b7   :  { %3703 = vmatpush2.bf16.msra.mxu0 %v4054_v3 }
 0x1b8   :  { %3704 = vmatprep.subr.bf16.mxu0 %v4039_v5  ;;  %v4217_v5 = vcombine.high %v359_v55, %v367_v57 }
 0x1b9   :  { %3744 = vmatpush2.bf16.msra.mxu1 %v4310_v4 }
 0x1ba   :  { %3745 = vmatprep.subr.bf16.mxu1 %v4295_v6  ;;  %v87_v6 = vld [vmem:[%s6104_s1 + $0x238] sm:$0xff] }
 0x1bb   :  { %3705 = vmatpush2.bf16.msra.mxu0 %v4038_v11  ;;  %v3945_v17 = vcombine.high %v87_v6, %v95_v7 }
 0x1bc   :  { %3706 = vmatprep.subr.bf16.mxu0 %v4023_v13  ;;  %v3960_v13 = vcombine.low %v103_v49, %v111_v51  ;;  %v31_v49 = vld [vmem:[%s6104_s1 + $0x78] sm:$0xff] }
 0x1bd   :  { %3746 = vmatpush2.bf16.msra.mxu1 %v4294_v12  ;;  %v279_v51 = vld [vmem:[%s6104_s1 + $0x838] sm:$0xff] }
 0x1be   :  { %3747 = vmatprep.subr.bf16.mxu1 %v4279_v15  ;;  %v4216_v15 = vcombine.low %v359_v55, %v367_v57  ;;  %v3896_v55 = vcombine.low %v39_v38, %v47_v40 }
 0x1bf   :  { %3707 = vmatpush2.bf16.msra.mxu0 %v4022_v22  ;;  %v327_v22 = vld [vmem:[%s6104_s1 + $0x9b8] sm:$0xff] }
 0x1c0   :  { %3708 = vmatprep.subr.bf16.mxu0 %v4007_v23  ;;  %v3944_v23 = vcombine.low %v87_v6, %v95_v7  ;;  %v247_v6 = vld [vmem:[%s6104_s1 + $0x738] sm:$0xff] }
 0x1c1   :  { %3748 = vmatpush2.bf16.msra.mxu1 %v4278_v53  ;;  %v335_v53 = vld [vmem:[%s6104_s1 + $0x9f8] sm:$0xff] }
 0x1c2   :  { %3749 = vmatprep.subr.bf16.mxu1 %v4263_v24  ;;  %v4200_v24 = vcombine.low %v343_v39, %v351_v9  ;;  %v4185_v25 = vcombine.high %v327_v22, %v335_v53  ;;  %v255_v7 = vld [vmem:[%s6104_s1 + $0x778] sm:$0xff] }
 0x1c3   :  { %3709 = vmatpush2.bf16.msra.mxu0 %v4006_v29  ;;  %v311_v29 = vld [vmem:[%s6104_s1 + $0x938] sm:$0xff] }
 0x1c4   :  { %3760 = vmatprep.subr.bf16.mxu0 %v3993_v32  ;;  %v3928_v32 = vcombine.low %v71_v20, %v79_v21 }
 0x1c5   :  { %3750 = vmatpush2.bf16.msra.mxu1 %v4262_v31  ;;  %v319_v31 = vld [vmem:[%s6104_s1 + $0x978] sm:$0xff] }
 0x1c6   :  { %3801 = vmatprep.subr.bf16.mxu1 %v4249_v33  ;;  %v3466_v52 = vpop.f32.mrf.mxu0  ;;  %3711 = vmatmul.mubr.bf16.vlgmr.msra.gmra.mxu0 %v4635_v16  ;;  %v4184_v33 = vcombine.low %v327_v22, %v335_v53  ;;  %v4169_v36 = vcombine.high %v311_v29, %v319_v31  ;;  %v215_v53 = vld [vmem:[%s6104_s1 + $0x638] sm:$0xff] }
 0x1c7   :  { %v3467_v60 = vadd.f32 %v3466_v52, %v559_v43  ;;  %3761 = vmatpush1.bf16.msra.mxu0 %v3992_v44  ;;  %3792 = vmatprep.mubr.bf16.mxu0 %v4505_v58  ;;  %v303_v43 = vld [vmem:[%s6104_s1 + $0x8f8] sm:$0xff]  ;;  %v3912_v44 = vcombine.low %v55_v26, %v63_v27 }
 0x1c8   :  { %v3507_v61 = vpop.f32.mrf.mxu1  ;;  %3752 = vmatmul.mubr.bf16.vlgmr.msra.gmra.mxu1 %v4645_v19  ;;  %v3468_v63 = vpop.f32.mrf.mxu0  ;;  %3762 = vmatprep.subr.bf16.mxu0 %v3977_v46  ;;  %v3897_v46 = vcombine.high %v39_v38, %v47_v40  ;;  %v287_v52 = vld [vmem:[%s6104_s1 + $0x878] sm:$0xff]  ;;  %v4152_v57 = vcombine.low %v295_v41, %v303_v43 }
 0x1c9   :  { %3802 = vmatpush1.bf16.msra.mxu1 %v4248_v45  ;;  %v3508_v2 = vadd.f32 %v3507_v61, %v3467_v60  ;;  %v3469_v3 = vadd.f32 %v3468_v63, %v563_v47  ;;  %3833 = vmatprep.mubr.bf16.mxu1 %v4509_v59  ;;  %v4201_v59 = vcombine.high %v343_v39, %v351_v9  ;;  %v271_v63 = vld [vmem:[%s6104_s1 + $0x7f8] sm:$0xff] }
 0x1ca   :  { %v3509_v4 = vpop.f32.mrf.mxu1  ;;  %3803 = vmatprep.subr.bf16.mxu1 %v4233_v48  ;;  %v3470_v8 = vpop.f32.mrf.mxu0  ;;  %v4168_v45 = vcombine.low %v311_v29, %v319_v31  ;;  %v4153_v47 = vcombine.high %v295_v41, %v303_v43  ;;  %v23_v48 = vld [vmem:[%s6104_s1 + $0x38] sm:$0xff]  ;;  %v4137_v61 = vcombine.high %v279_v51, %v287_v52 }
 0x1cb   :  { %3848 = vst [vmem:[%s6107_s3 + $0x30] sm:$0xff] %v3508_v2  ;;  %v3510_v11 = vadd.f32 %v3509_v4, %v3469_v3  ;;  %3763 = vmatpush1.bf16.msra.mxu0 %v3976_v62  ;;  %v3881_v60 = vcombine.high %v23_v48, %v31_v49  ;;  %v263_v62 = vld [vmem:[%s6104_s1 + $0x7b8] sm:$0xff]  ;;  %v3880_v2 = vcombine.low %v23_v48, %v31_v49 }
 0x1cc   :  { %v3511_v12 = vpop.f32.mrf.mxu1  ;;  %v3471_v58 = vpop.f32.mrf.mxu0  ;;  %3764 = vmatprep.subr.bf16.mxu0 %v3961_v1  ;;  %v527_v1 = vld [vmem:[%s6104_s1 + $0xff8] sm:$0xff]  ;;  %v4136_v3 = vcombine.low %v279_v51, %v287_v52  ;;  %v4121_v4 = vcombine.high %v263_v62, %v271_v63  ;;  %v4120_v9 = vcombine.low %v263_v62, %v271_v63 }
 0x1cd   :  { %3804 = vmatpush1.bf16.msra.mxu1 %v4232_v0  ;;  %3849 = vst [vmem:[%s6107_s3 + $0x38] sm:$0xff] %v3510_v11  ;;  %v519_v0 = vld [vmem:[%s6104_s1 + $0xfb8] sm:$0xff]  ;;  %v4105_v12 = vcombine.high %v247_v6, %v255_v7 }
 0x1ce   :  { %v3512_v18 = vpop.f32.mrf.mxu1  ;;  %3805 = vmatprep.subr.bf16.mxu1 %v4217_v5  ;;  %v4377_v5 = vcombine.high %v519_v0, %v527_v1  ;;  %v503_v8 = vld [vmem:[%s6104_s1 + $0xf38] sm:$0xff]  ;;  %v4376_v11 = vcombine.low %v519_v0, %v527_v1 }
 0x1cf   :  { %3765 = vmatpush1.bf16.msra.mxu0 %v3960_v13  ;;  %v511_v39 = vld [vmem:[%s6104_s1 + $0xf78] sm:$0xff] }
 0x1d0   :  { %3766 = vmatprep.subr.bf16.mxu0 %v3945_v17  ;;  %v4361_v13 = vcombine.high %v503_v8, %v511_v39  ;;  %v231_v58 = vld [vmem:[%s6104_s1 + $0x6b8] sm:$0xff]  ;;  %v4360_v20 = vcombine.low %v503_v8, %v511_v39 }
 0x1d1   :  { %3806 = vmatpush1.bf16.msra.mxu1 %v4216_v15  ;;  %v239_v15 = vld [vmem:[%s6104_s1 + $0x6f8] sm:$0xff] }
 0x1d2   :  { %3807 = vmatprep.subr.bf16.mxu1 %v4201_v59  ;;  %v487_v17 = vld [vmem:[%s6104_s1 + $0xeb8] sm:$0xff]  ;;  %v4104_v59 = vcombine.low %v247_v6, %v255_v7  ;;  %v4089_v21 = vcombine.high %v231_v58, %v239_v15 }
 0x1d3   :  { %3767 = vmatpush1.bf16.msra.mxu0 %v3944_v23  ;;  %v495_v18 = vld [vmem:[%s6104_s1 + $0xef8] sm:$0xff] }
 0x1d4   :  { %3768 = vmatprep.subr.bf16.mxu0 %v3929_v54  ;;  %v4345_v22 = vcombine.high %v487_v17, %v495_v18  ;;  %v223_v23 = vld [vmem:[%s6104_s1 + $0x678] sm:$0xff]  ;;  %v4344_v26 = vcombine.low %v487_v17, %v495_v18 }
 0x1d5   :  { %3808 = vmatpush1.bf16.msra.mxu1 %v4200_v24  ;;  %v471_v24 = vld [vmem:[%s6104_s1 + $0xe38] sm:$0xff]  ;;  %v4073_v27 = vcombine.high %v215_v53, %v223_v23 }
 0x1d6   :  { %3809 = vmatprep.subr.bf16.mxu1 %v4185_v25  ;;  %v479_v54 = vld [vmem:[%s6104_s1 + $0xe78] sm:$0xff]  ;;  %v4088_v25 = vcombine.low %v231_v58, %v239_v15 }
 0x1d7   :  { %3769 = vmatpush1.bf16.msra.mxu0 %v3928_v32  ;;  %v4329_v29 = vcombine.high %v471_v24, %v479_v54  ;;  %v199_v31 = vld [vmem:[%s6104_s1 + $0x5b8] sm:$0xff]  ;;  %v4328_v38 = vcombine.low %v471_v24, %v479_v54 }
 0x1d8   :  { %3770 = vmatprep.subr.bf16.mxu0 %v3913_v35  ;;  %v207_v32 = vld [vmem:[%s6104_s1 + $0x5f8] sm:$0xff] }
 0x1d9   :  { %3810 = vmatpush1.bf16.msra.mxu1 %v4184_v33  ;;  %v455_v33 = vld [vmem:[%s6104_s1 + $0xdb8] sm:$0xff]  ;;  %v4057_v40 = vcombine.high %v199_v31, %v207_v32 }
 0x1da   :  { %3811 = vmatprep.subr.bf16.mxu1 %v4169_v36  ;;  %v463_v35 = vld [vmem:[%s6104_s1 + $0xdf8] sm:$0xff]  ;;  %v4072_v36 = vcombine.low %v215_v53, %v223_v23 }
 0x1db   :  { %3771 = vmatpush1.bf16.msra.mxu0 %v3912_v44  ;;  %v4313_v41 = vcombine.high %v455_v33, %v463_v35  ;;  %v183_v43 = vld [vmem:[%s6104_s1 + $0x538] sm:$0xff]  ;;  %v4312_v48 = vcombine.low %v455_v33, %v463_v35 }
 0x1dc   :  { %3772 = vmatprep.subr.bf16.mxu0 %v3897_v46  ;;  %v191_v44 = vld [vmem:[%s6104_s1 + $0x578] sm:$0xff] }
 0x1dd   :  { %3812 = vmatpush1.bf16.msra.mxu1 %v4168_v45  ;;  %v439_v45 = vld [vmem:[%s6104_s1 + $0xd38] sm:$0xff]  ;;  %v4041_v49 = vcombine.high %v183_v43, %v191_v44 }
 0x1de   :  { %3813 = vmatprep.subr.bf16.mxu1 %v4153_v47  ;;  %v447_v46 = vld [vmem:[%s6104_s1 + $0xd78] sm:$0xff]  ;;  %v4056_v47 = vcombine.low %v199_v31, %v207_v32 }
 0x1df   :  { %3773 = vmatpush1.bf16.msra.mxu0 %v3896_v55  ;;  %v4297_v51 = vcombine.high %v439_v45, %v447_v46  ;;  %v167_v52 = vld [vmem:[%s6104_s1 + $0x4b8] sm:$0xff]  ;;  %v4296_v62 = vcombine.low %v439_v45, %v447_v46 }
 0x1e0   :  { %3774 = vmatprep.subr.bf16.mxu0 %v3881_v60  ;;  %v175_v55 = vld [vmem:[%s6104_s1 + $0x4f8] sm:$0xff] }
 0x1e1   :  { %3814 = vmatpush1.bf16.msra.mxu1 %v4152_v57  ;;  %v423_v57 = vld [vmem:[%s6104_s1 + $0xcb8] sm:$0xff]  ;;  %v4025_v63 = vcombine.high %v167_v52, %v175_v55 }
 0x1e2   :  { %3815 = vmatprep.subr.bf16.mxu1 %v4137_v61  ;;  %v431_v60 = vld [vmem:[%s6104_s1 + $0xcf8] sm:$0xff]  ;;  %v4040_v61 = vcombine.low %v183_v43, %v191_v44 }
 0x1e3   :  { %3775 = vmatpush1.bf16.msra.mxu0 %v3880_v2  ;;  %v4281_v0 = vcombine.high %v423_v57, %v431_v60  ;;  %v151_v1 = vld [vmem:[%s6104_s1 + $0x438] sm:$0xff]  ;;  %v4280_v6 = vcombine.low %v423_v57, %v431_v60 }
 0x1e4   :  { %3776 = vmatprep.subr.bf16.mxu0 %v4121_v4  ;;  %v159_v2 = vld [vmem:[%s6104_s1 + $0x478] sm:$0xff] }
 0x1e5   :  { %3816 = vmatpush1.bf16.msra.mxu1 %v4136_v3  ;;  %v407_v3 = vld [vmem:[%s6104_s1 + $0xc38] sm:$0xff]  ;;  %v4009_v7 = vcombine.high %v151_v1, %v159_v2  ;;  %v4008_v39 = vcombine.low %v151_v1, %v159_v2 }
 0x1e6   :  { %3817 = vmatprep.subr.bf16.mxu1 %v4377_v5  ;;  %v415_v4 = vld [vmem:[%s6104_s1 + $0xc78] sm:$0xff]  ;;  %v4024_v5 = vcombine.low %v167_v52, %v175_v55 }
 0x1e7   :  { %3777 = vmatpush2.bf16.msra.mxu0 %v4120_v9  ;;  %v4265_v8 = vcombine.high %v407_v3, %v415_v4  ;;  %v4264_v9 = vcombine.low %v407_v3, %v415_v4 }
 0x1e8   :  { %3778 = vmatprep.subr.bf16.mxu0 %v4105_v12 }
 0x1e9   :  { %3818 = vmatpush2.bf16.msra.mxu1 %v4376_v11  ;;  %v529_v11 = vld [vmem:[%s6106_s2 + $0x8] sm:$0xff] }
 0x1ea   :  { %3819 = vmatprep.subr.bf16.mxu1 %v4361_v13  ;;  %v567_v12 = vrot.slane %v529_v11, %v534_v37  ;;  %v571_v13 = vrot.slane %v529_v11, %v538_v42  ;;  %v579_v42 = vrot.slane %v529_v11, %v546_v14  ;;  %v583_v14 = vrot.slane %v529_v11, %v550_v50 }
 0x1eb   :  { %3779 = vmatpush2.bf16.msra.mxu0 %v4104_v59  ;;  %v595_v55 = vrot.slane %v529_v11, %v562_v34 }
 0x1ec   :  { %3780 = vmatprep.subr.bf16.mxu0 %v4089_v21 }
 0x1ed   :  { %3820 = vmatpush2.bf16.msra.mxu1 %v4360_v20 }
 0x1ee   :  { %3821 = vmatprep.subr.bf16.mxu1 %v4345_v22 }
 0x1ef   :  { %3781 = vmatpush2.bf16.msra.mxu0 %v4088_v25 }
 0x1f0   :  { %3782 = vmatprep.subr.bf16.mxu0 %v4073_v27 }
 0x1f1   :  { %3822 = vmatpush2.bf16.msra.mxu1 %v4344_v26 }
 0x1f2   :  { %3823 = vmatprep.subr.bf16.mxu1 %v4329_v29 }
 0x1f3   :  { %3783 = vmatpush2.bf16.msra.mxu0 %v4072_v36 }
 0x1f4   :  { %3784 = vmatprep.subr.bf16.mxu0 %v4057_v40 }
 0x1f5   :  { %3824 = vmatpush2.bf16.msra.mxu1 %v4328_v38  ;;  %v587_v38 = vrot.slane %v529_v11, %v554_v56  ;;  %v591_v56 = vrot.slane %v529_v11, %v558_v30 }
 0x1f6   :  { %3825 = vmatprep.subr.bf16.mxu1 %v4313_v41 }
 0x1f7   :  { %3785 = vmatpush2.bf16.msra.mxu0 %v4056_v47 }
 0x1f8   :  { %3786 = vmatprep.subr.bf16.mxu0 %v4041_v49 }
 0x1f9   :  { %3826 = vmatpush2.bf16.msra.mxu1 %v4312_v48 }
 0x1fa   :  { %3827 = vmatprep.subr.bf16.mxu1 %v4297_v51 }
 0x1fb   :  { %3787 = vmatpush2.bf16.msra.mxu0 %v4040_v61 }
 0x1fc   :  { %3788 = vmatprep.subr.bf16.mxu0 %v4025_v63 }
 0x1fd   :  { %3828 = vmatpush2.bf16.msra.mxu1 %v4296_v62 }
 0x1fe   :  { %3829 = vmatprep.subr.bf16.mxu1 %v4281_v0 }
 0x1ff   :  { %3789 = vmatpush2.bf16.msra.mxu0 %v4024_v5 }
 0x200   :  { %3790 = vmatprep.subr.bf16.mxu0 %v4009_v7 }
 0x201   :  { %3830 = vmatpush2.bf16.msra.mxu1 %v4280_v6 }
 0x202   :  { %3831 = vmatprep.subr.bf16.mxu1 %v4265_v8 }
 0x203   :  { %3791 = vmatpush2.bf16.msra.mxu0 %v4008_v39 }
 0x205   :  { %3832 = vmatpush2.bf16.msra.mxu1 %v4264_v9 }
 0x206   :  { %v3548_v58 = vpop.f32.mrf.mxu0  ;;  %3793 = vmatmul.mubr.bf16.vlgmr.msra.gmra.mxu0 %v4635_v16 }
 0x207   :  { %v3549_v15 = vadd.f32 %v3548_v58, %v567_v12 }
 0x208   :  { %v3589_v17 = vpop.f32.mrf.mxu1  ;;  %3834 = vmatmul.mubr.bf16.vlgmr.msra.gmra.mxu1 %v4645_v19  ;;  %v3550_v18 = vpop.f32.mrf.mxu0  ;;  %v575_v19 = vrot.slane %v529_v11, %v542_v10 }
 0x209   :  { %v3590_v59 = vadd.f32 %v3589_v17, %v3549_v15  ;;  %v3551_v20 = vadd.f32 %v3550_v18, %v571_v13 }
 0x20a   :  { %v3591_v21 = vpop.f32.mrf.mxu1  ;;  %v3552_v22 = vpop.f32.mrf.mxu0 }
 0x20b   :  { %3850 = vst [vmem:[%s6107_s3 + $0x40] sm:$0xff] %v3590_v59  ;;  %v3592_v37 = vadd.f32 %v3591_v21, %v3551_v20 }
 0x20c   :  { %v3593_v53 = vpop.f32.mrf.mxu1  ;;  %v3553_v23 = vpop.f32.mrf.mxu0 }
 0x20d   :  { %3851 = vst [vmem:[%s6107_s3 + $0x48] sm:$0xff] %v3592_v37 }
 0x20e   :  { %v3594_v16 = vpop.f32.mrf.mxu1 }
 0x246   :  { %v3630_v24 = vpop.f32.mrf.mxu0 }
 0x247   :  { %v3631_v54 = vadd.f32 %v3630_v24, %v575_v19 }
 0x248   :  { %v3671_v25 = vpop.f32.mrf.mxu1  ;;  %v3632_v26 = vpop.f32.mrf.mxu0 }
 0x249   :  { %v3672_v27 = vadd.f32 %v3671_v25, %v3631_v54  ;;  %v3633_v29 = vadd.f32 %v3632_v26, %v579_v42 }
 0x24a   :  { %v3673_v31 = vpop.f32.mrf.mxu1  ;;  %v3634_v32 = vpop.f32.mrf.mxu0 }
 0x24b   :  { %3852 = vst [vmem:[%s6107_s3 + $0x50] sm:$0xff] %v3672_v27  ;;  %v3674_v33 = vadd.f32 %v3673_v31, %v3633_v29 }
 0x24c   :  { %v3675_v35 = vpop.f32.mrf.mxu1  ;;  %v3635_v36 = vpop.f32.mrf.mxu0 }
 0x24d   :  { %3853 = vst [vmem:[%s6107_s3 + $0x58] sm:$0xff] %v3674_v33 }
 0x24e   :  { %v3676_v10 = vpop.f32.mrf.mxu1 }
 0x286   :  { %v3712_v40 = vpop.f32.mrf.mxu0 }
 0x287   :  { %v3713_v41 = vadd.f32 %v3712_v40, %v583_v14 }
 0x288   :  { %v3753_v43 = vpop.f32.mrf.mxu1  ;;  %v3714_v44 = vpop.f32.mrf.mxu0 }
 0x289   :  { %v3754_v45 = vadd.f32 %v3753_v43, %v3713_v41  ;;  %v3715_v46 = vadd.f32 %v3714_v44, %v587_v38 }
 0x28a   :  { %v3755_v47 = vpop.f32.mrf.mxu1  ;;  %v3716_v48 = vpop.f32.mrf.mxu0 }
 0x28b   :  { %3854 = vst [vmem:[%s6107_s3 + $0x60] sm:$0xff] %v3754_v45  ;;  %v3756_v49 = vadd.f32 %v3755_v47, %v3715_v46 }
 0x28c   :  { %v3757_v51 = vpop.f32.mrf.mxu1  ;;  %v3717_v52 = vpop.f32.mrf.mxu0 }
 0x28d   :  { %3855 = vst [vmem:[%s6107_s3 + $0x68] sm:$0xff] %v3756_v49 }
 0x28e   :  { %v3758_v50 = vpop.f32.mrf.mxu1 }
 0x2c6   :  { %v3794_v57 = vpop.f32.mrf.mxu0 }
 0x2c7   :  { %v3795_v60 = vadd.f32 %v3794_v57, %v591_v56 }
 0x2c8   :  { %v3835_v61 = vpop.f32.mrf.mxu1  ;;  %v3796_v62 = vpop.f32.mrf.mxu0 }
 0x2c9   :  { %v3836_v63 = vadd.f32 %v3835_v61, %v3795_v60  ;;  %v3797_v0 = vadd.f32 %v3796_v62, %v595_v55 }
 0x2ca   :  { %v3837_v1 = vpop.f32.mrf.mxu1  ;;  %v3798_v2 = vpop.f32.mrf.mxu0 }
 0x2cb   :  { %3856 = vst [vmem:[%s6107_s3 + $0x70] sm:$0xff] %v3836_v63  ;;  %v3838_v3 = vadd.f32 %v3837_v1, %v3797_v0 }
 0x2cc   :  { %v3839_v4 = vpop.f32.mrf.mxu1  ;;  %v3799_v5 = vpop.f32.mrf.mxu0 }
 0x2cd   :  { %3857 = vst [vmem:[%s6107_s3 + $0x78] sm:$0xff] %v3838_v3 }
 0x2ce   :  { %v3840_v28 = vpop.f32.mrf.mxu1 }

// kernel: crnn_forward.13
= control target key start
LH: loop header
LB: loop body
LE: loop exit
PB: predicated region body
PF: predicated region fallthrough
CT: control target
= control target key end

     0   :  { %s659_s0 = inlined_call_operand.vmem [shape: bf16[8,512], index: 0, kind: input, shape index: {}]   ;;  %s660_s1 = inlined_call_operand.vmem [shape: bf16[512,128], index: 1, kind: input, shape index: {}]   ;;  %s661_s2 = inlined_call_operand.vmem [shape: f32[1,128], index: 2, kind: input, shape index: {}]   ;;  %s662_s3 = inlined_call_operand.hbm [shape: f32[8,128], index: 3, kind: output, shape index: {}]  }
   0x1   :  { %v472_v0 = vld [vmem:[%s660_s1 + $0x78] sm:$0xff]   ;;  %v476_v4 = vld [vmem:[%s660_s1 + $0x70] sm:$0xff]   ;;  %v480_v8 = vld [vmem:[%s660_s1 + $0x68] sm:$0xff]  }
   0x2   :  { %v473_v1 = vld [vmem:[%s660_s1 + $0xf8] sm:$0xff]   ;;  %427 = vmatprep.subr.bf16.mxu0 %v472_v0  ;;  %v477_v5 = vld [vmem:[%s660_s1 + $0xf0] sm:$0xff]   ;;  %v481_v9 = vld [vmem:[%s660_s1 + $0xe8] sm:$0xff]  }
   0x3   :  { %v474_v2 = vld [vmem:[%s660_s1 + $0x38] sm:$0xff]   ;;  %449 = vmatprep.subr.bf16.mxu1 %v473_v1  ;;  %v478_v6 = vld [vmem:[%s660_s1 + $0x30] sm:$0xff]   ;;  %v482_v10 = vld [vmem:[%s660_s1 + $0x28] sm:$0xff]  }
   0x4   :  { %v475_v3 = vld [vmem:[%s660_s1 + $0xb8] sm:$0xff]   ;;  %428 = vmatpush3.bf16.msra.mxu0 %v474_v2  ;;  %v479_v7 = vld [vmem:[%s660_s1 + $0xb0] sm:$0xff]   ;;  %v483_v11 = vld [vmem:[%s660_s1 + $0xa8] sm:$0xff]  }
   0x5   :  { %450 = vmatpush3.bf16.msra.mxu1 %v475_v3  ;;  %429 = vmatprep.subr.bf16.mxu0 %v476_v4  ;;  %v484_v12 = vld [vmem:[%s660_s1 + $0x60] sm:$0xff]   ;;  %v488_v16 = vld [vmem:[%s660_s1 + $0x58] sm:$0xff]   ;;  %v492_v20 = vld [vmem:[%s660_s1 + $0x50] sm:$0xff]  }
   0x6   :  { %451 = vmatprep.subr.bf16.mxu1 %v477_v5  ;;  %v485_v13 = vld [vmem:[%s660_s1 + $0xe0] sm:$0xff]   ;;  %v489_v17 = vld [vmem:[%s660_s1 + $0xd8] sm:$0xff]   ;;  %v493_v21 = vld [vmem:[%s660_s1 + $0xd0] sm:$0xff]  }
   0x7   :  { %v486_v14 = vld [vmem:[%s660_s1 + $0x20] sm:$0xff]   ;;  %v490_v18 = vld [vmem:[%s660_s1 + $0x18] sm:$0xff]   ;;  %v494_v22 = vld [vmem:[%s660_s1 + $0x10] sm:$0xff]  }
   0x8   :  { %430 = vmatpush3.bf16.msra.mxu0 %v478_v6  ;;  %v487_v15 = vld [vmem:[%s660_s1 + $0xa0] sm:$0xff]   ;;  %v491_v19 = vld [vmem:[%s660_s1 + $0x98] sm:$0xff]   ;;  %v495_v23 = vld [vmem:[%s660_s1 + $0x90] sm:$0xff]  }
   0x9   :  { %452 = vmatpush3.bf16.msra.mxu1 %v479_v7  ;;  %431 = vmatprep.subr.bf16.mxu0 %v480_v8  ;;  %v496_v24 = vld [vmem:[%s660_s1 + $0x48] sm:$0xff]   ;;  %v500_v28 = vld [vmem:[%s660_s1 + $0x40] sm:$0xff]  }
   0xa   :  { %453 = vmatprep.subr.bf16.mxu1 %v481_v9  ;;  %v497_v25 = vld [vmem:[%s660_s1 + $0xc8] sm:$0xff]   ;;  %v501_v29 = vld [vmem:[%s660_s1 + $0xc0] sm:$0xff]  }
   0xb   :  { %v498_v26 = vld [vmem:[%s660_s1 + $0x8] sm:$0xff]   ;;  %v502_v30 = vld [vmem:[%s660_s1] sm:$0xff]  }
   0xc   :  { %432 = vmatpush3.bf16.msra.mxu0 %v482_v10  ;;  %v499_v27 = vld [vmem:[%s660_s1 + $0x88] sm:$0xff]   ;;  %v503_v31 = vld [vmem:[%s660_s1 + $0x80] sm:$0xff]  }
   0xd   :  { %454 = vmatpush3.bf16.msra.mxu1 %v483_v11  ;;  %433 = vmatprep.subr.bf16.mxu0 %v484_v12  ;;  %v16_v32 = vld [vmem:[%s659_s0] sm:$0xff]  ;;  %v17_v33 = vld [vmem:[%s659_s0 + $0x8] sm:$0xff] }
   0xe   :  { %455 = vmatprep.subr.bf16.mxu1 %v485_v13 }
  0x10   :  { %434 = vmatpush3.bf16.msra.mxu0 %v486_v14 }
  0x11   :  { %456 = vmatpush3.bf16.msra.mxu1 %v487_v15  ;;  %435 = vmatprep.subr.bf16.mxu0 %v488_v16 }
  0x12   :  { %457 = vmatprep.subr.bf16.mxu1 %v489_v17 }
  0x14   :  { %436 = vmatpush3.bf16.msra.mxu0 %v490_v18 }
  0x15   :  { %458 = vmatpush3.bf16.msra.mxu1 %v491_v19  ;;  %437 = vmatprep.subr.bf16.mxu0 %v492_v20 }
  0x16   :  { %459 = vmatprep.subr.bf16.mxu1 %v493_v21 }
  0x18   :  { %438 = vmatpush3.bf16.msra.mxu0 %v494_v22 }
  0x19   :  { %460 = vmatpush3.bf16.msra.mxu1 %v495_v23  ;;  %439 = vmatprep.subr.bf16.mxu0 %v496_v24 }
  0x1a   :  { %461 = vmatprep.subr.bf16.mxu1 %v497_v25 }
  0x1c   :  { %440 = vmatpush3.bf16.msra.mxu0 %v498_v26 }
  0x1d   :  { %462 = vmatpush3.bf16.msra.mxu1 %v499_v27  ;;  %441 = vmatprep.subr.bf16.mxu0 %v500_v28 }
  0x1e   :  { %463 = vmatprep.subr.bf16.mxu1 %v501_v29 }
  0x20   :  { %442 = vmatpush3.bf16.msra.mxu0 %v502_v30 }
  0x21   :  { %8 = vsyncpa [#allocation3], 0  ;;  %464 = vmatpush3.bf16.msra.mxu1 %v503_v31  ;;  %v391_v34 = vcombine.low %v16_v32, %v16_v32  ;;  %v392_v35 = vcombine.high %v16_v32, %v16_v32  ;;  %v393_v36 = vcombine.low %v17_v33, %v17_v33  ;;  %v394_v37 = vcombine.high %v17_v33, %v17_v33  ;;  %v390_v40 = vld [vmem:[%s661_s2] ss:$0 sm:$0xff]  ;;  %s530_s0 = smov [#allocation2]  }
  0x22   :  { %s382_s27 = sshll.u32 %s530_s0, 4  ;;  %s383_s27 = int_to_ptr.vmem [resolvable:$true] %s382_s27 }
  0x23   :  { %327 = vmatprep.mubr.bf16.mxu0 %v392_v35  ;;  %367 = vmatprep.mubr.bf16.mxu1 %v394_v37  ;;  %s508_s28 = scalar_lea.vmem %s383_s27, 128  ;;  %p513_p1 = scmp.lt.s32.totalorder %s383_s27, %s383_s27 }
  0x24   :  { %328 = vmatmul.mubr.bf16.vlgmr.msra.gmra.mxu0 %v391_v34  ;;  %368 = vmatmul.mubr.bf16.vlgmr.msra.gmra.mxu1 %v393_v36  ;;  %p509_p0 = scmp.ne.s32.totalorder %s383_s27, %s508_s28  ;;  %p514_p2 = scmp.lt.s32.totalorder %s508_s28, %s508_s28 }
  0x26   :  { %p515_p3 = por %p514_p2, %p513_p1 }
  0x28   :  { %p516_p4 = pnand %p515_p3, %p509_p0 }
  0xe4   :  { %v443_v38 = vpop.f32.mrf.mxu0  ;;  %v465_v39 = vpop.f32.mrf.mxu1 }
  0xe6   :  { %v444_v41 = vpop.f32.mrf.mxu0  ;;  %v466_v42 = vpop.f32.mrf.mxu1 }
  0xe7   :  { %v445_v43 = vadd.f32 %v444_v41, %v443_v38  ;;  %v467_v47 = vadd.f32 %v466_v42, %v465_v39 }
  0xe8   :  { %v446_v44 = vpop.f32.mrf.mxu0  ;;  %v468_v45 = vpop.f32.mrf.mxu1 }
  0xe9   :  { %v330_v46 = vadd.f32 %v445_v43, %v390_v40 }
  0xea   :  { %v447_v48 = vpop.f32.mrf.mxu0  ;;  %v469_v49 = vpop.f32.mrf.mxu1 }
  0xeb   :  { %v370_v50 = vadd.f32 %v467_v47, %v330_v46 }
  0xed   :  { %375 = vst [vmem:[#allocation2] sm:$0xff] %v370_v50 }
  0xee   :  { %519 = shalt.err (!%p516_p4)
}
  0xef   :  { %385 = dma.vmem_to_hbm [thread:$0]  %s383_s27, 128, %s662_s3, [#allocation3]  }
  0xf0   :  { %528 = dma.done.wait [#allocation3], 128  }
  0xf1   :  { %529 = vsyncadd [#allocation3], 4294967168 }
  0xf2   :  { %389 = vsyncpa [#allocation3], 1 }

</bundles_post_ra>
